<compile_context>
chip_gen: v5e
topology: v5e:2x2
jax: 0.10.0
libtpu: 0.0.40
codegen_flags: <defaults>
</compile_context>

<pallas_src>
import functools

import jax
import jax.numpy as jnp
from jax.experimental import pallas as pl
from jax.experimental.pallas import tpu as pltpu

LANE = 128                       # TPU lane width; all channel dims padded to this
_VMEM_LIMIT = 32 * 1024 * 1024   # explicit scoped-VMEM cap (safe on v5e/v6e/v7x)


# ----------------------------------------------------------------------------
# small helpers
# ----------------------------------------------------------------------------
def _rup(x, m):
    return ((x + m - 1) // m) * m


def _pad_to(x, target, axis):
    if x.shape[axis] == target:
        return x
    widths = [(0, 0)] * x.ndim
    widths[axis] = (0, target - x.shape[axis])
    return jnp.pad(x, widths)


def _full_spec(shape):
    nd = len(shape)
    return pl.BlockSpec(shape, lambda *_, nd=nd: (0,) * nd)


# ----------------------------------------------------------------------------
# Pallas kernels
# ----------------------------------------------------------------------------
def _conv_taps(x_ref, w_ref, oh, ow, stride):
    """3x3 conv over a spatially padded NHWC ref as 9 per-tap MXU matmuls.

    x_ref: (Bt, H+2, W+2, Cin) bf16 (zero halo), w_ref: (9, Cin, Cout) bf16.
    Returns a float32 (Bt*oh*ow, Cout) accumulator.
    """
    bt, _, _, cin = x_ref.shape
    cout = w_ref.shape[2]
    m = bt * oh * ow
    acc = jnp.zeros((m, cout), jnp.float32)
    for kh in range(3):
        for kw in range(3):
            if stride == 1:
                tap = x_ref[:, kh:kh + oh, kw:kw + ow, :]
            else:
                tap = x_ref[:, pl.ds(kh, oh, stride=stride),
                            pl.ds(kw, ow, stride=stride), :]
            acc += jnp.dot(tap.reshape(m, cin), w_ref[kh * 3 + kw],
                           preferred_element_type=jnp.float32)
    return acc


def _stem_kernel(x_ref, w_ref, s_ref, b_ref, o_ref, *, oh, ow):
    bt = x_ref.shape[0]
    cout = o_ref.shape[3]
    acc = _conv_taps(x_ref, w_ref, oh, ow, 1)
    y = jnp.maximum(acc * s_ref[...] + b_ref[...], 0.0)          # f32 epilogue
    o_ref[...] = jnp.zeros(o_ref.shape, o_ref.dtype)             # zero halo
    o_ref[:, 1:oh + 1, 1:ow + 1, :] = (
        y.reshape(bt, oh, ow, cout).astype(o_ref.dtype))


def _block_kernel(*refs, stride, has_proj, oh, ow):
    if has_proj:
        (x_ref, w1_ref, s1_ref, b1_ref, w2_ref, s2_ref, b2_ref,
         wsc_ref, ssc_ref, bsc_ref, o_ref, mid_ref) = refs
    else:
        (x_ref, w1_ref, s1_ref, b1_ref, w2_ref, s2_ref, b2_ref,
         o_ref, mid_ref) = refs

    bt, _, _, cin = x_ref.shape
    cout = o_ref.shape[3]
    m = bt * oh * ow

    # scratch persists across grid iterations -> zero its halo only once
    @pl.when(pl.program_id(0) == 0)
    def _():
        mid_ref[...] = jnp.zeros(mid_ref.shape, mid_ref.dtype)

    # conv1 (3x3, stride) + BN + ReLU -> padded VMEM scratch (never hits HBM)
    h1 = jnp.maximum(
        _conv_taps(x_ref, w1_ref, oh, ow, stride) * s1_ref[...] + b1_ref[...], 0.0)
    mid_ref[:, 1:oh + 1, 1:ow + 1, :] = (
        h1.reshape(bt, oh, ow, cout).astype(mid_ref.dtype))

    # conv2 (3x3, stride 1) + BN
    out = _conv_taps(mid_ref, w2_ref, oh, ow, 1) * s2_ref[...] + b2_ref[...]

    # fused shortcut: 1x1 projection conv + BN, or identity
    if has_proj:
        if stride == 1:
            xs = x_ref[:, 1:oh + 1, 1:ow + 1, :]
        else:
            xs = x_ref[:, pl.ds(1, oh, stride=stride),
                       pl.ds(1, ow, stride=stride), :]
        sc = jnp.dot(xs.reshape(m, cin), wsc_ref[...],
                     preferred_element_type=jnp.float32)
        sc = sc * ssc_ref[...] + bsc_ref[...]
    else:
        sc = x_ref[:, 1:oh + 1, 1:ow + 1, :].reshape(m, cin).astype(jnp.float32)

    # residual add + ReLU fused into the same epilogue; padded store for next layer
    y = jnp.maximum(out + sc, 0.0)
    o_ref[...] = jnp.zeros(o_ref.shape, o_ref.dtype)
    o_ref[:, 1:oh + 1, 1:ow + 1, :] = (
        y.reshape(bt, oh, ow, cout).astype(o_ref.dtype))


def _head_kernel(x_ref, w_ref, b_ref, o_ref, *, oh, ow):
    # global average pool over the halo interior + linear, fused
    bt = x_ref.shape[0]
    c = x_ref.shape[3]
    interior = x_ref[:, 1:oh + 1, 1:ow + 1, :].astype(jnp.float32)
    pooled = jnp.mean(interior.reshape(bt, oh * ow, c), axis=1)
    o_ref[...] = (jnp.dot(pooled, w_ref[...], preferred_element_type=jnp.float32)
                  + b_ref[...]).astype(o_ref.dtype)


# ----------------------------------------------------------------------------
# pallas_call wrappers
# ----------------------------------------------------------------------------
def _stem_forward(xp, w, s, b, *, bt):
    B, Hp, Wp, cin = xp.shape
    oh, ow = Hp - 2, Wp - 2
    cout = w.shape[2]
    nb = B // bt
    flops = 2 * B * oh * ow * 9 * cin * cout
    bytes_accessed = int(xp.size * xp.dtype.itemsize + w.size * w.dtype.itemsize
                         + B * Hp * Wp * cout * 2)
    return pl.pallas_call(
        functools.partial(_stem_kernel, oh=oh, ow=ow),
        out_shape=jax.ShapeDtypeStruct((B, Hp, Wp, cout), jnp.bfloat16),
        grid_spec=pltpu.PrefetchScalarGridSpec(
            num_scalar_prefetch=0,
            grid=(nb,),
            in_specs=[pl.BlockSpec((bt, Hp, Wp, cin), lambda i: (i, 0, 0, 0)),
                      _full_spec(w.shape), _full_spec(s.shape), _full_spec(b.shape)],
            out_specs=pl.BlockSpec((bt, Hp, Wp, cout), lambda i: (i, 0, 0, 0)),
        ),
        compiler_params=pltpu.CompilerParams(
            dimension_semantics=("parallel",), vmem_limit_bytes=_VMEM_LIMIT),
        cost_estimate=pl.CostEstimate(flops=flops, transcendentals=0,
                                      bytes_accessed=bytes_accessed),
    )(xp, w, s, b)


def _block_forward(xp, p, *, bt):
    B, Hp, Wp, cin = xp.shape
    stride = p["stride"]
    H, W = Hp - 2, Wp - 2
    oh = (H - 1) // stride + 1
    ow = (W - 1) // stride + 1
    cout = p["w1"].shape[2]
    has_proj = "wsc" in p
    nb = B // bt
    ohp, owp = oh + 2, ow + 2

    arrays = [xp, p["w1"], p["s1"], p["b1"], p["w2"], p["s2"], p["b2"]]
    in_specs = [pl.BlockSpec((bt, Hp, Wp, cin), lambda i: (i, 0, 0, 0)),
                _full_spec(p["w1"].shape), _full_spec(p["s1"].shape),
                _full_spec(p["b1"].shape), _full_spec(p["w2"].shape),
                _full_spec(p["s2"].shape), _full_spec(p["b2"].shape)]
    if has_proj:
        arrays += [p["wsc"], p["ssc"], p["bsc"]]
        in_specs += [_full_spec(p["wsc"].shape), _full_spec(p["ssc"].shape),
                     _full_spec(p["bsc"].shape)]

    m = B * oh * ow
    flops = 2 * m * 9 * cin * cout + 2 * m * 9 * cout * cout
    if has_proj:
        flops += 2 * m * cin * cout
    bytes_accessed = int(sum(a.size * a.dtype.itemsize for a in arrays)
                         + B * ohp * owp * cout * 2)

    return pl.pallas_call(
        functools.partial(_block_kernel, stride=stride, has_proj=has_proj,
                          oh=oh, ow=ow),
        out_shape=jax.ShapeDtypeStruct((B, ohp, owp, cout), jnp.bfloat16),
        grid_spec=pltpu.PrefetchScalarGridSpec(
            num_scalar_prefetch=0,
            grid=(nb,),
            in_specs=in_specs,
            out_specs=pl.BlockSpec((bt, ohp, owp, cout), lambda i: (i, 0, 0, 0)),
            scratch_shapes=[pltpu.VMEM((bt, ohp, owp, cout), jnp.bfloat16)],
        ),
        compiler_params=pltpu.CompilerParams(
            dimension_semantics=("parallel",), vmem_limit_bytes=_VMEM_LIMIT),
        cost_estimate=pl.CostEstimate(flops=flops, transcendentals=0,
                                      bytes_accessed=bytes_accessed),
    )(*arrays)


def _head_forward(xp, w, b):
    B, Hp, Wp, c = xp.shape
    oh, ow = Hp - 2, Wp - 2
    n = w.shape[1]
    flops = 2 * B * c * n + B * oh * ow * c
    bytes_accessed = int(xp.size * xp.dtype.itemsize
                         + w.size * w.dtype.itemsize + B * n * 4)
    return pl.pallas_call(
        functools.partial(_head_kernel, oh=oh, ow=ow),
        out_shape=jax.ShapeDtypeStruct((B, n), jnp.float32),
        in_specs=[_full_spec(xp.shape), _full_spec(w.shape), _full_spec(b.shape)],
        out_specs=_full_spec((B, n)),
        compiler_params=pltpu.CompilerParams(vmem_limit_bytes=_VMEM_LIMIT),
        cost_estimate=pl.CostEstimate(flops=flops, transcendentals=0,
                                      bytes_accessed=bytes_accessed),
    )(xp, w, b)


def resnet_forward(x_nchw, params, *, batch_tile=8):
    # NCHW (PyTorch convention) -> NHWC bf16
    x = jnp.transpose(x_nchw, (0, 2, 3, 1)).astype(jnp.bfloat16)
    B, H, W, C = x.shape
    cin_p = params["stem_w"].shape[1]
    # single wrapper-side pad: 1-px spatial halo + channel pad to lane width
    x = jnp.pad(x, ((0, 0), (1, 1), (1, 1), (0, cin_p - C)))

    bt = min(batch_tile, B)
    while B % bt:
        bt -= 1

    out = _stem_forward(x, params["stem_w"], params["stem_s"], params["stem_b"],
                        bt=bt)
    for layer in params["layers"]:
        for blk in layer:
            out = _block_forward(out, blk, bt=bt)
    return _head_forward(out, params["lin_w"], params["lin_b"])


# ----------------------------------------------------------------------------
# Parameters (PyTorch-equivalent raw params + TPU-ready prepared params)
# ----------------------------------------------------------------------------
def _make_bn(c):
    return {"gamma": jnp.ones((c,), jnp.float32),
            "beta": jnp.zeros((c,), jnp.float32),
            "mean": jnp.zeros((c,), jnp.float32),
            "var": jnp.ones((c,), jnp.float32)}


def _kaiming_conv(key, cout, cin, kh, kw):
    std = (2.0 / (cin * kh * kw)) ** 0.5
    return jax.random.normal(key, (cout, cin, kh, kw), jnp.float32) * std


def _kaiming_linear(key, out_f, in_f):
    std = (2.0 / in_f) ** 0.5
    return jax.random.normal(key, (out_f, in_f), jnp.float32) * std


def make_raw_params(key, num_blocks=(1, 1, 1), w=1, num_classes=10):
    """PyTorch-equivalent parameters (4-D conv weights, BN stats, linear)."""
    keys = jax.random.split(key, 3 + 3 * sum(num_blocks))
    in_planes = int(w * 16)
    raw = {"conv1": _kaiming_conv(keys[0], in_planes, 3, 3, 3),
           "bn1": _make_bn(in_planes), "layers": []}
    ki = 1
    for planes, nblk, s0 in zip((int(w * 16), int(w * 32), int(w * 64)),
                                num_blocks, (1, 2, 2)):
        layer = []
        for s in [s0] + [1] * (nblk - 1):
            blk = {"stride": s,
                   "conv1": _kaiming_conv(keys[ki], planes, in_planes, 3, 3),
                   "bn1": _make_bn(planes),
                   "conv2": _kaiming_conv(keys[ki + 1], planes, planes, 3, 3),
                   "bn2": _make_bn(planes)}
            if s != 1 or in_planes != planes:
                blk["sc_conv"] = _kaiming_conv(keys[ki + 2], planes, in_planes, 1, 1)
                blk["sc_bn"] = _make_bn(planes)
            layer.append(blk)
            in_planes = planes
            ki += 3
        raw["layers"].append(layer)
    raw["lin_w"] = _kaiming_linear(keys[ki], num_classes, int(w * 64))
    raw["lin_b"] = (jax.random.uniform(keys[ki + 1], (num_classes,), jnp.float32,
                                       -1.0, 1.0) / (int(w * 64) ** 0.5))
    return raw


def _fold_bn(bn, cpad, eps=1e-5):
    scale = bn["gamma"] / jnp.sqrt(bn["var"] + eps)
    bias = bn["beta"] - bn["mean"] * scale
    return (_pad_to(scale, cpad, 0).reshape(1, cpad).astype(jnp.float32),
            _pad_to(bias, cpad, 0).reshape(1, cpad).astype(jnp.float32))


def _conv3x3_taps(w4, cin_p, cout_p):
    # (Cout, Cin, 3, 3) -> (9, Cin_pad, Cout_pad), tap index = kh*3 + kw
    cout, cin, kh, kw = w4.shape
    w = jnp.transpose(w4, (2, 3, 1, 0)).reshape(kh * kw, cin, cout)
    return _pad_to(_pad_to(w, cin_p, 1), cout_p, 2).astype(jnp.bfloat16)


def _conv1x1_mat(w4, cin_p, cout_p):
    w = jnp.transpose(w4[:, :, 0, 0])            # (Cin, Cout)
    return _pad_to(_pad_to(w, cin_p, 0), cout_p, 1).astype(jnp.bfloat16)


def prepare_params(raw):
    """Fold BN, zero-pad channels to the lane width, cast weights to bf16."""
    cp = lambda c: _rup(c, LANE)
    cout1, cin1 = raw["conv1"].shape[0], raw["conv1"].shape[1]
    params = {"stem_w": _conv3x3_taps(raw["conv1"], cp(cin1), cp(cout1))}
    params["stem_s"], params["stem_b"] = _fold_bn(raw["bn1"], cp(cout1))
    params["layers"] = []
    for layer in raw["layers"]:
        blocks = []
        for blk in layer:
            cout, cin = blk["conv1"].shape[0], blk["conv1"].shape[1]
            q = {"stride": blk["stride"],
                 "w1": _conv3x3_taps(blk["conv1"], cp(cin), cp(cout)),
                 "w2": _conv3x3_taps(blk["conv2"], cp(cout), cp(cout))}
            q["s1"], q["b1"] = _fold_bn(blk["bn1"], cp(cout))
            q["s2"], q["b2"] = _fold_bn(blk["bn2"], cp(cout))
            if "sc_conv" in blk:
                q["wsc"] = _conv1x1_mat(blk["sc_conv"], cp(cin), cp(cout))
                q["ssc"], q["bsc"] = _fold_bn(blk["sc_bn"], cp(cout))
            blocks.append(q)
        params["layers"].append(blocks)
    clast = raw["lin_w"].shape[1]
    params["lin_w"] = _pad_to(jnp.transpose(raw["lin_w"]),
                              cp(clast), 0).astype(jnp.float32)
    params["lin_b"] = raw["lin_b"].reshape(1, -1).astype(jnp.float32)
    return params


# ----------------------------------------------------------------------------
# Plain-JAX float32 reference (for validation only)
# ----------------------------------------------------------------------------
def _ref_conv(x, w, stride, pad):
    return jax.lax.conv_general_dilated(
        x, w, window_strides=(stride, stride),
        padding=((pad, pad), (pad, pad)),
        dimension_numbers=("NCHW", "OIHW", "NCHW"))


def _ref_bn(x, bn, eps=1e-5):
    scale = (bn["gamma"] / jnp.sqrt(bn["var"] + eps)).reshape(1, -1, 1, 1)
    bias = (bn["beta"] - bn["mean"] * bn["gamma"]
            / jnp.sqrt(bn["var"] + eps)).reshape(1, -1, 1, 1)
    return x * scale + bias


def reference_forward(x_nchw, raw):
    x = x_nchw.astype(jnp.float32)
    out = jax.nn.relu(_ref_bn(_ref_conv(x, raw["conv1"], 1, 1), raw["bn1"]))
    for layer in raw["layers"]:
        for blk in layer:
            s = blk["stride"]
            h = jax.nn.relu(_ref_bn(_ref_conv(out, blk["conv1"], s, 1), blk["bn1"]))
            h = _ref_bn(_ref_conv(h, blk["conv2"], 1, 1), blk["bn2"])
            if "sc_conv" in blk:
                sc = _ref_bn(_ref_conv(out, blk["sc_conv"], s, 0), blk["sc_bn"])
            else:
                sc = out
            out = jax.nn.relu(h + sc)
    pooled = jnp.mean(out, axis=(2, 3))
    return pooled @ raw["lin_w"].T + raw["lin_b"]


# ----------------------------------------------------------------------------
if __name__ == "__main__":
    key = jax.random.PRNGKey(0)
    kp, kx = jax.random.split(key)
    raw = make_raw_params(kp, num_blocks=(1, 1, 1), w=1, num_classes=10)
    params = prepare_params(raw)

    # small NCHW input consistent with the module (3 input channels)
    x = jax.random.normal(kx, (2, 3, 16, 16), jnp.float32)

    out = jax.block_until_ready(resnet_forward(x, params))
    assert out.shape == (2, 10), out.shape
    assert bool(jnp.all(jnp.isfinite(out)))

    # loose tolerance: kernel path uses bf16 operands with f32 accumulation
    ref = jax.block_until_ready(reference_forward(x, raw))
    err = float(jnp.max(jnp.abs(out - ref)))
    tol = 0.1 * (1.0 + float(jnp.max(jnp.abs(ref))))
    assert err < tol, (err, tol)

    print("KERNEL_OK")
</pallas_src>

<mosaic_0001>
module attributes {stable_mosaic.version = 11 : i64} {
  func.func @_stem_kernel(%arg0: i32, %arg1: memref<2x18x18x128xbf16, #tpu.memory_space<vmem>>, %arg2: memref<9x128x128xbf16, #tpu.memory_space<vmem>>, %arg3: memref<1x128xf32, #tpu.memory_space<vmem>>, %arg4: memref<1x128xf32, #tpu.memory_space<vmem>>, %arg5: memref<2x18x18x128xbf16, #tpu.memory_space<vmem>>) attributes {dimension_semantics = [#tpu.dimension_semantics<parallel>], iteration_bounds = array<i64: 1>, scalar_prefetch = 0 : i64, scratch_operands = 0 : i64, tpu.core_type = #tpu.core_type<tc>, window_params = [{transform_indices = @transform_0, window_bounds = array<i64: 2, 18, 18, 128>}, {pipeline_mode = #tpu.pipeline_mode<synchronous>, transform_indices = @transform_1, window_bounds = array<i64: 9, 128, 128>}, {pipeline_mode = #tpu.pipeline_mode<synchronous>, transform_indices = @transform_2, window_bounds = array<i64: 1, 128>}, {pipeline_mode = #tpu.pipeline_mode<synchronous>, transform_indices = @transform_3, window_bounds = array<i64: 1, 128>}, {transform_indices = @transform_4, window_bounds = array<i64: 2, 18, 18, 128>}]} {
    %cst = arith.constant 0.000000e+00 : f32
    %0 = vector.broadcast %cst : f32 to vector<512x128xf32>
    %c0 = arith.constant 0 : index
    %c0_0 = arith.constant 0 : index
    %c0_1 = arith.constant 0 : index
    %c0_2 = arith.constant 0 : index
    %1 = vector.load %arg1[%c0, %c0_0, %c0_1, %c0_2] : memref<2x18x18x128xbf16, #tpu.memory_space<vmem>>, vector<2x16x16x128xbf16>
    %2 = vector.shape_cast %1 : vector<2x16x16x128xbf16> to vector<512x128xbf16>
    %c0_3 = arith.constant 0 : index
    %c0_4 = arith.constant 0 : index
    %c0_5 = arith.constant 0 : index
    %3 = vector.load %arg2[%c0_3, %c0_4, %c0_5] : memref<9x128x128xbf16, #tpu.memory_space<vmem>>, vector<1x128x128xbf16>
    %4 = vector.shape_cast %3 : vector<1x128x128xbf16> to vector<128x128xbf16>
    %cst_6 = arith.constant dense<0.000000e+00> : vector<512x128xf32>
    %5 = tpu.matmul %2, %4, %cst_6 {dimension_numbers = #tpu.dot_dimension_numbers<[1], [0], [0], [1], [0, 0, 1, 1], [], []>} : vector<512x128xbf16>, vector<128x128xbf16>, vector<512x128xf32> -> vector<512x128xf32>
    %6 = arith.addf %0, %5 : vector<512x128xf32>
    %c0_7 = arith.constant 0 : index
    %c0_8 = arith.constant 0 : index
    %c1 = arith.constant 1 : index
    %c0_9 = arith.constant 0 : index
    %7 = vector.load %arg1[%c0_7, %c0_8, %c1, %c0_9] : memref<2x18x18x128xbf16, #tpu.memory_space<vmem>>, vector<2x16x16x128xbf16>
    %8 = vector.shape_cast %7 : vector<2x16x16x128xbf16> to vector<512x128xbf16>
    %c1_10 = arith.constant 1 : index
    %c0_11 = arith.constant 0 : index
    %c0_12 = arith.constant 0 : index
    %9 = vector.load %arg2[%c1_10, %c0_11, %c0_12] : memref<9x128x128xbf16, #tpu.memory_space<vmem>>, vector<1x128x128xbf16>
    %10 = vector.shape_cast %9 : vector<1x128x128xbf16> to vector<128x128xbf16>
    %cst_13 = arith.constant dense<0.000000e+00> : vector<512x128xf32>
    %11 = tpu.matmul %8, %10, %cst_13 {dimension_numbers = #tpu.dot_dimension_numbers<[1], [0], [0], [1], [0, 0, 1, 1], [], []>} : vector<512x128xbf16>, vector<128x128xbf16>, vector<512x128xf32> -> vector<512x128xf32>
    %12 = arith.addf %6, %11 : vector<512x128xf32>
    %c0_14 = arith.constant 0 : index
    %c0_15 = arith.constant 0 : index
    %c2 = arith.constant 2 : index
    %c0_16 = arith.constant 0 : index
    %13 = vector.load %arg1[%c0_14, %c0_15, %c2, %c0_16] : memref<2x18x18x128xbf16, #tpu.memory_space<vmem>>, vector<2x16x16x128xbf16>
    %14 = vector.shape_cast %13 : vector<2x16x16x128xbf16> to vector<512x128xbf16>
    %c2_17 = arith.constant 2 : index
    %c0_18 = arith.constant 0 : index
    %c0_19 = arith.constant 0 : index
    %15 = vector.load %arg2[%c2_17, %c0_18, %c0_19] : memref<9x128x128xbf16, #tpu.memory_space<vmem>>, vector<1x128x128xbf16>
    %16 = vector.shape_cast %15 : vector<1x128x128xbf16> to vector<128x128xbf16>
    %cst_20 = arith.constant dense<0.000000e+00> : vector<512x128xf32>
    %17 = tpu.matmul %14, %16, %cst_20 {dimension_numbers = #tpu.dot_dimension_numbers<[1], [0], [0], [1], [0, 0, 1, 1], [], []>} : vector<512x128xbf16>, vector<128x128xbf16>, vector<512x128xf32> -> vector<512x128xf32>
    %18 = arith.addf %12, %17 : vector<512x128xf32>
    %c0_21 = arith.constant 0 : index
    %c1_22 = arith.constant 1 : index
    %c0_23 = arith.constant 0 : index
    %c0_24 = arith.constant 0 : index
    %19 = vector.load %arg1[%c0_21, %c1_22, %c0_23, %c0_24] : memref<2x18x18x128xbf16, #tpu.memory_space<vmem>>, vector<2x16x16x128xbf16>
    %20 = vector.shape_cast %19 : vector<2x16x16x128xbf16> to vector<512x128xbf16>
    %c3 = arith.constant 3 : index
    %c0_25 = arith.constant 0 : index
    %c0_26 = arith.constant 0 : index
    %21 = vector.load %arg2[%c3, %c0_25, %c0_26] : memref<9x128x128xbf16, #tpu.memory_space<vmem>>, vector<1x128x128xbf16>
    %22 = vector.shape_cast %21 : vector<1x128x128xbf16> to vector<128x128xbf16>
    %cst_27 = arith.constant dense<0.000000e+00> : vector<512x128xf32>
    %23 = tpu.matmul %20, %22, %cst_27 {dimension_numbers = #tpu.dot_dimension_numbers<[1], [0], [0], [1], [0, 0, 1, 1], [], []>} : vector<512x128xbf16>, vector<128x128xbf16>, vector<512x128xf32> -> vector<512x128xf32>
    %24 = arith.addf %18, %23 : vector<512x128xf32>
    %c0_28 = arith.constant 0 : index
    %c1_29 = arith.constant 1 : index
    %c1_30 = arith.constant 1 : index
    %c0_31 = arith.constant 0 : index
    %25 = vector.load %arg1[%c0_28, %c1_29, %c1_30, %c0_31] : memref<2x18x18x128xbf16, #tpu.memory_space<vmem>>, vector<2x16x16x128xbf16>
    %26 = vector.shape_cast %25 : vector<2x16x16x128xbf16> to vector<512x128xbf16>
    %c4 = arith.constant 4 : index
    %c0_32 = arith.constant 0 : index
    %c0_33 = arith.constant 0 : index
    %27 = vector.load %arg2[%c4, %c0_32, %c0_33] : memref<9x128x128xbf16, #tpu.memory_space<vmem>>, vector<1x128x128xbf16>
    %28 = vector.shape_cast %27 : vector<1x128x128xbf16> to vector<128x128xbf16>
    %cst_34 = arith.constant dense<0.000000e+00> : vector<512x128xf32>
    %29 = tpu.matmul %26, %28, %cst_34 {dimension_numbers = #tpu.dot_dimension_numbers<[1], [0], [0], [1], [0, 0, 1, 1], [], []>} : vector<512x128xbf16>, vector<128x128xbf16>, vector<512x128xf32> -> vector<512x128xf32>
    %30 = arith.addf %24, %29 : vector<512x128xf32>
    %c0_35 = arith.constant 0 : index
    %c1_36 = arith.constant 1 : index
    %c2_37 = arith.constant 2 : index
    %c0_38 = arith.constant 0 : index
    %31 = vector.load %arg1[%c0_35, %c1_36, %c2_37, %c0_38] : memref<2x18x18x128xbf16, #tpu.memory_space<vmem>>, vector<2x16x16x128xbf16>
    %32 = vector.shape_cast %31 : vector<2x16x16x128xbf16> to vector<512x128xbf16>
    %c5 = arith.constant 5 : index
    %c0_39 = arith.constant 0 : index
    %c0_40 = arith.constant 0 : index
    %33 = vector.load %arg2[%c5, %c0_39, %c0_40] : memref<9x128x128xbf16, #tpu.memory_space<vmem>>, vector<1x128x128xbf16>
    %34 = vector.shape_cast %33 : vector<1x128x128xbf16> to vector<128x128xbf16>
    %cst_41 = arith.constant dense<0.000000e+00> : vector<512x128xf32>
    %35 = tpu.matmul %32, %34, %cst_41 {dimension_numbers = #tpu.dot_dimension_numbers<[1], [0], [0], [1], [0, 0, 1, 1], [], []>} : vector<512x128xbf16>, vector<128x128xbf16>, vector<512x128xf32> -> vector<512x128xf32>
    %36 = arith.addf %30, %35 : vector<512x128xf32>
    %c0_42 = arith.constant 0 : index
    %c2_43 = arith.constant 2 : index
    %c0_44 = arith.constant 0 : index
    %c0_45 = arith.constant 0 : index
    %37 = vector.load %arg1[%c0_42, %c2_43, %c0_44, %c0_45] : memref<2x18x18x128xbf16, #tpu.memory_space<vmem>>, vector<2x16x16x128xbf16>
    %38 = vector.shape_cast %37 : vector<2x16x16x128xbf16> to vector<512x128xbf16>
    %c6 = arith.constant 6 : index
    %c0_46 = arith.constant 0 : index
    %c0_47 = arith.constant 0 : index
    %39 = vector.load %arg2[%c6, %c0_46, %c0_47] : memref<9x128x128xbf16, #tpu.memory_space<vmem>>, vector<1x128x128xbf16>
    %40 = vector.shape_cast %39 : vector<1x128x128xbf16> to vector<128x128xbf16>
    %cst_48 = arith.constant dense<0.000000e+00> : vector<512x128xf32>
    %41 = tpu.matmul %38, %40, %cst_48 {dimension_numbers = #tpu.dot_dimension_numbers<[1], [0], [0], [1], [0, 0, 1, 1], [], []>} : vector<512x128xbf16>, vector<128x128xbf16>, vector<512x128xf32> -> vector<512x128xf32>
    %42 = arith.addf %36, %41 : vector<512x128xf32>
    %c0_49 = arith.constant 0 : index
    %c2_50 = arith.constant 2 : index
    %c1_51 = arith.constant 1 : index
    %c0_52 = arith.constant 0 : index
    %43 = vector.load %arg1[%c0_49, %c2_50, %c1_51, %c0_52] : memref<2x18x18x128xbf16, #tpu.memory_space<vmem>>, vector<2x16x16x128xbf16>
    %44 = vector.shape_cast %43 : vector<2x16x16x128xbf16> to vector<512x128xbf16>
    %c7 = arith.constant 7 : index
    %c0_53 = arith.constant 0 : index
    %c0_54 = arith.constant 0 : index
    %45 = vector.load %arg2[%c7, %c0_53, %c0_54] : memref<9x128x128xbf16, #tpu.memory_space<vmem>>, vector<1x128x128xbf16>
    %46 = vector.shape_cast %45 : vector<1x128x128xbf16> to vector<128x128xbf16>
    %cst_55 = arith.constant dense<0.000000e+00> : vector<512x128xf32>
    %47 = tpu.matmul %44, %46, %cst_55 {dimension_numbers = #tpu.dot_dimension_numbers<[1], [0], [0], [1], [0, 0, 1, 1], [], []>} : vector<512x128xbf16>, vector<128x128xbf16>, vector<512x128xf32> -> vector<512x128xf32>
    %48 = arith.addf %42, %47 : vector<512x128xf32>
    %c0_56 = arith.constant 0 : index
    %c2_57 = arith.constant 2 : index
    %c2_58 = arith.constant 2 : index
    %c0_59 = arith.constant 0 : index
    %49 = vector.load %arg1[%c0_56, %c2_57, %c2_58, %c0_59] : memref<2x18x18x128xbf16, #tpu.memory_space<vmem>>, vector<2x16x16x128xbf16>
    %50 = vector.shape_cast %49 : vector<2x16x16x128xbf16> to vector<512x128xbf16>
    %c8 = arith.constant 8 : index
    %c0_60 = arith.constant 0 : index
    %c0_61 = arith.constant 0 : index
    %51 = vector.load %arg2[%c8, %c0_60, %c0_61] : memref<9x128x128xbf16, #tpu.memory_space<vmem>>, vector<1x128x128xbf16>
    %52 = vector.shape_cast %51 : vector<1x128x128xbf16> to vector<128x128xbf16>
    %cst_62 = arith.constant dense<0.000000e+00> : vector<512x128xf32>
    %53 = tpu.matmul %50, %52, %cst_62 {dimension_numbers = #tpu.dot_dimension_numbers<[1], [0], [0], [1], [0, 0, 1, 1], [], []>} : vector<512x128xbf16>, vector<128x128xbf16>, vector<512x128xf32> -> vector<512x128xf32>
    %54 = arith.addf %48, %53 : vector<512x128xf32>
    %c0_63 = arith.constant 0 : index
    %c0_64 = arith.constant 0 : index
    %55 = vector.load %arg3[%c0_63, %c0_64] : memref<1x128xf32, #tpu.memory_space<vmem>>, vector<1x128xf32>
    %56 = vector.broadcast %55 : vector<1x128xf32> to vector<512x128xf32>
    %57 = arith.mulf %54, %56 : vector<512x128xf32>
    %c0_65 = arith.constant 0 : index
    %c0_66 = arith.constant 0 : index
    %58 = vector.load %arg4[%c0_65, %c0_66] : memref<1x128xf32, #tpu.memory_space<vmem>>, vector<1x128xf32>
    %59 = vector.broadcast %58 : vector<1x128xf32> to vector<512x128xf32>
    %60 = arith.addf %57, %59 : vector<512x128xf32>
    %cst_67 = arith.constant 0.000000e+00 : f32
    %61 = vector.broadcast %cst_67 : f32 to vector<512x128xf32>
    %62 = arith.maximumf %60, %61 : vector<512x128xf32>
    %cst_68 = arith.constant 0.000000e+00 : bf16
    %63 = vector.broadcast %cst_68 : bf16 to vector<2x18x18x128xbf16>
    %c0_69 = arith.constant 0 : index
    %c0_70 = arith.constant 0 : index
    %c0_71 = arith.constant 0 : index
    %c0_72 = arith.constant 0 : index
    %64 = vector.load %arg5[%c0_69, %c0_70, %c0_71, %c0_72] : memref<2x18x18x128xbf16, #tpu.memory_space<vmem>>, vector<2x18x18x128xbf16>
    tpu.vector_store %arg5[%c0_69, %c0_70, %c0_71, %c0_72], %63 {strides = array<i32>} : memref<2x18x18x128xbf16, #tpu.memory_space<vmem>>, vector<2x18x18x128xbf16>,
    %65 = vector.shape_cast %62 : vector<512x128xf32> to vector<2x16x16x128xf32>
    %66 = arith.truncf %65 : vector<2x16x16x128xf32> to vector<2x16x16x128xbf16>
    %c0_73 = arith.constant 0 : index
    %c1_74 = arith.constant 1 : index
    %c1_75 = arith.constant 1 : index
    %c0_76 = arith.constant 0 : index
    %67 = vector.load %arg5[%c0_73, %c1_74, %c1_75, %c0_76] : memref<2x18x18x128xbf16, #tpu.memory_space<vmem>>, vector<2x16x16x128xbf16>
    tpu.vector_store %arg5[%c0_73, %c1_74, %c1_75, %c0_76], %66 {strides = array<i32>} : memref<2x18x18x128xbf16, #tpu.memory_space<vmem>>, vector<2x16x16x128xbf16>,
    return
  }
  func.func @transform_0(%arg0: i32) -> (i32, i32, i32, i32) {
    %c0_i32 = arith.constant 0 : i32
    %c0_i32_0 = arith.constant 0 : i32
    %c0_i32_1 = arith.constant 0 : i32
    %c0_i32_2 = arith.constant 0 : i32
    return %arg0, %c0_i32, %c0_i32_0, %c0_i32_1 : i32, i32, i32, i32
  }
  func.func @transform_1(%arg0: i32) -> (i32, i32, i32) {
    %c0_i32 = arith.constant 0 : i32
    %c0_i32_0 = arith.constant 0 : i32
    %c0_i32_1 = arith.constant 0 : i32
    %c0_i32_2 = arith.constant 0 : i32
    return %c0_i32, %c0_i32_0, %c0_i32_1 : i32, i32, i32
  }
  func.func @transform_2(%arg0: i32) -> (i32, i32) {
    %c0_i32 = arith.constant 0 : i32
    %c0_i32_0 = arith.constant 0 : i32
    %c0_i32_1 = arith.constant 0 : i32
    return %c0_i32, %c0_i32_0 : i32, i32
  }
  func.func @transform_3(%arg0: i32) -> (i32, i32) {
    %c0_i32 = arith.constant 0 : i32
    %c0_i32_0 = arith.constant 0 : i32
    %c0_i32_1 = arith.constant 0 : i32
    return %c0_i32, %c0_i32_0 : i32, i32
  }
  func.func @transform_4(%arg0: i32) -> (i32, i32, i32, i32) {
    %c0_i32 = arith.constant 0 : i32
    %c0_i32_0 = arith.constant 0 : i32
    %c0_i32_1 = arith.constant 0 : i32
    %c0_i32_2 = arith.constant 0 : i32
    return %arg0, %c0_i32, %c0_i32_0, %c0_i32_1 : i32, i32, i32, i32
  }
}

</mosaic_0001>

<bundles_post_ra>
// kernel: tpu_custom_call.1
= control target key start
LH: loop header
LB: loop body
LE: loop exit
PB: predicated region body
PF: predicated region fallthrough
CT: control target
= control target key end

     0   :  { %vm130_vm0 = vsmask.f32 3328  ;;  %vm131_vm1 = vsmask.f32 7440  ;;  %vm1768_vm3 = vcmask 1042432   ;;  %vm1769_vm4 = vcmask 1046532   ;;  %s15967_s1 = inlined_call_operand.vmem [shape: bf16[9,128,128], index: 1, kind: input, shape index: {}]   ;;  %s15968_s0 = inlined_call_operand.vmem [shape: bf16[2,18,18,128], index: 0, kind: input, shape index: {}]   ;;  %s15969_s2 = inlined_call_operand.vmem [shape: f32[1,128], index: 2, kind: input, shape index: {}]   ;;  %s15970_s3 = inlined_call_operand.vmem [shape: f32[1,128], index: 3, kind: input, shape index: {}]   ;;  %s15971_s4 = inlined_call_operand.vmem [shape: bf16[2,18,18,128], index: 4, kind: output, shape index: {}]  }
   0x1   :  { %v10403_v0 = vld [vmem:[%s15967_s1 + $0x78] sm:$0xff]  ;;  %v10402_v1 = vld [vmem:[%s15967_s1 + $0x70] sm:$0xff]  ;;  %v34_v2 = vld [vmem:[%s15968_s0 + $0x60] sm:$0xf]  ;;  %vm8683_vm6 = vcmask 1043456   ;;  %vm8690_vm12 = vcmask 1040384  }
   0x2   :  { %10524 = vmatpush.bf16.msra.mxu1 %v10403_v0  ;;  %10525 = vmatpush.bf16.msra.mxu2 %v10403_v0  ;;  %v35_v3 = vld [vmem:[%s15968_s0 + $0x64] sm:$0xf]  ;;  %v106_v4 = vld [vmem:[%s15968_s0 + $0x68] sm:$0x1]  ;;  %v326_v5 = vshrl.u32 %v34_v2, 16  ;;  %v329_v6 = vshll.u32 %v34_v2, 16  ;;  %vm10739_vm2 = vmor %vm130_vm0, %vm131_vm1 }
   0x3   :  { %10526 = vmatpush.bf16.msra.mxu3 %v10403_v0  ;;  %1094 = vmatpush.bf16.msra.mxu0 %v10403_v0  ;;  %v10401_v7 = vld [vmem:[%s15967_s1 + $0x68] sm:$0xff]  ;;  %v335_v8 = vshll.u32 %v35_v3, 16  ;;  %v339_v9 = vshrl.u32 %v35_v3, 16  ;;  %v345_v10 = vshll.u32 %v106_v4, 16  ;;  %v50_v11 = vld [vmem:[%s15968_s0 + $0xd8] sm:$0xf]  ;;  %vm11351_vm5 = vmor %vm1768_vm3, %vm1769_vm4 }
   0x4   :  { %v328_v12 = vrot.slane %v326_v5, 4  ;;  %v331_v13 = vrot.slane %v329_v6, 5  ;;  %v51_v14 = vld [vmem:[%s15968_s0 + $0xdc] sm:$0xf]  ;;  %v114_v15 = vld [vmem:[%s15968_s0 + $0xe0] sm:$0x1] }
   0x5   :  { %v337_v16 = vrot.slane %v335_v8, 5  ;;  %v341_v17 = vrot.slane %v339_v9, 4  ;;  %v347_v18 = vrot.slane %v345_v10, 5  ;;  %v518_v19 = vshrl.u32 %v50_v11, 16  ;;  %v66_v20 = vld [vmem:[%s15968_s0 + $0x138] sm:$0xf] }
   0x6   :  { %10527 = vmatpush.bf16.msra.mxu1 %v10402_v1  ;;  %10528 = vmatpush.bf16.msra.mxu2 %v10402_v1  ;;  %v332_v21 = vor.u32 %v331_v13, %v328_v12  ;;  %v521_v22 = vshll.u32 %v50_v11, 16  ;;  %v527_v23 = vshll.u32 %v51_v14, 16  ;;  %v531_v24 = vshrl.u32 %v51_v14, 16  ;;  %v67_v29 = vld [vmem:[%s15968_s0 + $0x13c] sm:$0xf]  ;;  %v10400_v35 = vld [vmem:[%s15967_s1 + $0x60] sm:$0xff] }
   0x7   :  { %10529 = vmatpush.bf16.msra.mxu3 %v10402_v1  ;;  %1095 = vmatpush.bf16.msra.mxu0 %v10402_v1  ;;  %v342_v26 = vor.u32 %v341_v17, %v337_v16  ;;  %v520_v27 = vrot.slane %v518_v19, 4  ;;  %v537_v28 = vshll.u32 %v114_v15, 16  ;;  %v710_v30 = vshrl.u32 %v66_v20, 16  ;;  %v122_v43 = vld [vmem:[%s15968_s0 + $0x140] sm:$0x1]  ;;  %v10399_v54 = vld [vmem:[%s15967_s1 + $0x58] sm:$0xff] }
   0x8   :  { %v333_v31 = vrot.slane %v332_v21, 4  ;;  %v523_v32 = vrot.slane %v521_v22, 5  ;;  %v529_v33 = vrot.slane %v527_v23, 5  ;;  %v533_v34 = vrot.slane %v531_v24, 4  ;;  %v18_v45 = vld [vmem:[%s15968_s0] sm:$0xf] }
   0x9   :  { %v343_v36 = vrot.slane %v342_v26, 4  ;;  %v539_v37 = vrot.slane %v537_v28, 5  ;;  %v712_v38 = vrot.slane %v710_v30, 4  ;;  %v713_v39 = vshll.u32 %v66_v20, 16  ;;  %v19_v58 = vld [vmem:[%s15968_s0 + $0x4] sm:$0xf] }
   0xa   :  { %10530 = vmatpush.bf16.msra.mxu1 %v10401_v7  ;;  %10531 = vmatpush.bf16.msra.mxu2 %v10401_v7  ;;  %v338_v40 = vsel %vm10739_vm2, %v333_v31, %v337_v16  ;;  %v524_v41 = vor.u32 %v523_v32, %v520_v27  ;;  %v534_v42 = vor.u32 %v533_v34, %v529_v33  ;;  %v719_v44 = vshll.u32 %v67_v29, 16  ;;  %v98_v4 = vld [vmem:[%s15968_s0 + $0x8] sm:$0x1]  ;;  %v36_v9 = vld [vmem:[%s15968_s0 + $0x6c] sm:$0xf]  ;;  %v10398_v10 = vld [vmem:[%s15967_s1 + $0x50] sm:$0xff] }
   0xb   :  { %10532 = vmatpush.bf16.msra.mxu3 %v10401_v7  ;;  %1096 = vmatpush.bf16.msra.mxu0 %v10401_v7  ;;  %v348_v46 = vsel %vm10739_vm2, %v343_v36, %v347_v18  ;;  %v10759_v47 = vunpack.c.l.b16 %v338_v40  ;;  %v715_v48 = vrot.slane %v713_v39, 5  ;;  %v723_v49 = vshrl.u32 %v67_v29, 16  ;;  %v37_v15 = vld [vmem:[%s15968_s0 + $0x70] sm:$0xf]  ;;  %v107_v22 = vld [vmem:[%s15968_s0 + $0x74] sm:$0x1] }
   0xc   :  { %v10761_v50 = vunpack.c.l.b16 %v348_v46  ;;  %v525_v51 = vrot.slane %v524_v41, 4  ;;  %v535_v52 = vrot.slane %v534_v42, 4  ;;  %v721_v53 = vrot.slane %v719_v44, 5  ;;  %v52_v30 = vld [vmem:[%s15968_s0 + $0xe4] sm:$0xf]  ;;  %v10397_v31 = vld [vmem:[%s15967_s1 + $0x48] sm:$0xff] }
   0xd   :  { %v716_v55 = vor.u32 %v715_v48, %v712_v38  ;;  %v725_v56 = vrot.slane %v723_v49, 4  ;;  %v729_v57 = vshll.u32 %v122_v43, 16  ;;  %v134_v59 = vshrl.u32 %v18_v45, 16  ;;  %v53_v36 = vld [vmem:[%s15968_s0 + $0xe8] sm:$0xf] }
   0xe   :  { %10533 = vmatpush.bf16.msra.mxu1 %v10400_v35  ;;  %10534 = vmatpush.bf16.msra.mxu2 %v10400_v35  ;;  %v990_v60 = vpack.c.b16 %v10761_v50, %v10759_v47  ;;  %v530_v61 = vsel %vm10739_vm2, %v525_v51, %v529_v33  ;;  %v540_v62 = vsel %vm10739_vm2, %v535_v52, %v539_v37  ;;  %v137_v63 = vshll.u32 %v18_v45, 16  ;;  %v115_v46 = vld [vmem:[%s15968_s0 + $0xec] sm:$0x1]  ;;  %v10396_v52 = vld [vmem:[%s15967_s1 + $0x40] sm:$0xff] }
   0xf   :  { %10535 = vmatpush.bf16.msra.mxu3 %v10400_v35  ;;  %1097 = vmatpush.bf16.msra.mxu0 %v10400_v35  ;;  %v10775_v0 = vunpack.c.l.b16 %v530_v61  ;;  %v10777_v1 = vunpack.c.l.b16 %v540_v62  ;;  %v717_v2 = vrot.slane %v716_v55, 4  ;;  %v726_v3 = vor.u32 %v725_v56, %v721_v53 }
  0x10   :  { %v731_v5 = vrot.slane %v729_v57, 5  ;;  %v136_v6 = vrot.slane %v134_v59, 4  ;;  %v139_v7 = vrot.slane %v137_v63, 5  ;;  %v143_v8 = vshll.u32 %v19_v58, 16  ;;  %v68_v57 = vld [vmem:[%s15968_s0 + $0x144] sm:$0xf] }
  0x11   :  { %v998_v11 = vpack.c.b16 %v10777_v1, %v10775_v0  ;;  %v722_v12 = vsel %vm10739_vm2, %v717_v2, %v721_v53  ;;  %v727_v13 = vrot.slane %v726_v3, 4  ;;  %v147_v14 = vshrl.u32 %v19_v58, 16  ;;  %v10411_v58 = vld [vmem:[%s15967_s1 + $0xb8] sm:$0xff]  ;;  %v99_v1 = vld [vmem:[%s15968_s0 + $0x14] sm:$0x1] }
  0x12   :  { %10536 = vmatpush.bf16.msra.mxu1 %v10399_v54  ;;  %10537 = vmatpush.bf16.msra.mxu2 %v10399_v54  ;;  %v10795_v16 = vunpack.c.l.b16 %v722_v12  ;;  %v140_v17 = vor.u32 %v139_v7, %v136_v6  ;;  %v145_v18 = vrot.slane %v143_v8, 5  ;;  %v153_v19 = vshll.u32 %v98_v4, 16  ;;  %v10451_v2 = vld [vmem:[%s15967_s1 + $0xf8] sm:$0xff]  ;;  %v69_v7 = vld [vmem:[%s15968_s0 + $0x148] sm:$0xf] }
  0x13   :  { %10538 = vmatpush.bf16.msra.mxu3 %v10399_v54  ;;  %1098 = vmatpush.bf16.msra.mxu0 %v10399_v54  ;;  %v732_v20 = vsel %vm10739_vm2, %v727_v13, %v731_v5  ;;  %v149_v21 = vrot.slane %v147_v14, 4  ;;  %v350_v23 = vshrl.u32 %v36_v9, 16  ;;  %v353_v24 = vshll.u32 %v36_v9, 16  ;;  %v123_v12 = vld [vmem:[%s15968_s0 + $0x14c] sm:$0x1] }
  0x14   :  { %v10802_v26 = vunpack.c.l.b16 %v732_v20  ;;  %v141_v27 = vrot.slane %v140_v17, 4  ;;  %v155_v28 = vrot.slane %v153_v19, 5  ;;  %v359_v29 = vshll.u32 %v37_v15, 16  ;;  %v20_v19 = vld [vmem:[%s15968_s0 + $0xc] sm:$0xf]  ;;  %v10395_v20 = vld [vmem:[%s15967_s1 + $0x38] sm:$0xff] }
  0x15   :  { %v150_v32 = vor.u32 %v149_v21, %v145_v18  ;;  %v352_v33 = vrot.slane %v350_v23, 4  ;;  %v355_v34 = vrot.slane %v353_v24, 5  ;;  %v363_v35 = vshrl.u32 %v37_v15, 16  ;;  %v10459_v21 = vld [vmem:[%s15967_s1 + $0x138] sm:$0xff] }
  0x16   :  { %10539 = vmatpush.bf16.msra.mxu1 %v10398_v10  ;;  %10540 = vmatpush.bf16.msra.mxu2 %v10398_v10  ;;  %v1006_v37 = vpack.c.b16 %v10802_v26, %v10795_v16  ;;  %v146_v38 = vsel %vm10739_vm2, %v141_v27, %v145_v18  ;;  %v361_v39 = vrot.slane %v359_v29, 5  ;;  %v369_v40 = vshll.u32 %v107_v22, 16 }
  0x17   :  { %10541 = vmatpush.bf16.msra.mxu3 %v10398_v10  ;;  %1099 = vmatpush.bf16.msra.mxu0 %v10398_v10  ;;  %v151_v41 = vrot.slane %v150_v32, 4  ;;  %v10817_v42 = vunpack.c.l.b16 %v146_v38  ;;  %v356_v43 = vor.u32 %v355_v34, %v352_v33  ;;  %v365_v44 = vrot.slane %v363_v35, 4  ;;  %v10410_v32 = vld [vmem:[%s15967_s1 + $0xb0] sm:$0xff] }
  0x18   :  { %v371_v45 = vrot.slane %v369_v40, 5  ;;  %v542_v48 = vshrl.u32 %v52_v30, 16  ;;  %v545_v49 = vshll.u32 %v52_v30, 16  ;;  %v551_v51 = vshll.u32 %v53_v36, 16  ;;  %v10450_v33 = vld [vmem:[%s15967_s1 + $0xf0] sm:$0xff] }
  0x19   :  { %v156_v53 = vsel %vm10739_vm2, %v151_v41, %v155_v28  ;;  %v357_v54 = vrot.slane %v356_v43, 4  ;;  %v366_v55 = vor.u32 %v365_v44, %v361_v39  ;;  %v555_v56 = vshrl.u32 %v53_v36, 16  ;;  %v21_v38 = vld [vmem:[%s15968_s0 + $0x10] sm:$0xf] }
  0x1a   :  { %10542 = vmatpush.bf16.msra.mxu1 %v10397_v31  ;;  %10543 = vmatpush.bf16.msra.mxu2 %v10397_v31  ;;  %v919_v59 = vunpack.c.l.b16 %v156_v53  ;;  %v544_v61 = vrot.slane %v542_v48, 4  ;;  %v547_v62 = vrot.slane %v545_v49, 5  ;;  %v553_v63 = vrot.slane %v551_v51, 5  ;;  %v10394_v41 = vld [vmem:[%s15967_s1 + $0x30] sm:$0xff]  ;;  %v10409_v48 = vld [vmem:[%s15967_s1 + $0xa8] sm:$0xff] }
  0x1b   :  { %10544 = vmatpush.bf16.msra.mxu3 %v10397_v31  ;;  %1100 = vmatpush.bf16.msra.mxu0 %v10397_v31  ;;  %v362_v3 = vsel %vm10739_vm2, %v357_v54, %v361_v39  ;;  %v367_v4 = vrot.slane %v366_v55, 4  ;;  %v557_v5 = vrot.slane %v555_v56, 4  ;;  %v561_v6 = vshll.u32 %v115_v46, 16  ;;  %v10449_v49 = vld [vmem:[%s15967_s1 + $0xe8] sm:$0xff]  ;;  %v39_v54 = vld [vmem:[%s15968_s0 + $0x7c] sm:$0xf] }
  0x1c   :  { %v982_v8 = vpack.c.b16 %v919_v59, %v10817_v42  ;;  %v10842_v9 = vunpack.c.l.b16 %v362_v3  ;;  %v548_v10 = vor.u32 %v547_v62, %v544_v61  ;;  %v734_v13 = vshrl.u32 %v68_v57, 16  ;;  %v10458_v42 = vld [vmem:[%s15967_s1 + $0x130] sm:$0xff]  ;;  %v108_v61 = vld [vmem:[%s15968_s0 + $0x80] sm:$0x1] }
  0x1d   :  { %v372_v14 = vsel %vm10739_vm2, %v367_v4, %v371_v45  ;;  %v558_v15 = vor.u32 %v557_v5, %v553_v63  ;;  %v563_v17 = vrot.slane %v561_v6, 5  ;;  %v737_v18 = vshll.u32 %v68_v57, 16  ;;  %v54_v4 = vld [vmem:[%s15968_s0 + $0xf0] sm:$0xf]  ;;  %v10393_v5 = vld [vmem:[%s15967_s1 + $0x28] sm:$0xff] }
  0x1e   :  { %10545 = vmatpush.bf16.msra.mxu1 %v10396_v52  ;;  %10546 = vmatpush.bf16.msra.mxu2 %v10396_v52  ;;  %v10858_v22 = vunpack.c.l.b16 %v372_v14  ;;  %v549_v23 = vrot.slane %v548_v10, 4  ;;  %v736_v24 = vrot.slane %v734_v13, 4  ;;  %v743_v27 = vshll.u32 %v69_v7, 16  ;;  %v10457_v6 = vld [vmem:[%s15967_s1 + $0x128] sm:$0xff] }
  0x1f   :  { %10547 = vmatpush.bf16.msra.mxu3 %v10396_v52  ;;  %1101 = vmatpush.bf16.msra.mxu0 %v10396_v52  ;;  %v559_v28 = vrot.slane %v558_v15, 4  ;;  %v739_v29 = vrot.slane %v737_v18, 5  ;;  %v747_v30 = vshrl.u32 %v69_v7, 16  ;;  %v753_v31 = vshll.u32 %v123_v12, 16 }
  0x20   :  { %v991_v34 = vpack.c.b16 %v10858_v22, %v10842_v9  ;;  %v554_v35 = vsel %vm10739_vm2, %v549_v23, %v553_v63  ;;  %v745_v36 = vrot.slane %v743_v27, 5  ;;  %v158_v39 = vshrl.u32 %v20_v19, 16  ;;  %v10408_v9 = vld [vmem:[%s15967_s1 + $0xa0] sm:$0xff] }
  0x21   :  { %1142 = vmatmul.bf16.vlgmr.msra.gmra.mxu1 %v990_v60  ;;  %1182 = vmatmul.bf16.vlgmr.msra.gmra.mxu2 %v998_v11  ;;  %v564_v47 = vsel %vm10739_vm2, %v559_v28, %v563_v17  ;;  %v10884_v50 = vunpack.c.l.b16 %v554_v35  ;;  %v740_v60 = vor.u32 %v739_v29, %v736_v24  ;;  %v749_v0 = vrot.slane %v747_v30, 4  ;;  %v38_v11 = vld [vmem:[%s15968_s0 + $0x78] sm:$0xf] }
  0x22   :  { %2188 = vmatpush.bf16.msrb.mxu2 %v10411_v58  ;;  %1222 = vmatmul.bf16.vlgmr.msra.gmra.mxu3 %v1006_v37  ;;  %v10892_v16 = vunpack.c.l.b16 %v564_v47  ;;  %v755_v26 = vrot.slane %v753_v31, 5  ;;  %v160_v37 = vrot.slane %v158_v39, 4  ;;  %v161_v40 = vshll.u32 %v20_v19, 16  ;;  %v116_v30 = vld [vmem:[%s15968_s0 + $0xf8] sm:$0x1] }
  0x23   :  { %2743 = vmatpush.bf16.msrb.mxu3 %v10451_v2  ;;  %1102 = vmatmul.bf16.vlgmr.msra.gmra.mxu0 %v982_v8  ;;  %v741_v43 = vrot.slane %v740_v60, 4  ;;  %v750_v44 = vor.u32 %v749_v0, %v745_v36  ;;  %v167_v45 = vshll.u32 %v21_v38, 16  ;;  %v171_v46 = vshrl.u32 %v21_v38, 16  ;;  %v70_v31 = vld [vmem:[%s15968_s0 + $0x150] sm:$0xf] }
  0x24   :  { %1503 = vmatpush.bf16.msrb.mxu1 %v10395_v20  ;;  %4033 = vmatpush.bf16.msrb.mxu0 %v10459_v21  ;;  %v999_v51 = vpack.c.b16 %v10892_v16, %v10884_v50  ;;  %v163_v52 = vrot.slane %v161_v40, 5  ;;  %v177_v53 = vshll.u32 %v99_v1, 16  ;;  %v374_v55 = vshrl.u32 %v38_v11, 16  ;;  %v55_v21 = vld [vmem:[%s15968_s0 + $0xf4] sm:$0xf] }
  0x25   :  { %v746_v56 = vsel %vm10739_vm2, %v741_v43, %v745_v36  ;;  %v751_v57 = vrot.slane %v750_v44, 4  ;;  %v169_v58 = vrot.slane %v167_v45, 5  ;;  %v173_v59 = vrot.slane %v171_v46, 4  ;;  %v124_v44 = vld [vmem:[%s15968_s0 + $0x158] sm:$0x1] }
  0x26   :  { %2189 = vmatpush.bf16.msrb.mxu2 %v10410_v32  ;;  %v968_v62 = vunpack.c.l.b16 %v746_v56  ;;  %v164_v63 = vor.u32 %v163_v52, %v160_v37  ;;  %v179_v2 = vrot.slane %v177_v53, 5  ;;  %v376_v3 = vrot.slane %v374_v55, 4  ;;  %v22_v52 = vld [vmem:[%s15968_s0 + $0x18] sm:$0xf] }
  0x27   :  { %2744 = vmatpush.bf16.msrb.mxu3 %v10450_v33  ;;  %v756_v7 = vsel %vm10739_vm2, %v751_v57, %v755_v26  ;;  %v174_v8 = vor.u32 %v173_v59, %v169_v58  ;;  %v377_v10 = vshll.u32 %v38_v11, 16  ;;  %v383_v12 = vshll.u32 %v39_v54, 16  ;;  %v71_v26 = vld [vmem:[%s15968_s0 + $0x154] sm:$0xf] }
  0x28   :  { %1504 = vmatpush.bf16.msrb.mxu1 %v10394_v41  ;;  %4034 = vmatpush.bf16.msrb.mxu0 %v10458_v42  ;;  %v969_v13 = vunpack.c.l.b16 %v756_v7  ;;  %v165_v14 = vrot.slane %v164_v63, 4  ;;  %v387_v15 = vshrl.u32 %v39_v54, 16  ;;  %v393_v17 = vshll.u32 %v108_v61, 16  ;;  %v100_v7 = vld [vmem:[%s15968_s0 + $0x20] sm:$0x1] }
  0x29   :  { %v175_v18 = vrot.slane %v174_v8, 4  ;;  %v379_v19 = vrot.slane %v377_v10, 5  ;;  %v385_v20 = vrot.slane %v383_v12, 5  ;;  %v566_v23 = vshrl.u32 %v54_v4, 16  ;;  %v40_v10 = vld [vmem:[%s15968_s0 + $0x84] sm:$0xf] }
  0x2a   :  { %2190 = vmatpush.bf16.msrb.mxu2 %v10409_v48  ;;  %v1007_v24 = vpack.c.b16 %v969_v13, %v968_v62  ;;  %v170_v27 = vsel %vm10739_vm2, %v165_v14, %v169_v58  ;;  %v389_v28 = vrot.slane %v387_v15, 4  ;;  %v395_v29 = vrot.slane %v393_v17, 5 }
  0x2b   :  { %2745 = vmatpush.bf16.msrb.mxu3 %v10449_v49  ;;  %v180_v32 = vsel %vm10739_vm2, %v175_v18, %v179_v2  ;;  %v920_v33 = vunpack.c.l.b16 %v170_v27  ;;  %v380_v35 = vor.u32 %v379_v19, %v376_v3  ;;  %v568_v36 = vrot.slane %v566_v23, 4  ;;  %v23_v3 = vld [vmem:[%s15968_s0 + $0x1c] sm:$0xf]  ;;  %v10392_v23 = vld [vmem:[%s15967_s1 + $0x20] sm:$0xff] }
  0x2c   :  { %1505 = vmatpush.bf16.msrb.mxu1 %v10393_v5  ;;  %4035 = vmatpush.bf16.msrb.mxu0 %v10457_v6  ;;  %v921_v38 = vunpack.c.l.b16 %v180_v32  ;;  %v390_v39 = vor.u32 %v389_v28, %v385_v20  ;;  %v569_v47 = vshll.u32 %v54_v4, 16  ;;  %v575_v60 = vshll.u32 %v55_v21, 16 }
  0x2d   :  { %v381_v0 = vrot.slane %v380_v35, 4  ;;  %v579_v1 = vshrl.u32 %v55_v21, 16  ;;  %v585_v11 = vshll.u32 %v116_v30, 16  ;;  %v758_v37 = vshrl.u32 %v70_v31, 16  ;;  %v10448_v21 = vld [vmem:[%s15967_s1 + $0xe0] sm:$0xff] }
  0x2e   :  { %v983_v40 = vpack.c.b16 %v921_v38, %v920_v33  ;;  %v391_v41 = vrot.slane %v390_v39, 4  ;;  %v571_v42 = vrot.slane %v569_v47, 5  ;;  %v577_v43 = vrot.slane %v575_v60, 5  ;;  %2191 = vmatpush.bf16.msrb.mxu2 %v10408_v9  ;;  %v109_v38 = vld [vmem:[%s15968_s0 + $0x8c] sm:$0x1] }
  0x2f   :  { %v386_v45 = vsel %vm10739_vm2, %v381_v0, %v385_v20  ;;  %v581_v46 = vrot.slane %v579_v1, 4  ;;  %v587_v48 = vrot.slane %v585_v11, 5  ;;  %v760_v49 = vrot.slane %v758_v37, 4  ;;  %2746 = vmatpush.bf16.msrb.mxu3 %v10448_v21  ;;  %v56_v1 = vld [vmem:[%s15968_s0 + $0xfc] sm:$0xf] }
  0x30   :  { %v396_v53 = vsel %vm10739_vm2, %v391_v41, %v395_v29  ;;  %v10959_v54 = vunpack.c.l.b16 %v386_v45  ;;  %v572_v55 = vor.u32 %v571_v42, %v568_v36  ;;  %v761_v56 = vshll.u32 %v70_v31, 16  ;;  %v41_v36 = vld [vmem:[%s15968_s0 + $0x88] sm:$0xf]  ;;  %1506 = vmatpush.bf16.msrb.mxu1 %v10392_v23  ;;  %v57_v45 = vld [vmem:[%s15968_s0 + $0x100] sm:$0xf] }
  0x31   :  { %1147 = vmatmul.bf16.gmra.mxu1 %v991_v34  ;;  %1187 = vmatmul.bf16.gmra.mxu2 %v999_v51  ;;  %v10961_v57 = vunpack.c.l.b16 %v396_v53  ;;  %v582_v58 = vor.u32 %v581_v46, %v577_v43  ;;  %v767_v59 = vshll.u32 %v71_v26, 16  ;;  %v771_v61 = vshrl.u32 %v71_v26, 16 }
  0x32   :  { %1227 = vmatmul.bf16.gmra.mxu3 %v1007_v24  ;;  %v573_v22 = vrot.slane %v572_v55, 4  ;;  %v763_v34 = vrot.slane %v761_v56, 5  ;;  %v777_v50 = vshll.u32 %v124_v44, 16  ;;  %v182_v16 = vshrl.u32 %v22_v52, 16  ;;  %v10456_v24 = vld [vmem:[%s15967_s1 + $0x120] sm:$0xff] }
  0x33   :  { %1107 = vmatmul.bf16.gmra.mxu0 %v983_v40  ;;  %v992_v51 = vpack.c.b16 %v10961_v57, %v10959_v54  ;;  %v583_v62 = vrot.slane %v582_v58, 4  ;;  %v769_v63 = vrot.slane %v767_v59, 5  ;;  %v773_v2 = vrot.slane %v771_v61, 4  ;;  %v72_v61 = vld [vmem:[%s15968_s0 + $0x15c] sm:$0xf] }
  0x34   :  { %v578_v4 = vsel %vm10739_vm2, %v573_v22, %v577_v43  ;;  %v764_v5 = vor.u32 %v763_v34, %v760_v49  ;;  %v779_v6 = vrot.slane %v777_v50, 5  ;;  %v184_v8 = vrot.slane %v182_v16, 4  ;;  %4036 = vmatpush.bf16.msrb.mxu0 %v10456_v24 }
  0x35   :  { %v588_v12 = vsel %vm10739_vm2, %v583_v62, %v587_v48  ;;  %v954_v13 = vunpack.c.l.b16 %v578_v4  ;;  %v774_v14 = vor.u32 %v773_v2, %v769_v63  ;;  %v185_v15 = vshll.u32 %v22_v52, 16  ;;  %v117_v52 = vld [vmem:[%s15968_s0 + $0x104] sm:$0x1] }
  0x36   :  { %v955_v17 = vunpack.c.l.b16 %v588_v12  ;;  %v765_v18 = vrot.slane %v764_v5, 4  ;;  %v191_v19 = vshll.u32 %v23_v3, 16  ;;  %v195_v20 = vshrl.u32 %v23_v3, 16 }
  0x37   :  { %v775_v27 = vrot.slane %v774_v14, 4  ;;  %v187_v28 = vrot.slane %v185_v15, 5  ;;  %v201_v29 = vshll.u32 %v100_v7, 16  ;;  %v398_v30 = vshrl.u32 %v40_v10, 16  ;;  %v125_v14 = vld [vmem:[%s15968_s0 + $0x164] sm:$0x1] }
  0x38   :  { %v1000_v31 = vpack.c.b16 %v955_v17, %v954_v13  ;;  %v770_v32 = vsel %vm10739_vm2, %v765_v18, %v769_v63  ;;  %v193_v33 = vrot.slane %v191_v19, 5  ;;  %v197_v35 = vrot.slane %v195_v20, 4  ;;  %v24_v17 = vld [vmem:[%s15968_s0 + $0x24] sm:$0xf] }
  0x39   :  { %v780_v39 = vsel %vm10739_vm2, %v775_v27, %v779_v6  ;;  %v970_v47 = vunpack.c.l.b16 %v770_v32  ;;  %v188_v60 = vor.u32 %v187_v28, %v184_v8  ;;  %v203_v0 = vrot.slane %v201_v29, 5  ;;  %v73_v6 = vld [vmem:[%s15968_s0 + $0x160] sm:$0xf]  ;;  %v10407_v29 = vld [vmem:[%s15967_s1 + $0x98] sm:$0xff] }
  0x3a   :  { %v971_v11 = vunpack.c.l.b16 %v780_v39  ;;  %v198_v26 = vor.u32 %v197_v35, %v193_v33  ;;  %v400_v37 = vrot.slane %v398_v30, 4  ;;  %v401_v40 = vshll.u32 %v40_v10, 16  ;;  %2192 = vmatpush.bf16.msrb.mxu2 %v10407_v29 }
  0x3b   :  { %v189_v41 = vrot.slane %v188_v60, 4  ;;  %v407_v42 = vshll.u32 %v41_v36, 16  ;;  %v411_v43 = vshrl.u32 %v41_v36, 16  ;;  %v417_v44 = vshll.u32 %v109_v38, 16 }
  0x3c   :  { %v1008_v46 = vpack.c.b16 %v971_v11, %v970_v47  ;;  %v199_v48 = vrot.slane %v198_v26, 4  ;;  %v403_v49 = vrot.slane %v401_v40, 5  ;;  %v590_v53 = vshrl.u32 %v56_v1, 16  ;;  %v25_v47 = vld [vmem:[%s15968_s0 + $0x28] sm:$0xf] }
  0x3d   :  { %v194_v55 = vsel %vm10739_vm2, %v189_v41, %v193_v33  ;;  %v409_v56 = vrot.slane %v407_v42, 5  ;;  %v413_v58 = vrot.slane %v411_v43, 4  ;;  %v419_v59 = vrot.slane %v417_v44, 5  ;;  %v101_v11 = vld [vmem:[%s15968_s0 + $0x2c] sm:$0x1] }
  0x3e   :  { %v204_v9 = vsel %vm10739_vm2, %v199_v48, %v203_v0  ;;  %v922_v22 = vunpack.c.l.b16 %v194_v55  ;;  %v404_v34 = vor.u32 %v403_v49, %v400_v37  ;;  %v592_v50 = vrot.slane %v590_v53, 4  ;;  %v42_v37 = vld [vmem:[%s15968_s0 + $0x90] sm:$0xf]  ;;  %v10447_v49 = vld [vmem:[%s15967_s1 + $0xd8] sm:$0xff] }
  0x3f   :  { %v923_v16 = vunpack.c.l.b16 %v204_v9  ;;  %v414_v62 = vor.u32 %v413_v58, %v409_v56  ;;  %v593_v63 = vshll.u32 %v56_v1, 16  ;;  %v599_v2 = vshll.u32 %v57_v45, 16  ;;  %v10455_v53 = vld [vmem:[%s15967_s1 + $0x118] sm:$0xff]  ;;  %2747 = vmatpush.bf16.msrb.mxu3 %v10447_v49 }
  0x40   :  { %v405_v3 = vrot.slane %v404_v34, 4  ;;  %v603_v4 = vshrl.u32 %v57_v45, 16  ;;  %v609_v5 = vshll.u32 %v117_v52, 16  ;;  %v782_v7 = vshrl.u32 %v72_v61, 16  ;;  %v10391_v52 = vld [vmem:[%s15967_s1 + $0x18] sm:$0xff]  ;;  %4037 = vmatpush.bf16.msrb.mxu0 %v10455_v53 }
  0x41   :  { %1152 = vmatmul.bf16.gmra.mxu1 %v992_v51  ;;  %1192 = vmatmul.bf16.gmra.mxu2 %v1000_v31  ;;  %v984_v8 = vpack.c.b16 %v923_v16, %v922_v22  ;;  %v415_v10 = vrot.slane %v414_v62, 4  ;;  %v595_v12 = vrot.slane %v593_v63, 5  ;;  %v601_v13 = vrot.slane %v599_v2, 5  ;;  %v110_v16 = vld [vmem:[%s15968_s0 + $0x98] sm:$0x1] }
  0x42   :  { %1232 = vmatmul.bf16.gmra.mxu3 %v1008_v46  ;;  %v410_v54 = vsel %vm10739_vm2, %v405_v3, %v409_v56  ;;  %v605_v57 = vrot.slane %v603_v4, 4  ;;  %v611_v51 = vrot.slane %v609_v5, 5  ;;  %v784_v15 = vrot.slane %v782_v7, 4  ;;  %1507 = vmatpush.bf16.msrb.mxu1 %v10391_v52  ;;  %v58_v4 = vld [vmem:[%s15968_s0 + $0x108] sm:$0xf] }
  0x43   :  { %1112 = vmatmul.bf16.gmra.mxu0 %v984_v8  ;;  %v420_v18 = vsel %vm10739_vm2, %v415_v10, %v419_v59  ;;  %v11032_v19 = vunpack.c.l.b16 %v410_v54  ;;  %v596_v20 = vor.u32 %v595_v12, %v592_v50  ;;  %v785_v21 = vshll.u32 %v72_v61, 16  ;;  %v43_v50 = vld [vmem:[%s15968_s0 + $0x94] sm:$0xf]  ;;  %v59_v54 = vld [vmem:[%s15968_s0 + $0x10c] sm:$0xf] }
  0x44   :  { %v11034_v23 = vunpack.c.l.b16 %v420_v18  ;;  %v606_v24 = vor.u32 %v605_v57, %v601_v13  ;;  %v791_v27 = vshll.u32 %v73_v6, 16  ;;  %v795_v28 = vshrl.u32 %v73_v6, 16 }
  0x45   :  { %v597_v30 = vrot.slane %v596_v20, 4  ;;  %v787_v31 = vrot.slane %v785_v21, 5  ;;  %v801_v32 = vshll.u32 %v125_v14, 16  ;;  %v206_v33 = vshrl.u32 %v24_v17, 16 }
  0x46   :  { %v993_v35 = vpack.c.b16 %v11034_v23, %v11032_v19  ;;  %v607_v36 = vrot.slane %v606_v24, 4  ;;  %v793_v38 = vrot.slane %v791_v27, 5  ;;  %v797_v39 = vrot.slane %v795_v28, 4  ;;  %v74_v24 = vld [vmem:[%s15968_s0 + $0x168] sm:$0xf] }
  0x47   :  { %v602_v60 = vsel %vm10739_vm2, %v597_v30, %v601_v13  ;;  %v788_v0 = vor.u32 %v787_v31, %v784_v15  ;;  %v803_v1 = vrot.slane %v801_v32, 5  ;;  %v208_v26 = vrot.slane %v206_v33, 4 }
  0x48   :  { %v612_v40 = vsel %vm10739_vm2, %v607_v36, %v611_v51  ;;  %v956_v41 = vunpack.c.l.b16 %v602_v60  ;;  %v798_v42 = vor.u32 %v797_v39, %v793_v38  ;;  %v209_v43 = vshll.u32 %v24_v17, 16  ;;  %v118_v17 = vld [vmem:[%s15968_s0 + $0x110] sm:$0x1] }
  0x49   :  { %v957_v44 = vunpack.c.l.b16 %v612_v40  ;;  %v789_v45 = vrot.slane %v788_v0, 4  ;;  %v215_v46 = vshll.u32 %v25_v47, 16  ;;  %v219_v48 = vshrl.u32 %v25_v47, 16  ;;  %v75_v47 = vld [vmem:[%s15968_s0 + $0x16c] sm:$0xf] }
  0x4a   :  { %v799_v55 = vrot.slane %v798_v42, 4  ;;  %v211_v56 = vrot.slane %v209_v43, 5  ;;  %v225_v58 = vshll.u32 %v101_v11, 16  ;;  %v422_v59 = vshrl.u32 %v42_v37, 16 }
  0x4b   :  { %v1001_v61 = vpack.c.b16 %v957_v44, %v956_v41  ;;  %v794_v9 = vsel %vm10739_vm2, %v789_v45, %v793_v38  ;;  %v217_v22 = vrot.slane %v215_v46, 5  ;;  %v221_v34 = vrot.slane %v219_v48, 4  ;;  %v26_v44 = vld [vmem:[%s15968_s0 + $0x30] sm:$0xf] }
  0x4c   :  { %v804_v62 = vsel %vm10739_vm2, %v799_v55, %v803_v1  ;;  %v972_v63 = vunpack.c.l.b16 %v794_v9  ;;  %v212_v2 = vor.u32 %v211_v56, %v208_v26  ;;  %v227_v3 = vrot.slane %v225_v58, 5  ;;  %v10406_v58 = vld [vmem:[%s15967_s1 + $0x90] sm:$0xff] }
  0x4d   :  { %v973_v5 = vunpack.c.l.b16 %v804_v62  ;;  %v222_v6 = vor.u32 %v221_v34, %v217_v22  ;;  %v424_v7 = vrot.slane %v422_v59, 4  ;;  %v425_v8 = vshll.u32 %v42_v37, 16  ;;  %v126_v37 = vld [vmem:[%s15968_s0 + $0x170] sm:$0x1]  ;;  %2193 = vmatpush.bf16.msrb.mxu2 %v10406_v58 }
  0x4e   :  { %v213_v10 = vrot.slane %v212_v2, 4  ;;  %v431_v12 = vshll.u32 %v43_v50, 16  ;;  %v435_v13 = vshrl.u32 %v43_v50, 16  ;;  %v441_v14 = vshll.u32 %v110_v16, 16 }
  0x4f   :  { %v1009_v57 = vpack.c.b16 %v973_v5, %v972_v63  ;;  %v223_v51 = vrot.slane %v222_v6, 4  ;;  %v427_v15 = vrot.slane %v425_v8, 5  ;;  %v614_v18 = vshrl.u32 %v58_v4, 16  ;;  %v27_v63 = vld [vmem:[%s15968_s0 + $0x34] sm:$0xf] }
  0x50   :  { %v218_v19 = vsel %vm10739_vm2, %v213_v10, %v217_v22  ;;  %v433_v20 = vrot.slane %v431_v12, 5  ;;  %v437_v21 = vrot.slane %v435_v13, 4  ;;  %v443_v23 = vrot.slane %v441_v14, 5  ;;  %v102_v5 = vld [vmem:[%s15968_s0 + $0x38] sm:$0x1] }
  0x51   :  { %1157 = vmatmul.bf16.gmra.mxu1 %v993_v35  ;;  %1197 = vmatmul.bf16.gmra.mxu2 %v1001_v61  ;;  %v228_v27 = vsel %vm10739_vm2, %v223_v51, %v227_v3  ;;  %v924_v28 = vunpack.c.l.b16 %v218_v19  ;;  %v428_v29 = vor.u32 %v427_v15, %v424_v7  ;;  %v616_v30 = vrot.slane %v614_v18, 4  ;;  %v44_v7 = vld [vmem:[%s15968_s0 + $0x9c] sm:$0xf]  ;;  %v10446_v15 = vld [vmem:[%s15967_s1 + $0xd0] sm:$0xff] }
  0x52   :  { %1237 = vmatmul.bf16.gmra.mxu3 %v1009_v57  ;;  %v925_v31 = vunpack.c.l.b16 %v228_v27  ;;  %v438_v32 = vor.u32 %v437_v21, %v433_v20  ;;  %v617_v33 = vshll.u32 %v58_v4, 16  ;;  %v623_v35 = vshll.u32 %v59_v54, 16  ;;  %v10454_v18 = vld [vmem:[%s15967_s1 + $0x110] sm:$0xff] }
  0x53   :  { %v429_v36 = vrot.slane %v428_v29, 4  ;;  %v627_v38 = vshrl.u32 %v59_v54, 16  ;;  %v633_v39 = vshll.u32 %v118_v17, 16  ;;  %v806_v60 = vshrl.u32 %v74_v24, 16  ;;  %v10390_v17 = vld [vmem:[%s15967_s1 + $0x10] sm:$0xff]  ;;  %2748 = vmatpush.bf16.msrb.mxu3 %v10446_v15  ;;  %4038 = vmatpush.bf16.msrb.mxu0 %v10454_v18 }
  0x54   :  { %v985_v0 = vpack.c.b16 %v925_v31, %v924_v28  ;;  %v439_v1 = vrot.slane %v438_v32, 4  ;;  %v619_v11 = vrot.slane %v617_v33, 5  ;;  %v625_v26 = vrot.slane %v623_v35, 5  ;;  %v111_v31 = vld [vmem:[%s15968_s0 + $0xa4] sm:$0x1]  ;;  %1508 = vmatpush.bf16.msrb.mxu1 %v10390_v17 }
  0x55   :  { %v434_v40 = vsel %vm10739_vm2, %v429_v36, %v433_v20  ;;  %v629_v41 = vrot.slane %v627_v38, 4  ;;  %v635_v42 = vrot.slane %v633_v39, 5  ;;  %v808_v43 = vrot.slane %v806_v60, 4  ;;  %v60_v38 = vld [vmem:[%s15968_s0 + $0x114] sm:$0xf] }
  0x56   :  { %1117 = vmatmul.bf16.gmra.mxu0 %v985_v0  ;;  %v444_v45 = vsel %vm10739_vm2, %v439_v1, %v443_v23  ;;  %v942_v46 = vunpack.c.l.b16 %v434_v40  ;;  %v620_v48 = vor.u32 %v619_v11, %v616_v30  ;;  %v809_v49 = vshll.u32 %v74_v24, 16  ;;  %v45_v30 = vld [vmem:[%s15968_s0 + $0xa0] sm:$0xf]  ;;  %v61_v40 = vld [vmem:[%s15968_s0 + $0x118] sm:$0xf] }
  0x57   :  { %v943_v52 = vunpack.c.l.b16 %v444_v45  ;;  %v630_v53 = vor.u32 %v629_v41, %v625_v26  ;;  %v815_v55 = vshll.u32 %v75_v47, 16  ;;  %v819_v56 = vshrl.u32 %v75_v47, 16 }
  0x58   :  { %v621_v59 = vrot.slane %v620_v48, 4  ;;  %v811_v61 = vrot.slane %v809_v49, 5  ;;  %v825_v9 = vshll.u32 %v126_v37, 16  ;;  %v230_v22 = vshrl.u32 %v26_v44, 16 }
  0x59   :  { %v994_v34 = vpack.c.b16 %v943_v52, %v942_v46  ;;  %v631_v50 = vrot.slane %v630_v53, 4  ;;  %v817_v16 = vrot.slane %v815_v55, 5  ;;  %v821_v62 = vrot.slane %v819_v56, 4  ;;  %v76_v53 = vld [vmem:[%s15968_s0 + $0x174] sm:$0xf] }
  0x5a   :  { %v626_v2 = vsel %vm10739_vm2, %v621_v59, %v625_v26  ;;  %v812_v3 = vor.u32 %v811_v61, %v808_v43  ;;  %v827_v4 = vrot.slane %v825_v9, 5  ;;  %v232_v6 = vrot.slane %v230_v22, 4 }
  0x5b   :  { %v636_v8 = vsel %vm10739_vm2, %v631_v50, %v635_v42  ;;  %v958_v10 = vunpack.c.l.b16 %v626_v2  ;;  %v822_v12 = vor.u32 %v821_v62, %v817_v16  ;;  %v233_v13 = vshll.u32 %v26_v44, 16  ;;  %v119_v44 = vld [vmem:[%s15968_s0 + $0x11c] sm:$0x1] }
  0x5c   :  { %v959_v14 = vunpack.c.l.b16 %v636_v8  ;;  %v813_v54 = vrot.slane %v812_v3, 4  ;;  %v239_v57 = vshll.u32 %v27_v63, 16  ;;  %v243_v51 = vshrl.u32 %v27_v63, 16  ;;  %v77_v63 = vld [vmem:[%s15968_s0 + $0x178] sm:$0xf] }
  0x5d   :  { %v823_v19 = vrot.slane %v822_v12, 4  ;;  %v235_v20 = vrot.slane %v233_v13, 5  ;;  %v249_v21 = vshll.u32 %v102_v5, 16  ;;  %v446_v23 = vshrl.u32 %v44_v7, 16 }
  0x5e   :  { %v1002_v24 = vpack.c.b16 %v959_v14, %v958_v10  ;;  %v818_v27 = vsel %vm10739_vm2, %v813_v54, %v817_v16  ;;  %v241_v28 = vrot.slane %v239_v57, 5  ;;  %v245_v29 = vrot.slane %v243_v51, 4  ;;  %v28_v14 = vld [vmem:[%s15968_s0 + $0x3c] sm:$0xf] }
  0x5f   :  { %v828_v32 = vsel %vm10739_vm2, %v823_v19, %v827_v4  ;;  %v974_v33 = vunpack.c.l.b16 %v818_v27  ;;  %v236_v35 = vor.u32 %v235_v20, %v232_v6  ;;  %v251_v36 = vrot.slane %v249_v21, 5  ;;  %v10405_v21 = vld [vmem:[%s15967_s1 + $0x88] sm:$0xff] }
  0x60   :  { %v975_v39 = vunpack.c.l.b16 %v828_v32  ;;  %v246_v47 = vor.u32 %v245_v29, %v241_v28  ;;  %v448_v60 = vrot.slane %v446_v23, 4  ;;  %v449_v0 = vshll.u32 %v44_v7, 16  ;;  %v127_v7 = vld [vmem:[%s15968_s0 + $0x17c] sm:$0x1]  ;;  %2194 = vmatpush.bf16.msrb.mxu2 %v10405_v21 }
  0x61   :  { %1162 = vmatmul.bf16.gmra.mxu1 %v994_v34  ;;  %1202 = vmatmul.bf16.gmra.mxu2 %v1002_v24  ;;  %v237_v1 = vrot.slane %v236_v35, 4  ;;  %v455_v11 = vshll.u32 %v45_v30, 16  ;;  %v459_v26 = vshrl.u32 %v45_v30, 16  ;;  %v465_v37 = vshll.u32 %v111_v31, 16 }
  0x62   :  { %v1010_v41 = vpack.c.b16 %v975_v39, %v974_v33  ;;  %v247_v42 = vrot.slane %v246_v47, 4  ;;  %v451_v43 = vrot.slane %v449_v0, 5  ;;  %v638_v45 = vshrl.u32 %v60_v38, 16  ;;  %v11172_v33 = vld [vmem:[%s15968_s0 + $0x40] sm:$0xf] }
  0x63   :  { %v242_v46 = vsel %vm10739_vm2, %v237_v1, %v241_v28  ;;  %v457_v48 = vrot.slane %v455_v11, 5  ;;  %v461_v49 = vrot.slane %v459_v26, 4  ;;  %v467_v52 = vrot.slane %v465_v37, 5  ;;  %v11179_v39 = vld [vmem:[%s15968_s0 + $0x44] sm:$0x1] }
  0x64   :  { %1242 = vmatmul.bf16.gmra.mxu3 %v1010_v41  ;;  %v252_v55 = vsel %vm10739_vm2, %v247_v42, %v251_v36  ;;  %v926_v56 = vunpack.c.l.b16 %v242_v46  ;;  %v452_v58 = vor.u32 %v451_v43, %v448_v60  ;;  %v640_v59 = vrot.slane %v638_v45, 4  ;;  %v46_v60 = vld [vmem:[%s15968_s0 + $0xa8] sm:$0xf] }
  0x65   :  { %v927_v61 = vunpack.c.l.b16 %v252_v55  ;;  %v462_v9 = vor.u32 %v461_v49, %v457_v48  ;;  %v641_v22 = vshll.u32 %v60_v38, 16  ;;  %v647_v34 = vshll.u32 %v61_v40, 16  ;;  %v10445_v43 = vld [vmem:[%s15967_s1 + $0xc8] sm:$0xff] }
  0x66   :  { %v453_v50 = vrot.slane %v452_v58, 4  ;;  %v651_v16 = vshrl.u32 %v61_v40, 16  ;;  %v657_v62 = vshll.u32 %v119_v44, 16  ;;  %v830_v2 = vshrl.u32 %v76_v53, 16  ;;  %v10389_v44 = vld [vmem:[%s15967_s1 + $0x8] sm:$0xff]  ;;  %2749 = vmatpush.bf16.msrb.mxu3 %v10445_v43 }
  0x67   :  { %v986_v3 = vpack.c.b16 %v927_v61, %v926_v56  ;;  %v463_v4 = vrot.slane %v462_v9, 4  ;;  %v643_v5 = vrot.slane %v641_v22, 5  ;;  %v649_v6 = vrot.slane %v647_v34, 5  ;;  %v10453_v45 = vld [vmem:[%s15967_s1 + $0x108] sm:$0xff]  ;;  %v112_v61 = vld [vmem:[%s15968_s0 + $0xb0] sm:$0x1]  ;;  %1509 = vmatpush.bf16.msrb.mxu1 %v10389_v44 }
  0x68   :  { %v458_v8 = vsel %vm10739_vm2, %v453_v50, %v457_v48  ;;  %v653_v10 = vrot.slane %v651_v16, 4  ;;  %v659_v12 = vrot.slane %v657_v62, 5  ;;  %v832_v13 = vrot.slane %v830_v2, 4  ;;  %v62_v16 = vld [vmem:[%s15968_s0 + $0x120] sm:$0xf]  ;;  %4039 = vmatpush.bf16.msrb.mxu0 %v10453_v45 }
  0x69   :  { %1122 = vmatmul.bf16.gmra.mxu0 %v986_v3  ;;  %v468_v54 = vsel %vm10739_vm2, %v463_v4, %v467_v52  ;;  %v944_v57 = vunpack.c.l.b16 %v458_v8  ;;  %v644_v51 = vor.u32 %v643_v5, %v640_v59  ;;  %v833_v15 = vshll.u32 %v76_v53, 16  ;;  %v47_v59 = vld [vmem:[%s15968_s0 + $0xac] sm:$0xf]  ;;  %v63_v8 = vld [vmem:[%s15968_s0 + $0x124] sm:$0xf] }
  0x6a   :  { %v945_v17 = vunpack.c.l.b16 %v468_v54  ;;  %v654_v18 = vor.u32 %v653_v10, %v649_v6  ;;  %v839_v19 = vshll.u32 %v77_v63, 16  ;;  %v843_v20 = vshrl.u32 %v77_v63, 16 }
  0x6b   :  { %v645_v23 = vrot.slane %v644_v51, 4  ;;  %v835_v24 = vrot.slane %v833_v15, 5  ;;  %v849_v27 = vshll.u32 %v127_v7, 16  ;;  %v254_v28 = vshrl.u32 %v28_v14, 16 }
  0x6c   :  { %v995_v29 = vpack.c.b16 %v945_v17, %v944_v57  ;;  %v655_v30 = vrot.slane %v654_v18, 4  ;;  %v841_v31 = vrot.slane %v839_v19, 5  ;;  %v845_v32 = vrot.slane %v843_v20, 4  ;;  %v78_v18 = vld [vmem:[%s15968_s0 + $0x180] sm:$0xf] }
  0x6d   :  { %v650_v35 = vsel %vm10739_vm2, %v645_v23, %v649_v6  ;;  %v836_v36 = vor.u32 %v835_v24, %v832_v13  ;;  %v851_v38 = vrot.slane %v849_v27, 5  ;;  %v256_v47 = vrot.slane %v254_v28, 4 }
  0x6e   :  { %v660_v0 = vsel %vm10739_vm2, %v655_v30, %v659_v12  ;;  %v960_v1 = vunpack.c.l.b16 %v650_v35  ;;  %v846_v11 = vor.u32 %v845_v32, %v841_v31  ;;  %v257_v26 = vshll.u32 %v28_v14, 16  ;;  %v120_v14 = vld [vmem:[%s15968_s0 + $0x128] sm:$0x1]  ;;  %v79_v35 = vld [vmem:[%s15968_s0 + $0x184] sm:$0xf] }
  0x6f   :  { %v961_v37 = vunpack.c.l.b16 %v660_v0  ;;  %v837_v40 = vrot.slane %v836_v36, 4  ;;  %v263_v41 = vshll.u32 %v11172_v33, 16  ;;  %v267_v42 = vshrl.u32 %v11172_v33, 16 }
  0x70   :  { %v847_v46 = vrot.slane %v846_v11, 4  ;;  %v259_v48 = vrot.slane %v257_v26, 5  ;;  %v273_v49 = vshll.u32 %v11179_v39, 16  ;;  %v470_v52 = vshrl.u32 %v46_v60, 16 }
  0x71   :  { %1167 = vmatmul.bf16.gmra.mxu1 %v995_v29  ;;  %v1003_v53 = vpack.c.b16 %v961_v37, %v960_v1  ;;  %v842_v55 = vsel %vm10739_vm2, %v837_v40, %v841_v31  ;;  %v265_v56 = vrot.slane %v263_v41, 5  ;;  %v269_v58 = vrot.slane %v267_v42, 4  ;;  %v128_v1 = vld [vmem:[%s15968_s0 + $0x188] sm:$0x1] }
  0x72   :  { %v852_v9 = vsel %vm10739_vm2, %v847_v46, %v851_v38  ;;  %v976_v22 = vunpack.c.l.b16 %v842_v55  ;;  %v260_v34 = vor.u32 %v259_v48, %v256_v47  ;;  %v275_v50 = vrot.slane %v273_v49, 5  ;;  %v30_v41 = vld [vmem:[%s15968_s0 + $0x48] sm:$0xf] }
  0x73   :  { %1207 = vmatmul.bf16.gmra.mxu2 %v1003_v53  ;;  %v977_v62 = vunpack.c.l.b16 %v852_v9  ;;  %v270_v63 = vor.u32 %v269_v58, %v265_v56  ;;  %v472_v2 = vrot.slane %v470_v52, 4  ;;  %v473_v3 = vshll.u32 %v46_v60, 16  ;;  %v10404_v53 = vld [vmem:[%s15967_s1 + $0x80] sm:$0xff] }
  0x74   :  { %v261_v4 = vrot.slane %v260_v34, 4  ;;  %v479_v5 = vshll.u32 %v47_v59, 16  ;;  %v483_v6 = vshrl.u32 %v47_v59, 16  ;;  %v489_v7 = vshll.u32 %v112_v61, 16  ;;  %2195 = vmatpush.bf16.msrb.mxu2 %v10404_v53 }
  0x75   :  { %v1011_v10 = vpack.c.b16 %v977_v62, %v976_v22  ;;  %v271_v12 = vrot.slane %v270_v63, 4  ;;  %v475_v13 = vrot.slane %v473_v3, 5  ;;  %v662_v54 = vshrl.u32 %v62_v16, 16 }
  0x76   :  { %v266_v57 = vsel %vm10739_vm2, %v261_v4, %v265_v56  ;;  %v481_v51 = vrot.slane %v479_v5, 5  ;;  %v485_v15 = vrot.slane %v483_v6, 4  ;;  %v491_v17 = vrot.slane %v489_v7, 5  ;;  %v48_v4 = vld [vmem:[%s15968_s0 + $0xb4] sm:$0xf] }
  0x77   :  { %1247 = vmatmul.bf16.gmra.mxu3 %v1011_v10  ;;  %v276_v19 = vsel %vm10739_vm2, %v271_v12, %v275_v50  ;;  %v928_v20 = vunpack.c.l.b16 %v266_v57  ;;  %v476_v21 = vor.u32 %v475_v13, %v472_v2  ;;  %v664_v23 = vrot.slane %v662_v54, 4  ;;  %v11243_v50 = vld [vmem:[%s15968_s0 + $0x4c] sm:$0xf]  ;;  %v11250_v2 = vld [vmem:[%s15968_s0 + $0x50] sm:$0x1]  ;;  %v10444_v54 = vld [vmem:[%s15967_s1 + $0xc0] sm:$0xff] }
  0x78   :  { %v929_v24 = vunpack.c.l.b16 %v276_v19  ;;  %v486_v27 = vor.u32 %v485_v15, %v481_v51  ;;  %v665_v28 = vshll.u32 %v62_v16, 16  ;;  %v671_v29 = vshll.u32 %v63_v8, 16  ;;  %v10388_v57 = vld [vmem:[%s15967_s1] sm:$0xff]  ;;  %2750 = vmatpush.bf16.msrb.mxu3 %v10444_v54 }
  0x79   :  { %v477_v30 = vrot.slane %v476_v21, 4  ;;  %v675_v31 = vshrl.u32 %v63_v8, 16  ;;  %v681_v32 = vshll.u32 %v120_v14, 16  ;;  %v854_v36 = vshrl.u32 %v78_v18, 16  ;;  %1510 = vmatpush.bf16.msrb.mxu1 %v10388_v57  ;;  %v32_v57 = vld [vmem:[%s15968_s0 + $0x54] sm:$0xf] }
  0x7a   :  { %v987_v38 = vpack.c.b16 %v929_v24, %v928_v20  ;;  %v487_v47 = vrot.slane %v486_v27, 4  ;;  %v667_v60 = vrot.slane %v665_v28, 5  ;;  %v673_v0 = vrot.slane %v671_v29, 5  ;;  %v49_v27 = vld [vmem:[%s15968_s0 + $0xb8] sm:$0xf] }
  0x7b   :  { %v482_v11 = vsel %vm10739_vm2, %v477_v30, %v481_v51  ;;  %v677_v26 = vrot.slane %v675_v31, 4  ;;  %v683_v37 = vrot.slane %v681_v32, 5  ;;  %v856_v40 = vrot.slane %v854_v36, 4  ;;  %v10452_v51 = vld [vmem:[%s15967_s1 + $0x100] sm:$0xff]  ;;  %v113_v28 = vld [vmem:[%s15968_s0 + $0xbc] sm:$0x1] }
  0x7c   :  { %1127 = vmatmul.bf16.gmra.mxu0 %v987_v38  ;;  %v492_v42 = vsel %vm10739_vm2, %v487_v47, %v491_v17  ;;  %v946_v43 = vunpack.c.l.b16 %v482_v11  ;;  %v668_v44 = vor.u32 %v667_v60, %v664_v23  ;;  %v857_v45 = vshll.u32 %v78_v18, 16 }
  0x7d   :  { %v947_v46 = vunpack.c.l.b16 %v492_v42  ;;  %v678_v48 = vor.u32 %v677_v26, %v673_v0  ;;  %v863_v49 = vshll.u32 %v79_v35, 16  ;;  %v867_v52 = vshrl.u32 %v79_v35, 16  ;;  %v64_v35 = vld [vmem:[%s15968_s0 + $0x12c] sm:$0xf]  ;;  %4040 = vmatpush.bf16.msrb.mxu0 %v10452_v51 }
  0x7e   :  { %v669_v55 = vrot.slane %v668_v44, 4  ;;  %v859_v56 = vrot.slane %v857_v45, 5  ;;  %v873_v58 = vshll.u32 %v128_v1, 16  ;;  %v278_v59 = vshrl.u32 %v30_v41, 16 }
  0x7f   :  { %v996_v61 = vpack.c.b16 %v947_v46, %v946_v43  ;;  %v679_v9 = vrot.slane %v678_v48, 4  ;;  %v865_v22 = vrot.slane %v863_v49, 5  ;;  %v869_v34 = vrot.slane %v867_v52, 4  ;;  %v121_v43 = vld [vmem:[%s15968_s0 + $0x134] sm:$0x1] }
  0x80   :  { %v674_v16 = vsel %vm10739_vm2, %v669_v55, %v673_v0  ;;  %v860_v62 = vor.u32 %v859_v56, %v856_v40  ;;  %v875_v63 = vrot.slane %v873_v58, 5  ;;  %v280_v3 = vrot.slane %v278_v59, 4  ;;  %v80_v52 = vld [vmem:[%s15968_s0 + $0x18c] sm:$0xf] }
  0x81   :  { %1172 = vmatmul.bf16.gmra.mxu1 %v996_v61  ;;  %v684_v5 = vsel %vm10739_vm2, %v679_v9, %v683_v37  ;;  %v962_v6 = vunpack.c.l.b16 %v674_v16  ;;  %v870_v7 = vor.u32 %v869_v34, %v865_v22  ;;  %v281_v8 = vshll.u32 %v30_v41, 16  ;;  %v65_v37 = vld [vmem:[%s15968_s0 + $0x130] sm:$0xf] }
  0x82   :  { %v963_v10 = vunpack.c.l.b16 %v684_v5  ;;  %v861_v12 = vrot.slane %v860_v62, 4  ;;  %v287_v13 = vshll.u32 %v11243_v50, 16  ;;  %v291_v14 = vshrl.u32 %v11243_v50, 16 }
  0x83   :  { %v871_v15 = vrot.slane %v870_v7, 4  ;;  %v283_v17 = vrot.slane %v281_v8, 5  ;;  %v297_v18 = vshll.u32 %v11250_v2, 16  ;;  %v494_v19 = vshrl.u32 %v48_v4, 16  ;;  %v129_v8 = vld [vmem:[%s15968_s0 + $0x194] sm:$0x1] }
  0x84   :  { %v1004_v20 = vpack.c.b16 %v963_v10, %v962_v6  ;;  %v866_v21 = vsel %vm10739_vm2, %v861_v12, %v865_v22  ;;  %v289_v23 = vrot.slane %v287_v13, 5  ;;  %v293_v24 = vrot.slane %v291_v14, 4  ;;  %v10507_v10 = vld [vmem:[%s15967_s1 + $0x1b8] sm:$0xff] }
  0x85   :  { %v876_v29 = vsel %vm10739_vm2, %v871_v15, %v875_v63  ;;  %v978_v30 = vunpack.c.l.b16 %v866_v21  ;;  %v284_v31 = vor.u32 %v283_v17, %v280_v3  ;;  %v299_v32 = vrot.slane %v297_v18, 5  ;;  %v81_v63 = vld [vmem:[%s15968_s0 + $0x190] sm:$0xf]  ;;  %5366 = vmatpush.bf16.msra.mxu2 %v10507_v10 }
  0x86   :  { %1212 = vmatmul.bf16.gmra.mxu2 %v1004_v20  ;;  %v979_v36 = vunpack.c.l.b16 %v876_v29  ;;  %v294_v38 = vor.u32 %v293_v24, %v289_v23  ;;  %v496_v47 = vrot.slane %v494_v19, 4  ;;  %v497_v60 = vshll.u32 %v48_v4, 16  ;;  %v11314_v29 = vld [vmem:[%s15968_s0 + $0x58] sm:$0xf] }
  0x87   :  { %v285_v0 = vrot.slane %v284_v31, 4  ;;  %v503_v1 = vshll.u32 %v49_v27, 16  ;;  %v507_v11 = vshrl.u32 %v49_v27, 16  ;;  %v513_v26 = vshll.u32 %v113_v28, 16 }
  0x88   :  { %v1012_v40 = vpack.c.b16 %v979_v36, %v978_v30  ;;  %v295_v41 = vrot.slane %v294_v38, 4  ;;  %v499_v42 = vrot.slane %v497_v60, 5  ;;  %v686_v44 = vshrl.u32 %v64_v35, 16  ;;  %v10515_v38 = vld [vmem:[%s15967_s1 + $0x1f8] sm:$0xff] }
  0x89   :  { %v290_v45 = vsel %vm10739_vm2, %v285_v0, %v289_v23  ;;  %v505_v46 = vrot.slane %v503_v1, 5  ;;  %v509_v48 = vrot.slane %v507_v11, 4  ;;  %v515_v49 = vrot.slane %v513_v26, 5  ;;  %v10523_v60 = vld [vmem:[%s15967_s1 + $0x238] sm:$0xff]  ;;  %6656 = vmatpush.bf16.msra.mxu3 %v10515_v38 }
  0x8a   :  { %1252 = vmatmul.bf16.gmra.mxu3 %v1012_v40  ;;  %v300_v53 = vsel %vm10739_vm2, %v295_v41, %v299_v32  ;;  %v930_v55 = vunpack.c.l.b16 %v290_v45  ;;  %v500_v56 = vor.u32 %v499_v42, %v496_v47  ;;  %v688_v58 = vrot.slane %v686_v44, 4  ;;  %v10467_v47 = vld [vmem:[%s15967_s1 + $0x178] sm:$0xff]  ;;  %7434 = vmatpush.bf16.msra.mxu0 %v10523_v60 }
  0x8b   :  { %v931_v59 = vunpack.c.l.b16 %v300_v53  ;;  %v510_v61 = vor.u32 %v509_v48, %v505_v46  ;;  %v689_v9 = vshll.u32 %v64_v35, 16  ;;  %v695_v22 = vshll.u32 %v65_v37, 16  ;;  %v11330_v26 = vld [vmem:[%s15968_s0 + $0x5c] sm:$0x1]  ;;  %4811 = vmatpush.bf16.msra.mxu1 %v10467_v47 }
  0x8c   :  { %v501_v34 = vrot.slane %v500_v56, 4  ;;  %v699_v16 = vshrl.u32 %v65_v37, 16  ;;  %v705_v62 = vshll.u32 %v121_v43, 16  ;;  %v878_v3 = vshrl.u32 %v80_v52, 16 }
  0x8d   :  { %v988_v4 = vpack.c.b16 %v931_v59, %v930_v55  ;;  %v511_v5 = vrot.slane %v510_v61, 4  ;;  %v691_v6 = vrot.slane %v689_v9, 5  ;;  %v697_v7 = vrot.slane %v695_v22, 5  ;;  %v1672_v55 = vld [vmem:[%s15968_s0] sm:$0xe] }
  0x8e   :  { %v506_v12 = vsel %vm10739_vm2, %v501_v34, %v505_v46  ;;  %v701_v13 = vrot.slane %v699_v16, 4  ;;  %v707_v14 = vrot.slane %v705_v62, 5  ;;  %v880_v54 = vrot.slane %v878_v3, 4  ;;  %v9444_v9 = vld [vmem:[%s15968_s0 + $0xc] sm:$0xf] }
  0x8f   :  { %1132 = vmatmul.bf16.gmra.mxu0 %v988_v4  ;;  %v516_v51 = vsel %vm10739_vm2, %v511_v5, %v515_v49  ;;  %v948_v15 = vunpack.c.l.b16 %v506_v12  ;;  %v692_v17 = vor.u32 %v691_v6, %v688_v58  ;;  %v881_v18 = vshll.u32 %v80_v52, 16  ;;  %v10552_v12 = vld [vmem:[%s15968_s0 + $0x8] sm:$0x1] }
  0x90   :  { %v949_v19 = vunpack.c.l.b16 %v516_v51  ;;  %v702_v20 = vor.u32 %v701_v13, %v697_v7  ;;  %v887_v21 = vshll.u32 %v81_v63, 16  ;;  %v891_v23 = vshrl.u32 %v81_v63, 16  ;;  %v9445_v63 = vld [vmem:[%s15968_s0 + $0x10] sm:$0xf] }
  0x91   :  { %v693_v24 = vrot.slane %v692_v17, 4  ;;  %v883_v27 = vrot.slane %v881_v18, 5  ;;  %v897_v28 = vshll.u32 %v129_v8, 16  ;;  %v302_v30 = vshrl.u32 %v32_v57, 16  ;;  %v10551_v8 = vld [vmem:[%s15968_s0 + $0x4] sm:$0xf] }
  0x92   :  { %v997_v31 = vpack.c.b16 %v949_v19, %v948_v15  ;;  %v703_v32 = vrot.slane %v702_v20, 4  ;;  %v889_v35 = vrot.slane %v887_v21, 5  ;;  %v893_v36 = vrot.slane %v891_v23, 4  ;;  %v9446_v19 = vld [vmem:[%s15968_s0 + $0x14] sm:$0x1] }
  0x93   :  { %v698_v0 = vsel %vm10739_vm2, %v693_v24, %v697_v7  ;;  %v884_v1 = vor.u32 %v883_v27, %v880_v54  ;;  %v899_v11 = vrot.slane %v897_v28, 5  ;;  %v304_v37 = vrot.slane %v302_v30, 4 }
  0x94   :  { %1177 = vmatmul.bf16.gmra.mxu1 %v997_v31  ;;  %v708_v40 = vsel %vm10739_vm2, %v703_v32, %v707_v14  ;;  %v964_v41 = vunpack.c.l.b16 %v698_v0  ;;  %v894_v42 = vor.u32 %v893_v36, %v889_v35  ;;  %v305_v43 = vshll.u32 %v32_v57, 16  ;;  %v10356_v0 = vld [vmem:[%s15968_s0] sm:$0xff] }
  0x95   :  { %v965_v44 = vunpack.c.l.b16 %v708_v40  ;;  %v885_v45 = vrot.slane %v884_v1, 4  ;;  %v311_v46 = vshll.u32 %v11314_v29, 16  ;;  %v315_v48 = vshrl.u32 %v11314_v29, 16 }
  0x96   :  { %v895_v49 = vrot.slane %v894_v42, 4  ;;  %v307_v52 = vrot.slane %v305_v43, 5  ;;  %v321_v53 = vshll.u32 %v11330_v26, 16  ;;  %v9124_v5 = vrot.slane %v1672_v55, 9 }
  0x97   :  { %v1005_v56 = vpack.c.b16 %v965_v44, %v964_v41  ;;  %v890_v58 = vsel %vm10739_vm2, %v885_v45, %v889_v35  ;;  %v313_v59 = vrot.slane %v311_v46, 5  ;;  %v317_v61 = vrot.slane %v315_v48, 4  ;;  %v9447_v44 = vld [vmem:[%s15968_s0 + $0x18] sm:$0xf]  ;;  %v9448_v48 = vld [vmem:[%s15968_s0 + $0x1c] sm:$0xf] }
  0x98   :  { %v900_v22 = vsel %vm10739_vm2, %v895_v49, %v899_v11  ;;  %v980_v34 = vunpack.c.l.b16 %v890_v58  ;;  %v308_v16 = vor.u32 %v307_v52, %v304_v37  ;;  %v323_v62 = vrot.slane %v321_v53, 5  ;;  %v10553_v58 = vld [vmem:[%s15968_s0 + $0x10] sm:$0xf] }
  0x99   :  { %1217 = vmatmul.bf16.gmra.mxu2 %v1005_v56  ;;  %v981_v3 = vunpack.c.l.b16 %v900_v22  ;;  %v318_v4 = vor.u32 %v317_v61, %v313_v59  ;;  %v1773_v10 = vrot.slane %v10551_v8, 5  ;;  %v1776_v13 = vrot.slane %v10552_v12, 5  ;;  %v1673_v56 = vld [vmem:[%s15968_s0 + $0xc] sm:$0xe] }
  0x9a   :  { %v309_v6 = vrot.slane %v308_v16, 4  ;;  %v3073_v14 = vshrl.u32 %v9444_v9, 16  ;;  %v3076_v51 = vshll.u32 %v9444_v9, 16  ;;  %v3082_v15 = vshll.u32 %v9445_v63, 16 }
  0x9b   :  { %v1013_v54 = vpack.c.b16 %v981_v3, %v980_v34  ;;  %v319_v57 = vrot.slane %v318_v4, 4  ;;  %v1775_v18 = vrot.slane %v1773_v10, 4  ;;  %v1774_v27 = vsel %vm11351_vm5, %v9124_v5, %v1773_v10  ;;  %v10554_v4 = vld [vmem:[%s15968_s0 + $0x14] sm:$0x1] }
  0x9c   :  { %v314_v17 = vsel %vm10739_vm2, %v309_v6, %v313_v59  ;;  %v3075_v20 = vrot.slane %v3073_v14, 4  ;;  %v3078_v28 = vrot.slane %v3076_v51, 5  ;;  %v3084_v35 = vrot.slane %v3082_v15, 5  ;;  %v9449_v51 = vld [vmem:[%s15968_s0 + $0x20] sm:$0x1] }
  0x9d   :  { %1257 = vmatmul.bf16.gmra.mxu3 %v1013_v54  ;;  %v324_v21 = vsel %vm10739_vm2, %v319_v57, %v323_v62  ;;  %v932_v23 = vunpack.c.l.b16 %v314_v17  ;;  %v1777_v32 = vsel %vm11351_vm5, %v1775_v18, %v1776_v13  ;;  %v3086_v36 = vshrl.u32 %v9445_v63, 16  ;;  %v10412_v62 = vld [vmem:[%s15968_s0 + $0xc] sm:$0xff] }
  0x9e   :  { %v11368_v24 = vpop.f32.mrf.mxu1  ;;  %v933_v30 = vunpack.c.l.b16 %v324_v21  ;;  %v3079_v38 = vor.u32 %v3078_v28, %v3075_v20  ;;  %v3092_v47 = vshll.u32 %v9446_v19, 16  ;;  %v2012_v11 = vunpack.c.l.b16 %v1774_v27  ;;  %v10357_v28 = vld [vmem:[%s15968_s0 + $0xc] sm:$0xff] }
  0x9f   :  { %v3088_v1 = vrot.slane %v3086_v36, 4  ;;  %v2013_v37 = vunpack.c.l.b16 %v1777_v32  ;;  %v1780_v59 = vrot.slane %v10553_v58, 5  ;;  %v3097_v61 = vshrl.u32 %v9447_v44, 16  ;;  %v9450_v36 = vld [vmem:[%s15968_s0 + $0x24] sm:$0xf] }
  0xa0   :  { %v11372_v31 = vpop.f32.mrf.mxu0  ;;  %v989_v60 = vpack.c.b16 %v933_v30, %v932_v23  ;;  %v3080_v40 = vrot.slane %v3079_v38, 4  ;;  %v3094_v42 = vrot.slane %v3092_v47, 5  ;;  %v3100_v9 = vshll.u32 %v9447_v44, 16 }
  0xa1   :  { %v3089_v41 = vor.u32 %v3088_v1, %v3084_v35  ;;  %v2076_v49 = vpack.c.b16 %v2013_v37, %v2012_v11  ;;  %v3106_v34 = vshll.u32 %v9448_v48, 16  ;;  %v3110_v16 = vshrl.u32 %v9448_v48, 16 }
  0xa2   :  { %1137 = vmatmul.bf16.gmra.mxu0 %v989_v60  ;;  %v3085_v53 = vsel %vm10739_vm2, %v3080_v40, %v3084_v35  ;;  %v9125_v3 = vrot.slane %v1673_v56, 9  ;;  %v1783_v5 = vrot.slane %v10554_v4, 5  ;;  %v1782_v8 = vrot.slane %v1780_v59, 4  ;;  %v1674_v40 = vld [vmem:[%s15968_s0 + $0x18] sm:$0xe] }
  0xa3   :  { %v3090_v45 = vrot.slane %v3089_v41, 4  ;;  %v3857_v63 = vunpack.c.l.b16 %v3085_v53  ;;  %v3099_v10 = vrot.slane %v3097_v61, 4  ;;  %v3102_v12 = vrot.slane %v3100_v9, 5  ;;  %v10555_v41 = vld [vmem:[%s15968_s0 + $0x1c] sm:$0xf] }
  0xa4   :  { %v11379_v43 = vpop.f32.mrf.mxu2  ;;  %1511 = vmatmul.bf16.vlgmr.msrb.gmra.mxu1 %v10356_v0  ;;  %v3108_v14 = vrot.slane %v3106_v34, 5  ;;  %v3112_v54 = vrot.slane %v3110_v16, 4  ;;  %v1781_v19 = vsel %vm11351_vm5, %v9125_v3, %v1780_v59  ;;  %v1784_v20 = vsel %vm11351_vm5, %v1782_v8, %v1783_v5  ;;  %v9451_v0 = vld [vmem:[%s15968_s0 + $0x28] sm:$0xf]  ;;  %v10413_v61 = vld [vmem:[%s15968_s0 + $0x18] sm:$0xff] }
  0xa5   :  { %v11384_v46 = vpop.f32.mrf.mxu3  ;;  %v3095_v22 = vsel %vm10739_vm2, %v3090_v45, %v3094_v42  ;;  %v3103_v21 = vor.u32 %v3102_v12, %v3099_v10  ;;  %v3116_v27 = vshll.u32 %v9449_v51, 16  ;;  %v2014_v30 = vunpack.c.l.b16 %v1781_v19  ;;  %v10556_v34 = vld [vmem:[%s15968_s0 + $0x20] sm:$0x1]  ;;  %v9452_v8 = vld [vmem:[%s15968_s0 + $0x2c] sm:$0x1] }
  0xa6   :  { %15976 = vst [vmem:[#allocation2_spill] sm:$0xff] %v11384_v46  ;;  %v11389_v52 = vpop.f32.mrf.mxu1  ;;  %v3858_v6 = vunpack.c.l.b16 %v3095_v22  ;;  %v3113_v23 = vor.u32 %v3112_v54, %v3108_v14  ;;  %v2015_v32 = vunpack.c.l.b16 %v1784_v20  ;;  %v1787_v42 = vrot.slane %v10555_v41, 5 }
  0xa7   :  { %v3104_v35 = vrot.slane %v3103_v21, 4  ;;  %v3118_v47 = vrot.slane %v3116_v27, 5  ;;  %v3121_v44 = vshrl.u32 %v9450_v36, 16  ;;  %v3130_v53 = vshll.u32 %v9451_v0, 16 }
  0xa8   :  { %v11393_v55 = vpop.f32.mrf.mxu0  ;;  %v3921_v17 = vpack.c.b16 %v3858_v6, %v3857_v63  ;;  %v3114_v38 = vrot.slane %v3113_v23, 4  ;;  %v2077_v11 = vpack.c.b16 %v2015_v32, %v2014_v30  ;;  %v3134_v56 = vshrl.u32 %v9451_v0, 16  ;;  %v10358_v23 = vld [vmem:[%s15968_s0 + $0x18] sm:$0xff]  ;;  %v9454_v0 = vld [vmem:[%s15968_s0 + $0x34] sm:$0xf] }
  0xa9   :  { %2196 = vmatmul.bf16.vlgmr.msrb.gmra.mxu2 %v2076_v49  ;;  %v3109_v45 = vsel %vm10739_vm2, %v3104_v35, %v3108_v14  ;;  %v3124_v49 = vshll.u32 %v9450_v36, 16  ;;  %v9126_v59 = vrot.slane %v1674_v40, 9  ;;  %v1789_v22 = vrot.slane %v1787_v42, 4 }
  0xaa   :  { %v3119_v58 = vsel %vm10739_vm2, %v3114_v38, %v3118_v47  ;;  %v3859_v9 = vunpack.c.l.b16 %v3109_v45  ;;  %v1790_v16 = vrot.slane %v10556_v34, 5  ;;  %v3132_v4 = vrot.slane %v3130_v53, 5  ;;  %v9453_v47 = vld [vmem:[%s15968_s0 + $0x30] sm:$0xf] }
  0xab   :  { %v3860_v63 = vunpack.c.l.b16 %v3119_v58  ;;  %v3126_v3 = vrot.slane %v3124_v49, 5  ;;  %v3136_v5 = vrot.slane %v3134_v56, 4  ;;  %v1788_v14 = vsel %vm11351_vm5, %v9126_v59, %v1787_v42  ;;  %v1675_v49 = vld [vmem:[%s15968_s0 + $0x24] sm:$0xe] }
  0xac   :  { %v11409_v13 = vpop.f32.mrf.mxu2  ;;  %v1791_v54 = vsel %vm11351_vm5, %v1789_v22, %v1790_v16  ;;  %v3140_v20 = vshll.u32 %v9452_v8, 16  ;;  %v2016_v27 = vunpack.c.l.b16 %v1788_v14  ;;  %v3145_v53 = vshrl.u32 %v9453_v47, 16 }
  0xad   :  { %15977 = vst [vmem:[#allocation3_spill] sm:$0xff] %v11409_v13  ;;  %v11411_v57 = vpop.f32.mrf.mxu3  ;;  %2751 = vmatmul.bf16.vlgmr.msrb.gmra.mxu3 %v10412_v62  ;;  %v3123_v62 = vrot.slane %v3121_v44, 4  ;;  %v3922_v51 = vpack.c.b16 %v3860_v63, %v3859_v9  ;;  %v3137_v19 = vor.u32 %v3136_v5, %v3132_v4  ;;  %v10557_v44 = vld [vmem:[%s15968_s0 + $0x28] sm:$0xf]  ;;  %v3148_v56 = vshll.u32 %v9453_v47, 16 }
  0xae   :  { %15978 = vst [vmem:[#allocation4_spill] sm:$0xff] %v11411_v57  ;;  %v11416_v15 = vpop.f32.mrf.mxu1  ;;  %v3142_v35 = vrot.slane %v3140_v20, 5  ;;  %v1794_v45 = vrot.slane %v10557_v44, 5  ;;  %v3154_v58 = vshll.u32 %v9454_v0, 16  ;;  %v3158_v59 = vshrl.u32 %v9454_v0, 16  ;;  %v10506_v20 = vld [vmem:[%s15967_s1 + $0x1b0] sm:$0xff] }
  0xaf   :  { %v3138_v32 = vrot.slane %v3137_v19, 4  ;;  %v9127_v16 = vrot.slane %v1675_v49, 9  ;;  %v10558_v63 = vld [vmem:[%s15968_s0 + $0x2c] sm:$0x1]  ;;  %v3147_v5 = vrot.slane %v3145_v53, 4  ;;  %v3150_v8 = vrot.slane %v3148_v56, 5  ;;  %5367 = vmatpush.bf16.msra.mxu2 %v10506_v20 }
  0xb0   :  { %v11418_v18 = vpop.f32.mrf.mxu0  ;;  %v3156_v14 = vrot.slane %v3154_v58, 5  ;;  %v10359_v47 = vld [vmem:[%s15968_s0 + $0x24] sm:$0xff]  ;;  %v10466_v44 = vld [vmem:[%s15967_s1 + $0x170] sm:$0xff]  ;;  %vm8684_vm7 = vsmask.f32 7938 }
  0xb1   :  { %v3143_v42 = vsel %vm10739_vm2, %v3138_v32, %v3142_v35  ;;  %4812 = vmatpush.bf16.msra.mxu1 %v10466_v44  ;;  %vm13735_vm8 = vmand %vm8683_vm6, %vm8684_vm7  ;;  %vm8039_vm9 = vsmask.f32 256  ;;  %vm8040_vm10 = vsmask.f32 4368 }
  0xb2   :  { %4041 = vmatmul.bf16.vlgmr.msrb.gmra.mxu0 %v3921_v17  ;;  %v3127_v17 = vor.u32 %v3126_v3, %v3123_v62  ;;  %v3862_v34 = vunpack.c.l.b16 %v3143_v42  ;;  %v1796_v62 = vrot.slane %v1794_v45, 4  ;;  %v1797_v3 = vrot.slane %v10558_v63, 5  ;;  %v10514_v42 = vld [vmem:[%s15967_s1 + $0x1f0] sm:$0xff]  ;;  %vm13786_vm11 = vmor %vm8039_vm9, %vm8040_vm10 }
  0xb3   :  { %6657 = vmatpush.bf16.msra.mxu3 %v10514_v42  ;;  %vm14037_vm13 = vmand %vm8690_vm12, %vm8039_vm9 }
  0xb4   :  { %v11430_v60 = vpop.f32.mrf.mxu2  ;;  %1516 = vmatmul.bf16.gmra.mxu1 %v10357_v28  ;;  %v2017_v28 = vunpack.c.l.b16 %v1791_v54  ;;  %v3128_v30 = vrot.slane %v3127_v17, 4  ;;  %v3160_v54 = vrot.slane %v3158_v59, 4  ;;  %v9455_v17 = vld [vmem:[%s15968_s0 + $0x38] sm:$0x1] }
  0xb5   :  { %15979 = vst [vmem:[#allocation5_spill] sm:$0xff] %v11430_v60  ;;  %v11435_v1 = vpop.f32.mrf.mxu3  ;;  %v3164_v35 = vshll.u32 %v9455_v17, 16 }
  0xb6   :  { %15980 = vst [vmem:[#allocation6_spill] sm:$0xff] %v11435_v1  ;;  %v11437_v37 = vpop.f32.mrf.mxu1  ;;  %v3133_v41 = vsel %vm10739_vm2, %v3128_v30, %v3132_v4  ;;  %v3151_v30 = vor.u32 %v3150_v8, %v3147_v5  ;;  %v3161_v32 = vor.u32 %v3160_v54, %v3156_v14  ;;  %v1676_v8 = vld [vmem:[%s15968_s0 + $0x30] sm:$0xe] }
  0xb7   :  { %v3861_v9 = vunpack.c.l.b16 %v3133_v41  ;;  %v9456_v41 = vld [vmem:[%s15968_s0 + $0x3c] sm:$0xf]  ;;  %v3166_v58 = vrot.slane %v3164_v35, 5 }
  0xb8   :  { %v11447_v48 = vpop.f32.mrf.mxu0  ;;  %v3152_v53 = vrot.slane %v3151_v30, 4  ;;  %v3162_v56 = vrot.slane %v3161_v32, 4  ;;  %v3172_v5 = vshll.u32 %v9456_v41, 16  ;;  %v10415_v30 = vld [vmem:[%s15968_s0 + $0x30] sm:$0xff]  ;;  %v9128_v32 = vrot.slane %v1676_v8, 9 }
  0xb9   :  { %2201 = vmatmul.bf16.gmra.mxu2 %v2077_v11  ;;  %v2078_v11 = vpack.c.b16 %v2017_v28, %v2016_v27  ;;  %v1795_v27 = vsel %vm11351_vm5, %v9127_v16, %v1794_v45  ;;  %v1798_v28 = vsel %vm11351_vm5, %v1796_v62, %v1797_v3  ;;  %v10522_v45 = vld [vmem:[%s15967_s1 + $0x230] sm:$0xff]  ;;  %v3169_v3 = vshrl.u32 %v9456_v41, 16 }
  0xba   :  { %v2018_v0 = vunpack.c.l.b16 %v1795_v27  ;;  %v10559_v62 = vld [vmem:[%s15968_s0 + $0x34] sm:$0xf]  ;;  %7435 = vmatpush.bf16.msra.mxu0 %v10522_v45  ;;  %v3157_v20 = vsel %vm10739_vm2, %v3152_v53, %v3156_v14  ;;  %v10560_v27 = vld [vmem:[%s15968_s0 + $0x38] sm:$0x1]  ;;  %v9458_v45 = vld [vmem:[%s15968_s0 + $0x44] sm:$0x1] }
  0xbb   :  { %v1801_v63 = vrot.slane %v10559_v62, 5  ;;  %v3188_v8 = vshll.u32 %v9458_v45, 16 }
  0xbc   :  { %v11457_v6 = vpop.f32.mrf.mxu2 }
  0xbd   :  { %15981 = vst [vmem:[#allocation7_spill] sm:$0xff] %v11457_v6  ;;  %v11462_v10 = vpop.f32.mrf.mxu3  ;;  %2756 = vmatmul.bf16.gmra.mxu3 %v10413_v61  ;;  %v10414_v61 = vld [vmem:[%s15968_s0 + $0x24] sm:$0xff]  ;;  %v1803_v35 = vrot.slane %v1801_v63, 4 }
  0xbe   :  { %15982 = vst [vmem:[#allocation8_spill] sm:$0xff] %v11462_v10  ;;  %v11464_v12 = vpop.f32.mrf.mxu1 }
  0xc0   :  { %v11470_v21 = vpop.f32.mrf.mxu0 }
  0xc2   :  { %4046 = vmatmul.bf16.gmra.mxu0 %v3922_v51 }
  0xc4   :  { %v11475_v36 = vpop.f32.mrf.mxu2  ;;  %1521 = vmatmul.bf16.gmra.mxu1 %v10358_v23  ;;  %v3923_v23 = vpack.c.b16 %v3862_v34, %v3861_v9 }
  0xc5   :  { %15983 = vst [vmem:[#allocation9_spill] sm:$0xff] %v11475_v36  ;;  %v11477_v38 = vpop.f32.mrf.mxu3  ;;  %v10565_v36 = vld [vmem:[%s15968_s0 + $0x7c] sm:$0xf] }
  0xc6   :  { %15984 = vst [vmem:[#allocation10_spill] sm:$0xff] %v11477_v38  ;;  %v11485_v40 = vpop.f32.mrf.mxu1 }
  0xc8   :  { %v11500_v22 = vpop.f32.mrf.mxu0 }
  0xc9   :  { %2206 = vmatmul.bf16.gmra.mxu2 %v2078_v11  ;;  %v2019_v11 = vunpack.c.l.b16 %v1798_v28  ;;  %v1804_v28 = vrot.slane %v10560_v27, 5 }
  0xcb   :  { %v2079_v34 = vpack.c.b16 %v2019_v11, %v2018_v0  ;;  %v3174_v0 = vrot.slane %v3172_v5, 5  ;;  %v3863_v11 = vunpack.c.l.b16 %v3157_v20 }
  0xcc   :  { %v11505_v4 = vpop.f32.mrf.mxu2 }
  0xcd   :  { %15985 = vst [vmem:[#allocation11_spill] sm:$0xff] %v11505_v4  ;;  %v11507_v51 = vpop.f32.mrf.mxu3  ;;  %2761 = vmatmul.bf16.gmra.mxu3 %v10414_v61  ;;  %v9457_v61 = vld [vmem:[%s15968_s0 + $0x40] sm:$0xf] }
  0xce   :  { %15986 = vst [vmem:[#allocation12_spill] sm:$0xff] %v11507_v51  ;;  %v11512_v19 = vpop.f32.mrf.mxu1  ;;  %v3178_v54 = vshll.u32 %v9457_v61, 16  ;;  %v3182_v17 = vshrl.u32 %v9457_v61, 16  ;;  %v1802_v61 = vsel %vm11351_vm5, %v9128_v32, %v1801_v63  ;;  %v9459_v63 = vld [vmem:[%s15968_s0 + $0x48] sm:$0xf] }
  0xd0   :  { %v3180_v14 = vrot.slane %v3178_v54, 5  ;;  %v3184_v42 = vrot.slane %v3182_v17, 4  ;;  %v10360_v54 = vld [vmem:[%s15968_s0 + $0x30] sm:$0xff]  ;;  %v2020_v17 = vunpack.c.l.b16 %v1802_v61 }
  0xd2   :  { %4051 = vmatmul.bf16.gmra.mxu0 %v3923_v23  ;;  %v3167_v23 = vsel %vm10739_vm2, %v3162_v56, %v3166_v58  ;;  %v3185_v5 = vor.u32 %v3184_v42, %v3180_v14 }
  0xd3   :  { %v11536_v49 = vpop.f32.mrf.mxu0  ;;  %v3864_v41 = vunpack.c.l.b16 %v3167_v23 }
  0xd4   :  { %v11538_v59 = vpop.f32.mrf.mxu2  ;;  %1526 = vmatmul.bf16.gmra.mxu1 %v10359_v47  ;;  %v3171_v47 = vrot.slane %v3169_v3, 4  ;;  %v3186_v27 = vrot.slane %v3185_v5, 4  ;;  %v1677_v5 = vld [vmem:[%s15968_s0 + $0x3c] sm:$0xe] }
  0xd5   :  { %15987 = vst [vmem:[#allocation13_spill] sm:$0xff] %v11538_v59  ;;  %v11543_v9 = vpop.f32.mrf.mxu3  ;;  %v3924_v3 = vpack.c.b16 %v3864_v41, %v3863_v11  ;;  %v3193_v11 = vshrl.u32 %v9459_v63, 16  ;;  %v3196_v41 = vshll.u32 %v9459_v63, 16 }
  0xd6   :  { %15988 = vst [vmem:[#allocation14_spill] sm:$0xff] %v11543_v9  ;;  %v11545_v16 = vpop.f32.mrf.mxu1  ;;  %v3175_v62 = vor.u32 %v3174_v0, %v3171_v47  ;;  %v1818_v9 = vrot.slane %v11250_v2, 5  ;;  %v10362_v2 = vld [vmem:[%s15968_s0 + $0x48] sm:$0xff] }
  0xd8   :  { %v3176_v23 = vrot.slane %v3175_v62, 4 }
  0xd9   :  { %2211 = vmatmul.bf16.gmra.mxu2 %v2079_v34  ;;  %v1805_v34 = vsel %vm11351_vm5, %v1803_v35, %v1804_v28  ;;  %v9460_v28 = vld [vmem:[%s15968_s0 + $0x4c] sm:$0xf] }
  0xda   :  { %v2021_v20 = vunpack.c.l.b16 %v1805_v34  ;;  %v3181_v47 = vsel %vm10739_vm2, %v3176_v23, %v3180_v14  ;;  %v3202_v42 = vshll.u32 %v9460_v28, 16  ;;  %v1808_v34 = vrot.slane %v11172_v33, 5 }
  0xdb   :  { %v11568_v53 = vpop.f32.mrf.mxu0  ;;  %v3206_v62 = vshrl.u32 %v9460_v28, 16  ;;  %v3865_v14 = vunpack.c.l.b16 %v3181_v47  ;;  %v1811_v33 = vrot.slane %v11179_v39, 5  ;;  %v9461_v28 = vld [vmem:[%s15968_s0 + $0x50] sm:$0x1] }
  0xdc   :  { %v11563_v44 = vpop.f32.mrf.mxu2  ;;  %v2080_v35 = vpack.c.b16 %v2021_v20, %v2020_v17  ;;  %v3195_v17 = vrot.slane %v3193_v11, 4  ;;  %v3198_v20 = vrot.slane %v3196_v41, 5  ;;  %v3204_v23 = vrot.slane %v3202_v42, 5 }
  0xdd   :  { %15989 = vst [vmem:[#allocation15_spill] sm:$0xff] %v11563_v44  ;;  %2766 = vmatmul.bf16.gmra.mxu3 %v10415_v30  ;;  %v11570_v56 = vpop.f32.mrf.mxu3  ;;  %v3190_v30 = vrot.slane %v3188_v8, 5  ;;  %v10416_v8 = vld [vmem:[%s15968_s0 + $0x3c] sm:$0xff]  ;;  %v3208_v63 = vrot.slane %v3206_v62, 4  ;;  %v3212_v39 = vshll.u32 %v9461_v28, 16 }
  0xde   :  { %15990 = vst [vmem:[#allocation16_spill] sm:$0xff] %v11570_v56  ;;  %v11572_v58 = vpop.f32.mrf.mxu1  ;;  %v3199_v56 = vor.u32 %v3198_v20, %v3195_v17 }
  0xdf   :  { %v3191_v61 = vsel %vm10739_vm2, %v3186_v27, %v3190_v30  ;;  %v9129_v27 = vrot.slane %v1677_v5, 9  ;;  %v1810_v30 = vrot.slane %v1808_v34, 4  ;;  %v3209_v42 = vor.u32 %v3208_v63, %v3204_v23  ;;  %v10361_v5 = vld [vmem:[%s15968_s0 + $0x3c] sm:$0xff] }
  0xe0   :  { %v3214_v20 = vrot.slane %v3212_v39, 5 }
  0xe1   :  { %v1809_v11 = vsel %vm11351_vm5, %v9129_v27, %v1808_v34  ;;  %v1812_v41 = vsel %vm11351_vm5, %v1810_v30, %v1811_v33  ;;  %v3200_v34 = vrot.slane %v3199_v56, 4  ;;  %v3210_v17 = vrot.slane %v3209_v42, 4  ;;  %v9463_v27 = vld [vmem:[%s15968_s0 + $0x58] sm:$0xf] }
  0xe2   :  { %4056 = vmatmul.bf16.gmra.mxu0 %v3924_v3  ;;  %v1815_v42 = vrot.slane %v11243_v50, 5  ;;  %v3230_v39 = vshrl.u32 %v9463_v27, 16 }
  0xe4   :  { %v11587_v32 = vpop.f32.mrf.mxu2  ;;  %1531 = vmatmul.bf16.gmra.mxu1 %v10360_v54  ;;  %v3866_v54 = vunpack.c.l.b16 %v3191_v61  ;;  %v3232_v51 = vrot.slane %v3230_v39, 4 }
  0xe5   :  { %15991 = vst [vmem:[#allocation17_spill] sm:$0xff] %v11587_v32 }
  0xe6   :  { %v11591_v0 = vpop.f32.mrf.mxu1  ;;  %v11593_v45 = vpop.f32.mrf.mxu0 }
  0xe7   :  { %v11598_v3 = vpop.f32.mrf.mxu3 }
  0xe8   :  { %15992 = vst [vmem:[#allocation18_spill] sm:$0xff] %v11598_v3 }
  0xe9   :  { %2216 = vmatmul.bf16.gmra.mxu2 %v2080_v35  ;;  %v3925_v35 = vpack.c.b16 %v3866_v54, %v3865_v14  ;;  %v2022_v14 = vunpack.c.l.b16 %v1809_v11  ;;  %v9462_v54 = vld [vmem:[%s15968_s0 + $0x54] sm:$0xf]  ;;  %v3226_v11 = vshll.u32 %v9463_v27, 16  ;;  %v1817_v27 = vrot.slane %v1815_v42, 4 }
  0xea   :  { %v3217_v30 = vshrl.u32 %v9462_v54, 16  ;;  %v3220_v33 = vshll.u32 %v9462_v54, 16 }
  0xec   :  { %v11610_v3 = vpop.f32.mrf.mxu2  ;;  %v3219_v54 = vrot.slane %v3217_v30, 4  ;;  %v9464_v30 = vld [vmem:[%s15968_s0 + $0x5c] sm:$0x1] }
  0xed   :  { %15993 = vst [vmem:[#allocation19_spill] sm:$0xff] %v11610_v3  ;;  %2771 = vmatmul.bf16.gmra.mxu3 %v10416_v8  ;;  %v2023_v8 = vunpack.c.l.b16 %v1812_v41  ;;  %v3205_v41 = vsel %vm10739_vm2, %v3200_v34, %v3204_v23  ;;  %v10417_v23 = vld [vmem:[%s15968_s0 + $0x48] sm:$0xff]  ;;  %v10564_v3 = vld [vmem:[%s15968_s0 + $0x74] sm:$0x1] }
  0xee   :  { %v11612_v47 = vpop.f32.mrf.mxu1  ;;  %v11618_v61 = vpop.f32.mrf.mxu0  ;;  %v3867_v34 = vunpack.c.l.b16 %v3205_v41  ;;  %v1839_v32 = vrot.slane %v10564_v3, 5 }
  0xef   :  { %v11620_v62 = vpop.f32.mrf.mxu3  ;;  %v2081_v63 = vpack.c.b16 %v2023_v8, %v2022_v14  ;;  %v3222_v14 = vrot.slane %v3220_v33, 5 }
  0xf0   :  { %15994 = vst [vmem:[#allocation20_spill] sm:$0xff] %v11620_v62 }
  0xf1   :  { %v3223_v33 = vor.u32 %v3222_v14, %v3219_v54 }
  0xf2   :  { %4061 = vmatmul.bf16.gmra.mxu0 %v3925_v35  ;;  %v3215_v35 = vsel %vm10739_vm2, %v3210_v17, %v3214_v20  ;;  %v3228_v20 = vrot.slane %v3226_v11, 5  ;;  %v1819_v11 = vsel %vm11351_vm5, %v1817_v27, %v1818_v9  ;;  %v9465_v9 = vld [vmem:[%s15968_s0 + $0x60] sm:$0xf] }
  0xf3   :  { %v3868_v17 = vunpack.c.l.b16 %v3215_v35  ;;  %v3224_v39 = vrot.slane %v3223_v33, 4  ;;  %v2025_v14 = vunpack.c.l.b16 %v1819_v11  ;;  %v3244_v33 = vshll.u32 %v9465_v9, 16 }
  0xf4   :  { %1536 = vmatmul.bf16.gmra.mxu1 %v10361_v5  ;;  %v1678_v5 = vld [vmem:[%s15968_s0 + $0x48] sm:$0xe]  ;;  %v3233_v35 = vor.u32 %v3232_v51, %v3228_v20  ;;  %v9466_v51 = vld [vmem:[%s15968_s0 + $0x64] sm:$0xf]  ;;  %v1822_v11 = vrot.slane %v11314_v29, 5 }
  0xf5   :  { %v9130_v50 = vrot.slane %v1678_v5, 9  ;;  %v3236_v5 = vshll.u32 %v9464_v30, 16  ;;  %v3241_v30 = vshrl.u32 %v9465_v9, 16 }
  0xf6   :  { %v11631_v28 = vpop.f32.mrf.mxu1  ;;  %v11637_v56 = vpop.f32.mrf.mxu2  ;;  %v1824_v9 = vrot.slane %v1822_v11, 4 }
  0xf7   :  { %15995 = vst [vmem:[#allocation21_spill] sm:$0xff] %v11637_v56  ;;  %v1816_v41 = vsel %vm11351_vm5, %v9130_v50, %v1815_v42  ;;  %v3229_v50 = vsel %vm10739_vm2, %v3224_v39, %v3228_v20  ;;  %v10418_v20 = vld [vmem:[%s15968_s0 + $0x54] sm:$0xff] }
  0xf8   :  { %v2024_v54 = vunpack.c.l.b16 %v1816_v41 }
  0xf9   :  { %v11643_v8 = vpop.f32.mrf.mxu0  ;;  %2221 = vmatmul.bf16.gmra.mxu2 %v2081_v63  ;;  %v3926_v63 = vpack.c.b16 %v3868_v17, %v3867_v34  ;;  %v3234_v34 = vrot.slane %v3233_v35, 4  ;;  %v3238_v17 = vrot.slane %v3236_v5, 5  ;;  %v3254_v35 = vshrl.u32 %v9466_v51, 16 }
  0xfa   :  { %v11648_v62 = vpop.f32.mrf.mxu3  ;;  %v2082_v27 = vpack.c.b16 %v2025_v14, %v2024_v54  ;;  %v3243_v14 = vrot.slane %v3241_v30, 4 }
  0xfb   :  { %15996 = vst [vmem:[#allocation22_spill] sm:$0xff] %v11648_v62  ;;  %v3239_v41 = vsel %vm10739_vm2, %v3234_v34, %v3238_v17  ;;  %v3246_v34 = vrot.slane %v3244_v33, 5  ;;  %v3256_v10 = vrot.slane %v3254_v35, 4  ;;  %v10363_v35 = vld [vmem:[%s15968_s0 + $0x54] sm:$0xff] }
  0xfc   :  { %v3870_v39 = vunpack.c.l.b16 %v3239_v41 }
  0xfd   :  { %2776 = vmatmul.bf16.gmra.mxu3 %v10417_v23  ;;  %v3247_v41 = vor.u32 %v3246_v34, %v3243_v14 }
  0xfe   :  { %v11654_v38 = vpop.f32.mrf.mxu1  ;;  %v11660_v62 = vpop.f32.mrf.mxu2 }
  0xff   :  { %15997 = vst [vmem:[#allocation23_spill] sm:$0xff] %v11660_v62  ;;  %v3248_v14 = vrot.slane %v3247_v41, 4 }
 0x101   :  { %v11665_v23 = vpop.f32.mrf.mxu0 }
 0x102   :  { %4066 = vmatmul.bf16.gmra.mxu0 %v3926_v63  ;;  %v11673_v42 = vpop.f32.mrf.mxu3  ;;  %v3250_v63 = vshll.u32 %v9466_v51, 16  ;;  %v1825_v51 = vrot.slane %v11330_v26, 5 }
 0x103   :  { %15998 = vst [vmem:[#allocation24_spill] sm:$0xff] %v11673_v42  ;;  %v1679_v42 = vld [vmem:[%s15968_s0 + $0x54] sm:$0xe] }
 0x104   :  { %1541 = vmatmul.bf16.gmra.mxu1 %v10362_v2  ;;  %v3869_v2 = vunpack.c.l.b16 %v3229_v50  ;;  %v3252_v17 = vrot.slane %v3250_v63, 5  ;;  %v9131_v29 = vrot.slane %v1679_v42, 9  ;;  %v9467_v50 = vld [vmem:[%s15968_s0 + $0x68] sm:$0x1]  ;;  %v1826_v42 = vsel %vm11351_vm5, %v1824_v9, %v1825_v51  ;;  %v9469_v9 = vld [vmem:[%s15968_s0 + $0x70] sm:$0xf] }
 0x105   :  { %v3260_v26 = vshll.u32 %v9467_v50, 16  ;;  %v10505_v63 = vld [vmem:[%s15967_s1 + $0x1a8] sm:$0xff] }
 0x106   :  { %v11680_v5 = vpop.f32.mrf.mxu1  ;;  %v3927_v1 = vpack.c.b16 %v3870_v39, %v3869_v2  ;;  %v1823_v30 = vsel %vm11351_vm5, %v9131_v29, %v1822_v11  ;;  %v3257_v33 = vor.u32 %v3256_v10, %v3252_v17  ;;  %v2027_v39 = vunpack.c.l.b16 %v1826_v42  ;;  %5368 = vmatpush.bf16.msra.mxu2 %v10505_v63  ;;  %v9468_v11 = vld [vmem:[%s15968_s0 + $0x6c] sm:$0xf] }
 0x107   :  { %v3262_v29 = vrot.slane %v3260_v26, 5  ;;  %v10513_v51 = vld [vmem:[%s15967_s1 + $0x1e8] sm:$0xff]  ;;  %v3265_v41 = vshrl.u32 %v9468_v11, 16  ;;  %v3253_v63 = vsel %vm10739_vm2, %v3248_v14, %v3252_v17  ;;  %v10419_v17 = vld [vmem:[%s15968_s0 + $0x60] sm:$0xff] }
 0x108   :  { %v3258_v34 = vrot.slane %v3257_v33, 4  ;;  %v10465_v50 = vld [vmem:[%s15967_s1 + $0x168] sm:$0xff]  ;;  %6658 = vmatpush.bf16.msra.mxu3 %v10513_v51  ;;  %v3274_v33 = vshll.u32 %v9469_v9, 16  ;;  %v3871_v14 = vunpack.c.l.b16 %v3253_v63 }
 0x109   :  { %2226 = vmatmul.bf16.gmra.mxu2 %v2082_v27  ;;  %v11688_v54 = vpop.f32.mrf.mxu2  ;;  %4813 = vmatpush.bf16.msra.mxu1 %v10465_v50  ;;  %v3267_v51 = vrot.slane %v3265_v41, 4 }
 0x10a   :  { %15999 = vst [vmem:[#allocation25_spill] sm:$0xff] %v11688_v54 }
 0x10c   :  { %v11694_v27 = vpop.f32.mrf.mxu0 }
 0x10d   :  { %2781 = vmatmul.bf16.gmra.mxu3 %v10418_v20  ;;  %v11696_v57 = vpop.f32.mrf.mxu3  ;;  %v2026_v20 = vunpack.c.l.b16 %v1823_v30  ;;  %v3268_v30 = vshll.u32 %v9468_v11, 16  ;;  %v3278_v11 = vshrl.u32 %v9469_v9, 16  ;;  %v3276_v9 = vrot.slane %v3274_v33, 5 }
 0x10e   :  { %16000 = vst [vmem:[#allocation26_spill] sm:$0xff] %v11696_v57  ;;  %v3263_v57 = vsel %vm10739_vm2, %v3258_v34, %v3262_v29 }
 0x10f   :  { %v2083_v42 = vpack.c.b16 %v2027_v39, %v2026_v20  ;;  %v1680_v20 = vld [vmem:[%s15968_s0 + $0x60] sm:$0xe]  ;;  %v10521_v39 = vld [vmem:[%s15967_s1 + $0x228] sm:$0xff]  ;;  %v3270_v50 = vrot.slane %v3268_v30, 5  ;;  %v3872_v34 = vunpack.c.l.b16 %v3263_v57  ;;  %v3280_v41 = vrot.slane %v3278_v11, 4 }
 0x110   :  { %7436 = vmatpush.bf16.msra.mxu0 %v10521_v39  ;;  %v9470_v30 = vld [vmem:[%s15968_s0 + $0x74] sm:$0x1]  ;;  %v10364_v11 = vld [vmem:[%s15968_s0 + $0x60] sm:$0xff] }
 0x111   :  { %v11708_v2 = vpop.f32.mrf.mxu1  ;;  %v11713_v10 = vpop.f32.mrf.mxu2  ;;  %v3271_v63 = vor.u32 %v3270_v50, %v3267_v51  ;;  %v3928_v57 = vpack.c.b16 %v3872_v34, %v3871_v14  ;;  %v3281_v39 = vor.u32 %v3280_v41, %v3276_v9  ;;  %v3284_v62 = vshll.u32 %v9470_v30, 16 }
 0x112   :  { %4071 = vmatmul.bf16.gmra.mxu0 %v3927_v1  ;;  %16001 = vst [vmem:[#allocation27_spill] sm:$0xff] %v11713_v10  ;;  %v10562_v10 = vld [vmem:[%s15968_s0 + $0x68] sm:$0x1] }
 0x113   :  { %v1832_v54 = vrot.slane %v10562_v10, 5  ;;  %v3282_v14 = vrot.slane %v3281_v39, 4 }
 0x114   :  { %1546 = vmatmul.bf16.gmra.mxu1 %v10363_v35  ;;  %v11724_v1 = vpop.f32.mrf.mxu0  ;;  %v10561_v35 = vld [vmem:[%s15968_s0 + $0x64] sm:$0xf] }
 0x115   :  { %v11726_v26 = vpop.f32.mrf.mxu3  ;;  %v1829_v46 = vrot.slane %v10561_v35, 5  ;;  %v9132_v35 = vrot.slane %v1680_v20, 9 }
 0x116   :  { %16002 = vst [vmem:[#allocation28_spill] sm:$0xff] %v11726_v26 }
 0x117   :  { %v1831_v26 = vrot.slane %v1829_v46, 4  ;;  %v1830_v33 = vsel %vm11351_vm5, %v9132_v35, %v1829_v46  ;;  %v3286_v46 = vrot.slane %v3284_v62, 5 }
 0x118   :  { %v2028_v50 = vunpack.c.l.b16 %v1830_v33  ;;  %v10563_v33 = vld [vmem:[%s15968_s0 + $0x70] sm:$0xf] }
 0x119   :  { %2231 = vmatmul.bf16.gmra.mxu2 %v2083_v42  ;;  %v11744_v29 = vpop.f32.mrf.mxu1  ;;  %v1833_v20 = vsel %vm11351_vm5, %v1831_v26, %v1832_v54  ;;  %v9471_v54 = vld [vmem:[%s15968_s0 + $0x78] sm:$0xf]  ;;  %v9472_v26 = vld [vmem:[%s15968_s0 + $0x7c] sm:$0xf]  ;;  %v3287_v62 = vsel %vm10739_vm2, %v3282_v14, %v3286_v46 }
 0x11a   :  { %v3289_v30 = vshrl.u32 %v9471_v54, 16  ;;  %v3302_v39 = vshrl.u32 %v9472_v26, 16 }
 0x11c   :  { %v11752_v42 = vpop.f32.mrf.mxu2  ;;  %v3291_v46 = vrot.slane %v3289_v30, 4  ;;  %v3304_v44 = vrot.slane %v3302_v39, 4 }
 0x11d   :  { %16003 = vst [vmem:[#allocation29_spill] sm:$0xff] %v11752_v42  ;;  %2786 = vmatmul.bf16.gmra.mxu3 %v10419_v17  ;;  %v3272_v42 = vrot.slane %v3271_v63, 4  ;;  %v2029_v17 = vunpack.c.l.b16 %v1833_v20  ;;  %v3292_v63 = vshll.u32 %v9471_v54, 16  ;;  %v1836_v20 = vrot.slane %v10563_v33, 5 }
 0x11f   :  { %v11758_v56 = vpop.f32.mrf.mxu0  ;;  %v3277_v35 = vsel %vm10739_vm2, %v3272_v42, %v3276_v9  ;;  %v2084_v41 = vpack.c.b16 %v2029_v17, %v2028_v50  ;;  %v10420_v50 = vld [vmem:[%s15968_s0 + $0x6c] sm:$0xff]  ;;  %v3874_v17 = vunpack.c.l.b16 %v3287_v62  ;;  %v3294_v54 = vrot.slane %v3292_v63, 5 }
 0x120   :  { %v11760_v10 = vpop.f32.mrf.mxu3  ;;  %v3873_v42 = vunpack.c.l.b16 %v3277_v35 }
 0x121   :  { %16004 = vst [vmem:[#allocation30_spill] sm:$0xff] %v11760_v10  ;;  %v1512_v51 = vpop.f32.mrf.mxu1  ;;  %v3295_v63 = vor.u32 %v3294_v54, %v3291_v46 }
 0x122   :  { %4076 = vmatmul.bf16.gmra.mxu0 %v3928_v57  ;;  %v3298_v57 = vshll.u32 %v9472_v26, 16  ;;  %v1513_v35 = vadd.f32 %v1512_v51, %v11372_v31  ;;  %v3929_v62 = vpack.c.b16 %v3874_v17, %v3873_v42  ;;  %v10365_v31 = vld [vmem:[%s15968_s0 + $0x6c] sm:$0xff]  ;;  %v9474_v51 = vld [vmem:[%s15968_s0 + $0x84] sm:$0xf] }
 0x123   :  { %v3313_v54 = vshrl.u32 %v9474_v51, 16 }
 0x124   :  { %v11771_v34 = vpop.f32.mrf.mxu2  ;;  %1551 = vmatmul.bf16.gmra.mxu1 %v10364_v11  ;;  %v1681_v11 = vld [vmem:[%s15968_s0 + $0x6c] sm:$0xe]  ;;  %v3300_v33 = vrot.slane %v3298_v57, 5 }
 0x125   :  { %16005 = vst [vmem:[#allocation31_spill] sm:$0xff] %v11771_v34  ;;  %v9133_v26 = vrot.slane %v1681_v11, 9  ;;  %v1838_v34 = vrot.slane %v1836_v20, 4 }
 0x126   :  { %v3305_v59 = vor.u32 %v3304_v44, %v3300_v33  ;;  %v3296_v44 = vrot.slane %v3295_v63, 4 }
 0x127   :  { %v11780_v10 = vpop.f32.mrf.mxu0  ;;  %v1837_v57 = vsel %vm11351_vm5, %v9133_v26, %v1836_v20  ;;  %v1840_v11 = vsel %vm11351_vm5, %v1838_v34, %v1839_v32  ;;  %v9475_v32 = vld [vmem:[%s15968_s0 + $0x88] sm:$0xf]  ;;  %v3316_v26 = vshll.u32 %v9474_v51, 16 }
 0x128   :  { %v11785_v9 = vpop.f32.mrf.mxu3  ;;  %v2031_v17 = vunpack.c.l.b16 %v1840_v11  ;;  %v3306_v34 = vrot.slane %v3305_v59, 4  ;;  %v1682_v59 = vld [vmem:[%s15968_s0 + $0x78] sm:$0xe] }
 0x129   :  { %16006 = vst [vmem:[#allocation32_spill] sm:$0xff] %v11785_v9  ;;  %2236 = vmatmul.bf16.gmra.mxu2 %v2084_v41  ;;  %v1514_v14 = vpop.f32.mrf.mxu1  ;;  %v9473_v41 = vld [vmem:[%s15968_s0 + $0x80] sm:$0x1] }
 0x12a   :  { %v3308_v3 = vshll.u32 %v9473_v41, 16  ;;  %v1515_v46 = vadd.f32 %v1514_v14, %v11393_v55  ;;  %v3301_v14 = vsel %vm10739_vm2, %v3296_v44, %v3300_v33  ;;  %v10566_v33 = vld [vmem:[%s15968_s0 + $0x80] sm:$0x1] }
 0x12b   :  { %v1846_v44 = vrot.slane %v10566_v33, 5 }
 0x12c   :  { %v2197_v9 = vpop.f32.mrf.mxu2  ;;  %v3310_v20 = vrot.slane %v3308_v3, 5  ;;  %v3315_v3 = vrot.slane %v3313_v54, 4 }
 0x12d   :  { %2791 = vmatmul.bf16.gmra.mxu3 %v10420_v50  ;;  %v2357_v30 = vadd.f32 %v2197_v9, %v1513_v35  ;;  %v2030_v50 = vunpack.c.l.b16 %v1837_v57 }
 0x12e   :  { %v3311_v63 = vsel %vm10739_vm2, %v3306_v34, %v3310_v20  ;;  %v9476_v34 = vld [vmem:[%s15968_s0 + $0x8c] sm:$0x1]  ;;  %v3875_v20 = vunpack.c.l.b16 %v3301_v14 }
 0x12f   :  { %v4042_v39 = vpop.f32.mrf.mxu0  ;;  %v2085_v11 = vpack.c.b16 %v2031_v17, %v2030_v50  ;;  %v3876_v54 = vunpack.c.l.b16 %v3311_v63 }
 0x130   :  { %v2752_v4 = vpop.f32.mrf.mxu3 }
 0x131   :  { %v2912_v9 = vadd.f32 %v2752_v4, %v2357_v30  ;;  %v1517_v42 = vpop.f32.mrf.mxu1  ;;  %v3322_v4 = vshll.u32 %v9475_v32, 16  ;;  %v3326_v30 = vshrl.u32 %v9475_v32, 16  ;;  %v9134_v32 = vrot.slane %v1682_v59, 9 }
 0x132   :  { %4081 = vmatmul.bf16.gmra.mxu0 %v3929_v62  ;;  %v1843_v62 = vrot.slane %v10565_v36, 5  ;;  %v10421_v36 = vld [vmem:[%s15968_s0 + $0x78] sm:$0xff] }
 0x133   :  { %v11811_v35 = vadd.f32 %v4042_v39, %v2912_v9  ;;  %v3318_v39 = vrot.slane %v3316_v26, 5  ;;  %v3324_v51 = vrot.slane %v3322_v4, 5  ;;  %v3328_v9 = vrot.slane %v3326_v30, 4 }
 0x134   :  { %v2199_v41 = vpop.f32.mrf.mxu2  ;;  %1556 = vmatmul.bf16.gmra.mxu1 %v10365_v31  ;;  %v1518_v26 = vadd.f32 %v1517_v42, %v11418_v18  ;;  %v10366_v18 = vld [vmem:[%s15968_s0 + $0x78] sm:$0xff] }
 0x135   :  { %16007 = vst [vmem:[#allocation33_spill] sm:$0xff] %v11811_v35  ;;  %v2358_v57 = vadd.f32 %v2199_v41, %v1515_v46  ;;  %v1845_v46 = vrot.slane %v1843_v62, 4  ;;  %v3319_v41 = vor.u32 %v3318_v39, %v3315_v3  ;;  %v3930_v35 = vpack.c.b16 %v3876_v54, %v3875_v20 }
 0x137   :  { %v4044_v55 = vpop.f32.mrf.mxu0  ;;  %v1847_v33 = vsel %vm11351_vm5, %v1845_v46, %v1846_v44  ;;  %v3320_v14 = vrot.slane %v3319_v41, 4 }
 0x138   :  { %v2754_v31 = vpop.f32.mrf.mxu3 }
 0x139   :  { %v2913_v50 = vadd.f32 %v2754_v31, %v2358_v57  ;;  %2241 = vmatmul.bf16.gmra.mxu2 %v2085_v11  ;;  %v1519_v17 = vpop.f32.mrf.mxu1  ;;  %v3329_v57 = vor.u32 %v3328_v9, %v3324_v51  ;;  %v3332_v11 = vshll.u32 %v9476_v34, 16  ;;  %v1844_v31 = vsel %vm11351_vm5, %v9134_v32, %v1843_v62  ;;  %v9477_v62 = vld [vmem:[%s15968_s0 + $0x90] sm:$0xf] }
 0x13a   :  { %v2032_v42 = vunpack.c.l.b16 %v1844_v31  ;;  %v1520_v32 = vadd.f32 %v1519_v17, %v11447_v48  ;;  %v3325_v34 = vsel %vm10739_vm2, %v3320_v14, %v3324_v51  ;;  %v3337_v54 = vshrl.u32 %v9477_v62, 16  ;;  %v1683_v17 = vld [vmem:[%s15968_s0 + $0x84] sm:$0xe] }
 0x13b   :  { %v11833_v4 = vadd.f32 %v4044_v55, %v2913_v50  ;;  %v2033_v55 = vunpack.c.l.b16 %v1847_v33  ;;  %v3330_v3 = vrot.slane %v3329_v57, 4  ;;  %v3334_v39 = vrot.slane %v3332_v11, 5  ;;  %v10422_v14 = vld [vmem:[%s15968_s0 + $0x84] sm:$0xff] }
 0x13c   :  { %v2202_v30 = vpop.f32.mrf.mxu2 }
 0x13d   :  { %16008 = vst [vmem:[#allocation34_spill] sm:$0xff] %v11833_v4  ;;  %2796 = vmatmul.bf16.gmra.mxu3 %v10421_v36  ;;  %v2359_v59 = vadd.f32 %v2202_v30, %v1518_v26  ;;  %v9478_v36 = vld [vmem:[%s15968_s0 + $0x94] sm:$0xf]  ;;  %v2086_v44 = vpack.c.b16 %v2033_v55, %v2032_v42  ;;  %v3335_v20 = vsel %vm10739_vm2, %v3330_v3, %v3334_v39  ;;  %v3340_v26 = vshll.u32 %v9477_v62, 16  ;;  %v10567_v30 = vld [vmem:[%s15968_s0 + $0x88] sm:$0xf] }
 0x13e   :  { %v3346_v41 = vshll.u32 %v9478_v36, 16  ;;  %v1850_v57 = vrot.slane %v10567_v30, 5  ;;  %v3350_v11 = vshrl.u32 %v9478_v36, 16  ;;  %v3878_v31 = vunpack.c.l.b16 %v3335_v20  ;;  %v10568_v62 = vld [vmem:[%s15968_s0 + $0x8c] sm:$0x1] }
 0x13f   :  { %v11839_v6 = vpop.f32.mrf.mxu0  ;;  %v3342_v42 = vrot.slane %v3340_v26, 5  ;;  %v9135_v3 = vrot.slane %v1683_v17, 9  ;;  %v1853_v36 = vrot.slane %v10568_v62, 5 }
 0x140   :  { %v2757_v63 = vpop.f32.mrf.mxu3  ;;  %v11870_v55 = vrot.slane %v3346_v41, 5  ;;  %v1852_v39 = vrot.slane %v1850_v57, 4 }
 0x141   :  { %v11844_v9 = vadd.f32 %v2757_v63, %v2359_v59  ;;  %v1522_v50 = vpop.f32.mrf.mxu1  ;;  %v3877_v59 = vunpack.c.l.b16 %v3325_v34  ;;  %v1851_v26 = vsel %vm11351_vm5, %v9135_v3, %v1850_v57  ;;  %v9480_v57 = vld [vmem:[%s15968_s0 + $0x9c] sm:$0xf] }
 0x142   :  { %4086 = vmatmul.bf16.gmra.mxu0 %v3930_v35  ;;  %v1854_v41 = vsel %vm11351_vm5, %v1852_v39, %v1853_v36  ;;  %v10512_v36 = vld [vmem:[%s15967_s1 + $0x1e0] sm:$0xff] }
 0x143   :  { %v3931_v20 = vpack.c.b16 %v3878_v31, %v3877_v59  ;;  %v9481_v59 = vld [vmem:[%s15968_s0 + $0xa0] sm:$0xf]  ;;  %6659 = vmatpush.bf16.msra.mxu3 %v10512_v36 }
 0x144   :  { %v2204_v46 = vpop.f32.mrf.mxu2  ;;  %1561 = vmatmul.bf16.gmra.mxu1 %v10366_v18  ;;  %v3339_v18 = vrot.slane %v3337_v54, 4 }
 0x145   :  { %v2360_v35 = vadd.f32 %v2204_v46, %v1520_v32  ;;  %v3352_v32 = vrot.slane %v3350_v11, 4  ;;  %v1523_v46 = vadd.f32 %v1522_v50, %v11470_v21  ;;  %v10504_v21 = vld [vmem:[%s15967_s1 + $0x1a0] sm:$0xff] }
 0x146   :  { %v3343_v54 = vor.u32 %v3342_v42, %v3339_v18  ;;  %v2034_v18 = vunpack.c.l.b16 %v1851_v26  ;;  %v2035_v42 = vunpack.c.l.b16 %v1854_v41  ;;  %5369 = vmatpush.bf16.msra.mxu2 %v10504_v21  ;;  %v3374_v41 = vshrl.u32 %v9481_v59, 16  ;;  %v1684_v21 = vld [vmem:[%s15968_s0 + $0x90] sm:$0xe] }
 0x147   :  { %v11860_v48 = vpop.f32.mrf.mxu0  ;;  %v3353_v30 = vor.u32 %v3352_v32, %v11870_v55  ;;  %v10464_v32 = vld [vmem:[%s15967_s1 + $0x160] sm:$0xff]  ;;  %v9136_v36 = vrot.slane %v1684_v21, 9 }
 0x148   :  { %v2759_v51 = vpop.f32.mrf.mxu3  ;;  %v3344_v3 = vrot.slane %v3343_v54, 4  ;;  %4814 = vmatpush.bf16.msra.mxu1 %v10464_v32  ;;  %v10570_v32 = vld [vmem:[%s15968_s0 + $0x98] sm:$0x1] }
 0x149   :  { %v11865_v33 = vadd.f32 %v2759_v51, %v2360_v35  ;;  %2246 = vmatmul.bf16.gmra.mxu2 %v2086_v44  ;;  %v1524_v63 = vpop.f32.mrf.mxu1  ;;  %v9479_v44 = vld [vmem:[%s15968_s0 + $0x98] sm:$0x1]  ;;  %v10367_v51 = vld [vmem:[%s15968_s0 + $0x84] sm:$0xff]  ;;  %v3354_v39 = vrot.slane %v3353_v30, 4 }
 0x14a   :  { %v3356_v11 = vshll.u32 %v9479_v44, 16  ;;  %v3361_v44 = vshrl.u32 %v9480_v57, 16 }
 0x14c   :  { %v2207_v34 = vpop.f32.mrf.mxu2  ;;  %v3358_v62 = vrot.slane %v3356_v11, 5  ;;  %v2087_v11 = vpack.c.b16 %v2035_v42, %v2034_v18  ;;  %v10520_v18 = vld [vmem:[%s15967_s1 + $0x220] sm:$0xff] }
 0x14d   :  { %2801 = vmatmul.bf16.gmra.mxu3 %v10422_v14  ;;  %v2361_v35 = vadd.f32 %v2207_v34, %v1523_v46  ;;  %v1525_v46 = vadd.f32 %v1524_v63, %v11500_v22  ;;  %v3364_v34 = vshll.u32 %v9480_v57, 16  ;;  %v3349_v22 = vsel %vm10739_vm2, %v3344_v3, %v11870_v55  ;;  %7437 = vmatpush.bf16.msra.mxu0 %v10520_v18 }
 0x14e   :  { %v1860_v55 = vrot.slane %v10570_v32, 5  ;;  %v3376_v3 = vrot.slane %v3374_v41, 4 }
 0x14f   :  { %v11884_v17 = vpop.f32.mrf.mxu0  ;;  %v3366_v57 = vrot.slane %v3364_v34, 5  ;;  %v3879_v34 = vunpack.c.l.b16 %v3349_v22 }
 0x150   :  { %v2762_v50 = vpop.f32.mrf.mxu3 }
 0x151   :  { %v11898_v31 = vadd.f32 %v2762_v50, %v2361_v35  ;;  %v1527_v14 = vpop.f32.mrf.mxu1  ;;  %v3370_v35 = vshll.u32 %v9481_v59, 16  ;;  %v3359_v50 = vsel %vm10739_vm2, %v3354_v39, %v3358_v62  ;;  %v10423_v39 = vld [vmem:[%s15968_s0 + $0x90] sm:$0xff] }
 0x152   :  { %4091 = vmatmul.bf16.gmra.mxu0 %v3931_v20  ;;  %v10569_v20 = vld [vmem:[%s15968_s0 + $0x94] sm:$0xf] }
 0x153   :  { %v1857_v54 = vrot.slane %v10569_v20, 5  ;;  %v3372_v59 = vrot.slane %v3370_v35, 5  ;;  %v3880_v35 = vunpack.c.l.b16 %v3359_v50  ;;  %v1528_v20 = vadd.f32 %v1527_v14, %v11536_v49  ;;  %v10368_v49 = vld [vmem:[%s15968_s0 + $0x90] sm:$0xff] }
 0x154   :  { %v2209_v26 = vpop.f32.mrf.mxu2  ;;  %1566 = vmatmul.bf16.gmra.mxu1 %v10367_v51  ;;  %v3363_v51 = vrot.slane %v3361_v44, 4  ;;  %v9482_v44 = vld [vmem:[%s15968_s0 + $0xa4] sm:$0x1] }
 0x155   :  { %v2362_v30 = vadd.f32 %v2209_v26, %v1525_v46  ;;  %v1859_v46 = vrot.slane %v1857_v54, 4  ;;  %v1858_v41 = vsel %vm11351_vm5, %v9136_v36, %v1857_v54  ;;  %v3932_v60 = vpack.c.b16 %v3880_v35, %v3879_v34 }
 0x156   :  { %v3367_v21 = vor.u32 %v3366_v57, %v3363_v51  ;;  %v2036_v18 = vunpack.c.l.b16 %v1858_v41  ;;  %v11946_v57 = vadd.f32 %v11839_v6, %v11844_v9 }
 0x157   :  { %v11916_v63 = vpop.f32.mrf.mxu0 }
 0x158   :  { %v2764_v42 = vpop.f32.mrf.mxu3  ;;  %v3368_v14 = vrot.slane %v3367_v21, 4  ;;  %v10571_v21 = vld [vmem:[%s15968_s0 + $0xa0] sm:$0xf] }
 0x159   :  { %v11926_v26 = vadd.f32 %v2764_v42, %v2362_v30  ;;  %2251 = vmatmul.bf16.gmra.mxu2 %v2087_v11  ;;  %v1529_v62 = vpop.f32.mrf.mxu1  ;;  %v1861_v30 = vsel %vm11351_vm5, %v1859_v46, %v1860_v55  ;;  %v3377_v11 = vor.u32 %v3376_v3, %v3372_v59  ;;  %v3380_v42 = vshll.u32 %v9482_v44, 16  ;;  %v9483_v55 = vld [vmem:[%s15968_s0 + $0xa8] sm:$0xf]  ;;  %v9484_v3 = vld [vmem:[%s15968_s0 + $0xac] sm:$0xf] }
 0x15a   :  { %v2037_v22 = vunpack.c.l.b16 %v1861_v30  ;;  %v3373_v6 = vsel %vm10739_vm2, %v3368_v14, %v3372_v59  ;;  %v3385_v9 = vshrl.u32 %v9483_v55, 16  ;;  %v3388_v35 = vshll.u32 %v9483_v55, 16 }
 0x15b   :  { %v3378_v51 = vrot.slane %v3377_v11, 4  ;;  %v3382_v54 = vrot.slane %v3380_v42, 5  ;;  %v3398_v41 = vshrl.u32 %v9484_v3, 16  ;;  %v3881_v30 = vunpack.c.l.b16 %v3373_v6 }
 0x15c   :  { %v2212_v32 = vpop.f32.mrf.mxu2  ;;  %v2088_v34 = vpack.c.b16 %v2037_v22, %v2036_v18  ;;  %v11971_v42 = vadd.f32 %v11860_v48, %v11865_v33  ;;  %v10424_v22 = vld [vmem:[%s15968_s0 + $0x9c] sm:$0xff]  ;;  %v3390_v14 = vrot.slane %v3388_v35, 5 }
 0x15d   :  { %2806 = vmatmul.bf16.gmra.mxu3 %v10423_v39  ;;  %v2363_v4 = vadd.f32 %v2212_v32, %v1528_v20  ;;  %v1530_v39 = vadd.f32 %v1529_v62, %v11568_v53  ;;  %v3394_v20 = vshll.u32 %v9484_v3, 16  ;;  %v1864_v32 = vrot.slane %v10571_v21, 5  ;;  %v1685_v62 = vld [vmem:[%s15968_s0 + $0x9c] sm:$0xe]  ;;  %v10572_v3 = vld [vmem:[%s15968_s0 + $0xa4] sm:$0x1] }
 0x15e   :  { %v3400_v48 = vrot.slane %v3398_v41, 4 }
 0x15f   :  { %v11939_v13 = vpop.f32.mrf.mxu0  ;;  %v1866_v55 = vrot.slane %v1864_v32, 4 }
 0x160   :  { %v2767_v50 = vpop.f32.mrf.mxu3 }
 0x161   :  { %v11948_v36 = vadd.f32 %v2767_v50, %v2363_v4  ;;  %v1532_v46 = vpop.f32.mrf.mxu1  ;;  %v3383_v4 = vsel %vm10739_vm2, %v3378_v51, %v3382_v54  ;;  %v3396_v51 = vrot.slane %v3394_v20, 5  ;;  %v9137_v54 = vrot.slane %v1685_v62, 9  ;;  %v10369_v62 = vld [vmem:[%s15968_s0 + $0x9c] sm:$0xff] }
 0x162   :  { %4096 = vmatmul.bf16.gmra.mxu0 %v3932_v60  ;;  %v3882_v11 = vunpack.c.l.b16 %v3383_v4  ;;  %v1533_v33 = vadd.f32 %v1532_v46, %v11593_v45  ;;  %v9486_v45 = vld [vmem:[%s15968_s0 + $0xb4] sm:$0xf] }
 0x163   :  { %v3401_v20 = vor.u32 %v3400_v48, %v3396_v51  ;;  %v3412_v48 = vshll.u32 %v9486_v45, 16 }
 0x164   :  { %v2214_v44 = vpop.f32.mrf.mxu2  ;;  %1571 = vmatmul.bf16.gmra.mxu1 %v10368_v49  ;;  %v3387_v49 = vrot.slane %v3385_v9, 4  ;;  %v3933_v6 = vpack.c.b16 %v3882_v11, %v3881_v30  ;;  %v1865_v9 = vsel %vm11351_vm5, %v9137_v54, %v1864_v32  ;;  %v9487_v32 = vld [vmem:[%s15968_s0 + $0xb8] sm:$0xf] }
 0x165   :  { %v2364_v60 = vadd.f32 %v2214_v44, %v1530_v39  ;;  %v1867_v39 = vrot.slane %v10572_v3, 5  ;;  %v9485_v44 = vld [vmem:[%s15968_s0 + $0xb0] sm:$0x1]  ;;  %v3402_v54 = vrot.slane %v3401_v20, 4  ;;  %v3409_v3 = vshrl.u32 %v9486_v45, 16 }
 0x166   :  { %v3404_v21 = vshll.u32 %v9485_v44, 16  ;;  %v3422_v44 = vshrl.u32 %v9487_v32, 16  ;;  %v3414_v20 = vrot.slane %v3412_v48, 5 }
 0x167   :  { %v11964_v53 = vpop.f32.mrf.mxu0  ;;  %v1868_v35 = vsel %vm11351_vm5, %v1866_v55, %v1867_v39 }
 0x168   :  { %v2769_v59 = vpop.f32.mrf.mxu3  ;;  %v3406_v55 = vrot.slane %v3404_v21, 5  ;;  %v3424_v45 = vrot.slane %v3422_v44, 4 }
 0x169   :  { %v11973_v18 = vadd.f32 %v2769_v59, %v2364_v60  ;;  %2256 = vmatmul.bf16.gmra.mxu2 %v2088_v34  ;;  %v1534_v50 = vpop.f32.mrf.mxu1  ;;  %v3391_v60 = vor.u32 %v3390_v14, %v3387_v49  ;;  %v12002_v59 = vadd.f32 %v11884_v17, %v11898_v31  ;;  %v2039_v49 = vunpack.c.l.b16 %v1868_v35  ;;  %v10573_v17 = vld [vmem:[%s15968_s0 + $0xac] sm:$0xf] }
 0x16a   :  { %v1535_v39 = vadd.f32 %v1534_v50, %v11618_v61  ;;  %v1871_v31 = vrot.slane %v10573_v17, 5  ;;  %v3407_v61 = vsel %vm10739_vm2, %v3402_v54, %v3406_v55  ;;  %v3411_v35 = vrot.slane %v3409_v3, 4  ;;  %v10425_v54 = vld [vmem:[%s15968_s0 + $0xa8] sm:$0xff]  ;;  %v9488_v3 = vld [vmem:[%s15968_s0 + $0xbc] sm:$0x1] }
 0x16b   :  { %v3392_v14 = vrot.slane %v3391_v60, 4  ;;  %v3884_v48 = vunpack.c.l.b16 %v3407_v61 }
 0x16c   :  { %v2217_v34 = vpop.f32.mrf.mxu2  ;;  %v3415_v44 = vor.u32 %v3414_v20, %v3411_v35  ;;  %v12046_v20 = vadd.f32 %v11939_v13, %v11948_v36 }
 0x16d   :  { %2811 = vmatmul.bf16.gmra.mxu3 %v10424_v22  ;;  %v2365_v4 = vadd.f32 %v2217_v34, %v1533_v33  ;;  %v2038_v22 = vunpack.c.l.b16 %v1865_v9  ;;  %v3418_v33 = vshll.u32 %v9487_v32, 16  ;;  %v3397_v60 = vsel %vm10739_vm2, %v3392_v14, %v3396_v51 }
 0x16e   :  { %v1873_v32 = vrot.slane %v1871_v31, 4  ;;  %v12024_v51 = vadd.f32 %v11916_v63, %v11926_v26 }
 0x16f   :  { %v11989_v41 = vpop.f32.mrf.mxu0  ;;  %v2089_v9 = vpack.c.b16 %v2039_v49, %v2038_v22  ;;  %v3420_v21 = vrot.slane %v3418_v33, 5  ;;  %v10574_v22 = vld [vmem:[%s15968_s0 + $0xb0] sm:$0x1] }
 0x170   :  { %v2772_v46 = vpop.f32.mrf.mxu3  ;;  %v1874_v49 = vrot.slane %v10574_v22, 5 }
 0x171   :  { %v12004_v30 = vadd.f32 %v2772_v46, %v2365_v4  ;;  %v1537_v11 = vpop.f32.mrf.mxu1  ;;  %v3425_v17 = vor.u32 %v3424_v45, %v3420_v21 }
 0x172   :  { %4101 = vmatmul.bf16.gmra.mxu0 %v3933_v6  ;;  %v1686_v6 = vld [vmem:[%s15968_s0 + $0xa8] sm:$0xe]  ;;  %v1538_v33 = vadd.f32 %v1537_v11, %v11643_v8  ;;  %v1875_v26 = vsel %vm11351_vm5, %v1873_v32, %v1874_v49  ;;  %v3416_v11 = vrot.slane %v3415_v44, 4  ;;  %v9489_v32 = vld [vmem:[%s15968_s0 + $0xc0] sm:$0xf] }
 0x173   :  { %v10370_v8 = vld [vmem:[%s15968_s0 + $0xa8] sm:$0xff]  ;;  %v3426_v35 = vrot.slane %v3425_v17, 4  ;;  %v9490_v49 = vld [vmem:[%s15968_s0 + $0xc4] sm:$0xf]  ;;  %v3436_v44 = vshll.u32 %v9489_v32, 16 }
 0x174   :  { %v2219_v34 = vpop.f32.mrf.mxu2  ;;  %1576 = vmatmul.bf16.gmra.mxu1 %v10369_v62  ;;  %v9138_v62 = vrot.slane %v1686_v6, 9  ;;  %v3421_v13 = vsel %vm10739_vm2, %v3416_v11, %v3420_v21  ;;  %v3446_v17 = vshrl.u32 %v9490_v49, 16 }
 0x175   :  { %v2366_v4 = vadd.f32 %v2219_v34, %v1535_v39  ;;  %v3883_v39 = vunpack.c.l.b16 %v3397_v60  ;;  %v2041_v60 = vunpack.c.l.b16 %v1875_v26  ;;  %v3438_v11 = vrot.slane %v3436_v44, 5 }
 0x176   :  { %v1872_v63 = vsel %vm11351_vm5, %v9138_v62, %v1871_v31 }
 0x177   :  { %v12017_v50 = vpop.f32.mrf.mxu0  ;;  %v3934_v6 = vpack.c.b16 %v3884_v48, %v3883_v39  ;;  %v2040_v22 = vunpack.c.l.b16 %v1872_v63  ;;  %v10575_v63 = vld [vmem:[%s15968_s0 + $0xb8] sm:$0xf] }
 0x178   :  { %v2774_v46 = vpop.f32.mrf.mxu3  ;;  %v1878_v26 = vrot.slane %v10575_v63, 5 }
 0x179   :  { %v12026_v14 = vadd.f32 %v2774_v46, %v2366_v4  ;;  %2261 = vmatmul.bf16.gmra.mxu2 %v2089_v9  ;;  %v1539_v55 = vpop.f32.mrf.mxu1  ;;  %v3428_v4 = vshll.u32 %v9488_v3, 16  ;;  %v2090_v39 = vpack.c.b16 %v2041_v60, %v2040_v22  ;;  %v10426_v60 = vld [vmem:[%s15968_s0 + $0xb4] sm:$0xff] }
 0x17b   :  { %v3430_v31 = vrot.slane %v3428_v4, 5  ;;  %v3885_v4 = vunpack.c.l.b16 %v3421_v13 }
 0x17c   :  { %v2222_v34 = vpop.f32.mrf.mxu2 }
 0x17d   :  { %2816 = vmatmul.bf16.gmra.mxu3 %v10425_v54  ;;  %v2367_v9 = vadd.f32 %v2222_v34, %v1538_v33  ;;  %v1540_v54 = vadd.f32 %v1539_v55, %v11665_v23  ;;  %v3431_v36 = vsel %vm10739_vm2, %v3426_v35, %v3430_v31  ;;  %v3433_v33 = vshrl.u32 %v9489_v32, 16  ;;  %v1687_v55 = vld [vmem:[%s15968_s0 + $0xb4] sm:$0xe] }
 0x17e   :  { %v3442_v34 = vshll.u32 %v9490_v49, 16  ;;  %v9139_v31 = vrot.slane %v1687_v55, 9  ;;  %v1880_v32 = vrot.slane %v1878_v26, 4  ;;  %v10576_v49 = vld [vmem:[%s15968_s0 + $0xbc] sm:$0x1] }
 0x17f   :  { %v12039_v46 = vpop.f32.mrf.mxu0 }
 0x180   :  { %v2777_v61 = vpop.f32.mrf.mxu3  ;;  %v12078_v35 = vrot.slane %v3442_v34, 5 }
 0x181   :  { %v12048_v45 = vadd.f32 %v2777_v61, %v2367_v9  ;;  %v1542_v62 = vpop.f32.mrf.mxu1  ;;  %v3886_v9 = vunpack.c.l.b16 %v3431_v36 }
 0x182   :  { %4106 = vmatmul.bf16.gmra.mxu0 %v3934_v6  ;;  %v12071_v6 = vadd.f32 %v11964_v53, %v11973_v18  ;;  %v1881_v53 = vrot.slane %v10576_v49, 5  ;;  %v3448_v18 = vrot.slane %v3446_v17, 4 }
 0x183   :  { %v3935_v13 = vpack.c.b16 %v3886_v9, %v3885_v4  ;;  %v12108_v4 = vadd.f32 %v11989_v41, %v12004_v30  ;;  %v10463_v41 = vld [vmem:[%s15967_s1 + $0x158] sm:$0xff] }
 0x184   :  { %v2224_v3 = vpop.f32.mrf.mxu2  ;;  %1581 = vmatmul.bf16.gmra.mxu1 %v10370_v8  ;;  %v3435_v8 = vrot.slane %v3433_v33, 4  ;;  %v1879_v33 = vsel %vm11351_vm5, %v9139_v31, %v1878_v26  ;;  %v1882_v44 = vsel %vm11351_vm5, %v1880_v32, %v1881_v53  ;;  %v3449_v34 = vor.u32 %v3448_v18, %v12078_v35  ;;  %v10371_v26 = vld [vmem:[%s15968_s0 + $0xb4] sm:$0xff] }
 0x185   :  { %v2368_v48 = vadd.f32 %v2224_v3, %v1540_v54  ;;  %v1543_v54 = vadd.f32 %v1542_v62, %v11694_v27  ;;  %v9491_v3 = vld [vmem:[%s15968_s0 + $0xc8] sm:$0x1]  ;;  %v10503_v27 = vld [vmem:[%s15967_s1 + $0x198] sm:$0xff]  ;;  %v9492_v62 = vld [vmem:[%s15968_s0 + $0xe4] sm:$0xf]  ;;  %4815 = vmatpush.bf16.msra.mxu1 %v10463_v41 }
 0x186   :  { %v3452_v63 = vshll.u32 %v9491_v3, 16  ;;  %5370 = vmatpush.bf16.msra.mxu2 %v10503_v27  ;;  %v3450_v32 = vrot.slane %v3449_v34, 4  ;;  %v3457_v53 = vshrl.u32 %v9492_v62, 16  ;;  %v10511_v18 = vld [vmem:[%s15967_s1 + $0x1d8] sm:$0xff] }
 0x187   :  { %v12064_v23 = vpop.f32.mrf.mxu0  ;;  %6660 = vmatpush.bf16.msra.mxu3 %v10511_v18  ;;  %v1688_v34 = vld [vmem:[%s15968_s0 + $0xd8] sm:$0xe] }
 0x188   :  { %v2779_v21 = vpop.f32.mrf.mxu3  ;;  %v3454_v49 = vrot.slane %v3452_v63, 5  ;;  %v3459_v27 = vrot.slane %v3457_v53, 4  ;;  %v10427_v53 = vld [vmem:[%s15968_s0 + $0xc0] sm:$0xff] }
 0x189   :  { %v12073_v22 = vadd.f32 %v2779_v21, %v2368_v48  ;;  %2266 = vmatmul.bf16.gmra.mxu2 %v2090_v39  ;;  %v1544_v61 = vpop.f32.mrf.mxu1  ;;  %v3439_v48 = vor.u32 %v3438_v11, %v3435_v8  ;;  %v9493_v21 = vld [vmem:[%s15968_s0 + $0xe8] sm:$0xf]  ;;  %v2042_v8 = vunpack.c.l.b16 %v1879_v33  ;;  %v2043_v11 = vunpack.c.l.b16 %v1882_v44 }
 0x18a   :  { %v1545_v30 = vadd.f32 %v1544_v61, %v11724_v1  ;;  %v3466_v3 = vshll.u32 %v9493_v21, 16  ;;  %v3455_v61 = vsel %vm10739_vm2, %v3450_v32, %v3454_v49  ;;  %v12140_v32 = vadd.f32 %v12017_v50, %v12026_v14 }
 0x18b   :  { %v3440_v31 = vrot.slane %v3439_v48, 4  ;;  %v2091_v44 = vpack.c.b16 %v2043_v11, %v2042_v8  ;;  %v9140_v11 = vrot.slane %v1688_v34, 9 }
 0x18c   :  { %v2227_v39 = vpop.f32.mrf.mxu2 }
 0x18d   :  { %2821 = vmatmul.bf16.gmra.mxu3 %v10426_v60  ;;  %v2369_v36 = vadd.f32 %v2227_v39, %v1543_v54  ;;  %v3460_v54 = vshll.u32 %v9492_v62, 16  ;;  %v3470_v39 = vshrl.u32 %v9493_v21, 16  ;;  %v3445_v1 = vsel %vm10739_vm2, %v3440_v31, %v12078_v35  ;;  %v10519_v21 = vld [vmem:[%s15967_s1 + $0x218] sm:$0xff]  ;;  %v10578_v35 = vld [vmem:[%s15968_s0 + $0xe0] sm:$0x1] }
 0x18e   :  { %v1888_v31 = vrot.slane %v10578_v35, 5  ;;  %7438 = vmatpush.bf16.msra.mxu0 %v10519_v21 }
 0x18f   :  { %v12092_v17 = vpop.f32.mrf.mxu0  ;;  %v3462_v62 = vrot.slane %v3460_v54, 5  ;;  %v3887_v54 = vunpack.c.l.b16 %v3445_v1 }
 0x190   :  { %v2782_v55 = vpop.f32.mrf.mxu3 }
 0x191   :  { %v12110_v9 = vadd.f32 %v2782_v55, %v2369_v36  ;;  %v1547_v60 = vpop.f32.mrf.mxu1  ;;  %v3468_v55 = vrot.slane %v3466_v3, 5  ;;  %v3888_v3 = vunpack.c.l.b16 %v3455_v61 }
 0x192   :  { %4111 = vmatmul.bf16.gmra.mxu0 %v3935_v13  ;;  %v10577_v13 = vld [vmem:[%s15968_s0 + $0xdc] sm:$0xf] }
 0x193   :  { %v1885_v48 = vrot.slane %v10577_v13, 5 }
 0x194   :  { %v2229_v36 = vpop.f32.mrf.mxu2  ;;  %1586 = vmatmul.bf16.gmra.mxu1 %v10371_v26  ;;  %v3472_v26 = vrot.slane %v3470_v39, 4  ;;  %v1548_v39 = vadd.f32 %v1547_v60, %v11758_v56  ;;  %v10372_v56 = vld [vmem:[%s15968_s0 + $0xd8] sm:$0xff] }
 0x195   :  { %v2370_v33 = vadd.f32 %v2229_v36, %v1545_v30  ;;  %v1887_v18 = vrot.slane %v1885_v48, 4  ;;  %v9494_v30 = vld [vmem:[%s15968_s0 + $0xec] sm:$0x1]  ;;  %v3463_v36 = vor.u32 %v3462_v62, %v3459_v27  ;;  %v1886_v14 = vsel %vm11351_vm5, %v9140_v11, %v1885_v48 }
 0x196   :  { %v2044_v21 = vunpack.c.l.b16 %v1886_v14  ;;  %v12162_v62 = vadd.f32 %v12039_v46, %v12048_v45  ;;  %v10579_v14 = vld [vmem:[%s15968_s0 + $0xe8] sm:$0xf] }
 0x197   :  { %v12130_v63 = vpop.f32.mrf.mxu0  ;;  %v1889_v13 = vsel %vm11351_vm5, %v1887_v18, %v1888_v31  ;;  %v3464_v60 = vrot.slane %v3463_v36, 4  ;;  %v9495_v18 = vld [vmem:[%s15968_s0 + $0xf0] sm:$0xf]  ;;  %v9496_v31 = vld [vmem:[%s15968_s0 + $0xf4] sm:$0xf] }
 0x198   :  { %v2784_v8 = vpop.f32.mrf.mxu3  ;;  %v2045_v1 = vunpack.c.l.b16 %v1889_v13  ;;  %v3484_v36 = vshll.u32 %v9495_v18, 16  ;;  %v1892_v13 = vrot.slane %v10579_v14, 5 }
 0x199   :  { %v12142_v49 = vadd.f32 %v2784_v8, %v2370_v33  ;;  %2271 = vmatmul.bf16.gmra.mxu2 %v2091_v44  ;;  %v1549_v41 = vpop.f32.mrf.mxu1  ;;  %v3473_v33 = vor.u32 %v3472_v26, %v3468_v55  ;;  %v3476_v44 = vshll.u32 %v9494_v30, 16  ;;  %v3936_v8 = vpack.c.b16 %v3888_v3, %v3887_v54 }
 0x19a   :  { %v2092_v54 = vpack.c.b16 %v2045_v1, %v2044_v21  ;;  %v3469_v46 = vsel %vm10739_vm2, %v3464_v60, %v3468_v55  ;;  %v10428_v1 = vld [vmem:[%s15968_s0 + $0xe4] sm:$0xff]  ;;  %v3486_v60 = vrot.slane %v3484_v36, 5 }
 0x19b   :  { %v3474_v27 = vrot.slane %v3473_v33, 4  ;;  %v3478_v48 = vrot.slane %v3476_v44, 5  ;;  %v3494_v33 = vshrl.u32 %v9496_v31, 16  ;;  %v3889_v44 = vunpack.c.l.b16 %v3469_v46 }
 0x19c   :  { %v2232_v50 = vpop.f32.mrf.mxu2 }
 0x19d   :  { %2826 = vmatmul.bf16.gmra.mxu3 %v10427_v53  ;;  %v2371_v34 = vadd.f32 %v2232_v50, %v1548_v39  ;;  %v1550_v53 = vadd.f32 %v1549_v41, %v11780_v10  ;;  %v3479_v45 = vsel %vm10739_vm2, %v3474_v27, %v3478_v48  ;;  %v3481_v39 = vshrl.u32 %v9495_v18, 16  ;;  %v1689_v41 = vld [vmem:[%s15968_s0 + $0xe4] sm:$0xe] }
 0x19e   :  { %v3490_v50 = vshll.u32 %v9496_v31, 16  ;;  %v9141_v48 = vrot.slane %v1689_v41, 9  ;;  %v1894_v18 = vrot.slane %v1892_v13, 4  ;;  %v10580_v31 = vld [vmem:[%s15968_s0 + $0xec] sm:$0x1]  ;;  %v10373_v41 = vld [vmem:[%s15968_s0 + $0xe4] sm:$0xff] }
 0x19f   :  { %v12155_v35 = vpop.f32.mrf.mxu0 }
 0x1a0   :  { %v2787_v61 = vpop.f32.mrf.mxu3  ;;  %v3492_v27 = vrot.slane %v3490_v50, 5 }
 0x1a1   :  { %v12164_v26 = vadd.f32 %v2787_v61, %v2371_v34  ;;  %v1552_v11 = vpop.f32.mrf.mxu1  ;;  %v3890_v34 = vunpack.c.l.b16 %v3479_v45 }
 0x1a2   :  { %4116 = vmatmul.bf16.gmra.mxu0 %v3936_v8  ;;  %v12187_v8 = vadd.f32 %v12064_v23, %v12073_v22  ;;  %v3496_v23 = vrot.slane %v3494_v33, 4  ;;  %v1553_v22 = vadd.f32 %v1552_v11, %v11368_v24  ;;  %v9498_v24 = vld [vmem:[%s15968_s0 + $0xfc] sm:$0xf] }
 0x1a3   :  { %v3937_v46 = vpack.c.b16 %v3890_v34, %v3889_v44 }
 0x1a4   :  { %v2234_v30 = vpop.f32.mrf.mxu2  ;;  %1591 = vmatmul.bf16.gmra.mxu1 %v10372_v56  ;;  %v3483_v56 = vrot.slane %v3481_v39, 4  ;;  %v1893_v39 = vsel %vm11351_vm5, %v9141_v48, %v1892_v13  ;;  %v3497_v50 = vor.u32 %v3496_v23, %v3492_v27  ;;  %v9499_v13 = vld [vmem:[%s15968_s0 + $0x100] sm:$0xf]  ;;  %v3508_v23 = vshll.u32 %v9498_v24, 16 }
 0x1a5   :  { %v2372_v3 = vadd.f32 %v2234_v30, %v1550_v53  ;;  %v1895_v53 = vrot.slane %v10580_v31, 5  ;;  %v9497_v30 = vld [vmem:[%s15968_s0 + $0xf8] sm:$0x1]  ;;  %v3505_v31 = vshrl.u32 %v9498_v24, 16 }
 0x1a6   :  { %v3500_v14 = vshll.u32 %v9497_v30, 16  ;;  %v3498_v48 = vrot.slane %v3497_v50, 4  ;;  %v3518_v30 = vshrl.u32 %v9499_v13, 16  ;;  %v3510_v50 = vrot.slane %v3508_v23, 5 }
 0x1a7   :  { %v12180_v10 = vpop.f32.mrf.mxu0  ;;  %v1896_v36 = vsel %vm11351_vm5, %v1894_v18, %v1895_v53 }
 0x1a8   :  { %v2789_v55 = vpop.f32.mrf.mxu3  ;;  %v3502_v18 = vrot.slane %v3500_v14, 5  ;;  %v3520_v24 = vrot.slane %v3518_v30, 4 }
 0x1a9   :  { %v12189_v21 = vadd.f32 %v2789_v55, %v2372_v3  ;;  %2276 = vmatmul.bf16.gmra.mxu2 %v2092_v54  ;;  %v1554_v61 = vpop.f32.mrf.mxu1  ;;  %v3487_v3 = vor.u32 %v3486_v60, %v3483_v56  ;;  %v12218_v55 = vadd.f32 %v12092_v17, %v12110_v9  ;;  %v2047_v56 = vunpack.c.l.b16 %v1896_v36  ;;  %v10581_v17 = vld [vmem:[%s15968_s0 + $0xf4] sm:$0xf] }
 0x1aa   :  { %v1555_v53 = vadd.f32 %v1554_v61, %v11389_v52  ;;  %v1899_v9 = vrot.slane %v10581_v17, 5  ;;  %v3503_v52 = vsel %vm10739_vm2, %v3498_v48, %v3502_v18  ;;  %v3507_v36 = vrot.slane %v3505_v31, 4  ;;  %v10429_v48 = vld [vmem:[%s15968_s0 + $0xf0] sm:$0xff]  ;;  %v9500_v31 = vld [vmem:[%s15968_s0 + $0x104] sm:$0x1] }
 0x1ab   :  { %v3488_v60 = vrot.slane %v3487_v3, 4  ;;  %v3892_v23 = vunpack.c.l.b16 %v3503_v52 }
 0x1ac   :  { %v2237_v54 = vpop.f32.mrf.mxu2  ;;  %v3511_v30 = vor.u32 %v3510_v50, %v3507_v36  ;;  %v12262_v50 = vadd.f32 %v12155_v35, %v12164_v26 }
 0x1ad   :  { %2831 = vmatmul.bf16.gmra.mxu3 %v10428_v1  ;;  %v2373_v45 = vadd.f32 %v2237_v54, %v1553_v22  ;;  %v2046_v1 = vunpack.c.l.b16 %v1893_v39  ;;  %v3514_v22 = vshll.u32 %v9499_v13, 16  ;;  %v3493_v3 = vsel %vm10739_vm2, %v3488_v60, %v3492_v27 }
 0x1ae   :  { %v1901_v13 = vrot.slane %v1899_v9, 4  ;;  %v12240_v27 = vadd.f32 %v12130_v63, %v12142_v49 }
 0x1af   :  { %v12205_v33 = vpop.f32.mrf.mxu0  ;;  %v2093_v39 = vpack.c.b16 %v2047_v56, %v2046_v1  ;;  %v3516_v14 = vrot.slane %v3514_v22, 5  ;;  %v10582_v1 = vld [vmem:[%s15968_s0 + $0xf8] sm:$0x1] }
 0x1b0   :  { %v2792_v11 = vpop.f32.mrf.mxu3  ;;  %v1902_v56 = vrot.slane %v10582_v1, 5 }
 0x1b1   :  { %v12220_v44 = vadd.f32 %v2792_v11, %v2373_v45  ;;  %v1557_v34 = vpop.f32.mrf.mxu1  ;;  %v3521_v17 = vor.u32 %v3520_v24, %v3516_v14 }
 0x1b2   :  { %4121 = vmatmul.bf16.gmra.mxu0 %v3937_v46  ;;  %v1690_v46 = vld [vmem:[%s15968_s0 + $0xf0] sm:$0xe]  ;;  %v1558_v22 = vadd.f32 %v1557_v34, %v11416_v15  ;;  %v1903_v49 = vsel %vm11351_vm5, %v1901_v13, %v1902_v56  ;;  %v3512_v34 = vrot.slane %v3511_v30, 4  ;;  %v9501_v13 = vld [vmem:[%s15968_s0 + $0x108] sm:$0xf] }
 0x1b3   :  { %v10374_v15 = vld [vmem:[%s15968_s0 + $0xf0] sm:$0xff]  ;;  %v3522_v36 = vrot.slane %v3521_v17, 4  ;;  %v9502_v56 = vld [vmem:[%s15968_s0 + $0x10c] sm:$0xf]  ;;  %v3532_v30 = vshll.u32 %v9501_v13, 16 }
 0x1b4   :  { %v2239_v54 = vpop.f32.mrf.mxu2  ;;  %1596 = vmatmul.bf16.gmra.mxu1 %v10373_v41  ;;  %v9142_v41 = vrot.slane %v1690_v46, 9  ;;  %v3517_v35 = vsel %vm10739_vm2, %v3512_v34, %v3516_v14  ;;  %v3542_v17 = vshrl.u32 %v9502_v56, 16 }
 0x1b5   :  { %v2374_v45 = vadd.f32 %v2239_v54, %v1555_v53  ;;  %v3891_v53 = vunpack.c.l.b16 %v3493_v3  ;;  %v2049_v3 = vunpack.c.l.b16 %v1903_v49  ;;  %v3534_v34 = vrot.slane %v3532_v30, 5 }
 0x1b6   :  { %v1900_v63 = vsel %vm11351_vm5, %v9142_v41, %v1899_v9 }
 0x1b7   :  { %v12233_v61 = vpop.f32.mrf.mxu0  ;;  %v3938_v46 = vpack.c.b16 %v3892_v23, %v3891_v53  ;;  %v2048_v1 = vunpack.c.l.b16 %v1900_v63  ;;  %v10583_v63 = vld [vmem:[%s15968_s0 + $0x100] sm:$0xf] }
 0x1b8   :  { %v2794_v11 = vpop.f32.mrf.mxu3  ;;  %v1906_v49 = vrot.slane %v10583_v63, 5 }
 0x1b9   :  { %v12242_v60 = vadd.f32 %v2794_v11, %v2374_v45  ;;  %2281 = vmatmul.bf16.gmra.mxu2 %v2093_v39  ;;  %v1559_v18 = vpop.f32.mrf.mxu1  ;;  %v3524_v45 = vshll.u32 %v9500_v31, 16  ;;  %v2094_v53 = vpack.c.b16 %v2049_v3, %v2048_v1  ;;  %v10430_v3 = vld [vmem:[%s15968_s0 + $0xfc] sm:$0xff] }
 0x1bb   :  { %v3526_v9 = vrot.slane %v3524_v45, 5  ;;  %v3893_v45 = vunpack.c.l.b16 %v3517_v35 }
 0x1bc   :  { %v2242_v54 = vpop.f32.mrf.mxu2 }
 0x1bd   :  { %2836 = vmatmul.bf16.gmra.mxu3 %v10429_v48  ;;  %v2375_v39 = vadd.f32 %v2242_v54, %v1558_v22  ;;  %v1560_v48 = vadd.f32 %v1559_v18, %v11437_v37  ;;  %v3527_v26 = vsel %vm10739_vm2, %v3522_v36, %v3526_v9  ;;  %v3529_v22 = vshrl.u32 %v9501_v13, 16  ;;  %v1691_v18 = vld [vmem:[%s15968_s0 + $0xfc] sm:$0xe] }
 0x1be   :  { %v3538_v54 = vshll.u32 %v9502_v56, 16  ;;  %v9143_v9 = vrot.slane %v1691_v18, 9  ;;  %v1908_v13 = vrot.slane %v1906_v49, 4  ;;  %v10584_v56 = vld [vmem:[%s15968_s0 + $0x104] sm:$0x1] }
 0x1bf   :  { %v12255_v11 = vpop.f32.mrf.mxu0 }
 0x1c0   :  { %v2797_v52 = vpop.f32.mrf.mxu3  ;;  %v12294_v36 = vrot.slane %v3538_v54, 5 }
 0x1c1   :  { %v12264_v24 = vadd.f32 %v2797_v52, %v2375_v39  ;;  %v1562_v41 = vpop.f32.mrf.mxu1  ;;  %v3894_v39 = vunpack.c.l.b16 %v3527_v26 }
 0x1c2   :  { %4126 = vmatmul.bf16.gmra.mxu0 %v3938_v46  ;;  %v12287_v46 = vadd.f32 %v12180_v10, %v12189_v21  ;;  %v1909_v10 = vrot.slane %v10584_v56, 5  ;;  %v3544_v21 = vrot.slane %v3542_v17, 4 }
 0x1c3   :  { %v3939_v35 = vpack.c.b16 %v3894_v39, %v3893_v45  ;;  %v12324_v45 = vadd.f32 %v12205_v33, %v12220_v44  ;;  %v10462_v33 = vld [vmem:[%s15967_s1 + $0x150] sm:$0xff] }
 0x1c4   :  { %v2244_v31 = vpop.f32.mrf.mxu2  ;;  %1601 = vmatmul.bf16.gmra.mxu1 %v10374_v15  ;;  %v3531_v15 = vrot.slane %v3529_v22, 4  ;;  %v1907_v22 = vsel %vm11351_vm5, %v9143_v9, %v1906_v49  ;;  %v1910_v30 = vsel %vm11351_vm5, %v1908_v13, %v1909_v10  ;;  %v3545_v54 = vor.u32 %v3544_v21, %v12294_v36  ;;  %v10375_v49 = vld [vmem:[%s15968_s0 + $0xfc] sm:$0xff]  ;;  %v10510_v21 = vld [vmem:[%s15967_s1 + $0x1d0] sm:$0xff] }
 0x1c5   :  { %v2376_v23 = vadd.f32 %v2244_v31, %v1560_v48  ;;  %v1563_v48 = vadd.f32 %v1562_v41, %v11464_v12  ;;  %v9503_v31 = vld [vmem:[%s15968_s0 + $0x110] sm:$0x1]  ;;  %v9504_v41 = vld [vmem:[%s15968_s0 + $0x114] sm:$0xf]  ;;  %6661 = vmatpush.bf16.msra.mxu3 %v10510_v21  ;;  %4816 = vmatpush.bf16.msra.mxu1 %v10462_v33 }
 0x1c6   :  { %v3548_v63 = vshll.u32 %v9503_v31, 16  ;;  %v10502_v12 = vld [vmem:[%s15967_s1 + $0x190] sm:$0xff]  ;;  %v3546_v13 = vrot.slane %v3545_v54, 4  ;;  %v3553_v10 = vshrl.u32 %v9504_v41, 16  ;;  %v1692_v54 = vld [vmem:[%s15968_s0 + $0x108] sm:$0xe] }
 0x1c7   :  { %v12280_v37 = vpop.f32.mrf.mxu0  ;;  %5371 = vmatpush.bf16.msra.mxu2 %v10502_v12 }
 0x1c8   :  { %v2799_v14 = vpop.f32.mrf.mxu3  ;;  %v3550_v56 = vrot.slane %v3548_v63, 5  ;;  %v3555_v12 = vrot.slane %v3553_v10, 4  ;;  %v10431_v10 = vld [vmem:[%s15968_s0 + $0x108] sm:$0xff] }
 0x1c9   :  { %v12289_v1 = vadd.f32 %v2799_v14, %v2376_v23  ;;  %2286 = vmatmul.bf16.gmra.mxu2 %v2094_v53  ;;  %v1564_v52 = vpop.f32.mrf.mxu1  ;;  %v3535_v23 = vor.u32 %v3534_v34, %v3531_v15  ;;  %v9505_v14 = vld [vmem:[%s15968_s0 + $0x118] sm:$0xf]  ;;  %v2050_v15 = vunpack.c.l.b16 %v1907_v22  ;;  %v2051_v34 = vunpack.c.l.b16 %v1910_v30 }
 0x1ca   :  { %v1565_v44 = vadd.f32 %v1564_v52, %v11485_v40  ;;  %v3562_v31 = vshll.u32 %v9505_v14, 16  ;;  %v3551_v52 = vsel %vm10739_vm2, %v3546_v13, %v3550_v56  ;;  %v12356_v13 = vadd.f32 %v12233_v61, %v12242_v60 }
 0x1cb   :  { %v3536_v9 = vrot.slane %v3535_v23, 4  ;;  %v2095_v30 = vpack.c.b16 %v2051_v34, %v2050_v15  ;;  %v9144_v34 = vrot.slane %v1692_v54, 9 }
 0x1cc   :  { %v2247_v53 = vpop.f32.mrf.mxu2 }
 0x1cd   :  { %2841 = vmatmul.bf16.gmra.mxu3 %v10430_v3  ;;  %v2377_v26 = vadd.f32 %v2247_v53, %v1563_v48  ;;  %v3556_v48 = vshll.u32 %v9504_v41, 16  ;;  %v3566_v53 = vshrl.u32 %v9505_v14, 16  ;;  %v3541_v40 = vsel %vm10739_vm2, %v3536_v9, %v12294_v36  ;;  %v10518_v14 = vld [vmem:[%s15967_s1 + $0x210] sm:$0xff] }
 0x1ce   :  { %v10586_v36 = vld [vmem:[%s15968_s0 + $0x110] sm:$0x1]  ;;  %7439 = vmatpush.bf16.msra.mxu0 %v10518_v14 }
 0x1cf   :  { %v12308_v17 = vpop.f32.mrf.mxu0  ;;  %v3558_v41 = vrot.slane %v3556_v48, 5  ;;  %v1916_v9 = vrot.slane %v10586_v36, 5  ;;  %v3895_v48 = vunpack.c.l.b16 %v3541_v40 }
 0x1d0   :  { %v2802_v18 = vpop.f32.mrf.mxu3 }
 0x1d1   :  { %v12326_v39 = vadd.f32 %v2802_v18, %v2377_v26  ;;  %v1567_v3 = vpop.f32.mrf.mxu1  ;;  %v3564_v18 = vrot.slane %v3562_v31, 5  ;;  %v3896_v31 = vunpack.c.l.b16 %v3551_v52 }
 0x1d2   :  { %4131 = vmatmul.bf16.gmra.mxu0 %v3939_v35  ;;  %v10585_v35 = vld [vmem:[%s15968_s0 + $0x10c] sm:$0xf] }
 0x1d3   :  { %v1913_v23 = vrot.slane %v10585_v35, 5 }
 0x1d4   :  { %v2249_v26 = vpop.f32.mrf.mxu2  ;;  %1606 = vmatmul.bf16.gmra.mxu1 %v10375_v49  ;;  %v3568_v49 = vrot.slane %v3566_v53, 4  ;;  %v1568_v53 = vadd.f32 %v1567_v3, %v11512_v19  ;;  %v10376_v19 = vld [vmem:[%s15968_s0 + $0x108] sm:$0xff] }
 0x1d5   :  { %v2378_v22 = vadd.f32 %v2249_v26, %v1565_v44  ;;  %v1915_v21 = vrot.slane %v1913_v23, 4  ;;  %v9506_v44 = vld [vmem:[%s15968_s0 + $0x11c] sm:$0x1]  ;;  %v3559_v26 = vor.u32 %v3558_v41, %v3555_v12  ;;  %v1914_v60 = vsel %vm11351_vm5, %v9144_v34, %v1913_v23 }
 0x1d6   :  { %v2052_v14 = vunpack.c.l.b16 %v1914_v60  ;;  %v12378_v41 = vadd.f32 %v12255_v11, %v12264_v24  ;;  %v10587_v60 = vld [vmem:[%s15968_s0 + $0x118] sm:$0xf] }
 0x1d7   :  { %v12346_v63 = vpop.f32.mrf.mxu0  ;;  %v1917_v35 = vsel %vm11351_vm5, %v1915_v21, %v1916_v9  ;;  %v3560_v3 = vrot.slane %v3559_v26, 4  ;;  %v9507_v21 = vld [vmem:[%s15968_s0 + $0x120] sm:$0xf]  ;;  %v9508_v9 = vld [vmem:[%s15968_s0 + $0x124] sm:$0xf] }
 0x1d8   :  { %v2804_v15 = vpop.f32.mrf.mxu3  ;;  %v2053_v40 = vunpack.c.l.b16 %v1917_v35  ;;  %v3580_v26 = vshll.u32 %v9507_v21, 16  ;;  %v1920_v35 = vrot.slane %v10587_v60, 5 }
 0x1d9   :  { %v12358_v56 = vadd.f32 %v2804_v15, %v2378_v22  ;;  %2291 = vmatmul.bf16.gmra.mxu2 %v2095_v30  ;;  %v1569_v33 = vpop.f32.mrf.mxu1  ;;  %v3569_v22 = vor.u32 %v3568_v49, %v3564_v18  ;;  %v3572_v30 = vshll.u32 %v9506_v44, 16  ;;  %v3940_v15 = vpack.c.b16 %v3896_v31, %v3895_v48 }
 0x1da   :  { %v2096_v48 = vpack.c.b16 %v2053_v40, %v2052_v14  ;;  %v3565_v11 = vsel %vm10739_vm2, %v3560_v3, %v3564_v18  ;;  %v10432_v40 = vld [vmem:[%s15968_s0 + $0x114] sm:$0xff]  ;;  %v3582_v3 = vrot.slane %v3580_v26, 5 }
 0x1db   :  { %v3570_v12 = vrot.slane %v3569_v22, 4  ;;  %v3574_v23 = vrot.slane %v3572_v30, 5  ;;  %v3590_v22 = vshrl.u32 %v9508_v9, 16  ;;  %v3897_v30 = vunpack.c.l.b16 %v3565_v11 }
 0x1dc   :  { %v2252_v61 = vpop.f32.mrf.mxu2 }
 0x1dd   :  { %2846 = vmatmul.bf16.gmra.mxu3 %v10431_v10  ;;  %v2379_v54 = vadd.f32 %v2252_v61, %v1568_v53  ;;  %v1570_v10 = vadd.f32 %v1569_v33, %v11545_v16  ;;  %v3575_v24 = vsel %vm10739_vm2, %v3570_v12, %v3574_v23  ;;  %v3577_v53 = vshrl.u32 %v9507_v21, 16  ;;  %v1693_v33 = vld [vmem:[%s15968_s0 + $0x114] sm:$0xe] }
 0x1de   :  { %v3586_v61 = vshll.u32 %v9508_v9, 16  ;;  %v9145_v23 = vrot.slane %v1693_v33, 9  ;;  %v1922_v21 = vrot.slane %v1920_v35, 4  ;;  %v10588_v9 = vld [vmem:[%s15968_s0 + $0x11c] sm:$0x1]  ;;  %v10377_v33 = vld [vmem:[%s15968_s0 + $0x114] sm:$0xff] }
 0x1df   :  { %v12371_v36 = vpop.f32.mrf.mxu0 }
 0x1e0   :  { %v2807_v52 = vpop.f32.mrf.mxu3  ;;  %v3588_v12 = vrot.slane %v3586_v61, 5 }
 0x1e1   :  { %v12380_v49 = vadd.f32 %v2807_v52, %v2379_v54  ;;  %v1572_v34 = vpop.f32.mrf.mxu1  ;;  %v3898_v54 = vunpack.c.l.b16 %v3575_v24 }
 0x1e2   :  { %4136 = vmatmul.bf16.gmra.mxu0 %v3940_v15  ;;  %v12403_v15 = vadd.f32 %v12280_v37, %v12289_v1  ;;  %v3592_v37 = vrot.slane %v3590_v22, 4  ;;  %v1573_v1 = vadd.f32 %v1572_v34, %v11572_v58  ;;  %v9510_v58 = vld [vmem:[%s15968_s0 + $0x12c] sm:$0xf] }
 0x1e3   :  { %v3941_v11 = vpack.c.b16 %v3898_v54, %v3897_v30 }
 0x1e4   :  { %v2254_v44 = vpop.f32.mrf.mxu2  ;;  %1611 = vmatmul.bf16.gmra.mxu1 %v10376_v19  ;;  %v3579_v19 = vrot.slane %v3577_v53, 4  ;;  %v1921_v53 = vsel %vm11351_vm5, %v9145_v23, %v1920_v35  ;;  %v3593_v61 = vor.u32 %v3592_v37, %v3588_v12  ;;  %v9511_v35 = vld [vmem:[%s15968_s0 + $0x130] sm:$0xf]  ;;  %v3604_v37 = vshll.u32 %v9510_v58, 16 }
 0x1e5   :  { %v2380_v31 = vadd.f32 %v2254_v44, %v1570_v10  ;;  %v1923_v10 = vrot.slane %v10588_v9, 5  ;;  %v9509_v44 = vld [vmem:[%s15968_s0 + $0x128] sm:$0x1]  ;;  %v3601_v9 = vshrl.u32 %v9510_v58, 16 }
 0x1e6   :  { %v3596_v60 = vshll.u32 %v9509_v44, 16  ;;  %v3594_v23 = vrot.slane %v3593_v61, 4  ;;  %v3614_v44 = vshrl.u32 %v9511_v35, 16  ;;  %v3606_v61 = vrot.slane %v3604_v37, 5 }
 0x1e7   :  { %v12396_v16 = vpop.f32.mrf.mxu0  ;;  %v1924_v26 = vsel %vm11351_vm5, %v1922_v21, %v1923_v10 }
 0x1e8   :  { %v2809_v18 = vpop.f32.mrf.mxu3  ;;  %v3598_v21 = vrot.slane %v3596_v60, 5  ;;  %v3616_v58 = vrot.slane %v3614_v44, 4 }
 0x1e9   :  { %v12405_v14 = vadd.f32 %v2809_v18, %v2380_v31  ;;  %2296 = vmatmul.bf16.gmra.mxu2 %v2096_v48  ;;  %v1574_v52 = vpop.f32.mrf.mxu1  ;;  %v3583_v31 = vor.u32 %v3582_v3, %v3579_v19  ;;  %v12434_v18 = vadd.f32 %v12308_v17, %v12326_v39  ;;  %v2055_v19 = vunpack.c.l.b16 %v1924_v26  ;;  %v10589_v17 = vld [vmem:[%s15968_s0 + $0x124] sm:$0xf] }
 0x1ea   :  { %v1575_v10 = vadd.f32 %v1574_v52, %v11591_v0  ;;  %v1927_v39 = vrot.slane %v10589_v17, 5  ;;  %v3599_v0 = vsel %vm10739_vm2, %v3594_v23, %v3598_v21  ;;  %v3603_v26 = vrot.slane %v3601_v9, 4  ;;  %v10433_v23 = vld [vmem:[%s15968_s0 + $0x120] sm:$0xff]  ;;  %v9512_v9 = vld [vmem:[%s15968_s0 + $0x134] sm:$0x1] }
 0x1eb   :  { %v3584_v3 = vrot.slane %v3583_v31, 4  ;;  %v3900_v37 = vunpack.c.l.b16 %v3599_v0 }
 0x1ec   :  { %v2257_v48 = vpop.f32.mrf.mxu2  ;;  %v3607_v44 = vor.u32 %v3606_v61, %v3603_v26  ;;  %v12478_v61 = vadd.f32 %v12371_v36, %v12380_v49 }
 0x1ed   :  { %2851 = vmatmul.bf16.gmra.mxu3 %v10432_v40  ;;  %v2381_v24 = vadd.f32 %v2257_v48, %v1573_v1  ;;  %v2054_v40 = vunpack.c.l.b16 %v1921_v53  ;;  %v3610_v1 = vshll.u32 %v9511_v35, 16  ;;  %v3589_v31 = vsel %vm10739_vm2, %v3584_v3, %v3588_v12 }
 0x1ee   :  { %v1929_v35 = vrot.slane %v1927_v39, 4  ;;  %v12456_v12 = vadd.f32 %v12346_v63, %v12358_v56 }
 0x1ef   :  { %v12421_v22 = vpop.f32.mrf.mxu0  ;;  %v2097_v53 = vpack.c.b16 %v2055_v19, %v2054_v40  ;;  %v3612_v60 = vrot.slane %v3610_v1, 5  ;;  %v10590_v40 = vld [vmem:[%s15968_s0 + $0x128] sm:$0x1] }
 0x1f0   :  { %v2812_v34 = vpop.f32.mrf.mxu3  ;;  %v1930_v19 = vrot.slane %v10590_v40, 5 }
 0x1f1   :  { %v12436_v30 = vadd.f32 %v2812_v34, %v2381_v24  ;;  %v1577_v54 = vpop.f32.mrf.mxu1  ;;  %v3617_v17 = vor.u32 %v3616_v58, %v3612_v60 }
 0x1f2   :  { %4141 = vmatmul.bf16.gmra.mxu0 %v3941_v11  ;;  %v1694_v11 = vld [vmem:[%s15968_s0 + $0x120] sm:$0xe]  ;;  %v1578_v1 = vadd.f32 %v1577_v54, %v11612_v47  ;;  %v1931_v56 = vsel %vm11351_vm5, %v1929_v35, %v1930_v19  ;;  %v3608_v54 = vrot.slane %v3607_v44, 4  ;;  %v9513_v35 = vld [vmem:[%s15968_s0 + $0x138] sm:$0xf] }
 0x1f3   :  { %v10378_v47 = vld [vmem:[%s15968_s0 + $0x120] sm:$0xff]  ;;  %v3618_v26 = vrot.slane %v3617_v17, 4  ;;  %v9514_v19 = vld [vmem:[%s15968_s0 + $0x13c] sm:$0xf]  ;;  %v3628_v44 = vshll.u32 %v9513_v35, 16 }
 0x1f4   :  { %v2259_v48 = vpop.f32.mrf.mxu2  ;;  %1616 = vmatmul.bf16.gmra.mxu1 %v10377_v33  ;;  %v9146_v33 = vrot.slane %v1694_v11, 9  ;;  %v3613_v36 = vsel %vm10739_vm2, %v3608_v54, %v3612_v60  ;;  %v3638_v17 = vshrl.u32 %v9514_v19, 16 }
 0x1f5   :  { %v2382_v24 = vadd.f32 %v2259_v48, %v1575_v10  ;;  %v3899_v10 = vunpack.c.l.b16 %v3589_v31  ;;  %v2057_v31 = vunpack.c.l.b16 %v1931_v56  ;;  %v3630_v54 = vrot.slane %v3628_v44, 5 }
 0x1f6   :  { %v1928_v63 = vsel %vm11351_vm5, %v9146_v33, %v1927_v39 }
 0x1f7   :  { %v12449_v52 = vpop.f32.mrf.mxu0  ;;  %v3942_v11 = vpack.c.b16 %v3900_v37, %v3899_v10  ;;  %v2056_v40 = vunpack.c.l.b16 %v1928_v63  ;;  %v10591_v63 = vld [vmem:[%s15968_s0 + $0x130] sm:$0xf] }
 0x1f8   :  { %v2814_v34 = vpop.f32.mrf.mxu3  ;;  %v1934_v56 = vrot.slane %v10591_v63, 5 }
 0x1f9   :  { %v12458_v3 = vadd.f32 %v2814_v34, %v2382_v24  ;;  %2301 = vmatmul.bf16.gmra.mxu2 %v2097_v53  ;;  %v1579_v21 = vpop.f32.mrf.mxu1  ;;  %v3620_v24 = vshll.u32 %v9512_v9, 16  ;;  %v2098_v10 = vpack.c.b16 %v2057_v31, %v2056_v40  ;;  %v10434_v31 = vld [vmem:[%s15968_s0 + $0x12c] sm:$0xff] }
 0x1fb   :  { %v3622_v39 = vrot.slane %v3620_v24, 5  ;;  %v3901_v24 = vunpack.c.l.b16 %v3613_v36 }
 0x1fc   :  { %v2262_v48 = vpop.f32.mrf.mxu2 }
 0x1fd   :  { %2856 = vmatmul.bf16.gmra.mxu3 %v10433_v23  ;;  %v2383_v53 = vadd.f32 %v2262_v48, %v1578_v1  ;;  %v1580_v23 = vadd.f32 %v1579_v21, %v11631_v28  ;;  %v3623_v49 = vsel %vm10739_vm2, %v3618_v26, %v3622_v39  ;;  %v3625_v1 = vshrl.u32 %v9513_v35, 16  ;;  %v1695_v21 = vld [vmem:[%s15968_s0 + $0x12c] sm:$0xe] }
 0x1fe   :  { %v3634_v48 = vshll.u32 %v9514_v19, 16  ;;  %v9147_v39 = vrot.slane %v1695_v21, 9  ;;  %v1936_v35 = vrot.slane %v1934_v56, 4  ;;  %v10592_v19 = vld [vmem:[%s15968_s0 + $0x134] sm:$0x1] }
 0x1ff   :  { %v12471_v34 = vpop.f32.mrf.mxu0 }
 0x200   :  { %v2817_v0 = vpop.f32.mrf.mxu3  ;;  %v12510_v26 = vrot.slane %v3634_v48, 5 }
 0x201   :  { %v12480_v58 = vadd.f32 %v2817_v0, %v2383_v53  ;;  %v1582_v33 = vpop.f32.mrf.mxu1  ;;  %v3902_v53 = vunpack.c.l.b16 %v3623_v49 }
 0x202   :  { %4146 = vmatmul.bf16.gmra.mxu0 %v3942_v11  ;;  %v12503_v11 = vadd.f32 %v12396_v16, %v12405_v14  ;;  %v1937_v16 = vrot.slane %v10592_v19, 5  ;;  %v3640_v14 = vrot.slane %v3638_v17, 4 }
 0x203   :  { %v3943_v36 = vpack.c.b16 %v3902_v53, %v3901_v24  ;;  %v12540_v24 = vadd.f32 %v12421_v22, %v12436_v30  ;;  %v10461_v22 = vld [vmem:[%s15967_s1 + $0x148] sm:$0xff] }
 0x204   :  { %v2264_v9 = vpop.f32.mrf.mxu2  ;;  %1621 = vmatmul.bf16.gmra.mxu1 %v10378_v47  ;;  %16009 = vst [vmem:[#allocation35_spill] sm:$0xff] %v12503_v11  ;;  %v3627_v47 = vrot.slane %v3625_v1, 4  ;;  %v1935_v1 = vsel %vm11351_vm5, %v9147_v39, %v1934_v56  ;;  %v1938_v44 = vsel %vm11351_vm5, %v1936_v35, %v1937_v16  ;;  %v3641_v48 = vor.u32 %v3640_v14, %v12510_v26  ;;  %v10379_v56 = vld [vmem:[%s15968_s0 + $0x12c] sm:$0xff] }
 0x205   :  { %v2384_v37 = vadd.f32 %v2264_v9, %v1580_v23  ;;  %v1583_v23 = vadd.f32 %v1582_v33, %v11654_v38  ;;  %v9515_v9 = vld [vmem:[%s15968_s0 + $0x140] sm:$0x1]  ;;  %v10501_v38 = vld [vmem:[%s15967_s1 + $0x188] sm:$0xff]  ;;  %v9516_v33 = vld [vmem:[%s15968_s0 + $0x144] sm:$0xf]  ;;  %16010 = vst [vmem:[#allocation36_spill] sm:$0xff] %v12540_v24  ;;  %4817 = vmatpush.bf16.msra.mxu1 %v10461_v22 }
 0x206   :  { %v3644_v63 = vshll.u32 %v9515_v9, 16  ;;  %5372 = vmatpush.bf16.msra.mxu2 %v10501_v38  ;;  %v3642_v35 = vrot.slane %v3641_v48, 4  ;;  %v3649_v16 = vshrl.u32 %v9516_v33, 16  ;;  %v10509_v14 = vld [vmem:[%s15967_s1 + $0x1c8] sm:$0xff]  ;;  %v1696_v48 = vld [vmem:[%s15968_s0 + $0x138] sm:$0xe] }
 0x207   :  { %v12496_v28 = vpop.f32.mrf.mxu0  ;;  %6662 = vmatpush.bf16.msra.mxu3 %v10509_v14 }
 0x208   :  { %v2819_v60 = vpop.f32.mrf.mxu3  ;;  %v3646_v19 = vrot.slane %v3644_v63, 5  ;;  %v3651_v38 = vrot.slane %v3649_v16, 4  ;;  %v10435_v16 = vld [vmem:[%s15968_s0 + $0x138] sm:$0xff] }
 0x209   :  { %v12505_v40 = vadd.f32 %v2819_v60, %v2384_v37  ;;  %2306 = vmatmul.bf16.gmra.mxu2 %v2098_v10  ;;  %v1584_v0 = vpop.f32.mrf.mxu1  ;;  %v3631_v37 = vor.u32 %v3630_v54, %v3627_v47  ;;  %v9517_v60 = vld [vmem:[%s15968_s0 + $0x148] sm:$0xf]  ;;  %v2058_v47 = vunpack.c.l.b16 %v1935_v1  ;;  %v2059_v54 = vunpack.c.l.b16 %v1938_v44 }
 0x20a   :  { %v1585_v30 = vadd.f32 %v1584_v0, %v11680_v5  ;;  %v3658_v9 = vshll.u32 %v9517_v60, 16  ;;  %v3647_v0 = vsel %vm10739_vm2, %v3642_v35, %v3646_v19  ;;  %v12572_v35 = vadd.f32 %v12449_v52, %v12458_v3 }
 0x20b   :  { %v3632_v39 = vrot.slane %v3631_v37, 4  ;;  %v2099_v44 = vpack.c.b16 %v2059_v54, %v2058_v47  ;;  %v9148_v54 = vrot.slane %v1696_v48, 9 }
 0x20c   :  { %v2267_v10 = vpop.f32.mrf.mxu2  ;;  %16011 = vst [vmem:[#allocation37_spill] sm:$0xff] %v12572_v35 }
 0x20d   :  { %2861 = vmatmul.bf16.gmra.mxu3 %v10434_v31  ;;  %v2385_v49 = vadd.f32 %v2267_v10, %v1583_v23  ;;  %v3652_v23 = vshll.u32 %v9516_v33, 16  ;;  %v3662_v10 = vshrl.u32 %v9517_v60, 16  ;;  %v3637_v5 = vsel %vm10739_vm2, %v3632_v39, %v12510_v26  ;;  %v10517_v60 = vld [vmem:[%s15967_s1 + $0x208] sm:$0xff]  ;;  %v10594_v26 = vld [vmem:[%s15968_s0 + $0x140] sm:$0x1] }
 0x20e   :  { %v1944_v39 = vrot.slane %v10594_v26, 5  ;;  %7440 = vmatpush.bf16.msra.mxu0 %v10517_v60 }
 0x20f   :  { %v12524_v17 = vpop.f32.mrf.mxu0  ;;  %v3654_v33 = vrot.slane %v3652_v23, 5  ;;  %v3903_v23 = vunpack.c.l.b16 %v3637_v5 }
 0x210   :  { %v2822_v21 = vpop.f32.mrf.mxu3 }
 0x211   :  { %v12542_v53 = vadd.f32 %v2822_v21, %v2385_v49  ;;  %v1587_v31 = vpop.f32.mrf.mxu1  ;;  %v3660_v21 = vrot.slane %v3658_v9, 5  ;;  %v3904_v9 = vunpack.c.l.b16 %v3647_v0 }
 0x212   :  { %4151 = vmatmul.bf16.gmra.mxu0 %v3943_v36  ;;  %v10593_v36 = vld [vmem:[%s15968_s0 + $0x13c] sm:$0xf] }
 0x213   :  { %v1941_v37 = vrot.slane %v10593_v36, 5 }
 0x214   :  { %v2269_v49 = vpop.f32.mrf.mxu2  ;;  %1626 = vmatmul.bf16.gmra.mxu1 %v10379_v56  ;;  %v3664_v56 = vrot.slane %v3662_v10, 4  ;;  %v1588_v10 = vadd.f32 %v1587_v31, %v11708_v2  ;;  %v10380_v2 = vld [vmem:[%s15968_s0 + $0x138] sm:$0xff] }
 0x215   :  { %v2386_v1 = vadd.f32 %v2269_v49, %v1585_v30  ;;  %v1943_v14 = vrot.slane %v1941_v37, 4  ;;  %v9518_v30 = vld [vmem:[%s15968_s0 + $0x14c] sm:$0x1]  ;;  %v3655_v49 = vor.u32 %v3654_v33, %v3651_v38  ;;  %v1942_v3 = vsel %vm11351_vm5, %v9148_v54, %v1941_v37 }
 0x216   :  { %v2060_v60 = vunpack.c.l.b16 %v1942_v3  ;;  %v12594_v33 = vadd.f32 %v12471_v34, %v12480_v58  ;;  %v10595_v3 = vld [vmem:[%s15968_s0 + $0x148] sm:$0xf] }
 0x217   :  { %v12562_v63 = vpop.f32.mrf.mxu0  ;;  %v1945_v36 = vsel %vm11351_vm5, %v1943_v14, %v1944_v39  ;;  %v3656_v31 = vrot.slane %v3655_v49, 4  ;;  %v9519_v14 = vld [vmem:[%s15968_s0 + $0x150] sm:$0xf]  ;;  %v9520_v39 = vld [vmem:[%s15968_s0 + $0x154] sm:$0xf] }
 0x218   :  { %v2824_v47 = vpop.f32.mrf.mxu3  ;;  %v2061_v5 = vunpack.c.l.b16 %v1945_v36  ;;  %16012 = vst [vmem:[#allocation38_spill] sm:$0xff] %v12594_v33  ;;  %v3676_v49 = vshll.u32 %v9519_v14, 16  ;;  %v1948_v36 = vrot.slane %v10595_v3, 5  ;;  %v16037_v33 = vld [vmem:[#allocation25_spill] sm:$0xff] }
 0x219   :  { %v12574_v19 = vadd.f32 %v2824_v47, %v2386_v1  ;;  %2311 = vmatmul.bf16.gmra.mxu2 %v2099_v44  ;;  %v1589_v22 = vpop.f32.mrf.mxu1  ;;  %v3665_v1 = vor.u32 %v3664_v56, %v3660_v21  ;;  %v3668_v44 = vshll.u32 %v9518_v30, 16  ;;  %v3944_v47 = vpack.c.b16 %v3904_v9, %v3903_v23 }
 0x21a   :  { %v2100_v23 = vpack.c.b16 %v2061_v5, %v2060_v60  ;;  %v3661_v34 = vsel %vm10739_vm2, %v3656_v31, %v3660_v21  ;;  %v10436_v5 = vld [vmem:[%s15968_s0 + $0x144] sm:$0xff]  ;;  %v3678_v31 = vrot.slane %v3676_v49, 5 }
 0x21b   :  { %v3666_v38 = vrot.slane %v3665_v1, 4  ;;  %v3670_v37 = vrot.slane %v3668_v44, 5  ;;  %v3686_v1 = vshrl.u32 %v9520_v39, 16  ;;  %v3905_v44 = vunpack.c.l.b16 %v3661_v34 }
 0x21c   :  { %v2272_v52 = vpop.f32.mrf.mxu2 }
 0x21d   :  { %2866 = vmatmul.bf16.gmra.mxu3 %v10435_v16  ;;  %v2387_v48 = vadd.f32 %v2272_v52, %v1588_v10  ;;  %v1590_v16 = vadd.f32 %v1589_v22, %v11744_v29  ;;  %v3671_v58 = vsel %vm10739_vm2, %v3666_v38, %v3670_v37  ;;  %v3673_v10 = vshrl.u32 %v9519_v14, 16  ;;  %v1697_v22 = vld [vmem:[%s15968_s0 + $0x144] sm:$0xe] }
 0x21e   :  { %v3682_v52 = vshll.u32 %v9520_v39, 16  ;;  %v9149_v37 = vrot.slane %v1697_v22, 9  ;;  %v1950_v14 = vrot.slane %v1948_v36, 4  ;;  %v10596_v39 = vld [vmem:[%s15968_s0 + $0x14c] sm:$0x1]  ;;  %v10381_v22 = vld [vmem:[%s15968_s0 + $0x144] sm:$0xff] }
 0x21f   :  { %v12587_v26 = vpop.f32.mrf.mxu0 }
 0x220   :  { %v2827_v0 = vpop.f32.mrf.mxu3  ;;  %v3684_v38 = vrot.slane %v3682_v52, 5 }
 0x221   :  { %v12596_v56 = vadd.f32 %v2827_v0, %v2387_v48  ;;  %v1592_v54 = vpop.f32.mrf.mxu1  ;;  %v3906_v48 = vunpack.c.l.b16 %v3671_v58 }
 0x222   :  { %4156 = vmatmul.bf16.gmra.mxu0 %v3944_v47  ;;  %v12619_v47 = vadd.f32 %v12496_v28, %v12505_v40  ;;  %v3688_v28 = vrot.slane %v3686_v1, 4  ;;  %v1593_v40 = vadd.f32 %v1592_v54, %v11379_v43  ;;  %v9522_v43 = vld [vmem:[%s15968_s0 + $0x15c] sm:$0xf] }
 0x223   :  { %v3945_v34 = vpack.c.b16 %v3906_v48, %v3905_v44 }
 0x224   :  { %v2274_v30 = vpop.f32.mrf.mxu2  ;;  %1631 = vmatmul.bf16.gmra.mxu1 %v10380_v2  ;;  %16013 = vst [vmem:[#allocation39_spill] sm:$0xff] %v12619_v47  ;;  %v3675_v2 = vrot.slane %v3673_v10, 4  ;;  %v1949_v10 = vsel %vm11351_vm5, %v9149_v37, %v1948_v36  ;;  %v3689_v52 = vor.u32 %v3688_v28, %v3684_v38  ;;  %v9523_v36 = vld [vmem:[%s15968_s0 + $0x160] sm:$0xf] }
 0x225   :  { %v2388_v9 = vadd.f32 %v2274_v30, %v1590_v16  ;;  %v1951_v16 = vrot.slane %v10596_v39, 5  ;;  %v9521_v30 = vld [vmem:[%s15968_s0 + $0x158] sm:$0x1]  ;;  %v3697_v39 = vshrl.u32 %v9522_v43, 16 }
 0x226   :  { %v3692_v3 = vshll.u32 %v9521_v30, 16  ;;  %v3690_v37 = vrot.slane %v3689_v52, 4  ;;  %v3706_v30 = vshll.u32 %v9523_v36, 16 }
 0x227   :  { %v12612_v29 = vpop.f32.mrf.mxu0  ;;  %v1952_v49 = vsel %vm11351_vm5, %v1950_v14, %v1951_v16  ;;  %v16015_v16 = vld [vmem:[#allocation3_spill] sm:$0xff]  ;;  %v3699_v52 = vrot.slane %v3697_v39, 4  ;;  %v9524_v39 = vld [vmem:[%s15968_s0 + $0x164] sm:$0x1] }
 0x228   :  { %v2829_v21 = vpop.f32.mrf.mxu3  ;;  %v3694_v14 = vrot.slane %v3692_v3, 5 }
 0x229   :  { %v12621_v60 = vadd.f32 %v2829_v21, %v2388_v9  ;;  %2316 = vmatmul.bf16.gmra.mxu2 %v2100_v23  ;;  %v1594_v0 = vpop.f32.mrf.mxu1  ;;  %v3679_v9 = vor.u32 %v3678_v31, %v3675_v2  ;;  %v12650_v21 = vadd.f32 %v12524_v17, %v12542_v53  ;;  %v2063_v2 = vunpack.c.l.b16 %v1952_v49  ;;  %v10597_v17 = vld [vmem:[%s15968_s0 + $0x154] sm:$0xf] }
 0x22a   :  { %v1595_v28 = vadd.f32 %v1594_v0, %v16015_v16  ;;  %v1955_v53 = vrot.slane %v10597_v17, 5  ;;  %v3695_v0 = vsel %vm10739_vm2, %v3690_v37, %v3694_v14  ;;  %v10437_v37 = vld [vmem:[%s15968_s0 + $0x150] sm:$0xff] }
 0x22b   :  { %16014 = vst [vmem:[#allocation40_spill] sm:$0xff] %v12650_v21  ;;  %v3680_v31 = vrot.slane %v3679_v9, 4 }
 0x22c   :  { %v2277_v23 = vpop.f32.mrf.mxu2 }
 0x22d   :  { %2871 = vmatmul.bf16.gmra.mxu3 %v10436_v5  ;;  %v2389_v58 = vadd.f32 %v2277_v23, %v1593_v40  ;;  %v2062_v5 = vunpack.c.l.b16 %v1949_v10  ;;  %v3700_v40 = vshll.u32 %v9522_v43, 16  ;;  %v3710_v23 = vshrl.u32 %v9523_v36, 16 }
 0x22e   :  { %v3685_v9 = vsel %vm10739_vm2, %v3680_v31, %v3684_v38  ;;  %v3708_v43 = vrot.slane %v3706_v30, 5  ;;  %v12672_v38 = vadd.f32 %v12562_v63, %v12574_v19 }
 0x22f   :  { %v12637_v1 = vpop.f32.mrf.mxu0  ;;  %v2101_v10 = vpack.c.b16 %v2063_v2, %v2062_v5  ;;  %v3702_v3 = vrot.slane %v3700_v40, 5  ;;  %v10598_v5 = vld [vmem:[%s15968_s0 + $0x158] sm:$0x1]  ;;  %v3907_v16 = vunpack.c.l.b16 %v3685_v9 }
 0x230   :  { %v2832_v54 = vpop.f32.mrf.mxu3  ;;  %v1958_v2 = vrot.slane %v10598_v5, 5  ;;  %16016 = vst [vmem:[#allocation3_spill] sm:$0xff] %v12672_v38  ;;  %v16017_v40 = vld [vmem:[#allocation5_spill] sm:$0xff] }
 0x231   :  { %v12652_v44 = vadd.f32 %v2832_v54, %v2389_v58  ;;  %v1597_v48 = vpop.f32.mrf.mxu1  ;;  %v3712_v54 = vrot.slane %v3710_v23, 4  ;;  %v3703_v23 = vor.u32 %v3702_v3, %v3699_v52 }
 0x232   :  { %4161 = vmatmul.bf16.gmra.mxu0 %v3945_v34  ;;  %v1698_v34 = vld [vmem:[%s15968_s0 + $0x150] sm:$0xe]  ;;  %v1598_v30 = vadd.f32 %v1597_v48, %v16017_v40 }
 0x233   :  { %v9150_v36 = vrot.slane %v1698_v34, 9  ;;  %v10382_v48 = vld [vmem:[%s15968_s0 + $0x150] sm:$0xff]  ;;  %v3704_v52 = vrot.slane %v3703_v23, 4 }
 0x234   :  { %v2279_v47 = vpop.f32.mrf.mxu2  ;;  %1636 = vmatmul.bf16.gmra.mxu1 %v10381_v22 }
 0x235   :  { %v2390_v58 = vadd.f32 %v2279_v47, %v1595_v28  ;;  %v1957_v47 = vrot.slane %v1955_v53, 4  ;;  %v3908_v28 = vunpack.c.l.b16 %v3695_v0  ;;  %v1956_v63 = vsel %vm11351_vm5, %v9150_v36, %v1955_v53 }
 0x236   :  { %v2064_v38 = vunpack.c.l.b16 %v1956_v63  ;;  %v12694_v36 = vadd.f32 %v12587_v26, %v12596_v56  ;;  %v3709_v26 = vsel %vm10739_vm2, %v3704_v52, %v3708_v43 }
 0x237   :  { %v12665_v49 = vpop.f32.mrf.mxu0  ;;  %v1959_v19 = vsel %vm11351_vm5, %v1957_v47, %v1958_v2  ;;  %v9525_v2 = vld [vmem:[%s15968_s0 + $0x168] sm:$0xf] }
 0x238   :  { %v2834_v22 = vpop.f32.mrf.mxu3  ;;  %v2065_v9 = vunpack.c.l.b16 %v1959_v19  ;;  %16018 = vst [vmem:[#allocation5_spill] sm:$0xff] %v12694_v36  ;;  %v3721_v23 = vshrl.u32 %v9525_v2, 16  ;;  %v10599_v19 = vld [vmem:[%s15968_s0 + $0x160] sm:$0xf] }
 0x239   :  { %v12674_v31 = vadd.f32 %v2834_v22, %v2390_v58  ;;  %2321 = vmatmul.bf16.gmra.mxu2 %v2101_v10  ;;  %v1599_v14 = vpop.f32.mrf.mxu1  ;;  %v3713_v58 = vor.u32 %v3712_v54, %v3708_v43  ;;  %v3716_v10 = vshll.u32 %v9524_v39, 16  ;;  %v3946_v22 = vpack.c.b16 %v3908_v28, %v3907_v16  ;;  %v16019_v39 = vld [vmem:[#allocation7_spill] sm:$0xff] }
 0x23a   :  { %v1600_v16 = vadd.f32 %v1599_v14, %v16019_v39  ;;  %v2102_v40 = vpack.c.b16 %v2065_v9, %v2064_v38  ;;  %v1699_v38 = vld [vmem:[%s15968_s0 + $0x15c] sm:$0xe]  ;;  %v12719_v9 = vadd.f32 %v12612_v29, %v12621_v60 }
 0x23b   :  { %v3714_v3 = vrot.slane %v3713_v58, 4  ;;  %v3718_v53 = vrot.slane %v3716_v10, 5  ;;  %v1962_v58 = vrot.slane %v10599_v19, 5 }
 0x23c   :  { %v2282_v17 = vpop.f32.mrf.mxu2  ;;  %16020 = vst [vmem:[#allocation7_spill] sm:$0xff] %v12719_v9 }
 0x23d   :  { %2876 = vmatmul.bf16.gmra.mxu3 %v10437_v37  ;;  %v2391_v34 = vadd.f32 %v2282_v17, %v1598_v30  ;;  %v9526_v37 = vld [vmem:[%s15968_s0 + $0x16c] sm:$0xf]  ;;  %v3719_v56 = vsel %vm10739_vm2, %v3714_v3, %v3718_v53  ;;  %v3724_v17 = vshll.u32 %v9525_v2, 16  ;;  %v3723_v3 = vrot.slane %v3721_v23, 4 }
 0x23e   :  { %v3730_v63 = vshll.u32 %v9526_v37, 16  ;;  %v3734_v10 = vshrl.u32 %v9526_v37, 16  ;;  %v9151_v37 = vrot.slane %v1699_v38, 9  ;;  %v1964_v39 = vrot.slane %v1962_v58, 4 }
 0x23f   :  { %v12687_v5 = vpop.f32.mrf.mxu0  ;;  %v3726_v53 = vrot.slane %v3724_v17, 5 }
 0x240   :  { %v2837_v0 = vpop.f32.mrf.mxu3  ;;  %v12726_v2 = vrot.slane %v3730_v63, 5  ;;  %v3736_v60 = vrot.slane %v3734_v10, 4  ;;  %v1963_v63 = vsel %vm11351_vm5, %v9151_v37, %v1962_v58  ;;  %v10383_v58 = vld [vmem:[%s15968_s0 + $0x15c] sm:$0xff] }
 0x241   :  { %v12696_v54 = vadd.f32 %v2837_v0, %v2391_v34  ;;  %v1602_v47 = vpop.f32.mrf.mxu1  ;;  %v3909_v34 = vunpack.c.l.b16 %v3709_v26  ;;  %v3727_v17 = vor.u32 %v3726_v53, %v3723_v3  ;;  %v12756_v3 = vadd.f32 %v12637_v1, %v12652_v44  ;;  %v10460_v1 = vld [vmem:[%s15967_s1 + $0x140] sm:$0xff]  ;;  %v16023_v44 = vld [vmem:[#allocation11_spill] sm:$0xff] }
 0x242   :  { %4166 = vmatmul.bf16.gmra.mxu0 %v3946_v22  ;;  %v3910_v22 = vunpack.c.l.b16 %v3719_v56  ;;  %v3737_v38 = vor.u32 %v3736_v60, %v12726_v2  ;;  %4818 = vmatpush.bf16.msra.mxu1 %v10460_v1 }
 0x244   :  { %v2284_v28 = vpop.f32.mrf.mxu2  ;;  %1641 = vmatmul.bf16.gmra.mxu1 %v10382_v48  ;;  %v10438_v48 = vld [vmem:[%s15968_s0 + $0x15c] sm:$0xff]  ;;  %v3738_v60 = vrot.slane %v3737_v38, 4 }
 0x245   :  { %v2392_v30 = vadd.f32 %v2284_v28, %v1600_v16  ;;  %v10600_v16 = vld [vmem:[%s15968_s0 + $0x164] sm:$0x1]  ;;  %v16021_v28 = vld [vmem:[#allocation9_spill] sm:$0xff] }
 0x246   :  { %v1965_v29 = vrot.slane %v10600_v16, 5  ;;  %v1603_v26 = vadd.f32 %v1602_v47, %v16021_v28  ;;  %v10500_v47 = vld [vmem:[%s15967_s1 + $0x180] sm:$0xff]  ;;  %16022 = vst [vmem:[#allocation9_spill] sm:$0xff] %v12756_v3 }
 0x247   :  { %v12712_v14 = vpop.f32.mrf.mxu0  ;;  %5373 = vmatpush.bf16.msra.mxu2 %v10500_v47  ;;  %v1700_v47 = vld [vmem:[%s15968_s0 + $0x168] sm:$0xe] }
 0x248   :  { %v2839_v43 = vpop.f32.mrf.mxu3  ;;  %v1966_v19 = vsel %vm11351_vm5, %v1964_v39, %v1965_v29  ;;  %v2066_v39 = vunpack.c.l.b16 %v1963_v63  ;;  %v3728_v29 = vrot.slane %v3727_v17, 4 }
 0x249   :  { %v12721_v0 = vadd.f32 %v2839_v43, %v2392_v30  ;;  %2326 = vmatmul.bf16.gmra.mxu2 %v2102_v40  ;;  %v1604_v52 = vpop.f32.mrf.mxu1  ;;  %v9527_v40 = vld [vmem:[%s15968_s0 + $0x170] sm:$0x1]  ;;  %v3947_v30 = vpack.c.b16 %v3910_v22, %v3909_v34  ;;  %v9528_v34 = vld [vmem:[%s15968_s0 + $0x174] sm:$0xf]  ;;  %v2067_v16 = vunpack.c.l.b16 %v1966_v19 }
 0x24a   :  { %v3740_v10 = vshll.u32 %v9527_v40, 16  ;;  %v10508_v40 = vld [vmem:[%s15967_s1 + $0x1c0] sm:$0xff] }
 0x24b   :  { %6663 = vmatpush.bf16.msra.mxu3 %v10508_v40 }
 0x24c   :  { %v2287_v56 = vpop.f32.mrf.mxu2  ;;  %v3742_v28 = vrot.slane %v3740_v10, 5  ;;  %v2103_v10 = vpack.c.b16 %v2067_v16, %v2066_v39  ;;  %v10516_v39 = vld [vmem:[%s15967_s1 + $0x200] sm:$0xff] }
 0x24d   :  { %2881 = vmatmul.bf16.gmra.mxu3 %v10438_v48  ;;  %v2393_v23 = vadd.f32 %v2287_v56, %v1603_v26  ;;  %v9529_v48 = vld [vmem:[%s15968_s0 + $0x178] sm:$0xf]  ;;  %v3745_v26 = vshrl.u32 %v9528_v34, 16  ;;  %v1605_v56 = vadd.f32 %v1604_v52, %v16023_v44  ;;  %v3733_v52 = vsel %vm10739_vm2, %v3728_v29, %v12726_v2  ;;  %v10602_v2 = vld [vmem:[%s15968_s0 + $0x170] sm:$0x1]  ;;  %7441 = vmatpush.bf16.msra.mxu0 %v10516_v39 }
 0x24e   :  { %v3758_v63 = vshrl.u32 %v9529_v48, 16  ;;  %v1972_v29 = vrot.slane %v10602_v2, 5 }
 0x24f   :  { %v12740_v43 = vpop.f32.mrf.mxu0 }
 0x250   :  { %v2842_v22 = vpop.f32.mrf.mxu3  ;;  %v3760_v40 = vrot.slane %v3758_v63, 4  ;;  %v3911_v63 = vunpack.c.l.b16 %v3733_v52 }
 0x251   :  { %v12758_v53 = vadd.f32 %v2842_v22, %v2393_v23  ;;  %v1607_v37 = vpop.f32.mrf.mxu1  ;;  %v3748_v23 = vshll.u32 %v9528_v34, 16  ;;  %v3754_v22 = vshll.u32 %v9529_v48, 16  ;;  %v3743_v34 = vsel %vm10739_vm2, %v3738_v60, %v3742_v28 }
 0x252   :  { %4171 = vmatmul.bf16.gmra.mxu0 %v3947_v30  ;;  %v10601_v30 = vld [vmem:[%s15968_s0 + $0x16c] sm:$0xf]  ;;  %v3747_v48 = vrot.slane %v3745_v26, 4  ;;  %v12788_v60 = vadd.f32 %v12665_v49, %v12674_v31 }
 0x253   :  { %v1969_v17 = vrot.slane %v10601_v30, 5  ;;  %v3750_v44 = vrot.slane %v3748_v23, 5  ;;  %v3756_v30 = vrot.slane %v3754_v22, 5  ;;  %v10439_v26 = vld [vmem:[%s15968_s0 + $0x168] sm:$0xff]  ;;  %v9530_v22 = vld [vmem:[%s15968_s0 + $0x17c] sm:$0x1] }
 0x254   :  { %v2289_v19 = vpop.f32.mrf.mxu2  ;;  %1646 = vmatmul.bf16.gmra.mxu1 %v10383_v58  ;;  %16024 = vst [vmem:[#allocation11_spill] sm:$0xff] %v12788_v60 }
 0x255   :  { %v2394_v38 = vadd.f32 %v2289_v19, %v1605_v56  ;;  %v9152_v56 = vrot.slane %v1700_v47, 9  ;;  %v1971_v1 = vrot.slane %v1969_v17, 4  ;;  %v3912_v19 = vunpack.c.l.b16 %v3743_v34  ;;  %v16025_v47 = vld [vmem:[#allocation13_spill] sm:$0xff] }
 0x256   :  { %v1608_v2 = vadd.f32 %v1607_v37, %v16025_v47  ;;  %v3751_v3 = vor.u32 %v3750_v44, %v3747_v48  ;;  %v10384_v37 = vld [vmem:[%s15968_s0 + $0x168] sm:$0xff] }
 0x257   :  { %v12778_v58 = vpop.f32.mrf.mxu0  ;;  %v1970_v31 = vsel %vm11351_vm5, %v9152_v56, %v1969_v17  ;;  %v3948_v9 = vpack.c.b16 %v3912_v19, %v3911_v63  ;;  %v12810_v56 = vadd.f32 %v12687_v5, %v12696_v54 }
 0x258   :  { %v2844_v16 = vpop.f32.mrf.mxu3  ;;  %v2068_v39 = vunpack.c.l.b16 %v1970_v31  ;;  %v3752_v48 = vrot.slane %v3751_v3, 4 }
 0x259   :  { %v12790_v28 = vadd.f32 %v2844_v16, %v2394_v38  ;;  %2331 = vmatmul.bf16.gmra.mxu2 %v2103_v10  ;;  %v1609_v23 = vpop.f32.mrf.mxu1  ;;  %v1973_v38 = vsel %vm11351_vm5, %v1971_v1, %v1972_v29  ;;  %v3761_v10 = vor.u32 %v3760_v40, %v3756_v30  ;;  %v3764_v16 = vshll.u32 %v9530_v22, 16  ;;  %16026 = vst [vmem:[#allocation13_spill] sm:$0xff] %v12810_v56  ;;  %v9531_v29 = vld [vmem:[%s15968_s0 + $0x180] sm:$0xf]  ;;  %v16027_v22 = vld [vmem:[#allocation15_spill] sm:$0xff] }
 0x25a   :  { %v2069_v52 = vunpack.c.l.b16 %v1973_v38  ;;  %v1610_v3 = vadd.f32 %v1609_v23, %v16027_v22  ;;  %v3757_v5 = vsel %vm10739_vm2, %v3752_v48, %v3756_v30  ;;  %v3772_v47 = vshll.u32 %v9531_v29, 16 }
 0x25b   :  { %v3762_v44 = vrot.slane %v3761_v10, 4  ;;  %v3766_v17 = vrot.slane %v3764_v16, 5  ;;  %v1701_v10 = vld [vmem:[%s15968_s0 + $0x174] sm:$0xe]  ;;  %v3913_v16 = vunpack.c.l.b16 %v3757_v5 }
 0x25c   :  { %v2292_v49 = vpop.f32.mrf.mxu2  ;;  %v2104_v19 = vpack.c.b16 %v2069_v52, %v2068_v39  ;;  %v12835_v52 = vadd.f32 %v12712_v14, %v12721_v0  ;;  %v16029_v0 = vld [vmem:[#allocation17_spill] sm:$0xff] }
 0x25d   :  { %2886 = vmatmul.bf16.gmra.mxu3 %v10439_v26  ;;  %v2395_v60 = vadd.f32 %v2292_v49, %v1608_v2  ;;  %v9532_v26 = vld [vmem:[%s15968_s0 + $0x184] sm:$0xf]  ;;  %v3767_v54 = vsel %vm10739_vm2, %v3762_v44, %v3766_v17  ;;  %v10603_v49 = vld [vmem:[%s15968_s0 + $0x178] sm:$0xf]  ;;  %v3774_v17 = vrot.slane %v3772_v47, 5 }
 0x25e   :  { %v3778_v2 = vshll.u32 %v9532_v26, 16  ;;  %v1976_v31 = vrot.slane %v10603_v49, 5  ;;  %v3782_v38 = vshrl.u32 %v9532_v26, 16  ;;  %v3914_v39 = vunpack.c.l.b16 %v3767_v54  ;;  %16028 = vst [vmem:[#allocation15_spill] sm:$0xff] %v12835_v52 }
 0x25f   :  { %v12803_v36 = vpop.f32.mrf.mxu0  ;;  %v9153_v26 = vrot.slane %v1701_v10, 9 }
 0x260   :  { %v2847_v34 = vpop.f32.mrf.mxu3  ;;  %v1978_v22 = vrot.slane %v1976_v31, 4  ;;  %v3784_v14 = vrot.slane %v3782_v38, 4 }
 0x261   :  { %v12812_v40 = vadd.f32 %v2847_v34, %v2395_v60  ;;  %v1612_v1 = vpop.f32.mrf.mxu1  ;;  %v3769_v60 = vshrl.u32 %v9531_v29, 16  ;;  %v3780_v29 = vrot.slane %v3778_v2, 5  ;;  %v1977_v2 = vsel %vm11351_vm5, %v9153_v26, %v1976_v31 }
 0x262   :  { %4176 = vmatmul.bf16.gmra.mxu0 %v3948_v9  ;;  %v1613_v5 = vadd.f32 %v1612_v1, %v16029_v0  ;;  %v2070_v31 = vunpack.c.l.b16 %v1977_v2  ;;  %v9534_v0 = vld [vmem:[%s15968_s0 + $0x18c] sm:$0xf] }
 0x263   :  { %v3771_v44 = vrot.slane %v3769_v60, 4  ;;  %v3785_v10 = vor.u32 %v3784_v14, %v3780_v29 }
 0x264   :  { %v2294_v63 = vpop.f32.mrf.mxu2  ;;  %1651 = vmatmul.bf16.gmra.mxu1 %v10384_v37  ;;  %v10440_v37 = vld [vmem:[%s15968_s0 + $0x174] sm:$0xff] }
 0x265   :  { %v2396_v9 = vadd.f32 %v2294_v63, %v1610_v3  ;;  %v10604_v3 = vld [vmem:[%s15968_s0 + $0x17c] sm:$0x1]  ;;  %v3775_v47 = vor.u32 %v3774_v17, %v3771_v44  ;;  %v3786_v26 = vrot.slane %v3785_v10, 4  ;;  %v3796_v10 = vshll.u32 %v9534_v0, 16 }
 0x266   :  { %v1979_v63 = vrot.slane %v10604_v3, 5  ;;  %v10385_v3 = vld [vmem:[%s15968_s0 + $0x174] sm:$0xff] }
 0x267   :  { %v12828_v23 = vpop.f32.mrf.mxu0  ;;  %v3776_v17 = vrot.slane %v3775_v47, 4  ;;  %v3793_v47 = vshrl.u32 %v9534_v0, 16  ;;  %v10606_v0 = vld [vmem:[%s15968_s0 + $0x188] sm:$0x1] }
 0x268   :  { %v2849_v30 = vpop.f32.mrf.mxu3  ;;  %v1980_v49 = vsel %vm11351_vm5, %v1978_v22, %v1979_v63  ;;  %v16031_v63 = vld [vmem:[#allocation19_spill] sm:$0xff] }
 0x269   :  { %v12837_v34 = vadd.f32 %v2849_v30, %v2396_v9  ;;  %2336 = vmatmul.bf16.gmra.mxu2 %v2104_v19  ;;  %v1614_v48 = vpop.f32.mrf.mxu1  ;;  %v9533_v19 = vld [vmem:[%s15968_s0 + $0x188] sm:$0x1]  ;;  %v3949_v9 = vpack.c.b16 %v3914_v39, %v3913_v16  ;;  %v12860_v16 = vadd.f32 %v12740_v43, %v12758_v53  ;;  %v2071_v44 = vunpack.c.l.b16 %v1980_v49  ;;  %v9535_v43 = vld [vmem:[%s15968_s0 + $0x190] sm:$0xf]  ;;  %v1702_v49 = vld [vmem:[%s15968_s0 + $0x180] sm:$0xe] }
 0x26a   :  { %v3788_v30 = vshll.u32 %v9533_v19, 16  ;;  %v1615_v14 = vadd.f32 %v1614_v48, %v16031_v63  ;;  %v10605_v48 = vld [vmem:[%s15968_s0 + $0x184] sm:$0xf]  ;;  %v9154_v63 = vrot.slane %v1702_v49, 9 }
 0x26b   :  { %16030 = vst [vmem:[#allocation17_spill] sm:$0xff] %v12860_v16  ;;  %v2105_v19 = vpack.c.b16 %v2071_v44, %v2070_v31  ;;  %v10441_v44 = vld [vmem:[%s15968_s0 + $0x180] sm:$0xff]  ;;  %v16035_v16 = vld [vmem:[#allocation23_spill] sm:$0xff] }
 0x26c   :  { %v2297_v54 = vpop.f32.mrf.mxu2  ;;  %v3790_v22 = vrot.slane %v3788_v30, 5  ;;  %v3802_v30 = vshll.u32 %v9535_v43, 16 }
 0x26d   :  { %2891 = vmatmul.bf16.gmra.mxu3 %v10440_v37  ;;  %v2397_v60 = vadd.f32 %v2297_v54, %v1613_v5  ;;  %v3781_v54 = vsel %vm10739_vm2, %v3776_v17, %v3780_v29  ;;  %v12885_v29 = vadd.f32 %v12778_v58, %v12790_v28  ;;  %v16033_v58 = vld [vmem:[#allocation21_spill] sm:$0xff] }
 0x26e   :  { %v3915_v17 = vunpack.c.l.b16 %v3781_v54  ;;  %v9536_v54 = vld [vmem:[%s15968_s0 + $0x194] sm:$0x1] }
 0x26f   :  { %v12853_v38 = vpop.f32.mrf.mxu0  ;;  %16032 = vst [vmem:[#allocation19_spill] sm:$0xff] %v12885_v29 }
 0x270   :  { %v2852_v1 = vpop.f32.mrf.mxu3 }
 0x271   :  { %v12862_v39 = vadd.f32 %v2852_v1, %v2397_v60  ;;  %v1617_v37 = vpop.f32.mrf.mxu1  ;;  %v1983_v60 = vrot.slane %v10605_v48, 5  ;;  %v3806_v1 = vshrl.u32 %v9535_v43, 16  ;;  %v3795_v43 = vrot.slane %v3793_v47, 4 }
 0x272   :  { %4181 = vmatmul.bf16.gmra.mxu0 %v3949_v9  ;;  %v3791_v9 = vsel %vm10739_vm2, %v3786_v26, %v3790_v22  ;;  %v1618_v28 = vadd.f32 %v1617_v37, %v16033_v58  ;;  %v12896_v48 = vrot.slane %v3802_v30, 5  ;;  %v3812_v30 = vshll.u32 %v9536_v54, 16 }
 0x273   :  { %v3916_v26 = vunpack.c.l.b16 %v3791_v9  ;;  %v1984_v29 = vsel %vm11351_vm5, %v9154_v63, %v1983_v60  ;;  %v10607_v63 = vld [vmem:[%s15968_s0 + $0x10] sm:$0xf] }
 0x274   :  { %v2299_v5 = vpop.f32.mrf.mxu2  ;;  %1656 = vmatmul.bf16.gmra.mxu1 %v10385_v3  ;;  %v2072_v58 = vunpack.c.l.b16 %v1984_v29 }
 0x275   :  { %v2398_v53 = vadd.f32 %v2299_v5, %v1615_v14  ;;  %v1985_v14 = vrot.slane %v1983_v60, 4  ;;  %v1986_v5 = vrot.slane %v10606_v0, 5  ;;  %v3950_v49 = vpack.c.b16 %v3916_v26, %v3915_v17  ;;  %v10386_v60 = vld [vmem:[%s15968_s0 + $0x180] sm:$0xff] }
 0x276   :  { %v12919_v26 = vadd.f32 %v12803_v36, %v12812_v40  ;;  %v3814_v40 = vrot.slane %v3812_v30, 5 }
 0x277   :  { %v12878_v2 = vpop.f32.mrf.mxu0  ;;  %v1987_v47 = vsel %vm11351_vm5, %v1985_v14, %v1986_v5  ;;  %v4396_v14 = vrot.slane %v10607_v63, 5 }
 0x278   :  { %v2854_v3 = vpop.f32.mrf.mxu3  ;;  %16034 = vst [vmem:[#allocation21_spill] sm:$0xff] %v12919_v26 }
 0x279   :  { %v12887_v31 = vadd.f32 %v2854_v3, %v2398_v53  ;;  %2341 = vmatmul.bf16.gmra.mxu2 %v2105_v19  ;;  %v1619_v22 = vpop.f32.mrf.mxu1  ;;  %v3798_v53 = vrot.slane %v3796_v10, 5  ;;  %v3808_v19 = vrot.slane %v3806_v1, 4  ;;  %v9537_v1 = vld [vmem:[%s15968_s0 + $0x198] sm:$0xf] }
 0x27a   :  { %v1620_v52 = vadd.f32 %v1619_v22, %v16035_v16  ;;  %v4398_v22 = vrot.slane %v4396_v14, 4 }
 0x27b   :  { %v3799_v37 = vor.u32 %v3798_v53, %v3795_v43  ;;  %v3809_v10 = vor.u32 %v3808_v19, %v12896_v48  ;;  %v3817_v53 = vshrl.u32 %v9537_v1, 16  ;;  %v3820_v19 = vshll.u32 %v9537_v1, 16 }
 0x27c   :  { %v2302_v3 = vpop.f32.mrf.mxu2 }
 0x27d   :  { %2896 = vmatmul.bf16.gmra.mxu3 %v10441_v44  ;;  %v2399_v9 = vadd.f32 %v2302_v3, %v1618_v28  ;;  %v9538_v44 = vld [vmem:[%s15968_s0 + $0x19c] sm:$0xf]  ;;  %v2073_v28 = vunpack.c.l.b16 %v1987_v47  ;;  %v3800_v56 = vrot.slane %v3799_v37, 4  ;;  %v3810_v36 = vrot.slane %v3809_v10, 4  ;;  %v10609_v37 = vld [vmem:[%s15968_s0 + $0x14] sm:$0x1] }
 0x27e   :  { %v3826_v3 = vshll.u32 %v9538_v44, 16  ;;  %v3830_v54 = vshrl.u32 %v9538_v44, 16  ;;  %v3819_v47 = vrot.slane %v3817_v53, 4  ;;  %v3822_v1 = vrot.slane %v3820_v19, 5  ;;  %v10610_v19 = vld [vmem:[%s15968_s0 + $0x194] sm:$0x1] }
 0x27f   :  { %v12905_v0 = vpop.f32.mrf.mxu0  ;;  %v2106_v29 = vpack.c.b16 %v2073_v28, %v2072_v58  ;;  %v4399_v10 = vrot.slane %v10609_v37, 5 }
 0x280   :  { %v2857_v17 = vpop.f32.mrf.mxu3  ;;  %v12933_v44 = vrot.slane %v3826_v3, 5  ;;  %v3832_v16 = vrot.slane %v3830_v54, 4  ;;  %v1993_v3 = vrot.slane %v10610_v19, 5  ;;  %v9588_v54 = vld [vmem:[%s15968_s0 + $0xc] sm:$0xe]  ;;  %v3823_v19 = vor.u32 %v3822_v1, %v3819_v47 }
 0x281   :  { %v12924_v5 = vadd.f32 %v2857_v17, %v2399_v9  ;;  %v1622_v43 = vpop.f32.mrf.mxu1  ;;  %v10608_v9 = vld [vmem:[%s15968_s0 + $0x190] sm:$0xf] }
 0x282   :  { %4186 = vmatmul.bf16.gmra.mxu0 %v3950_v49  ;;  %v1990_v17 = vrot.slane %v10608_v9, 5  ;;  %v1703_v49 = vld [vmem:[%s15968_s0 + $0x18c] sm:$0xe]  ;;  %v9620_v9 = vrot.slane %v9588_v54, 9  ;;  %v3833_v21 = vor.u32 %v3832_v16, %v12933_v44  ;;  %v1623_v35 = vadd.f32 %v1622_v43, %v16037_v33  ;;  %v9940_v33 = vld [vmem:[%s15968_s0 + $0x18] sm:$0xf] }
 0x283   :  { %v9155_v28 = vrot.slane %v1703_v49, 9  ;;  %v12981_v16 = vld [vmem:[%s15968_s0 + $0x1c] sm:$0xf]  ;;  %v12990_v54 = vadd.f32 %v12853_v38, %v12862_v39 }
 0x284   :  { %v2304_v26 = vpop.f32.mrf.mxu2  ;;  %1661 = vmatmul.bf16.gmra.mxu1 %v10386_v60  ;;  %v3815_v60 = vsel %vm10739_vm2, %v3810_v36, %v3814_v40  ;;  %v1992_v53 = vrot.slane %v1990_v17, 4  ;;  %v10442_v36 = vld [vmem:[%s15968_s0 + $0x18c] sm:$0xff] }
 0x285   :  { %v2400_v63 = vadd.f32 %v2304_v26, %v1620_v52  ;;  %v3805_v52 = vsel %vm10739_vm2, %v3800_v56, %v12896_v48  ;;  %v9539_v26 = vld [vmem:[%s15968_s0 + $0x1a0] sm:$0x1]  ;;  %v12956_v56 = vadd.f32 %v12828_v23, %v12837_v34  ;;  %v3918_v37 = vunpack.c.l.b16 %v3815_v60  ;;  %16038 = vst [vmem:[#allocation25_spill] sm:$0xff] %v12990_v54 }
 0x286   :  { %v3917_v49 = vunpack.c.l.b16 %v3805_v52  ;;  %v3836_v24 = vshll.u32 %v9539_v26, 16  ;;  %v4397_v23 = vsel %vm11351_vm5, %v9620_v9, %v4396_v14  ;;  %v4400_v34 = vsel %vm11351_vm5, %v4398_v22, %v4399_v10  ;;  %v16045_v54 = vld [vmem:[#allocation2_spill] sm:$0xff] }
 0x287   :  { %v12938_v30 = vpop.f32.mrf.mxu0  ;;  %16036 = vst [vmem:[#allocation23_spill] sm:$0xff] %v12956_v56  ;;  %v1994_v52 = vsel %vm11351_vm5, %v1992_v53, %v1993_v3  ;;  %v4635_v60 = vunpack.c.l.b16 %v4397_v23  ;;  %v4636_v47 = vunpack.c.l.b16 %v4400_v34  ;;  %v3824_v26 = vrot.slane %v3823_v19, 4  ;;  %v16039_v23 = vld [vmem:[#allocation27_spill] sm:$0xff] }
 0x288   :  { %v2859_v58 = vpop.f32.mrf.mxu3  ;;  %v3951_v43 = vpack.c.b16 %v3918_v37, %v3917_v49  ;;  %v2075_v10 = vunpack.c.l.b16 %v1994_v52  ;;  %v3838_v53 = vrot.slane %v3836_v24, 5  ;;  %v5696_v3 = vshrl.u32 %v9940_v33, 16 }
 0x289   :  { %v12958_v48 = vadd.f32 %v2859_v58, %v2400_v63  ;;  %2346 = vmatmul.bf16.gmra.mxu2 %v2106_v29  ;;  %v1624_v40 = vpop.f32.mrf.mxu1  ;;  %v1991_v29 = vsel %vm11351_vm5, %v9155_v28, %v1990_v17  ;;  %v12976_v14 = vpack.c.b16 %v4636_v47, %v4635_v60  ;;  %v3834_v28 = vrot.slane %v3833_v21, 4 }
 0x28a   :  { %v2074_v22 = vunpack.c.l.b16 %v1991_v29  ;;  %v5699_v49 = vshll.u32 %v9940_v33, 16  ;;  %v5705_v37 = vshll.u32 %v12981_v16, 16  ;;  %v5709_v19 = vshrl.u32 %v12981_v16, 16 }
 0x28b   :  { %v1625_v34 = vadd.f32 %v1624_v40, %v16039_v23  ;;  %v3829_v24 = vsel %vm10739_vm2, %v3824_v26, %v12933_v44  ;;  %v3839_v38 = vsel %vm10739_vm2, %v3834_v28, %v3838_v53  ;;  %v5698_v39 = vrot.slane %v5696_v3, 4  ;;  %v10443_v26 = vld [vmem:[%s15968_s0 + $0x198] sm:$0xff] }
 0x28c   :  { %v2307_v63 = vpop.f32.mrf.mxu2  ;;  %v2107_v21 = vpack.c.b16 %v2075_v10, %v2074_v22  ;;  %v5701_v52 = vrot.slane %v5699_v49, 5  ;;  %v5707_v60 = vrot.slane %v5705_v37, 5  ;;  %v5711_v47 = vrot.slane %v5709_v19, 4  ;;  %v16041_v3 = vld [vmem:[#allocation29_spill] sm:$0xff]  ;;  %v9943_v37 = vld [vmem:[%s15968_s0 + $0x24] sm:$0xf] }
 0x28d   :  { %2901 = vmatmul.bf16.gmra.mxu3 %v10442_v36  ;;  %v2401_v1 = vadd.f32 %v2307_v63, %v1623_v35  ;;  %v10387_v35 = vld [vmem:[%s15968_s0 + $0x18c] sm:$0xff]  ;;  %v3920_v22 = vunpack.c.l.b16 %v3839_v38  ;;  %v13011_v44 = vadd.f32 %v12878_v2, %v12887_v31  ;;  %v13026_v2 = vld [vmem:[%s15968_s0 + $0x28] sm:$0xf]  ;;  %v5723_v38 = vshll.u32 %v9943_v37, 16 }
 0x28e   :  { %v5712_v28 = vor.u32 %v5711_v47, %v5707_v60  ;;  %v7019_v47 = vrot.slane %v12981_v16, 5 }
 0x28f   :  { %v12983_v17 = vpop.f32.mrf.mxu0  ;;  %16040 = vst [vmem:[#allocation27_spill] sm:$0xff] %v13011_v44 }
 0x290   :  { %v2862_v58 = vpop.f32.mrf.mxu3 }
 0x291   :  { %v12992_v36 = vadd.f32 %v2862_v58, %v2401_v1  ;;  %v1627_v9 = vpop.f32.mrf.mxu1  ;;  %v13005_v1 = vld [vmem:[%s15968_s0 + $0x20] sm:$0x1] }
 0x292   :  { %4191 = vmatmul.bf16.gmra.mxu0 %v3951_v43  ;;  %v3919_v43 = vunpack.c.l.b16 %v3829_v24  ;;  %v5715_v53 = vshll.u32 %v13005_v1, 16  ;;  %v1628_v49 = vadd.f32 %v1627_v9, %v16041_v3  ;;  %v10084_v9 = vld [vmem:[%s15968_s0 + $0x18] sm:$0xe]  ;;  %v5720_v24 = vshrl.u32 %v9943_v37, 16 }
 0x293   :  { %v10116_v16 = vrot.slane %v10084_v9, 9 }
 0x294   :  { %v2309_v63 = vpop.f32.mrf.mxu2  ;;  %1666 = vmatmul.bf16.gmra.mxu1 %v10387_v35  ;;  %v5702_v35 = vor.u32 %v5701_v52, %v5698_v39  ;;  %v3952_v31 = vpack.c.b16 %v3920_v22, %v3919_v43  ;;  %v5729_v39 = vshll.u32 %v13026_v2, 16  ;;  %v10611_v43 = vld [vmem:[%s15968_s0 + $0x1c] sm:$0xf]  ;;  %v5722_v37 = vrot.slane %v5720_v24, 4 }
 0x295   :  { %v2402_v29 = vadd.f32 %v2309_v63, %v1625_v34  ;;  %v5713_v63 = vrot.slane %v5712_v28, 4  ;;  %v4403_v22 = vrot.slane %v10611_v43, 5 }
 0x296   :  { %v5703_v34 = vrot.slane %v5702_v35, 4  ;;  %v13052_v43 = vrot.slane %v5729_v39, 5  ;;  %v7020_v39 = vsel %vm11351_vm5, %v10116_v16, %v7019_v47 }
 0x297   :  { %v13007_v40 = vpop.f32.mrf.mxu0 }
 0x298   :  { %v2864_v33 = vpop.f32.mrf.mxu3 }
 0x299   :  { %v13013_v10 = vadd.f32 %v2864_v33, %v2402_v29  ;;  %2351 = vmatmul.bf16.gmra.mxu2 %v2107_v21  ;;  %v1629_v58 = vpop.f32.mrf.mxu1  ;;  %v5717_v21 = vrot.slane %v5715_v53, 5  ;;  %v5733_v29 = vshrl.u32 %v13026_v2, 16  ;;  %v5708_v53 = vsel %vm10739_vm2, %v5703_v34, %v5707_v60  ;;  %v13059_v60 = vld [vmem:[%s15968_s0 + $0x2c] sm:$0x1] }
 0x29b   :  { %v5718_v3 = vsel %vm10739_vm2, %v5713_v63, %v5717_v21  ;;  %v10612_v21 = vld [vmem:[%s15968_s0 + $0x20] sm:$0x1] }
 0x29c   :  { %v2312_v19 = vpop.f32.mrf.mxu2  ;;  %v4406_v9 = vrot.slane %v10612_v21, 5 }
 0x29d   :  { %2906 = vmatmul.bf16.gmra.mxu3 %v10443_v26  ;;  %v2403_v23 = vadd.f32 %v2312_v19, %v1628_v49  ;;  %v13041_v26 = vadd.f32 %v12905_v0, %v12924_v5  ;;  %v9589_v49 = vld [vmem:[%s15968_s0 + $0x18] sm:$0xe]  ;;  %v5725_v19 = vrot.slane %v5723_v38, 5  ;;  %v5735_v0 = vrot.slane %v5733_v29, 4  ;;  %v16043_v5 = vld [vmem:[#allocation31_spill] sm:$0xff] }
 0x29e   :  { %v9621_v63 = vrot.slane %v9589_v49, 9  ;;  %v6481_v38 = vunpack.c.l.b16 %v5718_v3  ;;  %v5739_v49 = vshll.u32 %v13059_v60, 16 }
 0x29f   :  { %v13033_v52 = vpop.f32.mrf.mxu0  ;;  %16042 = vst [vmem:[#allocation29_spill] sm:$0xff] %v13041_v26  ;;  %v7022_v26 = vrot.slane %v13005_v1, 5  ;;  %v10468_v1 = vld [vmem:[%s15968_s0 + $0x18] sm:$0xff]  ;;  %v5726_v29 = vor.u32 %v5725_v19, %v5722_v37  ;;  %v7258_v37 = vunpack.c.l.b16 %v7020_v39 }
 0x2a0   :  { %v2867_v33 = vpop.f32.mrf.mxu3 }
 0x2a1   :  { %v13043_v35 = vadd.f32 %v2867_v33, %v2403_v23  ;;  %v1632_v28 = vpop.f32.mrf.mxu1  ;;  %v1630_v23 = vadd.f32 %v1629_v58, %v16043_v5  ;;  %v7021_v33 = vrot.slane %v7019_v47, 4  ;;  %v6480_v58 = vunpack.c.l.b16 %v5708_v53 }
 0x2a2   :  { %4196 = vmatmul.bf16.gmra.mxu0 %v3952_v31  ;;  %v4405_v31 = vrot.slane %v4403_v22, 4  ;;  %v13082_v47 = vadd.f32 %v12938_v30, %v12958_v48  ;;  %v5727_v44 = vrot.slane %v5726_v29, 4  ;;  %v1633_v56 = vadd.f32 %v1632_v28, %v16045_v54 }
 0x2a3   :  { %v7023_v21 = vsel %vm11351_vm5, %v7021_v33, %v7022_v26  ;;  %v6544_v16 = vpack.c.b16 %v6481_v38, %v6480_v58  ;;  %v5741_v33 = vrot.slane %v5739_v49, 5  ;;  %v7026_v30 = vrot.slane %v13026_v2, 5 }
 0x2a4   :  { %v2314_v34 = vpop.f32.mrf.mxu2  ;;  %4819 = vmatmul.bf16.vlgmr.msra.gmra.mxu1 %v12976_v14  ;;  %v5736_v14 = vor.u32 %v5735_v0, %v13052_v43  ;;  %v4407_v53 = vsel %vm11351_vm5, %v4405_v31, %v4406_v9  ;;  %16044 = vst [vmem:[#allocation31_spill] sm:$0xff] %v13082_v47  ;;  %v7259_v0 = vunpack.c.l.b16 %v7023_v21  ;;  %v10085_v31 = vld [vmem:[%s15968_s0 + $0x24] sm:$0xe]  ;;  %v9946_v9 = vld [vmem:[%s15968_s0 + $0x30] sm:$0xf]  ;;  %v5732_v28 = vsel %vm10739_vm2, %v5727_v44, %v13052_v43 }
 0x2a5   :  { %v2404_v24 = vadd.f32 %v2314_v34, %v1630_v23  ;;  %v4404_v34 = vsel %vm11351_vm5, %v9621_v63, %v4403_v22  ;;  %v4638_v63 = vunpack.c.l.b16 %v4407_v53  ;;  %v10117_v58 = vrot.slane %v10085_v31, 9 }
 0x2a6   :  { %v5737_v26 = vrot.slane %v5736_v14, 4  ;;  %v4637_v22 = vunpack.c.l.b16 %v4404_v34  ;;  %v7322_v54 = vpack.c.b16 %v7259_v0, %v7258_v37  ;;  %v7028_v29 = vrot.slane %v7026_v30, 4  ;;  %v9590_v0 = vld [vmem:[%s15968_s0 + $0x24] sm:$0xe] }
 0x2a7   :  { %v13072_v5 = vpop.f32.mrf.mxu0  ;;  %v5744_v14 = vshrl.u32 %v9946_v9, 16  ;;  %v5747_v21 = vshll.u32 %v9946_v9, 16  ;;  %v13111_v44 = vadd.f32 %v12983_v17, %v12992_v36  ;;  %v7027_v17 = vsel %vm11351_vm5, %v10117_v58, %v7026_v30  ;;  %v10614_v30 = vld [vmem:[%s15968_s0 + $0x2c] sm:$0x1] }
 0x2a8   :  { %v2869_v23 = vpop.f32.mrf.mxu3  ;;  %v5742_v2 = vsel %vm10739_vm2, %v5737_v26, %v5741_v33  ;;  %v4700_v39 = vpack.c.b16 %v4638_v63, %v4637_v22  ;;  %v16047_v26 = vld [vmem:[#allocation4_spill] sm:$0xff]  ;;  %v4413_v58 = vrot.slane %v10614_v30, 5 }
 0x2a9   :  { %v13084_v3 = vadd.f32 %v2869_v23, %v2404_v24  ;;  %5374 = vmatmul.bf16.vlgmr.msra.gmra.mxu2 %v10468_v1  ;;  %v1634_v19 = vpop.f32.mrf.mxu1  ;;  %v13097_v1 = vld [vmem:[%s15968_s0 + $0x34] sm:$0xf]  ;;  %16046 = vst [vmem:[#allocation2_spill] sm:$0xff] %v13111_v44  ;;  %v6483_v22 = vunpack.c.l.b16 %v5742_v2  ;;  %v5746_v31 = vrot.slane %v5744_v14, 4  ;;  %v7260_v14 = vunpack.c.l.b16 %v7027_v17  ;;  %v16049_v17 = vld [vmem:[#allocation6_spill] sm:$0xff] }
 0x2aa   :  { %v5753_v23 = vshll.u32 %v13097_v1, 16  ;;  %v5757_v34 = vshrl.u32 %v13097_v1, 16  ;;  %v1635_v33 = vadd.f32 %v1634_v19, %v16047_v26  ;;  %v9622_v19 = vrot.slane %v9590_v0, 9 }
 0x2ac   :  { %v2317_v48 = vpop.f32.mrf.mxu2  ;;  %v13126_v9 = vrot.slane %v5753_v23, 5 }
 0x2ad   :  { %6664 = vmatmul.bf16.vlgmr.msra.gmra.mxu3 %v6544_v16  ;;  %v2405_v24 = vadd.f32 %v2317_v48, %v1633_v56  ;;  %v7029_v56 = vrot.slane %v13059_v60, 5  ;;  %v10613_v16 = vld [vmem:[%s15968_s0 + $0x28] sm:$0xf]  ;;  %v6482_v60 = vunpack.c.l.b16 %v5732_v28  ;;  %v5749_v48 = vrot.slane %v5747_v21, 5 }
 0x2ae   :  { %v4410_v37 = vrot.slane %v10613_v16, 5  ;;  %v10469_v28 = vld [vmem:[%s15968_s0 + $0x24] sm:$0xff]  ;;  %v13144_v16 = vadd.f32 %v13007_v40, %v13013_v10  ;;  %v13160_v40 = vld [vmem:[%s15968_s0 + $0x40] sm:$0xf] }
 0x2af   :  { %v13104_v38 = vpop.f32.mrf.mxu0  ;;  %v7030_v36 = vsel %vm11351_vm5, %v7028_v29, %v7029_v56  ;;  %v6545_v56 = vpack.c.b16 %v6483_v22, %v6482_v60  ;;  %v5750_v23 = vor.u32 %v5749_v48, %v5746_v31  ;;  %v5777_v30 = vshll.u32 %v13160_v40, 16 }
 0x2b0   :  { %v2872_v49 = vpop.f32.mrf.mxu3  ;;  %v4412_v2 = vrot.slane %v4410_v37, 4  ;;  %v7261_v21 = vunpack.c.l.b16 %v7030_v36  ;;  %16048 = vst [vmem:[#allocation4_spill] sm:$0xff] %v13144_v16 }
 0x2b1   :  { %v13113_v43 = vadd.f32 %v2872_v49, %v2405_v24  ;;  %v1637_v53 = vpop.f32.mrf.mxu1  ;;  %v5759_v24 = vrot.slane %v5757_v34, 4 }
 0x2b2   :  { %7442 = vmatmul.bf16.vlgmr.msra.gmra.mxu0 %v7322_v54  ;;  %v4414_v60 = vsel %vm11351_vm5, %v4412_v2, %v4413_v58  ;;  %v1638_v36 = vadd.f32 %v1637_v53, %v16049_v17  ;;  %v7323_v10 = vpack.c.b16 %v7261_v21, %v7260_v14  ;;  %v5781_v58 = vshrl.u32 %v13160_v40, 16  ;;  %v10615_v21 = vld [vmem:[%s15968_s0 + $0x34] sm:$0xf] }
 0x2b3   :  { %v5760_v22 = vor.u32 %v5759_v24, %v13126_v9  ;;  %v7033_v17 = vrot.slane %v13097_v1, 5 }
 0x2b4   :  { %v2319_v63 = vpop.f32.mrf.mxu2  ;;  %4824 = vmatmul.bf16.gmra.mxu1 %v4700_v39  ;;  %v13137_v39 = vld [vmem:[%s15968_s0 + $0x38] sm:$0x1] }
 0x2b5   :  { %v2406_v54 = vadd.f32 %v2319_v63, %v1635_v33  ;;  %v5763_v34 = vshll.u32 %v13137_v39, 16  ;;  %v4411_v33 = vsel %vm11351_vm5, %v9622_v19, %v4410_v37  ;;  %v9949_v63 = vld [vmem:[%s15968_s0 + $0x3c] sm:$0xf]  ;;  %v4640_v37 = vunpack.c.l.b16 %v4414_v60 }
 0x2b6   :  { %v4639_v48 = vunpack.c.l.b16 %v4411_v33  ;;  %v5761_v19 = vrot.slane %v5760_v22, 4  ;;  %v5768_v2 = vshrl.u32 %v9949_v63, 16  ;;  %v5771_v53 = vshll.u32 %v9949_v63, 16 }
 0x2b7   :  { %v13139_v29 = vpop.f32.mrf.mxu0  ;;  %v5765_v24 = vrot.slane %v5763_v34, 5  ;;  %v13175_v34 = vadd.f32 %v13033_v52, %v13043_v35  ;;  %v5783_v52 = vrot.slane %v5781_v58, 4  ;;  %v16051_v35 = vld [vmem:[#allocation8_spill] sm:$0xff] }
 0x2b8   :  { %v2874_v49 = vpop.f32.mrf.mxu3  ;;  %v4701_v14 = vpack.c.b16 %v4640_v37, %v4639_v48  ;;  %v5770_v63 = vrot.slane %v5768_v2, 4  ;;  %v5779_v48 = vrot.slane %v5777_v30, 5 }
 0x2b9   :  { %v13146_v0 = vadd.f32 %v2874_v49, %v2406_v54  ;;  %5379 = vmatmul.bf16.gmra.mxu2 %v10469_v28  ;;  %v1639_v26 = vpop.f32.mrf.mxu1  ;;  %v5751_v28 = vrot.slane %v5750_v23, 4  ;;  %v4417_v23 = vrot.slane %v10615_v21, 5  ;;  %16050 = vst [vmem:[#allocation6_spill] sm:$0xff] %v13175_v34  ;;  %v5766_v22 = vsel %vm10739_vm2, %v5761_v19, %v5765_v24  ;;  %v10616_v19 = vld [vmem:[%s15968_s0 + $0x38] sm:$0x1] }
 0x2ba   :  { %v7036_v21 = vrot.slane %v13137_v39, 5  ;;  %v4420_v24 = vrot.slane %v10616_v19, 5  ;;  %v5784_v58 = vor.u32 %v5783_v52, %v5779_v48 }
 0x2bb   :  { %v5756_v1 = vsel %vm10739_vm2, %v5751_v28, %v13126_v9  ;;  %v4419_v28 = vrot.slane %v4417_v23, 4 }
 0x2bc   :  { %v2322_v31 = vpop.f32.mrf.mxu2  ;;  %v6484_v39 = vunpack.c.l.b16 %v5756_v1 }
 0x2bd   :  { %6669 = vmatmul.bf16.gmra.mxu3 %v6545_v56  ;;  %v2407_v54 = vadd.f32 %v2322_v31, %v1638_v36  ;;  %v10086_v56 = vld [vmem:[%s15968_s0 + $0x30] sm:$0xe]  ;;  %v5773_v31 = vrot.slane %v5771_v53, 5  ;;  %v6485_v53 = vunpack.c.l.b16 %v5766_v22  ;;  %v4421_v1 = vsel %vm11351_vm5, %v4419_v28, %v4420_v24  ;;  %v13224_v28 = vld [vmem:[%s15968_s0 + $0x4c] sm:$0xf] }
 0x2be   :  { %v9591_v36 = vld [vmem:[%s15968_s0 + $0x30] sm:$0xe]  ;;  %v10118_v37 = vrot.slane %v10086_v56, 9  ;;  %v13213_v22 = vadd.f32 %v13072_v5, %v13084_v3  ;;  %v9952_v5 = vld [vmem:[%s15968_s0 + $0x48] sm:$0xf] }
 0x2bf   :  { %v13164_v49 = vpop.f32.mrf.mxu0  ;;  %v9623_v9 = vrot.slane %v9591_v36, 9  ;;  %v5774_v30 = vor.u32 %v5773_v31, %v5770_v63 }
 0x2c0   :  { %v2877_v16 = vpop.f32.mrf.mxu3  ;;  %v7034_v56 = vsel %vm11351_vm5, %v10118_v37, %v7033_v17 }
 0x2c1   :  { %v13177_v33 = vadd.f32 %v2877_v16, %v2407_v54  ;;  %v1642_v60 = vpop.f32.mrf.mxu1  ;;  %v1640_v16 = vadd.f32 %v1639_v26, %v16051_v35  ;;  %v7035_v54 = vrot.slane %v7033_v17, 4  ;;  %v10470_v26 = vld [vmem:[%s15968_s0 + $0x30] sm:$0xff]  ;;  %v6546_v17 = vpack.c.b16 %v6485_v53, %v6484_v39 }
 0x2c2   :  { %7447 = vmatmul.bf16.gmra.mxu0 %v7323_v10  ;;  %v13195_v10 = vld [vmem:[%s15968_s0 + $0x44] sm:$0x1]  ;;  %v7262_v52 = vunpack.c.l.b16 %v7034_v56  ;;  %v5775_v37 = vrot.slane %v5774_v30, 4  ;;  %v5801_v56 = vshll.u32 %v13224_v28, 16 }
 0x2c3   :  { %v7037_v36 = vsel %vm11351_vm5, %v7035_v54, %v7036_v21  ;;  %v5787_v35 = vshll.u32 %v13195_v10, 16  ;;  %v5785_v54 = vrot.slane %v5784_v58, 4  ;;  %v16052_v21 = vld [vmem:[#allocation10_spill] sm:$0xff]  ;;  %v5795_v58 = vshll.u32 %v9952_v5, 16 }
 0x2c4   :  { %v2324_v34 = vpop.f32.mrf.mxu2  ;;  %4829 = vmatmul.bf16.gmra.mxu1 %v4701_v14  ;;  %v1643_v44 = vadd.f32 %v1642_v60, %v16052_v21  ;;  %v5780_v39 = vsel %vm10739_vm2, %v5775_v37, %v5779_v48 }
 0x2c5   :  { %v2408_v2 = vadd.f32 %v2324_v34, %v1640_v16  ;;  %v4418_v34 = vsel %vm11351_vm5, %v9623_v9, %v4417_v23  ;;  %v7263_v16 = vunpack.c.l.b16 %v7037_v36  ;;  %v4642_v23 = vunpack.c.l.b16 %v4421_v1 }
 0x2c6   :  { %v4641_v47 = vunpack.c.l.b16 %v4418_v34  ;;  %v5789_v9 = vrot.slane %v5787_v35, 5  ;;  %v10617_v35 = vld [vmem:[%s15968_s0 + $0x40] sm:$0xf]  ;;  %v6486_v34 = vunpack.c.l.b16 %v5780_v39 }
 0x2c7   :  { %v13200_v14 = vpop.f32.mrf.mxu0  ;;  %v7324_v24 = vpack.c.b16 %v7263_v16, %v7262_v52  ;;  %v16053_v52 = vld [vmem:[#allocation12_spill] sm:$0xff] }
 0x2c8   :  { %v2879_v19 = vpop.f32.mrf.mxu3  ;;  %v4702_v60 = vpack.c.b16 %v4642_v23, %v4641_v47  ;;  %v5790_v53 = vsel %vm10739_vm2, %v5785_v54, %v5789_v9  ;;  %v13240_v47 = vadd.f32 %v13104_v38, %v13113_v43  ;;  %v7043_v43 = vrot.slane %v13195_v10, 5  ;;  %v13261_v10 = vld [vmem:[%s15968_s0 + $0x50] sm:$0x1] }
 0x2c9   :  { %v13215_v63 = vadd.f32 %v2879_v19, %v2408_v2  ;;  %5384 = vmatmul.bf16.gmra.mxu2 %v10470_v26  ;;  %v1644_v31 = vpop.f32.mrf.mxu1  ;;  %v7040_v2 = vrot.slane %v13160_v40, 5  ;;  %v5805_v40 = vshrl.u32 %v13224_v28, 16  ;;  %v4424_v19 = vrot.slane %v10617_v35, 5 }
 0x2ca   :  { %v1645_v16 = vadd.f32 %v1644_v31, %v16053_v52  ;;  %v6487_v37 = vunpack.c.l.b16 %v5790_v53  ;;  %v5797_v23 = vrot.slane %v5795_v58, 5  ;;  %v5803_v9 = vrot.slane %v5801_v56, 5  ;;  %v10618_v31 = vld [vmem:[%s15968_s0 + $0x44] sm:$0x1] }
 0x2cb   :  { %v7042_v38 = vrot.slane %v7040_v2, 4  ;;  %v4427_v53 = vrot.slane %v10618_v31, 5  ;;  %v5811_v35 = vshll.u32 %v13261_v10, 16 }
 0x2cc   :  { %v2327_v11 = vpop.f32.mrf.mxu2  ;;  %v6547_v56 = vpack.c.b16 %v6487_v37, %v6486_v34  ;;  %v16055_v37 = vld [vmem:[#allocation14_spill] sm:$0xff] }
 0x2cd   :  { %6674 = vmatmul.bf16.gmra.mxu3 %v6546_v17  ;;  %v2409_v3 = vadd.f32 %v2327_v11, %v1643_v44  ;;  %v10087_v11 = vld [vmem:[%s15968_s0 + $0x3c] sm:$0xe]  ;;  %v5792_v44 = vshrl.u32 %v9952_v5, 16  ;;  %v5807_v5 = vrot.slane %v5805_v40, 4 }
 0x2ce   :  { %v10119_v1 = vrot.slane %v10087_v11, 9  ;;  %v9592_v17 = vld [vmem:[%s15968_s0 + $0x3c] sm:$0xe]  ;;  %v4426_v11 = vrot.slane %v4424_v19, 4 }
 0x2cf   :  { %v13227_v26 = vpop.f32.mrf.mxu0  ;;  %v5794_v21 = vrot.slane %v5792_v44, 4  ;;  %v9624_v39 = vrot.slane %v9592_v17, 9  ;;  %v13272_v17 = vadd.f32 %v13139_v29, %v13146_v0 }
 0x2d0   :  { %v2882_v30 = vpop.f32.mrf.mxu3  ;;  %v7041_v44 = vsel %vm11351_vm5, %v10119_v1, %v7040_v2  ;;  %v4428_v2 = vsel %vm11351_vm5, %v4426_v11, %v4427_v53  ;;  %v5808_v1 = vor.u32 %v5807_v5, %v5803_v9  ;;  %v7047_v5 = vrot.slane %v13224_v28, 5 }
 0x2d1   :  { %v13242_v36 = vadd.f32 %v2882_v30, %v2409_v3  ;;  %v1647_v48 = vpop.f32.mrf.mxu1  ;;  %v7044_v30 = vsel %vm11351_vm5, %v7042_v38, %v7043_v43  ;;  %v5798_v40 = vor.u32 %v5797_v23, %v5794_v21  ;;  %16054 = vst [vmem:[#allocation8_spill] sm:$0xff] %v13272_v17  ;;  %v7264_v38 = vunpack.c.l.b16 %v7041_v44  ;;  %v10088_v44 = vld [vmem:[%s15968_s0 + $0x48] sm:$0xe] }
 0x2d2   :  { %7452 = vmatmul.bf16.gmra.mxu0 %v7324_v24  ;;  %v10471_v24 = vld [vmem:[%s15968_s0 + $0x3c] sm:$0xff]  ;;  %v7265_v34 = vunpack.c.l.b16 %v7044_v30  ;;  %v1648_v43 = vadd.f32 %v1647_v48, %v16055_v37  ;;  %v4644_v31 = vunpack.c.l.b16 %v4428_v2  ;;  %v13290_v48 = vld [vmem:[%s15968_s0 + $0x58] sm:$0xf]  ;;  %v16057_v37 = vld [vmem:[#allocation16_spill] sm:$0xff] }
 0x2d3   :  { %v5799_v0 = vrot.slane %v5798_v40, 4  ;;  %v13297_v40 = vadd.f32 %v13164_v49, %v13177_v33  ;;  %v9593_v49 = vld [vmem:[%s15968_s0 + $0x48] sm:$0xe]  ;;  %v5825_v33 = vshll.u32 %v13290_v48, 16 }
 0x2d4   :  { %v2329_v54 = vpop.f32.mrf.mxu2  ;;  %4834 = vmatmul.bf16.gmra.mxu1 %v4702_v60 }
 0x2d5   :  { %v2410_v3 = vadd.f32 %v2329_v54, %v1645_v16  ;;  %v4425_v54 = vsel %vm11351_vm5, %v9624_v39, %v4424_v19  ;;  %v9955_v19 = vld [vmem:[%s15968_s0 + $0x54] sm:$0xf]  ;;  %v7325_v39 = vpack.c.b16 %v7265_v34, %v7264_v38  ;;  %16056 = vst [vmem:[#allocation10_spill] sm:$0xff] %v13297_v40  ;;  %v5829_v34 = vshrl.u32 %v13290_v48, 16 }
 0x2d6   :  { %v4643_v23 = vunpack.c.l.b16 %v4425_v54  ;;  %v5816_v30 = vshrl.u32 %v9955_v19, 16  ;;  %v5804_v54 = vsel %vm10739_vm2, %v5799_v0, %v5803_v9  ;;  %v10120_v9 = vrot.slane %v10088_v44, 9 }
 0x2d7   :  { %v13263_v60 = vpop.f32.mrf.mxu0 }
 0x2d8   :  { %v2884_v58 = vpop.f32.mrf.mxu3  ;;  %v4703_v53 = vpack.c.b16 %v4644_v31, %v4643_v23  ;;  %v7050_v23 = vrot.slane %v13261_v10, 5  ;;  %v5831_v10 = vrot.slane %v5829_v34, 4 }
 0x2d9   :  { %v13274_v52 = vadd.f32 %v2884_v58, %v2410_v3  ;;  %5389 = vmatmul.bf16.gmra.mxu2 %v10471_v24  ;;  %v1649_v16 = vpop.f32.mrf.mxu1  ;;  %v5809_v3 = vrot.slane %v5808_v1, 4  ;;  %v5813_v24 = vrot.slane %v5811_v35, 5  ;;  %v10619_v1 = vld [vmem:[%s15968_s0 + $0x4c] sm:$0xf] }
 0x2da   :  { %v4431_v38 = vrot.slane %v10619_v1, 5 }
 0x2db   :  { %v5814_v2 = vsel %vm10739_vm2, %v5809_v3, %v5813_v24  ;;  %v5818_v3 = vrot.slane %v5816_v30, 4 }
 0x2dc   :  { %v2332_v21 = vpop.f32.mrf.mxu2  ;;  %v6489_v0 = vunpack.c.l.b16 %v5814_v2  ;;  %v4433_v1 = vrot.slane %v4431_v38, 4 }
 0x2dd   :  { %6679 = vmatmul.bf16.gmra.mxu3 %v6547_v56  ;;  %v2411_v29 = vadd.f32 %v2332_v21, %v1648_v43  ;;  %v5819_v56 = vshll.u32 %v9955_v19, 16  ;;  %v1650_v43 = vadd.f32 %v1649_v16, %v16057_v37  ;;  %v7049_v21 = vrot.slane %v7047_v5, 4  ;;  %v10620_v16 = vld [vmem:[%s15968_s0 + $0x50] sm:$0x1] }
 0x2de   :  { %v4434_v44 = vrot.slane %v10620_v16, 5  ;;  %v5827_v37 = vrot.slane %v5825_v33, 5 }
 0x2df   :  { %v13284_v58 = vpop.f32.mrf.mxu0  ;;  %v5821_v24 = vrot.slane %v5819_v56, 5  ;;  %v7051_v30 = vsel %vm11351_vm5, %v7049_v21, %v7050_v23  ;;  %v13330_v56 = vld [vmem:[%s15968_s0 + $0x5c] sm:$0x1] }
 0x2e0   :  { %v2887_v11 = vpop.f32.mrf.mxu3  ;;  %v7267_v23 = vunpack.c.l.b16 %v7051_v30 }
 0x2e1   :  { %v13299_v35 = vadd.f32 %v2887_v11, %v2411_v29  ;;  %v1652_v28 = vpop.f32.mrf.mxu1  ;;  %v6488_v29 = vunpack.c.l.b16 %v5804_v54  ;;  %v9625_v11 = vrot.slane %v9593_v49, 9  ;;  %v13334_v49 = vadd.f32 %v13200_v14, %v13215_v63 }
 0x2e2   :  { %7457 = vmatmul.bf16.gmra.mxu0 %v7325_v39  ;;  %v10472_v39 = vld [vmem:[%s15968_s0 + $0x48] sm:$0xff] }
 0x2e3   :  { %v6548_v2 = vpack.c.b16 %v6489_v0, %v6488_v29  ;;  %16058 = vst [vmem:[#allocation12_spill] sm:$0xff] %v13334_v49  ;;  %v5835_v29 = vshll.u32 %v13330_v56, 16  ;;  %v16059_v0 = vld [vmem:[#allocation18_spill] sm:$0xff] }
 0x2e4   :  { %v2334_v31 = vpop.f32.mrf.mxu2  ;;  %4839 = vmatmul.bf16.gmra.mxu1 %v4703_v53  ;;  %v7048_v53 = vsel %vm11351_vm5, %v10120_v9, %v7047_v5  ;;  %v4432_v5 = vsel %vm11351_vm5, %v9625_v11, %v4431_v38  ;;  %v5822_v9 = vor.u32 %v5821_v24, %v5818_v3  ;;  %v1653_v16 = vadd.f32 %v1652_v28, %v16059_v0 }
 0x2e5   :  { %v2412_v19 = vadd.f32 %v2334_v31, %v1650_v43  ;;  %v4435_v43 = vsel %vm11351_vm5, %v4433_v1, %v4434_v44  ;;  %v7266_v21 = vunpack.c.l.b16 %v7048_v53  ;;  %v5832_v31 = vor.u32 %v5831_v10, %v5827_v37  ;;  %v13351_v44 = vld [vmem:[%s15968_s0 + $0x64] sm:$0xf]  ;;  %v10089_v10 = vld [vmem:[%s15968_s0 + $0x54] sm:$0xe] }
 0x2e6   :  { %v4645_v63 = vunpack.c.l.b16 %v4432_v5  ;;  %v5823_v11 = vrot.slane %v5822_v9, 4  ;;  %v5837_v3 = vrot.slane %v5835_v29, 5  ;;  %v7054_v24 = vrot.slane %v13290_v48, 5  ;;  %v9594_v29 = vld [vmem:[%s15968_s0 + $0x54] sm:$0xe] }
 0x2e7   :  { %v13321_v40 = vpop.f32.mrf.mxu0  ;;  %v5833_v1 = vrot.slane %v5832_v31, 4  ;;  %v13363_v9 = vadd.f32 %v13227_v26, %v13242_v36  ;;  %v5849_v0 = vshll.u32 %v13351_v44, 16  ;;  %v10121_v26 = vrot.slane %v10089_v10, 9  ;;  %v13387_v10 = vld [vmem:[%s15968_s0 + $0x68] sm:$0x1] }
 0x2e8   :  { %v2889_v54 = vpop.f32.mrf.mxu3  ;;  %v5828_v31 = vsel %vm10739_vm2, %v5823_v11, %v5827_v37  ;;  %v7056_v36 = vrot.slane %v7054_v24, 4 }
 0x2e9   :  { %v13336_v33 = vadd.f32 %v2889_v54, %v2412_v19  ;;  %5394 = vmatmul.bf16.gmra.mxu2 %v10472_v39  ;;  %v1654_v34 = vpop.f32.mrf.mxu1  ;;  %v4646_v19 = vunpack.c.l.b16 %v4435_v43  ;;  %v9958_v39 = vld [vmem:[%s15968_s0 + $0x60] sm:$0xf]  ;;  %v7326_v54 = vpack.c.b16 %v7267_v23, %v7266_v21  ;;  %v10621_v43 = vld [vmem:[%s15968_s0 + $0x58] sm:$0xf]  ;;  %16060 = vst [vmem:[#allocation14_spill] sm:$0xff] %v13363_v9 }
 0x2ea   :  { %v5840_v53 = vshrl.u32 %v9958_v39, 16  ;;  %v5843_v30 = vshll.u32 %v9958_v39, 16  ;;  %v4438_v48 = vrot.slane %v10621_v43, 5  ;;  %v7057_v39 = vrot.slane %v13330_v56, 5 }
 0x2eb   :  { %v4704_v5 = vpack.c.b16 %v4646_v19, %v4645_v63  ;;  %v16061_v63 = vld [vmem:[#allocation20_spill] sm:$0xff]  ;;  %v9626_v43 = vrot.slane %v9594_v29, 9 }
 0x2ec   :  { %v2337_v14 = vpop.f32.mrf.mxu2  ;;  %v1655_v19 = vadd.f32 %v1654_v34, %v16061_v63  ;;  %v5845_v37 = vrot.slane %v5843_v30, 5  ;;  %v4440_v9 = vrot.slane %v4438_v48, 4  ;;  %v7055_v30 = vsel %vm11351_vm5, %v10121_v26, %v7054_v24 }
 0x2ed   :  { %6684 = vmatmul.bf16.gmra.mxu3 %v6548_v2  ;;  %v2413_v38 = vadd.f32 %v2337_v14, %v1653_v16  ;;  %v5853_v16 = vshrl.u32 %v13351_v44, 16  ;;  %v5838_v14 = vsel %vm10739_vm2, %v5833_v1, %v5837_v3  ;;  %v10473_v1 = vld [vmem:[%s15968_s0 + $0x54] sm:$0xff]  ;;  %v5851_v3 = vrot.slane %v5849_v0, 5 }
 0x2ee   :  { %v6491_v34 = vunpack.c.l.b16 %v5838_v14  ;;  %v4439_v14 = vsel %vm11351_vm5, %v9626_v43, %v4438_v48 }
 0x2ef   :  { %v13353_v28 = vpop.f32.mrf.mxu0  ;;  %v5855_v56 = vrot.slane %v5853_v16, 4  ;;  %v13401_v16 = vadd.f32 %v13263_v60, %v13274_v52 }
 0x2f0   :  { %v2892_v2 = vpop.f32.mrf.mxu3 }
 0x2f1   :  { %v13365_v21 = vadd.f32 %v2892_v2, %v2413_v38  ;;  %v1657_v23 = vpop.f32.mrf.mxu1  ;;  %v5842_v38 = vrot.slane %v5840_v53, 4  ;;  %v6490_v2 = vunpack.c.l.b16 %v5828_v31  ;;  %v5856_v26 = vor.u32 %v5855_v56, %v5851_v3 }
 0x2f2   :  { %7462 = vmatmul.bf16.gmra.mxu0 %v7326_v54  ;;  %v10622_v54 = vld [vmem:[%s15968_s0 + $0x5c] sm:$0x1] }
 0x2f3   :  { %v4441_v49 = vrot.slane %v10622_v54, 5  ;;  %v5846_v31 = vor.u32 %v5845_v37, %v5842_v38  ;;  %v16063_v37 = vld [vmem:[#allocation22_spill] sm:$0xff]  ;;  %v5857_v52 = vrot.slane %v5856_v26, 4  ;;  %v13415_v54 = vld [vmem:[%s15968_s0 + $0x70] sm:$0xf] }
 0x2f4   :  { %v2339_v11 = vpop.f32.mrf.mxu2  ;;  %4844 = vmatmul.bf16.gmra.mxu1 %v4704_v5  ;;  %v7058_v5 = vsel %vm11351_vm5, %v7056_v36, %v7057_v39  ;;  %v5859_v36 = vshll.u32 %v13387_v10, 16  ;;  %v7268_v39 = vunpack.c.l.b16 %v7055_v30  ;;  %v1658_v48 = vadd.f32 %v1657_v23, %v16063_v37  ;;  %v9595_v37 = vld [vmem:[%s15968_s0 + $0x60] sm:$0xe] }
 0x2f5   :  { %v2414_v17 = vadd.f32 %v2339_v11, %v1655_v19  ;;  %v4442_v0 = vsel %vm11351_vm5, %v4440_v9, %v4441_v49  ;;  %v6549_v19 = vpack.c.b16 %v6491_v34, %v6490_v2  ;;  %v7269_v38 = vunpack.c.l.b16 %v7058_v5  ;;  %v9961_v2 = vld [vmem:[%s15968_s0 + $0x6c] sm:$0xf] }
 0x2f6   :  { %v4647_v11 = vunpack.c.l.b16 %v4439_v14  ;;  %v4648_v43 = vunpack.c.l.b16 %v4442_v0  ;;  %v5847_v49 = vrot.slane %v5846_v31, 4  ;;  %v7061_v30 = vrot.slane %v13351_v44, 5  ;;  %v10090_v31 = vld [vmem:[%s15968_s0 + $0x60] sm:$0xe]  ;;  %v10623_v44 = vld [vmem:[%s15968_s0 + $0x64] sm:$0xf] }
 0x2f7   :  { %v13389_v53 = vpop.f32.mrf.mxu0  ;;  %v5867_v14 = vshll.u32 %v9961_v2, 16  ;;  %v5873_v0 = vshll.u32 %v13415_v54, 16 }
 0x2f8   :  { %v2894_v29 = vpop.f32.mrf.mxu3  ;;  %v4705_v23 = vpack.c.b16 %v4648_v43, %v4647_v11  ;;  %v5852_v56 = vsel %vm10739_vm2, %v5847_v49, %v5851_v3  ;;  %v7064_v11 = vrot.slane %v13387_v10, 5  ;;  %v13453_v10 = vld [vmem:[%s15968_s0 + $0x74] sm:$0x1] }
 0x2f9   :  { %v13403_v63 = vadd.f32 %v2894_v29, %v2414_v17  ;;  %5399 = vmatmul.bf16.gmra.mxu2 %v10473_v1  ;;  %v13405_v24 = vpop.f32.mrf.mxu1  ;;  %v5861_v17 = vrot.slane %v5859_v36, 5  ;;  %v7327_v1 = vpack.c.b16 %v7269_v38, %v7268_v39  ;;  %v5864_v29 = vshrl.u32 %v9961_v2, 16 }
 0x2fa   :  { %16062 = vst [vmem:[#allocation16_spill] sm:$0xff] %v13405_v24  ;;  %v4445_v39 = vrot.slane %v10623_v44, 5  ;;  %v5877_v38 = vshrl.u32 %v13415_v54, 16  ;;  %v9627_v2 = vrot.slane %v9595_v37, 9 }
 0x2fb   :  { %v5862_v3 = vsel %vm10739_vm2, %v5857_v52, %v5861_v17  ;;  %v5875_v52 = vrot.slane %v5873_v0, 5  ;;  %v10474_v17 = vld [vmem:[%s15968_s0 + $0x60] sm:$0xff] }
 0x2fc   :  { %v2342_v9 = vpop.f32.mrf.mxu2  ;;  %v6493_v49 = vunpack.c.l.b16 %v5862_v3 }
 0x2fd   :  { %6689 = vmatmul.bf16.gmra.mxu3 %v6549_v19  ;;  %v2415_v60 = vadd.f32 %v2342_v9, %v1658_v48  ;;  %v13428_v19 = vadd.f32 %v13284_v58, %v13299_v35  ;;  %v6492_v58 = vunpack.c.l.b16 %v5852_v56  ;;  %v10122_v35 = vrot.slane %v10090_v31, 9  ;;  %v10624_v56 = vld [vmem:[%s15968_s0 + $0x68] sm:$0x1] }
 0x2fe   :  { %v7063_v48 = vrot.slane %v7061_v30, 4  ;;  %v5866_v9 = vrot.slane %v5864_v29, 4  ;;  %v5879_v31 = vrot.slane %v5877_v38, 4  ;;  %v13465_v38 = vadd.f32 %v13321_v40, %v13336_v33 }
 0x2ff   :  { %v13417_v34 = vpop.f32.mrf.mxu0  ;;  %v7062_v29 = vsel %vm11351_vm5, %v10122_v35, %v7061_v30  ;;  %v6550_v3 = vpack.c.b16 %v6493_v49, %v6492_v58  ;;  %v16068_v58 = vld [vmem:[#allocation26_spill] sm:$0xff] }
 0x300   :  { %v2897_v5 = vpop.f32.mrf.mxu3  ;;  %v5880_v35 = vor.u32 %v5879_v31, %v5875_v52  ;;  %v13487_v31 = vld [vmem:[%s15968_s0 + $0x7c] sm:$0xf] }
 0x301   :  { %v13430_v26 = vadd.f32 %v2897_v5, %v2415_v60  ;;  %v1662_v36 = vpop.f32.mrf.mxu1  ;;  %v5869_v60 = vrot.slane %v5867_v14, 5  ;;  %v4448_v5 = vrot.slane %v10624_v56, 5  ;;  %v7065_v14 = vsel %vm11351_vm5, %v7063_v48, %v7064_v11 }
 0x302   :  { %7467 = vmatmul.bf16.gmra.mxu0 %v7327_v1  ;;  %v4447_v1 = vrot.slane %v4445_v39, 4  ;;  %v4446_v56 = vsel %vm11351_vm5, %v9627_v2, %v4445_v39  ;;  %v5883_v48 = vshll.u32 %v13453_v10, 16  ;;  %v7270_v11 = vunpack.c.l.b16 %v7062_v29  ;;  %v10091_v39 = vld [vmem:[%s15968_s0 + $0x6c] sm:$0xe] }
 0x303   :  { %v5870_v44 = vor.u32 %v5869_v60, %v5866_v9  ;;  %v1663_v49 = vadd.f32 %v1662_v36, %v16068_v58  ;;  %v4649_v60 = vunpack.c.l.b16 %v4446_v56  ;;  %v9964_v36 = vld [vmem:[%s15968_s0 + $0x78] sm:$0xf]  ;;  %v5897_v58 = vshll.u32 %v13487_v31, 16 }
 0x304   :  { %v13442_v43 = vpop.f32.mrf.mxu2  ;;  %4849 = vmatmul.bf16.gmra.mxu1 %v4705_v23  ;;  %v4449_v30 = vsel %vm11351_vm5, %v4447_v1, %v4448_v5  ;;  %v7068_v5 = vrot.slane %v13415_v54, 5 }
 0x305   :  { %16064 = vst [vmem:[#allocation18_spill] sm:$0xff] %v13442_v43  ;;  %v4650_v40 = vunpack.c.l.b16 %v4449_v30 }
 0x307   :  { %v13455_v23 = vpop.f32.mrf.mxu0 }
 0x308   :  { %16065 = vst [vmem:[#allocation20_spill] sm:$0xff] %v13455_v23  ;;  %v13461_v0 = vpop.f32.mrf.mxu3  ;;  %v7271_v23 = vunpack.c.l.b16 %v7065_v14  ;;  %v4706_v14 = vpack.c.b16 %v4650_v40, %v4649_v60  ;;  %v10475_v40 = vld [vmem:[%s15968_s0 + $0x6c] sm:$0xff] }
 0x309   :  { %16066 = vst [vmem:[#allocation22_spill] sm:$0xff] %v13461_v0  ;;  %5404 = vmatmul.bf16.gmra.mxu2 %v10474_v17  ;;  %v13467_v37 = vpop.f32.mrf.mxu1  ;;  %v5871_v17 = vrot.slane %v5870_v44, 4  ;;  %v5885_v0 = vrot.slane %v5883_v48, 5  ;;  %v13491_v44 = vadd.f32 %v13353_v28, %v13365_v21  ;;  %v9596_v28 = vld [vmem:[%s15968_s0 + $0x6c] sm:$0xe]  ;;  %v5888_v21 = vshrl.u32 %v9964_v36, 16 }
 0x30a   :  { %16067 = vst [vmem:[#allocation41_spill] sm:$0xff] %v13467_v37  ;;  %v5881_v37 = vrot.slane %v5880_v35, 4  ;;  %v7328_v2 = vpack.c.b16 %v7271_v23, %v7270_v11  ;;  %v10625_v35 = vld [vmem:[%s15968_s0 + $0x70] sm:$0xf]  ;;  %v5891_v11 = vshll.u32 %v9964_v36, 16 }
 0x30b   :  { %v5876_v54 = vsel %vm10739_vm2, %v5871_v17, %v5875_v52  ;;  %v4452_v48 = vrot.slane %v10625_v35, 5  ;;  %v7070_v52 = vrot.slane %v7068_v5, 4  ;;  %v9628_v17 = vrot.slane %v9596_v28, 9 }
 0x30c   :  { %v2347_v9 = vpop.f32.mrf.mxu2  ;;  %v5886_v30 = vsel %vm10739_vm2, %v5881_v37, %v5885_v0  ;;  %v6494_v37 = vunpack.c.l.b16 %v5876_v54  ;;  %v5899_v35 = vrot.slane %v5897_v58, 5 }
 0x30d   :  { %6694 = vmatmul.bf16.gmra.mxu3 %v6550_v3  ;;  %v2417_v33 = vadd.f32 %v2347_v9, %v1663_v49  ;;  %v10123_v3 = vrot.slane %v10091_v39, 9  ;;  %v5901_v49 = vshrl.u32 %v13487_v31, 16  ;;  %v7071_v9 = vrot.slane %v13453_v10, 5 }
 0x30e   :  { %v6495_v60 = vunpack.c.l.b16 %v5886_v30  ;;  %v4454_v39 = vrot.slane %v4452_v48, 4  ;;  %v5890_v10 = vrot.slane %v5888_v21, 4 }
 0x30f   :  { %v13478_v1 = vpop.f32.mrf.mxu0  ;;  %v7072_v30 = vsel %vm11351_vm5, %v7070_v52, %v7071_v9 }
 0x310   :  { %v2902_v29 = vpop.f32.mrf.mxu3  ;;  %v6551_v21 = vpack.c.b16 %v6495_v60, %v6494_v37 }
 0x311   :  { %v13493_v23 = vadd.f32 %v2902_v29, %v2417_v33  ;;  %v1667_v56 = vpop.f32.mrf.mxu1  ;;  %v7069_v33 = vsel %vm11351_vm5, %v10123_v3, %v7068_v5  ;;  %v5893_v29 = vrot.slane %v5891_v11, 5  ;;  %v9966_v5 = vld [vmem:[%s15968_s0 + $0x80] sm:$0x1]  ;;  %v4453_v11 = vsel %vm11351_vm5, %v9628_v17, %v4452_v48 }
 0x312   :  { %7472 = vmatmul.bf16.gmra.mxu0 %v7328_v2  ;;  %v10626_v2 = vld [vmem:[%s15968_s0 + $0x74] sm:$0x1]  ;;  %v7272_v28 = vunpack.c.l.b16 %v7069_v33  ;;  %v4651_v37 = vunpack.c.l.b16 %v4453_v11 }
 0x313   :  { %v4455_v36 = vrot.slane %v10626_v2, 5  ;;  %v5894_v52 = vor.u32 %v5893_v29, %v5890_v10  ;;  %v5907_v2 = vshll.u32 %v9966_v5, 16  ;;  %v7075_v29 = vrot.slane %v13487_v31, 5 }
 0x314   :  { %v13508_v0 = vpop.f32.mrf.mxu2  ;;  %4854 = vmatmul.bf16.gmra.mxu1 %v4706_v14  ;;  %v5903_v14 = vrot.slane %v5901_v49, 4  ;;  %v7273_v49 = vunpack.c.l.b16 %v7072_v30 }
 0x315   :  { %16069 = vst [vmem:[#allocation26_spill] sm:$0xff] %v13508_v0  ;;  %v13529_v0 = vadd.f32 %v13389_v53, %v13403_v63  ;;  %v4456_v58 = vsel %vm11351_vm5, %v4454_v39, %v4455_v36  ;;  %v16073_v53 = vld [vmem:[#allocation30_spill] sm:$0xff]  ;;  %v5895_v17 = vrot.slane %v5894_v52, 4  ;;  %v5909_v36 = vrot.slane %v5907_v2, 5 }
 0x316   :  { %v5904_v9 = vor.u32 %v5903_v14, %v5899_v35  ;;  %v1668_v63 = vadd.f32 %v1667_v56, %v16073_v53  ;;  %v4652_v60 = vunpack.c.l.b16 %v4456_v58  ;;  %v7329_v56 = vpack.c.b16 %v7273_v49, %v7272_v28  ;;  %v10092_v28 = vld [vmem:[%s15968_s0 + $0x78] sm:$0xe] }
 0x317   :  { %v13518_v54 = vpop.f32.mrf.mxu0  ;;  %16072 = vst [vmem:[#allocation44_spill] sm:$0xff] %v13529_v0  ;;  %v5900_v11 = vsel %vm10739_vm2, %v5895_v17, %v5899_v35  ;;  %v10124_v49 = vrot.slane %v10092_v28, 9  ;;  %v7077_v52 = vrot.slane %v7075_v29, 4  ;;  %v10476_v35 = vld [vmem:[%s15968_s0 + $0x78] sm:$0xff] }
 0x318   :  { %16070 = vst [vmem:[#allocation42_spill] sm:$0xff] %v13518_v54  ;;  %v13525_v3 = vpop.f32.mrf.mxu3  ;;  %v10681_v54 = vmov 0   ;;  %v5905_v39 = vrot.slane %v5904_v9, 4  ;;  %v4707_v30 = vpack.c.b16 %v4652_v60, %v4651_v37  ;;  %v7078_v9 = vrot.slane %v9966_v5, 5  ;;  %v16079_v17 = vld [vmem:[#allocation33_spill] sm:$0xff] }
 0x319   :  { %16071 = vst [vmem:[#allocation43_spill] sm:$0xff] %v13525_v3  ;;  %5409 = vmatmul.bf16.gmra.mxu2 %v10475_v40  ;;  %v13540_v40 = vpop.f32.mrf.mxu1  ;;  %v6496_v2 = vunpack.c.l.b16 %v5900_v11 }
 0x31a   :  { %7870 = vst [vmem:[%s15971_s4 + $0xc] sm:$0xf] %v10681_v54  ;;  %v5910_v58 = vsel %vm10739_vm2, %v5905_v39, %v5909_v36 }
 0x31b   :  { %16074 = vst [vmem:[#allocation30_spill] sm:$0xff] %v13540_v40  ;;  %v6497_v5 = vunpack.c.l.b16 %v5910_v58  ;;  %v13658_v58 = vadd.f32 %v13478_v1, %v13493_v23  ;;  %v13676_v1 = vld [vmem:[%s15970_s3] ss:$0 sm:$0xff] }
 0x31c   :  { %7867 = vst [vmem:[%s15971_s4] sm:$0xf] %v10681_v54  ;;  %v2352_v48 = vpop.f32.mrf.mxu2  ;;  %v16081_v23 = vld [vmem:[#allocation34_spill] sm:$0xff] }
 0x31d   :  { %7868 = vst [vmem:[%s15971_s4 + $0x4] sm:$0xf] %v10681_v54  ;;  %6699 = vmatmul.bf16.gmra.mxu3 %v6551_v21  ;;  %v2419_v33 = vadd.f32 %v2352_v48, %v1668_v63  ;;  %v13574_v21 = vadd.f32 %v13417_v34, %v13430_v26  ;;  %v7076_v63 = vsel %vm11351_vm5, %v10124_v49, %v7075_v29 }
 0x31e   :  { %7869 = vst [vmem:[%s15971_s4 + $0x8] sm:$0x1] %v10681_v54  ;;  %v7079_v48 = vsel %vm11351_vm5, %v7077_v52, %v7078_v9  ;;  %v6552_v60 = vpack.c.b16 %v6497_v5, %v6496_v2  ;;  %v13663_v52 = vld [vmem:[%s15969_s2] ss:$0 sm:$0xff] }
 0x31f   :  { %7871 = vst [vmem:[%s15971_s4 + $0x10] sm:$0xf] %v10681_v54  ;;  %v13558_v10 = vpop.f32.mrf.mxu0 }
 0x320   :  { %7872 = vst [vmem:[%s15971_s4 + $0x14] sm:$0x1] %v10681_v54  ;;  %v2907_v14 = vpop.f32.mrf.mxu3 }
 0x321   :  { %7873 = vst [vmem:[%s15971_s4 + $0x18] sm:$0xf] %v10681_v54  ;;  %v13576_v31 = vadd.f32 %v2907_v14, %v2419_v33  ;;  %v4820_v26 = vpop.f32.mrf.mxu1  ;;  %v7274_v33 = vunpack.c.l.b16 %v7076_v63 }
 0x322   :  { %16075 = vst [vmem:[#allocation45_spill] sm:$0xff] %v13574_v21  ;;  %7477 = vmatmul.bf16.gmra.mxu0 %v7329_v56  ;;  %v7275_v56 = vunpack.c.l.b16 %v7079_v48  ;;  %v4980_v39 = vadd.f32 %v4820_v26, %v16079_v17  ;;  %v10095_v21 = vld [vmem:[%s15968_s0 + $0x9c] sm:$0xe] }
 0x323   :  { %7874 = vst [vmem:[%s15971_s4 + $0x1c] sm:$0xf] %v10681_v54 }
 0x324   :  { %7875 = vst [vmem:[%s15971_s4 + $0x20] sm:$0x1] %v10681_v54  ;;  %v13590_v34 = vpop.f32.mrf.mxu2  ;;  %4859 = vmatmul.bf16.gmra.mxu1 %v4707_v30  ;;  %v7330_v14 = vpack.c.b16 %v7275_v56, %v7274_v33 }
 0x325   :  { %16076 = vst [vmem:[#allocation46_spill] sm:$0xff] %v13590_v34 }
 0x326   :  { %7876 = vst [vmem:[%s15971_s4 + $0x24] sm:$0xf] %v10681_v54 }
 0x327   :  { %7877 = vst [vmem:[%s15971_s4 + $0x28] sm:$0xf] %v10681_v54  ;;  %v13607_v53 = vpop.f32.mrf.mxu0 }
 0x328   :  { %7878 = vst [vmem:[%s15971_s4 + $0x2c] sm:$0x1] %v10681_v54  ;;  %v13617_v37 = vpop.f32.mrf.mxu3 }
 0x329   :  { %16077 = vst [vmem:[#allocation47_spill] sm:$0xff] %v13607_v53  ;;  %5414 = vmatmul.bf16.gmra.mxu2 %v10476_v35  ;;  %v4822_v30 = vpop.f32.mrf.mxu1 }
 0x32a   :  { %7879 = vst [vmem:[%s15971_s4 + $0x30] sm:$0xf] %v10681_v54  ;;  %v4981_v26 = vadd.f32 %v4822_v30, %v16081_v23 }
 0x32b   :  { %16078 = vst [vmem:[#allocation48_spill] sm:$0xff] %v13617_v37 }
 0x32c   :  { %7880 = vst [vmem:[%s15971_s4 + $0x34] sm:$0xf] %v10681_v54  ;;  %v5375_v36 = vpop.f32.mrf.mxu2 }
 0x32d   :  { %7881 = vst [vmem:[%s15971_s4 + $0x38] sm:$0x1] %v10681_v54  ;;  %6704 = vmatmul.bf16.gmra.mxu3 %v6552_v60  ;;  %v5535_v29 = vadd.f32 %v5375_v36, %v4980_v39 }
 0x32e   :  { %7882 = vst [vmem:[%s15971_s4 + $0x3c] sm:$0xf] %v10681_v54 }
 0x32f   :  { %7883 = vst [vmem:[%s15971_s4 + $0x40] sm:$0xf] %v10681_v54  ;;  %v7443_v28 = vpop.f32.mrf.mxu0 }
 0x330   :  { %7884 = vst [vmem:[%s15971_s4 + $0x44] sm:$0x1] %v10681_v54  ;;  %v6665_v11 = vpop.f32.mrf.mxu3 }
 0x331   :  { %7885 = vst [vmem:[%s15971_s4 + $0x48] sm:$0xf] %v10681_v54  ;;  %v6825_v49 = vadd.f32 %v6665_v11, %v5535_v29 }
 0x332   :  { %7886 = vst [vmem:[%s15971_s4 + $0x4c] sm:$0xf] %v10681_v54  ;;  %7482 = vmatmul.bf16.gmra.mxu0 %v7330_v14 }
 0x333   :  { %7887 = vst [vmem:[%s15971_s4 + $0x50] sm:$0x1] %v10681_v54  ;;  %v7603_v9 = vadd.f32 %v7443_v28, %v6825_v49  ;;  %v10196_v49 = vld [vmem:[%s15971_s4 + $0xc] sm:$0xf] }
 0x334   :  { %7888 = vst [vmem:[%s15971_s4 + $0x54] sm:$0xf] %v10681_v54  ;;  %v5377_v35 = vpop.f32.mrf.mxu2 }
 0x335   :  { %16080 = vst [vmem:[#allocation33_spill] sm:$0xff] %v13658_v58  ;;  %v7671_v2 = vmul.f32 %v13663_v52, %v7603_v9  ;;  %v5536_v5 = vadd.f32 %v5377_v35, %v4981_v26  ;;  %v13748_v9 = vadd.f32 %v13558_v10, %v13576_v31 }
 0x336   :  { %7889 = vst [vmem:[%s15971_s4 + $0x58] sm:$0xf] %v10681_v54 }
 0x337   :  { %7890 = vst [vmem:[%s15971_s4 + $0x5c] sm:$0x1] %v10681_v54  ;;  %v7739_v63 = vadd.f32 %v13676_v1, %v7671_v2  ;;  %v7445_v56 = vpop.f32.mrf.mxu0 }
 0x338   :  { %7891 = vst [vmem:[%s15971_s4 + $0x60] sm:$0xf] %v10681_v54  ;;  %v6667_v48 = vpop.f32.mrf.mxu3 }
 0x339   :  { %7892 = vst [vmem:[%s15971_s4 + $0x64] sm:$0xf] %v10681_v54  ;;  %v7803_v60 = vmax.f32 %v7739_v63, 0.0  ;;  %v6826_v33 = vadd.f32 %v6667_v48, %v5536_v5 }
 0x33a   :  { %7893 = vst [vmem:[%s15971_s4 + $0x68] sm:$0x1] %v10681_v54 }
 0x33b   :  { %7894 = vst [vmem:[%s15971_s4 + $0x6c] sm:$0xf] %v10681_v54  ;;  %v7975_v17 = vpack.c.bf16 %v7803_v60, %v7803_v60  ;;  %v7604_v39 = vadd.f32 %v7445_v56, %v6826_v33  ;;  %v9967_v33 = vld [vmem:[%s15968_s0 + $0x84] sm:$0xf]  ;;  %v9968_v56 = vld [vmem:[%s15968_s0 + $0x88] sm:$0xf] }
 0x33c   :  { %7895 = vst [vmem:[%s15971_s4 + $0x70] sm:$0xf] %v10681_v54 }
 0x33d   :  { %7896 = vst [vmem:[%s15971_s4 + $0x74] sm:$0x1] %v10681_v54  ;;  %v8043_v36 = vshrl.u32 %v7975_v17, 16  ;;  %v7672_v29 = vmul.f32 %v13663_v52, %v7604_v39  ;;  %v8046_v30 = vshll.u32 %v7975_v17, 16  ;;  %v5912_v39 = vshrl.u32 %v9967_v33, 16 }
 0x33e   :  { %7897 = vst [vmem:[%s15971_s4 + $0x78] sm:$0xf] %v10681_v54 }
 0x33f   :  { %7898 = vst [vmem:[%s15971_s4 + $0x7c] sm:$0xf] %v10681_v54  ;;  %v8045_v14 = vrot.slane %v8043_v36, 7  ;;  %v7740_v28 = vadd.f32 %v13676_v1, %v7672_v29  ;;  %v5915_v36 = vshll.u32 %v9967_v33, 16  ;;  %v5921_v29 = vshll.u32 %v9968_v56, 16 }
 0x340   :  { %7899 = vst [vmem:[%s15971_s4 + $0x80] sm:$0x1] %v10681_v54 }
 0x341   :  { %7900 = vst [vmem:[%s15971_s4 + $0x84] sm:$0xf] %v10681_v54  ;;  %v8048_v23 = vor.u32 %v8046_v30, %v8045_v14  ;;  %v7804_v26 = vmax.f32 %v7740_v28, 0.0  ;;  %v8049_v48 = vrot.slane %v8045_v14, 4  ;;  %v5925_v14 = vshrl.u32 %v9968_v56, 16 }
 0x342   :  { %7901 = vst [vmem:[%s15971_s4 + $0x88] sm:$0xf] %v10681_v54  ;;  %v5914_v30 = vrot.slane %v5912_v39, 4  ;;  %v5917_v28 = vrot.slane %v5915_v36, 5  ;;  %v10628_v36 = vld [vmem:[%s15968_s0 + $0x80] sm:$0x1] }
 0x343   :  { %7902 = vst [vmem:[%s15971_s4 + $0x8c] sm:$0x1] %v10681_v54  ;;  %v8687_v35 = vsel %vm13735_vm8, %v8048_v23, %v10196_v49  ;;  %v7976_v10 = vpack.c.bf16 %v7804_v26, %v7804_v26  ;;  %v5923_v49 = vrot.slane %v5921_v29, 5  ;;  %v9969_v23 = vld [vmem:[%s15968_s0 + $0x8c] sm:$0x1]  ;;  %v5927_v26 = vrot.slane %v5925_v14, 4 }
 0x344   :  { %7903 = vst [vmem:[%s15971_s4 + $0x90] sm:$0xf] %v10681_v54  ;;  %v4462_v29 = vrot.slane %v10628_v36, 5 }
 0x345   :  { %7904 = vst [vmem:[%s15971_s4 + $0x94] sm:$0xf] %v10681_v54  ;;  %v8051_v31 = vshrl.u32 %v7976_v10, 16  ;;  %v8054_v5 = vshll.u32 %v7976_v10, 16 }
 0x346   :  { %16084 = vst [vmem:[#allocation34_spill] sm:$0xff] %v13748_v9 }
 0x347   :  { %7905 = vst [vmem:[%s15971_s4 + $0x98] sm:$0x1] %v10681_v54  ;;  %v13779_v2 = vrot.slane %v8051_v31, 7  ;;  %v5918_v31 = vor.u32 %v5917_v28, %v5914_v30 }
 0x348   :  { %7906 = vst [vmem:[%s15971_s4 + $0x9c] sm:$0xf] %v10681_v54 }
 0x349   :  { %7907 = vst [vmem:[%s15971_s4 + $0xa0] sm:$0xf] %v10681_v54  ;;  %v8056_v60 = vor.u32 %v8054_v5, %v13779_v2  ;;  %v5931_v5 = vshll.u32 %v9969_v23, 16  ;;  %v5919_v14 = vrot.slane %v5918_v31, 4 }
 0x34a   :  { %10197 = vst [vmem:[%s15971_s4 + $0xc] sm:$0xf] %v8687_v35  ;;  %v10627_v35 = vld [vmem:[%s15968_s0 + $0x7c] sm:$0xf] }
 0x34b   :  { %7908 = vst [vmem:[%s15971_s4 + $0xa4] sm:$0x1] %v10681_v54  ;;  %v13811_v17 = vsel %vm13786_vm11, %v8049_v48, %v8056_v60  ;;  %v4459_v10 = vrot.slane %v10627_v35, 5  ;;  %v9597_v48 = vld [vmem:[%s15968_s0 + $0x78] sm:$0xe]  ;;  %v5928_v60 = vor.u32 %v5927_v26, %v5923_v49  ;;  %v5933_v28 = vrot.slane %v5931_v5, 5 }
 0x34c   :  { %7909 = vst [vmem:[%s15971_s4 + $0xa8] sm:$0xf] %v10681_v54  ;;  %v9629_v33 = vrot.slane %v9597_v48, 9  ;;  %v10093_v26 = vld [vmem:[%s15968_s0 + $0x84] sm:$0xe]  ;;  %v5924_v48 = vsel %vm10739_vm2, %v5919_v14, %v5923_v49  ;;  %v7082_v49 = vrot.slane %v9968_v56, 5 }
 0x34d   :  { %7910 = vst [vmem:[%s15971_s4 + $0xac] sm:$0xf] %v10681_v54  ;;  %v4461_v39 = vrot.slane %v4459_v10, 4  ;;  %v5929_v30 = vrot.slane %v5928_v60, 4  ;;  %v10125_v60 = vrot.slane %v10093_v26, 9  ;;  %v6498_v37 = vunpack.c.l.b16 %v5924_v48  ;;  %v10477_v14 = vld [vmem:[%s15968_s0 + $0x84] sm:$0xff] }
 0x34e   :  { %7911 = vst [vmem:[%s15971_s4 + $0xb0] sm:$0x1] %v10681_v54  ;;  %v4460_v35 = vsel %vm11351_vm5, %v9629_v33, %v4459_v10  ;;  %v4825_v10 = vpop.f32.mrf.mxu1  ;;  %v7084_v56 = vrot.slane %v7082_v49, 4  ;;  %5419 = vmatmul.bf16.gmra.mxu2 %v10477_v14  ;;  %v13910_v48 = vld [vmem:[%s15968_s0 + $0x94] sm:$0xf] }
 0x34f   :  { %7912 = vst [vmem:[%s15971_s4 + $0xb4] sm:$0xf] %v10681_v54  ;;  %v4463_v31 = vsel %vm11351_vm5, %v4461_v39, %v4462_v29  ;;  %v4653_v5 = vunpack.c.l.b16 %v4460_v35  ;;  %v5934_v53 = vsel %vm10739_vm2, %v5929_v30, %v5933_v28  ;;  %v7085_v39 = vrot.slane %v9969_v23, 5  ;;  %v7448_v30 = vpop.f32.mrf.mxu0 }
 0x350   :  { %7913 = vst [vmem:[%s15971_s4 + $0xb8] sm:$0xf] %v10681_v54  ;;  %v4654_v36 = vunpack.c.l.b16 %v4463_v31  ;;  %v6499_v33 = vunpack.c.l.b16 %v5934_v53  ;;  %v7083_v53 = vsel %vm11351_vm5, %v10125_v60, %v7082_v49  ;;  %v4982_v26 = vadd.f32 %v4825_v10, %v11946_v57  ;;  %v9970_v31 = vld [vmem:[%s15968_s0 + $0x90] sm:$0xf]  ;;  %v5380_v60 = vpop.f32.mrf.mxu2 }
 0x351   :  { %7914 = vst [vmem:[%s15971_s4 + $0xbc] sm:$0x1] %v10681_v54  ;;  %v7276_v23 = vunpack.c.l.b16 %v7083_v53  ;;  %v5945_v57 = vshll.u32 %v13910_v48, 16  ;;  %v5949_v10 = vshrl.u32 %v13910_v48, 16 }
 0x352   :  { %7915 = vst [vmem:[%s15971_s4 + $0xc0] sm:$0xf] %v10681_v54  ;;  %v4708_v29 = vpack.c.b16 %v4654_v36, %v4653_v5  ;;  %v6553_v28 = vpack.c.b16 %v6499_v33, %v6498_v37  ;;  %v7086_v37 = vsel %vm11351_vm5, %v7084_v56, %v7085_v39  ;;  %v6670_v5 = vpop.f32.mrf.mxu3  ;;  %v5936_v36 = vshrl.u32 %v9970_v31, 16 }
 0x353   :  { %7916 = vst [vmem:[%s15971_s4 + $0xc4] sm:$0xf] %v10681_v54  ;;  %v7277_v35 = vunpack.c.l.b16 %v7086_v37  ;;  %v5939_v33 = vshll.u32 %v9970_v31, 16  ;;  %v5537_v39 = vadd.f32 %v5380_v60, %v4982_v26  ;;  %v5947_v53 = vrot.slane %v5945_v57, 5  ;;  %v9598_v57 = vld [vmem:[%s15968_s0 + $0x84] sm:$0xe] }
 0x354   :  { %7917 = vst [vmem:[%s15971_s4 + $0xc8] sm:$0x1] %v10681_v54  ;;  %4864 = vmatmul.bf16.gmra.mxu1 %v4708_v29  ;;  %6709 = vmatmul.bf16.gmra.mxu3 %v6553_v28  ;;  %v5938_v14 = vrot.slane %v5936_v36, 4  ;;  %v5951_v56 = vrot.slane %v5949_v10, 4  ;;  %v9630_v10 = vrot.slane %v9598_v57, 9 }
 0x355   :  { %7918 = vst [vmem:[%s15971_s4 + $0xcc] sm:$0xf] %v10681_v54  ;;  %v7331_v49 = vpack.c.b16 %v7277_v35, %v7276_v23  ;;  %v5941_v28 = vrot.slane %v5939_v33, 5  ;;  %v6827_v37 = vadd.f32 %v6670_v5, %v5537_v39  ;;  %v13933_v23 = vld [vmem:[%s15968_s0 + $0x98] sm:$0x1] }
 0x356   :  { %7919 = vst [vmem:[%s15971_s4 + $0xd0] sm:$0xf] %v10681_v54  ;;  %v4827_v29 = vpop.f32.mrf.mxu1  ;;  %v10629_v35 = vld [vmem:[%s15968_s0 + $0x88] sm:$0xf]  ;;  %v5952_v36 = vor.u32 %v5951_v56, %v5947_v53  ;;  %v5955_v5 = vshll.u32 %v13933_v23, 16 }
 0x357   :  { %7920 = vst [vmem:[%s15971_s4 + $0xd4] sm:$0x1] %v10681_v54  ;;  %7487 = vmatmul.bf16.gmra.mxu0 %v7331_v49  ;;  %v7450_v26 = vpop.f32.mrf.mxu0  ;;  %v4466_v31 = vrot.slane %v10629_v35, 5  ;;  %v5942_v60 = vor.u32 %v5941_v28, %v5938_v14  ;;  %v7605_v33 = vadd.f32 %v7448_v30, %v6827_v37  ;;  %v10630_v39 = vld [vmem:[%s15968_s0 + $0x8c] sm:$0x1]  ;;  %v4983_v56 = vadd.f32 %v4827_v29, %v11971_v42 }
 0x358   :  { %7921 = vst [vmem:[%s15971_s4 + $0xd8] sm:$0xf] %v10681_v54  ;;  %v4469_v14 = vrot.slane %v10630_v39, 5  ;;  %v5953_v37 = vrot.slane %v5952_v36, 4  ;;  %v5957_v35 = vrot.slane %v5955_v5, 5 }
 0x359   :  { %7922 = vst [vmem:[%s15971_s4 + $0xdc] sm:$0xf] %v10681_v54  ;;  %v4468_v49 = vrot.slane %v4466_v31, 4  ;;  %v5943_v28 = vrot.slane %v5942_v60, 4  ;;  %v7673_v30 = vmul.f32 %v13663_v52, %v7605_v33  ;;  %v10094_v57 = vld [vmem:[%s15968_s0 + $0x90] sm:$0xe]  ;;  %v5382_v60 = vpop.f32.mrf.mxu2  ;;  %v4467_v9 = vsel %vm11351_vm5, %v9630_v10, %v4466_v31 }
 0x35a   :  { %7923 = vst [vmem:[%s15971_s4 + $0xe0] sm:$0x1] %v10681_v54  ;;  %v6672_v39 = vpop.f32.mrf.mxu3  ;;  %v10126_v29 = vrot.slane %v10094_v57, 9  ;;  %v5538_v5 = vadd.f32 %v5382_v60, %v4983_v56  ;;  %v4655_v34 = vunpack.c.l.b16 %v4467_v9  ;;  %v7092_v57 = vrot.slane %v13933_v23, 5 }
 0x35b   :  { %7924 = vst [vmem:[%s15971_s4 + $0xe4] sm:$0xf] %v10681_v54  ;;  %v4470_v33 = vsel %vm11351_vm5, %v4468_v49, %v4469_v14  ;;  %v5948_v42 = vsel %vm10739_vm2, %v5943_v28, %v5947_v53  ;;  %v7741_v36 = vadd.f32 %v13676_v1, %v7673_v30  ;;  %v5958_v53 = vsel %vm10739_vm2, %v5953_v37, %v5957_v35  ;;  %v10478_v30 = vld [vmem:[%s15968_s0 + $0x90] sm:$0xff] }
 0x35c   :  { %7925 = vst [vmem:[%s15971_s4 + $0xe8] sm:$0xf] %v10681_v54  ;;  %v4656_v40 = vunpack.c.l.b16 %v4470_v33  ;;  %v6500_v10 = vunpack.c.l.b16 %v5948_v42  ;;  %v7089_v49 = vrot.slane %v13910_v48, 5  ;;  %v6828_v9 = vadd.f32 %v6672_v39, %v5538_v5 }
 0x35d   :  { %7926 = vst [vmem:[%s15971_s4 + $0xec] sm:$0x1] %v10681_v54  ;;  %v7805_v14 = vmax.f32 %v7741_v36, 0.0  ;;  %v6501_v37 = vunpack.c.l.b16 %v5958_v53  ;;  %v8058_v36 = vrot.slane %v13779_v2, 4  ;;  %v10199_v2 = vld [vmem:[%s15971_s4 + $0x14] sm:$0x1] }
 0x35e   :  { %7927 = vst [vmem:[%s15971_s4 + $0xf0] sm:$0xf] %v10681_v54  ;;  %v4830_v31 = vpop.f32.mrf.mxu1  ;;  %v4709_v28 = vpack.c.b16 %v4656_v40, %v4655_v34  ;;  %v7090_v48 = vsel %vm11351_vm5, %v10126_v29, %v7089_v49  ;;  %v7091_v35 = vrot.slane %v7089_v49, 4  ;;  %v7606_v34 = vadd.f32 %v7450_v26, %v6828_v9  ;;  %5424 = vmatmul.bf16.gmra.mxu2 %v10478_v30  ;;  %v9973_v29 = vld [vmem:[%s15968_s0 + $0x9c] sm:$0xf] }
 0x35f   :  { %7928 = vst [vmem:[%s15971_s4 + $0xf4] sm:$0xf] %v10681_v54  ;;  %v7453_v56 = vpop.f32.mrf.mxu0  ;;  %v7977_v40 = vpack.c.bf16 %v7805_v14, %v7805_v14  ;;  %v6554_v60 = vpack.c.b16 %v6501_v37, %v6500_v10  ;;  %v7278_v39 = vunpack.c.l.b16 %v7090_v48  ;;  %v4984_v42 = vadd.f32 %v4830_v31, %v12002_v59  ;;  %v14029_v59 = vld [vmem:[%s15968_s0 + $0xa0] sm:$0xf] }
 0x360   :  { %7929 = vst [vmem:[%s15971_s4 + $0xf8] sm:$0x1] %v10681_v54  ;;  %v7674_v26 = vmul.f32 %v13663_v52, %v7606_v34  ;;  %v7093_v23 = vsel %vm11351_vm5, %v7091_v35, %v7092_v57  ;;  %v5960_v48 = vshrl.u32 %v9973_v29, 16  ;;  %v5963_v35 = vshll.u32 %v9973_v29, 16  ;;  %v10631_v29 = vld [vmem:[%s15968_s0 + $0x94] sm:$0xf] }
 0x361   :  { %7930 = vst [vmem:[%s15971_s4 + $0xfc] sm:$0xf] %v10681_v54  ;;  %v8060_v33 = vshrl.u32 %v7977_v40, 16  ;;  %v7279_v5 = vunpack.c.l.b16 %v7093_v23  ;;  %v5385_v53 = vpop.f32.mrf.mxu2  ;;  %v8063_v14 = vshll.u32 %v7977_v40, 16  ;;  %v5969_v34 = vshll.u32 %v14029_v59, 16 }
 0x362   :  { %7931 = vst [vmem:[%s15971_s4 + $0x100] sm:$0xf] %v10681_v54  ;;  %v6675_v10 = vpop.f32.mrf.mxu3  ;;  %v7742_v9 = vadd.f32 %v13676_v1, %v7674_v26  ;;  %v9599_v23 = vld [vmem:[%s15968_s0 + $0x90] sm:$0xe] }
 0x363   :  { %7932 = vst [vmem:[%s15971_s4 + $0x104] sm:$0x1] %v10681_v54  ;;  %v14044_v49 = vrot.slane %v8060_v33, 7  ;;  %v7332_v30 = vpack.c.b16 %v7279_v5, %v7278_v39  ;;  %v5973_v33 = vshrl.u32 %v14029_v59, 16  ;;  %v14064_v39 = vsel %vm14037_vm13, %v8058_v36, %v10199_v2 }
 0x364   :  { %7933 = vst [vmem:[%s15971_s4 + $0x108] sm:$0xf] %v10681_v54  ;;  %4869 = vmatmul.bf16.gmra.mxu1 %v4709_v28  ;;  %6714 = vmatmul.bf16.gmra.mxu3 %v6554_v60  ;;  %v5539_v28 = vadd.f32 %v5385_v53, %v4984_v42  ;;  %v7806_v57 = vmax.f32 %v7742_v9, 0.0  ;;  %v4473_v5 = vrot.slane %v10631_v29, 5  ;;  %v10632_v53 = vld [vmem:[%s15968_s0 + $0x98] sm:$0x1] }
 0x365   :  { %7934 = vst [vmem:[%s15971_s4 + $0x10c] sm:$0xf] %v10681_v54  ;;  %v14067_v26 = vor.u32 %v8063_v14, %v14044_v49  ;;  %v4476_v36 = vrot.slane %v10632_v53, 5  ;;  %v5962_v29 = vrot.slane %v5960_v48, 4  ;;  %v5965_v53 = vrot.slane %v5963_v35, 5 }
 0x366   :  { %7935 = vst [vmem:[%s15971_s4 + $0x110] sm:$0x1] %v10681_v54  ;;  %v4832_v37 = vpop.f32.mrf.mxu1  ;;  %v6829_v60 = vadd.f32 %v6675_v10, %v5539_v28  ;;  %v14085_v10 = vld [vmem:[%s15971_s4 + $0x18] sm:$0xf]  ;;  %v7978_v2 = vpack.c.bf16 %v7806_v57, %v7806_v57  ;;  %v9631_v28 = vrot.slane %v9599_v23, 9  ;;  %v5971_v40 = vrot.slane %v5969_v34, 5 }
 0x367   :  { %7936 = vst [vmem:[%s15971_s4 + $0x114] sm:$0xf] %v10681_v54  ;;  %7492 = vmatmul.bf16.gmra.mxu0 %v7332_v30  ;;  %v7455_v42 = vpop.f32.mrf.mxu0  ;;  %v4985_v9 = vadd.f32 %v4832_v37, %v12024_v51  ;;  %v4475_v30 = vrot.slane %v4473_v5, 4  ;;  %v14102_v37 = vld [vmem:[%s15968_s0 + $0xa4] sm:$0x1]  ;;  %v5966_v23 = vor.u32 %v5965_v53, %v5962_v29 }
 0x368   :  { %7937 = vst [vmem:[%s15971_s4 + $0x118] sm:$0xf] %v10681_v54  ;;  %v7607_v14 = vadd.f32 %v7453_v56, %v6829_v60  ;;  %v8068_v3 = vshrl.u32 %v7978_v2, 16  ;;  %v8071_v57 = vshll.u32 %v7978_v2, 16  ;;  %v4474_v51 = vsel %vm11351_vm5, %v9631_v28, %v4473_v5 }
 0x369   :  { %7938 = vst [vmem:[%s15971_s4 + $0x11c] sm:$0x1] %v10681_v54  ;;  %v5387_v48 = vpop.f32.mrf.mxu2  ;;  %v4477_v34 = vsel %vm11351_vm5, %v4475_v30, %v4476_v36  ;;  %v4657_v60 = vunpack.c.l.b16 %v4474_v51  ;;  %v5975_v2 = vrot.slane %v5973_v33, 4  ;;  %v5979_v29 = vshll.u32 %v14102_v37, 16  ;;  %v10204_v51 = vld [vmem:[%s15971_s4 + $0x20] sm:$0x1] }
 0x36a   :  { %7939 = vst [vmem:[%s15971_s4 + $0x120] sm:$0xf] %v10681_v54  ;;  %v7675_v56 = vmul.f32 %v13663_v52, %v7607_v14  ;;  %v6677_v35 = vpop.f32.mrf.mxu3  ;;  %v8070_v5 = vrot.slane %v8068_v3, 7  ;;  %v5540_v28 = vadd.f32 %v5387_v48, %v4985_v9  ;;  %v4658_v58 = vunpack.c.l.b16 %v4477_v34  ;;  %v10479_v3 = vld [vmem:[%s15968_s0 + $0x9c] sm:$0xff] }
 0x36b   :  { %7940 = vst [vmem:[%s15971_s4 + $0x124] sm:$0xf] %v10681_v54  ;;  %v5967_v9 = vrot.slane %v5966_v23, 4  ;;  %v5976_v30 = vor.u32 %v5975_v2, %v5971_v40 }
 0x36c   :  { %7941 = vst [vmem:[%s15971_s4 + $0x128] sm:$0x1] %v10681_v54  ;;  %v7743_v14 = vadd.f32 %v13676_v1, %v7675_v56  ;;  %v8073_v53 = vor.u32 %v8071_v57, %v8070_v5  ;;  %v8075_v56 = vrot.slane %v8070_v5, 4  ;;  %v6830_v34 = vadd.f32 %v6677_v35, %v5540_v28 }
 0x36d   :  { %7942 = vst [vmem:[%s15971_s4 + $0x12c] sm:$0xf] %v10681_v54  ;;  %v4710_v2 = vpack.c.b16 %v4658_v58, %v4657_v60  ;;  %v5972_v33 = vsel %vm10739_vm2, %v5967_v9, %v5971_v40  ;;  %v5977_v43 = vrot.slane %v5976_v30, 4  ;;  %v10127_v57 = vrot.slane %v10095_v21, 9 }
 0x36e   :  { %7943 = vst [vmem:[%s15971_s4 + $0x130] sm:$0xf] %v10681_v54  ;;  %v4835_v36 = vpop.f32.mrf.mxu1  ;;  %v7807_v48 = vmax.f32 %v7743_v14, 0.0  ;;  %v16089_v35 = vrot.slane %v14044_v49, 4  ;;  %v7608_v28 = vadd.f32 %v7455_v42, %v6830_v34  ;;  %v14162_v21 = vsel %vm14037_vm13, %v8075_v56, %v10204_v51  ;;  %5429 = vmatmul.bf16.gmra.mxu2 %v10479_v3 }
 0x36f   :  { %7944 = vst [vmem:[%s15971_s4 + $0x134] sm:$0x1] %v10681_v54  ;;  %v14141_v23 = vpop.f32.mrf.mxu0  ;;  %v4986_v58 = vadd.f32 %v4835_v36, %v12046_v20  ;;  %v5981_v49 = vrot.slane %v5979_v29, 5  ;;  %v7096_v40 = vrot.slane %v14029_v59, 5  ;;  %v7099_v60 = vrot.slane %v14102_v37, 5 }
 0x370   :  { %7945 = vst [vmem:[%s15971_s4 + $0x138] sm:$0xf] %v10681_v54  ;;  %v14153_v5 = vsel %vm13786_vm11, %v16089_v35, %v8073_v53  ;;  %v7979_v14 = vpack.c.bf16 %v7807_v48, %v7807_v48  ;;  %v7676_v36 = vmul.f32 %v13663_v52, %v7608_v28  ;;  %v6502_v9 = vunpack.c.l.b16 %v5972_v33  ;;  %v9600_v53 = vld [vmem:[%s15968_s0 + $0x9c] sm:$0xe]  ;;  %v10633_v33 = vld [vmem:[%s15968_s0 + $0xa0] sm:$0xf] }
 0x371   :  { %7946 = vst [vmem:[%s15971_s4 + $0x13c] sm:$0xf] %v10681_v54  ;;  %v5982_v59 = vsel %vm10739_vm2, %v5977_v43, %v5981_v49  ;;  %v7097_v37 = vsel %vm11351_vm5, %v10127_v57, %v7096_v40  ;;  %v7098_v3 = vrot.slane %v7096_v40, 4  ;;  %v5390_v30 = vpop.f32.mrf.mxu2  ;;  %v4480_v56 = vrot.slane %v10633_v33, 5 }
 0x372   :  { %7947 = vst [vmem:[%s15971_s4 + $0x140] sm:$0x1] %v10681_v54  ;;  %v8077_v20 = vshrl.u32 %v7979_v14, 16  ;;  %v8080_v42 = vshll.u32 %v7979_v14, 16  ;;  %v6680_v29 = vpop.f32.mrf.mxu3  ;;  %v7744_v51 = vadd.f32 %v13676_v1, %v7676_v36  ;;  %v6503_v48 = vunpack.c.l.b16 %v5982_v59 }
 0x373   :  { %7948 = vst [vmem:[%s15971_s4 + $0x144] sm:$0xf] %v10681_v54  ;;  %v7280_v34 = vunpack.c.l.b16 %v7097_v37  ;;  %v7100_v57 = vsel %vm11351_vm5, %v7098_v3, %v7099_v60  ;;  %v5541_v35 = vadd.f32 %v5390_v30, %v4986_v58  ;;  %v9632_v28 = vrot.slane %v9600_v53, 9  ;;  %v9976_v60 = vld [vmem:[%s15968_s0 + $0xa8] sm:$0xf] }
 0x374   :  { %7949 = vst [vmem:[%s15971_s4 + $0x148] sm:$0xf] %v10681_v54  ;;  %4874 = vmatmul.bf16.gmra.mxu1 %v4710_v2  ;;  %v14189_v43 = vrot.slane %v8077_v20, 7  ;;  %v14199_v2 = vld [vmem:[%s15971_s4 + $0x24] sm:$0xf]  ;;  %v4482_v49 = vrot.slane %v4480_v56, 4  ;;  %v6555_v59 = vpack.c.b16 %v6503_v48, %v6502_v9  ;;  %v7281_v58 = vunpack.c.l.b16 %v7100_v57 }
 0x375   :  { %7950 = vst [vmem:[%s15971_s4 + $0x14c] sm:$0x1] %v10681_v54  ;;  %v7808_v36 = vmax.f32 %v7744_v51, 0.0  ;;  %v6831_v37 = vadd.f32 %v6680_v29, %v5541_v35  ;;  %v14224_v9 = vld [vmem:[%s15968_s0 + $0xac] sm:$0xf]  ;;  %v5984_v35 = vshrl.u32 %v9976_v60, 16 }
 0x376   :  { %7951 = vst [vmem:[%s15971_s4 + $0x150] sm:$0xf] %v10681_v54  ;;  %v4837_v14 = vpop.f32.mrf.mxu1  ;;  %v14208_v40 = vor.u32 %v8080_v42, %v14189_v43  ;;  %v4481_v42 = vsel %vm11351_vm5, %v9632_v28, %v4480_v56  ;;  %6719 = vmatmul.bf16.gmra.mxu3 %v6555_v59  ;;  %v10634_v53 = vld [vmem:[%s15968_s0 + $0xa4] sm:$0x1]  ;;  %v7333_v51 = vpack.c.b16 %v7281_v58, %v7280_v34  ;;  %v14245_v57 = vld [vmem:[%s15968_s0 + $0xb0] sm:$0x1] }
 0x377   :  { %7952 = vst [vmem:[%s15971_s4 + $0x154] sm:$0xf] %v10681_v54  ;;  %v4987_v3 = vadd.f32 %v4837_v14, %v12071_v6  ;;  %v7460_v30 = vpop.f32.mrf.mxu0  ;;  %v7980_v6 = vpack.c.bf16 %v7808_v36, %v7808_v36  ;;  %v4483_v33 = vrot.slane %v10634_v53, 5  ;;  %v4659_v56 = vunpack.c.l.b16 %v4481_v42  ;;  %v10306_v7 = vld [vmem:[%s15971_s4 + $0x12c] sm:$0xf] }
 0x378   :  { %7953 = vst [vmem:[%s15971_s4 + $0x158] sm:$0x1] %v10681_v54  ;;  %v7609_v48 = vadd.f32 %v14141_v23, %v6831_v37  ;;  %v5987_v14 = vshll.u32 %v9976_v60, 16  ;;  %v5993_v34 = vshll.u32 %v14224_v9, 16  ;;  %v10209_v23 = vld [vmem:[%s15971_s4 + $0x2c] sm:$0x1]  ;;  %7497 = vmatmul.bf16.gmra.mxu0 %v7333_v51 }
 0x379   :  { %7954 = vst [vmem:[%s15971_s4 + $0x15c] sm:$0xf] %v10681_v54  ;;  %v8085_v28 = vshrl.u32 %v7980_v6, 16  ;;  %v8088_v36 = vshll.u32 %v7980_v6, 16  ;;  %v4484_v59 = vsel %vm11351_vm5, %v4482_v49, %v4483_v33  ;;  %v5392_v58 = vpop.f32.mrf.mxu2  ;;  %v5986_v6 = vrot.slane %v5984_v35, 4 }
 0x37a   :  { %7955 = vst [vmem:[%s15971_s4 + $0x160] sm:$0xf] %v10681_v54  ;;  %v7677_v60 = vmul.f32 %v13663_v52, %v7609_v48  ;;  %v6682_v37 = vpop.f32.mrf.mxu3  ;;  %v4660_v42 = vunpack.c.l.b16 %v4484_v59  ;;  %v5989_v53 = vrot.slane %v5987_v14, 5  ;;  %v5542_v33 = vadd.f32 %v5392_v58, %v4987_v3  ;;  %v10480_v14 = vld [vmem:[%s15968_s0 + $0xa8] sm:$0xff] }
 0x37b   :  { %7956 = vst [vmem:[%s15971_s4 + $0x164] sm:$0x1] %v10681_v54  ;;  %v8087_v49 = vrot.slane %v8085_v28, 7  ;;  %v5995_v29 = vrot.slane %v5993_v34, 5  ;;  %v5997_v20 = vshrl.u32 %v14224_v9, 16  ;;  %v6003_v28 = vshll.u32 %v14245_v57, 16 }
 0x37c   :  { %7957 = vst [vmem:[%s15971_s4 + $0x168] sm:$0xf] %v10681_v54  ;;  %v7745_v51 = vadd.f32 %v13676_v1, %v7677_v60  ;;  %v4711_v35 = vpack.c.b16 %v4660_v42, %v4659_v56  ;;  %v5990_v59 = vor.u32 %v5989_v53, %v5986_v6  ;;  %v10096_v3 = vld [vmem:[%s15968_s0 + $0xa8] sm:$0xe]  ;;  %v6832_v58 = vadd.f32 %v6682_v37, %v5542_v33 }
 0x37d   :  { %7958 = vst [vmem:[%s15971_s4 + $0x16c] sm:$0xf] %v10681_v54  ;;  %v8090_v34 = vor.u32 %v8088_v36, %v8087_v49  ;;  %v8092_v60 = vrot.slane %v8087_v49, 4  ;;  %v5999_v24 = vrot.slane %v5997_v20, 4  ;;  %v6005_v0 = vrot.slane %v6003_v28, 5 }
 0x37e   :  { %7959 = vst [vmem:[%s15971_s4 + $0x170] sm:$0x1] %v10681_v54  ;;  %v4840_v48 = vpop.f32.mrf.mxu1  ;;  %v7809_v42 = vmax.f32 %v7745_v51, 0.0  ;;  %v5991_v53 = vrot.slane %v5990_v59, 4  ;;  %v16090_v36 = vrot.slane %v14189_v43, 4  ;;  %v7610_v49 = vadd.f32 %v7460_v30, %v6832_v58  ;;  %5434 = vmatmul.bf16.gmra.mxu2 %v10480_v14 }
 0x37f   :  { %7960 = vst [vmem:[%s15971_s4 + $0x174] sm:$0xf] %v10681_v54  ;;  %v4988_v56 = vadd.f32 %v4840_v48, %v12108_v4  ;;  %v7463_v6 = vpop.f32.mrf.mxu0  ;;  %v8707_v37 = vsel %vm14037_vm13, %v8092_v60, %v10209_v23  ;;  %v6000_v43 = vor.u32 %v5999_v24, %v5995_v29  ;;  %v16091_v33 = vsel %vm13735_vm8, %v14067_v26, %v14085_v10  ;;  %v9601_v24 = vld [vmem:[%s15968_s0 + $0xa8] sm:$0xe]  ;;  %v10635_v58 = vld [vmem:[%s15968_s0 + $0xac] sm:$0xf] }
 0x380   :  { %7961 = vst [vmem:[%s15971_s4 + $0x178] sm:$0xf] %v10681_v54  ;;  %v8091_v4 = vsel %vm13786_vm11, %v16090_v36, %v8090_v34  ;;  %v7981_v20 = vpack.c.bf16 %v7809_v42, %v7809_v42  ;;  %v7678_v30 = vmul.f32 %v13663_v52, %v7610_v49  ;;  %v7106_v51 = vrot.slane %v14245_v57, 5 }
 0x381   :  { %7962 = vst [vmem:[%s15971_s4 + $0x17c] sm:$0x1] %v10681_v54  ;;  %v5395_v48 = vpop.f32.mrf.mxu2  ;;  %v9633_v14 = vrot.slane %v9601_v24, 9 }
 0x382   :  { %7963 = vst [vmem:[%s15971_s4 + $0x180] sm:$0xf] %v10681_v54  ;;  %v8094_v26 = vshrl.u32 %v7981_v20, 16  ;;  %v8097_v10 = vshll.u32 %v7981_v20, 16  ;;  %v5543_v28 = vadd.f32 %v5395_v48, %v4988_v56  ;;  %v4487_v56 = vrot.slane %v10635_v58, 5 }
 0x383   :  { %7964 = vst [vmem:[%s15971_s4 + $0x184] sm:$0xf] %v10681_v54 }
 0x384   :  { %7965 = vst [vmem:[%s15971_s4 + $0x188] sm:$0x1] %v10681_v54  ;;  %4879 = vmatmul.bf16.gmra.mxu1 %v4711_v35  ;;  %v6685_v35 = vpop.f32.mrf.mxu3  ;;  %v4489_v24 = vrot.slane %v4487_v56, 4 }
 0x385   :  { %7966 = vst [vmem:[%s15971_s4 + $0x18c] sm:$0xf] %v10681_v54 }
 0x386   :  { %7967 = vst [vmem:[%s15971_s4 + $0x190] sm:$0xf] %v10681_v54  ;;  %v4842_v60 = vpop.f32.mrf.mxu1 }
 0x387   :  { %7968 = vst [vmem:[%s15971_s4 + $0x194] sm:$0x1] %v10681_v54  ;;  %v7465_v20 = vpop.f32.mrf.mxu0 }
 0x388   :  { %7969 = vst [vmem:[%s15971_s4 + $0x198] sm:$0xf] %v10681_v54 }
 0x389   :  { %7970 = vst [vmem:[%s15971_s4 + $0x19c] sm:$0xf] %v10681_v54 }
 0x38a   :  { %7971 = vst [vmem:[%s15971_s4 + $0x1a0] sm:$0x1] %v10681_v54 }
 0x38b   :  { %7972 = vst [vmem:[%s15971_s4 + $0x1a4] sm:$0xf] %v10681_v54 }
 0x38c   :  { %7973 = vst [vmem:[%s15971_s4 + $0x1a8] sm:$0xf] %v10681_v54 }
 0x38d   :  { %7974 = vst [vmem:[%s15971_s4 + $0x1ac] sm:$0x1] %v10681_v54  ;;  %v10128_v54 = vrot.slane %v10096_v3, 9  ;;  %v14337_v3 = vrot.slane %v8094_v26, 7 }
 0x38e   :  { %10198 = vst [vmem:[%s15971_s4 + $0x10] sm:$0xf] %v13811_v17  ;;  %v5996_v17 = vsel %vm10739_vm2, %v5991_v53, %v5995_v29  ;;  %v6001_v29 = vrot.slane %v6000_v43, 4  ;;  %v6833_v53 = vadd.f32 %v6685_v35, %v5543_v28  ;;  %v5397_v35 = vpop.f32.mrf.mxu2  ;;  %v4845_v58 = vpop.f32.mrf.mxu1 }
 0x38f   :  { %10200 = vst [vmem:[%s15971_s4 + $0x14] sm:$0x1] %v14064_v39  ;;  %v6504_v23 = vunpack.c.l.b16 %v5996_v17  ;;  %v7103_v39 = vrot.slane %v14224_v9, 5  ;;  %v7746_v9 = vadd.f32 %v13676_v1, %v7678_v30  ;;  %v8099_v36 = vor.u32 %v8097_v10, %v14337_v3 }
 0x390   :  { %10202 = vst [vmem:[%s15971_s4 + $0x18] sm:$0xf] %v16091_v33  ;;  %v8100_v49 = vrot.slane %v14337_v3, 4  ;;  %v7611_v33 = vadd.f32 %v7463_v6, %v6833_v53  ;;  %v4488_v30 = vsel %vm11351_vm5, %v9633_v14, %v4487_v56  ;;  %v10636_v6 = vld [vmem:[%s15968_s0 + $0xb0] sm:$0x1]  ;;  %v6687_v14 = vpop.f32.mrf.mxu3  ;;  %v10481_v56 = vld [vmem:[%s15968_s0 + $0xb4] sm:$0xff] }
 0x391   :  { %10203 = vst [vmem:[%s15971_s4 + $0x1c] sm:$0xf] %v14153_v5  ;;  %v7104_v57 = vsel %vm11351_vm5, %v10128_v54, %v7103_v39  ;;  %v7105_v59 = vrot.slane %v7103_v39, 4  ;;  %v16092_v5 = vsel %vm13735_vm8, %v14208_v40, %v14199_v2  ;;  %v10211_v2 = vld [vmem:[%s15971_s4 + $0x30] sm:$0xf]  ;;  %v7810_v40 = vmax.f32 %v7746_v9, 0.0  ;;  %5439 = vmatmul.bf16.gmra.mxu2 %v10481_v56 }
 0x392   :  { %10205 = vst [vmem:[%s15971_s4 + $0x20] sm:$0x1] %v14162_v21  ;;  %v6006_v21 = vsel %vm10739_vm2, %v6001_v29, %v6005_v0  ;;  %v7282_v34 = vunpack.c.l.b16 %v7104_v57  ;;  %v9979_v39 = vld [vmem:[%s15968_s0 + $0xb4] sm:$0xf]  ;;  %v7679_v29 = vmul.f32 %v13663_v52, %v7611_v33  ;;  %v4661_v48 = vunpack.c.l.b16 %v4488_v30  ;;  %v10214_v3 = vld [vmem:[%s15971_s4 + $0x38] sm:$0x1]  ;;  %v7468_v30 = vpop.f32.mrf.mxu0 }
 0x393   :  { %10207 = vst [vmem:[%s15971_s4 + $0x24] sm:$0xf] %v16092_v5  ;;  %v6505_v42 = vunpack.c.l.b16 %v6006_v21  ;;  %v7107_v0 = vsel %vm11351_vm5, %v7105_v59, %v7106_v51  ;;  %v7982_v17 = vpack.c.bf16 %v7810_v40, %v7810_v40  ;;  %v8710_v51 = vsel %vm13735_vm8, %v8099_v36, %v10211_v2 }
 0x394   :  { %10208 = vst [vmem:[%s15971_s4 + $0x28] sm:$0xf] %v8091_v4  ;;  %v7283_v54 = vunpack.c.l.b16 %v7107_v0  ;;  %v4989_v4 = vadd.f32 %v4842_v60, %v12140_v32  ;;  %v6008_v57 = vshrl.u32 %v9979_v39, 16  ;;  %v6011_v59 = vshll.u32 %v9979_v39, 16 }
 0x395   :  { %10210 = vst [vmem:[%s15971_s4 + $0x2c] sm:$0x1] %v8707_v37  ;;  %v6556_v43 = vpack.c.b16 %v6505_v42, %v6504_v23  ;;  %v14366_v37 = vld [vmem:[%s15968_s0 + $0xb8] sm:$0xf]  ;;  %v4490_v23 = vrot.slane %v10636_v6, 5  ;;  %v8102_v26 = vshrl.u32 %v7982_v17, 16  ;;  %v7747_v21 = vadd.f32 %v13676_v1, %v7679_v29 }
 0x396   :  { %v7334_v32 = vpack.c.b16 %v7283_v54, %v7282_v34  ;;  %10212 = vst [vmem:[%s15971_s4 + $0x30] sm:$0xf] %v8710_v51  ;;  %v8105_v10 = vshll.u32 %v7982_v17, 16  ;;  %v6017_v28 = vshll.u32 %v14366_v37, 16  ;;  %v5544_v34 = vadd.f32 %v5397_v35, %v4989_v4  ;;  %v10097_v4 = vld [vmem:[%s15968_s0 + $0xb4] sm:$0xe] }
 0x397   :  { %6724 = vmatmul.bf16.gmra.mxu3 %v6556_v43  ;;  %v4491_v9 = vsel %vm11351_vm5, %v4489_v24, %v4490_v23  ;;  %v8104_v5 = vrot.slane %v8102_v26, 7  ;;  %v6010_v2 = vrot.slane %v6008_v57, 4  ;;  %v6013_v40 = vrot.slane %v6011_v59, 5  ;;  %v9981_v43 = vld [vmem:[%s15968_s0 + $0xbc] sm:$0x1] }
 0x398   :  { %7502 = vmatmul.bf16.gmra.mxu0 %v7334_v32  ;;  %v4662_v60 = vunpack.c.l.b16 %v4491_v9  ;;  %v6019_v42 = vrot.slane %v6017_v28, 5  ;;  %v6021_v0 = vshrl.u32 %v14366_v37, 16  ;;  %v7811_v54 = vmax.f32 %v7747_v21, 0.0 }
 0x399   :  { %v8107_v53 = vor.u32 %v8105_v10, %v8104_v5  ;;  %v8109_v36 = vrot.slane %v8104_v5, 4  ;;  %v6834_v17 = vadd.f32 %v6687_v14, %v5544_v34  ;;  %v4990_v33 = vadd.f32 %v4845_v58, %v12162_v62  ;;  %v5400_v5 = vpop.f32.mrf.mxu2 }
 0x39a   :  { %v4712_v39 = vpack.c.b16 %v4662_v60, %v4661_v48  ;;  %v6014_v51 = vor.u32 %v6013_v40, %v6010_v2  ;;  %v6023_v32 = vrot.slane %v6021_v0, 4  ;;  %v7983_v23 = vpack.c.bf16 %v7811_v54, %v7811_v54  ;;  %v4847_v0 = vpop.f32.mrf.mxu1 }
 0x39b   :  { %v8108_v24 = vsel %vm13786_vm11, %v8100_v49, %v8107_v53  ;;  %v8714_v6 = vsel %vm14037_vm13, %v8109_v36, %v10214_v3  ;;  %v7612_v26 = vadd.f32 %v7465_v20, %v6834_v17  ;;  %v6027_v29 = vshll.u32 %v9981_v43, 16  ;;  %v6690_v3 = vpop.f32.mrf.mxu3  ;;  %v9982_v17 = vld [vmem:[%s15968_s0 + $0xc0] sm:$0xf] }
 0x39c   :  { %10213 = vst [vmem:[%s15971_s4 + $0x34] sm:$0xf] %v8108_v24  ;;  %4884 = vmatmul.bf16.gmra.mxu1 %v4712_v39  ;;  %v6015_v10 = vrot.slane %v6014_v51, 4  ;;  %v6024_v62 = vor.u32 %v6023_v32, %v6019_v42  ;;  %v10129_v48 = vrot.slane %v10097_v4, 9  ;;  %v8111_v49 = vshrl.u32 %v7983_v23, 16  ;;  %v7470_v51 = vpop.f32.mrf.mxu0 }
 0x39d   :  { %10215 = vst [vmem:[%s15971_s4 + $0x38] sm:$0x1] %v8714_v6  ;;  %v8114_v35 = vshll.u32 %v7983_v23, 16  ;;  %v7680_v14 = vmul.f32 %v13663_v52, %v7612_v26  ;;  %v7110_v20 = vrot.slane %v14366_v37, 5  ;;  %v6029_v59 = vrot.slane %v6027_v29, 5 }
 0x39e   :  { %v6020_v9 = vsel %vm10739_vm2, %v6015_v10, %v6019_v42  ;;  %v6025_v57 = vrot.slane %v6024_v62, 4  ;;  %v7113_v28 = vrot.slane %v9981_v43, 5  ;;  %v14409_v21 = vrot.slane %v8111_v49, 7  ;;  %v9602_v52 = vld [vmem:[%s15968_s0 + $0xb4] sm:$0xe] }
 0x39f   :  { %v7748_v34 = vadd.f32 %v13676_v1, %v7680_v14  ;;  %v6506_v60 = vunpack.c.l.b16 %v6020_v9  ;;  %v7111_v58 = vsel %vm11351_vm5, %v10129_v48, %v7110_v20  ;;  %v10216_v37 = vld [vmem:[%s15971_s4 + $0x3c] sm:$0xf]  ;;  %v7112_v2 = vrot.slane %v7110_v20, 4  ;;  %v10637_v10 = vld [vmem:[%s15968_s0 + $0xb8] sm:$0xf] }
 0x3a0   :  { %v6030_v56 = vsel %vm10739_vm2, %v6025_v57, %v6029_v59  ;;  %v7284_v40 = vunpack.c.l.b16 %v7111_v58  ;;  %v5545_v42 = vadd.f32 %v5400_v5, %v4990_v33  ;;  %v8116_v1 = vor.u32 %v8114_v35, %v14409_v21  ;;  %v9983_v20 = vld [vmem:[%s15968_s0 + $0xc4] sm:$0xf]  ;;  %v14447_v9 = vld [vmem:[%s15969_s2] ss:$0 sm:$0xff] }
 0x3a1   :  { %v8117_v53 = vrot.slane %v14409_v21, 4  ;;  %v7812_v36 = vmax.f32 %v7748_v34, 0.0  ;;  %v6507_v54 = vunpack.c.l.b16 %v6030_v56  ;;  %v7114_v43 = vsel %vm11351_vm5, %v7112_v2, %v7113_v28  ;;  %v5402_v59 = vpop.f32.mrf.mxu2  ;;  %v14458_v56 = vld [vmem:[%s15970_s3] ss:$0 sm:$0xff] }
 0x3a2   :  { %v6835_v4 = vadd.f32 %v6690_v3, %v5545_v42  ;;  %v4991_v39 = vadd.f32 %v4847_v0, %v12187_v8  ;;  %v9634_v32 = vrot.slane %v9602_v52, 9  ;;  %v8717_v33 = vsel %vm13735_vm8, %v8116_v1, %v10216_v37  ;;  %v10638_v8 = vld [vmem:[%s15968_s0 + $0xbc] sm:$0x1]  ;;  %v10219_v37 = vld [vmem:[%s15971_s4 + $0x44] sm:$0x1] }
 0x3a3   :  { %v7984_v24 = vpack.c.bf16 %v7812_v36, %v7812_v36  ;;  %v6557_v6 = vpack.c.b16 %v6507_v54, %v6506_v60  ;;  %v7285_v23 = vunpack.c.l.b16 %v7114_v43  ;;  %10217 = vst [vmem:[%s15971_s4 + $0x3c] sm:$0xf] %v8717_v33  ;;  %v4494_v62 = vrot.slane %v10637_v10, 5  ;;  %v6692_v28 = vpop.f32.mrf.mxu3  ;;  %v10482_v0 = vld [vmem:[%s15968_s0 + $0xc0] sm:$0xff] }
 0x3a4   :  { %v7613_v26 = vadd.f32 %v7468_v30, %v6835_v4  ;;  %v4497_v29 = vrot.slane %v10638_v8, 5  ;;  %v6032_v48 = vshrl.u32 %v9982_v17, 16  ;;  %v6035_v30 = vshll.u32 %v9982_v17, 16  ;;  %v7473_v33 = vpop.f32.mrf.mxu0  ;;  %5444 = vmatmul.bf16.gmra.mxu2 %v10482_v0  ;;  %v9603_v0 = vld [vmem:[%s15968_s0 + $0xc0] sm:$0xe] }
 0x3a5   :  { %v8119_v49 = vshrl.u32 %v7984_v24, 16  ;;  %v8122_v35 = vshll.u32 %v7984_v24, 16  ;;  %v7335_v14 = vpack.c.b16 %v7285_v23, %v7284_v40  ;;  %v4495_v5 = vsel %vm11351_vm5, %v9634_v32, %v4494_v62  ;;  %v4850_v40 = vpop.f32.mrf.mxu1 }
 0x3a6   :  { %v7681_v57 = vmul.f32 %v14447_v9, %v7613_v26  ;;  %v4496_v3 = vrot.slane %v4494_v62, 4  ;;  %v6034_v21 = vrot.slane %v6032_v48, 4  ;;  %v5546_v60 = vadd.f32 %v5402_v59, %v4991_v39  ;;  %v9984_v39 = vld [vmem:[%s15968_s0 + $0xc8] sm:$0x1]  ;;  %v10098_v26 = vld [vmem:[%s15968_s0 + $0xc0] sm:$0xe] }
 0x3a7   :  { %6729 = vmatmul.bf16.gmra.mxu3 %v6557_v6  ;;  %v8121_v34 = vrot.slane %v8119_v49, 7  ;;  %v4663_v58 = vunpack.c.l.b16 %v4495_v5  ;;  %v6037_v52 = vrot.slane %v6035_v30, 5  ;;  %v6041_v1 = vshll.u32 %v9983_v20, 16 }
 0x3a8   :  { %7507 = vmatmul.bf16.gmra.mxu0 %v7335_v14  ;;  %v7749_v2 = vadd.f32 %v14458_v56, %v7681_v57  ;;  %v4498_v42 = vsel %vm11351_vm5, %v4496_v3, %v4497_v29  ;;  %v6045_v36 = vshrl.u32 %v9983_v20, 16  ;;  %v6836_v43 = vadd.f32 %v6692_v28, %v5546_v60 }
 0x3a9   :  { %v8124_v54 = vor.u32 %v8122_v35, %v8121_v34  ;;  %v8126_v17 = vrot.slane %v8121_v34, 4  ;;  %v4992_v4 = vadd.f32 %v4850_v40, %v12218_v55  ;;  %v4664_v24 = vunpack.c.l.b16 %v4498_v42  ;;  %v5405_v3 = vpop.f32.mrf.mxu2 }
 0x3aa   :  { %v7813_v32 = vmax.f32 %v7749_v2, 0.0  ;;  %v6038_v6 = vor.u32 %v6037_v52, %v6034_v21  ;;  %v6043_v23 = vrot.slane %v6041_v1, 5  ;;  %v7614_v55 = vadd.f32 %v7470_v51, %v6836_v43  ;;  %v10221_v1 = vld [vmem:[%s15971_s4 + $0x48] sm:$0xf] }
 0x3ab   :  { %v8125_v10 = vsel %vm13786_vm11, %v8117_v53, %v8124_v54  ;;  %v8721_v62 = vsel %vm14037_vm13, %v8126_v17, %v10219_v37  ;;  %v6047_v8 = vrot.slane %v6045_v36, 4  ;;  %v4713_v48 = vpack.c.b16 %v4664_v24, %v4663_v58  ;;  %v6695_v21 = vpop.f32.mrf.mxu3 }
 0x3ac   :  { %10218 = vst [vmem:[%s15971_s4 + $0x40] sm:$0xf] %v8125_v10  ;;  %v7985_v29 = vpack.c.bf16 %v7813_v32, %v7813_v32  ;;  %v6039_v49 = vrot.slane %v6038_v6, 4  ;;  %v6051_v35 = vshll.u32 %v9984_v39, 16  ;;  %v7682_v53 = vmul.f32 %v14447_v9, %v7614_v55 }
 0x3ad   :  { %10220 = vst [vmem:[%s15971_s4 + $0x44] sm:$0x1] %v8721_v62  ;;  %v6048_v14 = vor.u32 %v6047_v8, %v6043_v23  ;;  %v10130_v30 = vrot.slane %v10098_v26, 9  ;;  %v7117_v57 = vrot.slane %v9983_v20, 5  ;;  %4889 = vmatmul.bf16.gmra.mxu1 %v4713_v48  ;;  %v7120_v20 = vrot.slane %v9984_v39, 5  ;;  %v4852_v42 = vpop.f32.mrf.mxu1 }
 0x3ae   :  { %v8128_v51 = vshrl.u32 %v7985_v29, 16  ;;  %v8131_v59 = vshll.u32 %v7985_v29, 16  ;;  %v6044_v28 = vsel %vm10739_vm2, %v6039_v49, %v6043_v23  ;;  %v6053_v5 = vrot.slane %v6051_v35, 5  ;;  %v7475_v23 = vpop.f32.mrf.mxu0  ;;  %v9985_v8 = vld [vmem:[%s15968_s0 + $0xcc] sm:$0xf] }
 0x3af   :  { %v7750_v34 = vadd.f32 %v14458_v56, %v7682_v53  ;;  %v6049_v60 = vrot.slane %v6048_v14, 4  ;;  %v6508_v58 = vunpack.c.l.b16 %v6044_v28  ;;  %v7118_v52 = vsel %vm11351_vm5, %v10130_v30, %v7117_v57  ;;  %v10641_v29 = vld [vmem:[%s15968_s0 + $0xc4] sm:$0xf]  ;;  %v10642_v49 = vld [vmem:[%s15968_s0 + $0xc8] sm:$0x1] }
 0x3b0   :  { %v14489_v37 = vrot.slane %v8128_v51, 7  ;;  %v7119_v2 = vrot.slane %v7117_v57, 4  ;;  %v7286_v40 = vunpack.c.l.b16 %v7118_v52  ;;  %v5547_v17 = vadd.f32 %v5405_v3, %v4992_v4  ;;  %v9986_v51 = vld [vmem:[%s15968_s0 + $0xd0] sm:$0xf] }
 0x3b1   :  { %v7814_v36 = vmax.f32 %v7750_v34, 0.0  ;;  %v6054_v54 = vsel %vm10739_vm2, %v6049_v60, %v6053_v5  ;;  %v4993_v43 = vadd.f32 %v4852_v42, %v12240_v27  ;;  %v9635_v55 = vrot.slane %v9603_v0, 9 }
 0x3b2   :  { %v8133_v32 = vor.u32 %v8131_v59, %v14489_v37  ;;  %v8134_v39 = vrot.slane %v14489_v37, 4  ;;  %v6509_v24 = vunpack.c.l.b16 %v6054_v54  ;;  %v7121_v6 = vsel %vm11351_vm5, %v7119_v2, %v7120_v20  ;;  %v5407_v59 = vpop.f32.mrf.mxu2 }
 0x3b3   :  { %v7986_v26 = vpack.c.bf16 %v7814_v36, %v7814_v36  ;;  %v7287_v10 = vunpack.c.l.b16 %v7121_v6  ;;  %v6837_v62 = vadd.f32 %v6695_v21, %v5547_v17  ;;  %v4501_v48 = vrot.slane %v10641_v29, 5  ;;  %v6697_v28 = vpop.f32.mrf.mxu3 }
 0x3b4   :  { %v8724_v27 = vsel %vm13735_vm8, %v8133_v32, %v10221_v1  ;;  %v6558_v4 = vpack.c.b16 %v6509_v24, %v6508_v58  ;;  %v4504_v35 = vrot.slane %v10642_v49, 5  ;;  %v6056_v21 = vshrl.u32 %v9985_v8, 16  ;;  %v9987_v32 = vld [vmem:[%s15968_s0 + $0xd4] sm:$0x1] }
 0x3b5   :  { %10222 = vst [vmem:[%s15971_s4 + $0x48] sm:$0xf] %v8724_v27  ;;  %v8136_v53 = vshrl.u32 %v7986_v26, 16  ;;  %v8139_v14 = vshll.u32 %v7986_v26, 16  ;;  %v7336_v30 = vpack.c.b16 %v7287_v10, %v7286_v40  ;;  %v7615_v57 = vadd.f32 %v7473_v33, %v6837_v62  ;;  %v10224_v33 = vld [vmem:[%s15971_s4 + $0x50] sm:$0x1]  ;;  %v4855_v2 = vpop.f32.mrf.mxu1 }
 0x3b6   :  { %v4502_v5 = vsel %vm11351_vm5, %v9635_v55, %v4501_v48  ;;  %v4503_v3 = vrot.slane %v4501_v48, 4  ;;  %v6059_v34 = vshll.u32 %v9985_v8, 16  ;;  %v5548_v52 = vadd.f32 %v5407_v59, %v4993_v43  ;;  %v10483_v40 = vld [vmem:[%s15968_s0 + $0xcc] sm:$0xff]  ;;  %v7478_v6 = vpop.f32.mrf.mxu0 }
 0x3b7   :  { %6734 = vmatmul.bf16.gmra.mxu3 %v6558_v4  ;;  %v8138_v60 = vrot.slane %v8136_v53, 7  ;;  %v7683_v58 = vmul.f32 %v14447_v9, %v7615_v57  ;;  %v4665_v37 = vunpack.c.l.b16 %v4502_v5  ;;  %v6058_v42 = vrot.slane %v6056_v21, 4  ;;  %v10099_v55 = vld [vmem:[%s15968_s0 + $0xcc] sm:$0xe]  ;;  %5449 = vmatmul.bf16.gmra.mxu2 %v10483_v40 }
 0x3b8   :  { %7512 = vmatmul.bf16.gmra.mxu0 %v7336_v30  ;;  %v4505_v20 = vsel %vm11351_vm5, %v4503_v3, %v4504_v35  ;;  %v6061_v0 = vrot.slane %v6059_v34, 5  ;;  %v6065_v1 = vshll.u32 %v9986_v51, 16  ;;  %v6838_v43 = vadd.f32 %v6697_v28, %v5548_v52  ;;  %v9604_v52 = vld [vmem:[%s15968_s0 + $0xe4] sm:$0xe] }
 0x3b9   :  { %v8141_v36 = vor.u32 %v8139_v14, %v8138_v60  ;;  %v8143_v54 = vrot.slane %v8138_v60, 4  ;;  %v7751_v17 = vadd.f32 %v14458_v56, %v7683_v58  ;;  %v4994_v24 = vadd.f32 %v4855_v2, %v12262_v50 }
 0x3ba   :  { %v4666_v26 = vunpack.c.l.b16 %v4505_v20  ;;  %v6062_v10 = vor.u32 %v6061_v0, %v6058_v42  ;;  %v6067_v62 = vrot.slane %v6065_v1, 5  ;;  %v7616_v29 = vadd.f32 %v7475_v23, %v6838_v43  ;;  %v5410_v5 = vpop.f32.mrf.mxu2 }
 0x3bb   :  { %v8142_v8 = vsel %vm13786_vm11, %v8134_v39, %v8141_v36  ;;  %v8728_v27 = vsel %vm14037_vm13, %v8143_v54, %v10224_v33  ;;  %v7815_v4 = vmax.f32 %v7751_v17, 0.0  ;;  %v6069_v49 = vshrl.u32 %v9986_v51, 16  ;;  %v6700_v3 = vpop.f32.mrf.mxu3  ;;  %v10226_v36 = vld [vmem:[%s15971_s4 + $0x54] sm:$0xf] }
 0x3bc   :  { %10223 = vst [vmem:[%s15971_s4 + $0x4c] sm:$0xf] %v8142_v8  ;;  %v4714_v50 = vpack.c.b16 %v4666_v26, %v4665_v37  ;;  %v6063_v48 = vrot.slane %v6062_v10, 4  ;;  %v6075_v35 = vshll.u32 %v9987_v32, 16  ;;  %v7684_v39 = vmul.f32 %v14447_v9, %v7616_v29  ;;  %v10644_v29 = vld [vmem:[%s15968_s0 + $0xec] sm:$0x1] }
 0x3bd   :  { %10225 = vst [vmem:[%s15971_s4 + $0x50] sm:$0x1] %v8728_v27  ;;  %v7987_v53 = vpack.c.bf16 %v7815_v4, %v7815_v4  ;;  %v10131_v14 = vrot.slane %v10099_v55, 9  ;;  %v7124_v30 = vrot.slane %v9986_v51, 5  ;;  %v6071_v57 = vrot.slane %v6069_v49, 4  ;;  %v4857_v20 = vpop.f32.mrf.mxu1 }
 0x3be   :  { %4894 = vmatmul.bf16.gmra.mxu1 %v4714_v50  ;;  %v6068_v23 = vsel %vm10739_vm2, %v6063_v48, %v6067_v62  ;;  %v6077_v59 = vrot.slane %v6075_v35, 5  ;;  %v7127_v28 = vrot.slane %v9987_v32, 5  ;;  %v7752_v60 = vadd.f32 %v14458_v56, %v7684_v39  ;;  %v7480_v32 = vpop.f32.mrf.mxu0 }
 0x3bf   :  { %v8145_v21 = vshrl.u32 %v7987_v53, 16  ;;  %v8148_v34 = vshll.u32 %v7987_v53, 16  ;;  %v6510_v58 = vunpack.c.l.b16 %v6068_v23  ;;  %v6072_v37 = vor.u32 %v6071_v57, %v6067_v62 }
 0x3c0   :  { %v7125_v51 = vsel %vm11351_vm5, %v10131_v14, %v7124_v30  ;;  %v7126_v33 = vrot.slane %v7124_v30, 4  ;;  %v5549_v2 = vadd.f32 %v5410_v5, %v4994_v24  ;;  %v7816_v42 = vmax.f32 %v7752_v60, 0.0  ;;  %v10229_v5 = vld [vmem:[%s15971_s4 + $0x5c] sm:$0x1] }
 0x3c1   :  { %v8147_v40 = vrot.slane %v8145_v21, 7  ;;  %v7288_v0 = vunpack.c.l.b16 %v7125_v51  ;;  %v4995_v1 = vadd.f32 %v4857_v20, %v12287_v46  ;;  %v6073_v54 = vrot.slane %v6072_v37, 4  ;;  %v10643_v46 = vld [vmem:[%s15968_s0 + $0xe8] sm:$0xf]  ;;  %v10484_v51 = vld [vmem:[%s15968_s0 + $0xf0] sm:$0xff] }
 0x3c2   :  { %v7128_v17 = vsel %vm11351_vm5, %v7126_v33, %v7127_v28  ;;  %v6839_v43 = vadd.f32 %v6700_v3, %v5549_v2  ;;  %v9636_v26 = vrot.slane %v9604_v52, 9  ;;  %v7988_v24 = vpack.c.bf16 %v7816_v42, %v7816_v42  ;;  %v5412_v30 = vpop.f32.mrf.mxu2  ;;  %v9989_v33 = vld [vmem:[%s15968_s0 + $0xf4] sm:$0xf] }
 0x3c3   :  { %v8150_v10 = vor.u32 %v8148_v34, %v8147_v40  ;;  %v8151_v62 = vrot.slane %v8147_v40, 4  ;;  %v7289_v55 = vunpack.c.l.b16 %v7128_v17  ;;  %v6078_v8 = vsel %vm10739_vm2, %v6073_v54, %v6077_v59  ;;  %v6702_v23 = vpop.f32.mrf.mxu3 }
 0x3c4   :  { %v7617_v27 = vadd.f32 %v7478_v6, %v6839_v43  ;;  %v4508_v4 = vrot.slane %v10643_v46, 5  ;;  %v4511_v50 = vrot.slane %v10644_v29, 5  ;;  %v8153_v49 = vshrl.u32 %v7988_v24, 16  ;;  %v9988_v6 = vld [vmem:[%s15968_s0 + $0xf0] sm:$0xf] }
 0x3c5   :  { %v8731_v48 = vsel %vm13735_vm8, %v8150_v10, %v10226_v36  ;;  %v8156_v35 = vshll.u32 %v7988_v24, 16  ;;  %v6511_v53 = vunpack.c.l.b16 %v6078_v8  ;;  %v7337_v39 = vpack.c.b16 %v7289_v55, %v7288_v0  ;;  %v4860_v52 = vpop.f32.mrf.mxu1  ;;  %v10100_v10 = vld [vmem:[%s15968_s0 + $0xf0] sm:$0xe] }
 0x3c6   :  { %10227 = vst [vmem:[%s15971_s4 + $0x54] sm:$0xf] %v8731_v48  ;;  %v7685_v14 = vmul.f32 %v14447_v9, %v7617_v27  ;;  %v4509_v57 = vsel %vm11351_vm5, %v9636_v26, %v4508_v4  ;;  %v4510_v59 = vrot.slane %v4508_v4, 4  ;;  %v8155_v28 = vrot.slane %v8153_v49, 7  ;;  %v7483_v54 = vpop.f32.mrf.mxu0 }
 0x3c7   :  { %v6559_v3 = vpack.c.b16 %v6511_v53, %v6510_v58  ;;  %v5550_v21 = vadd.f32 %v5412_v30, %v4995_v1  ;;  %v4667_v34 = vunpack.c.l.b16 %v4509_v57  ;;  %v6080_v2 = vshrl.u32 %v9988_v6, 16  ;;  %v9990_v1 = vld [vmem:[%s15968_s0 + $0xf8] sm:$0x1]  ;;  %5454 = vmatmul.bf16.gmra.mxu2 %v10484_v51 }
 0x3c8   :  { %7517 = vmatmul.bf16.gmra.mxu0 %v7337_v39  ;;  %v7753_v60 = vadd.f32 %v14458_v56, %v7685_v14  ;;  %v4512_v37 = vsel %vm11351_vm5, %v4510_v59, %v4511_v50  ;;  %v6083_v20 = vshll.u32 %v9988_v6, 16  ;;  %v8158_v58 = vor.u32 %v8156_v35, %v8155_v28 }
 0x3c9   :  { %v8160_v40 = vrot.slane %v8155_v28, 4  ;;  %6739 = vmatmul.bf16.gmra.mxu3 %v6559_v3  ;;  %v6840_v42 = vadd.f32 %v6702_v23, %v5550_v21  ;;  %v4996_v0 = vadd.f32 %v4860_v52, %v12324_v45  ;;  %v4668_v17 = vunpack.c.l.b16 %v4512_v37 }
 0x3ca   :  { %v7817_v36 = vmax.f32 %v7753_v60, 0.0  ;;  %v6082_v43 = vrot.slane %v6080_v2, 4  ;;  %v6085_v26 = vrot.slane %v6083_v20, 5  ;;  %v8159_v24 = vsel %vm13786_vm11, %v8151_v62, %v8158_v58  ;;  %v5415_v39 = vpop.f32.mrf.mxu2  ;;  %v10231_v60 = vld [vmem:[%s15971_s4 + $0x60] sm:$0xf] }
 0x3cb   :  { %v8735_v55 = vsel %vm14037_vm13, %v8160_v40, %v10229_v5  ;;  %v7618_v45 = vadd.f32 %v7480_v32, %v6840_v42  ;;  %v6089_v8 = vshll.u32 %v9989_v33, 16  ;;  %10228 = vst [vmem:[%s15971_s4 + $0x58] sm:$0xf] %v8159_v24  ;;  %v4715_v46 = vpack.c.b16 %v4668_v17, %v4667_v34  ;;  %v6705_v14 = vpop.f32.mrf.mxu3 }
 0x3cc   :  { %v7989_v27 = vpack.c.bf16 %v7817_v36, %v7817_v36  ;;  %v6086_v4 = vor.u32 %v6085_v26, %v6082_v43  ;;  %v6093_v29 = vshrl.u32 %v9989_v33, 16  ;;  %10230 = vst [vmem:[%s15971_s4 + $0x5c] sm:$0x1] %v8735_v55  ;;  %v6099_v48 = vshll.u32 %v9990_v1, 16  ;;  %v9991_v43 = vld [vmem:[%s15968_s0 + $0xfc] sm:$0xf] }
 0x3cd   :  { %v7686_v62 = vmul.f32 %v14447_v9, %v7618_v45  ;;  %v6091_v50 = vrot.slane %v6089_v8, 5  ;;  %v10132_v49 = vrot.slane %v10100_v10, 9  ;;  %v7131_v57 = vrot.slane %v9989_v33, 5  ;;  %v4862_v34 = vpop.f32.mrf.mxu1  ;;  %v9605_v33 = vld [vmem:[%s15968_s0 + $0xf0] sm:$0xe] }
 0x3ce   :  { %v8162_v32 = vshrl.u32 %v7989_v27, 16  ;;  %v8165_v35 = vshll.u32 %v7989_v27, 16  ;;  %4899 = vmatmul.bf16.gmra.mxu1 %v4715_v46  ;;  %v6087_v53 = vrot.slane %v6086_v4, 4  ;;  %v6095_v6 = vrot.slane %v6093_v29, 4  ;;  %v7485_v55 = vpop.f32.mrf.mxu0 }
 0x3cf   :  { %v7754_v30 = vadd.f32 %v14458_v56, %v7686_v62  ;;  %v6101_v23 = vrot.slane %v6099_v48, 5  ;;  %v7134_v59 = vrot.slane %v9990_v1, 5  ;;  %v5551_v21 = vadd.f32 %v5415_v39, %v4996_v0 }
 0x3d0   :  { %v14615_v28 = vrot.slane %v8162_v32, 7  ;;  %v6092_v5 = vsel %vm10739_vm2, %v6087_v53, %v6091_v50  ;;  %v6096_v3 = vor.u32 %v6095_v6, %v6091_v50  ;;  %v7132_v51 = vsel %vm11351_vm5, %v10132_v49, %v7131_v57  ;;  %v10645_v50 = vld [vmem:[%s15968_s0 + $0xf4] sm:$0xf]  ;;  %v10646_v49 = vld [vmem:[%s15968_s0 + $0xf8] sm:$0x1] }
 0x3d1   :  { %v7818_v52 = vmax.f32 %v7754_v30, 0.0  ;;  %v6512_v37 = vunpack.c.l.b16 %v6092_v5  ;;  %v7133_v2 = vrot.slane %v7131_v57, 4  ;;  %v7290_v42 = vunpack.c.l.b16 %v7132_v51 }
 0x3d2   :  { %v8167_v20 = vor.u32 %v8165_v35, %v14615_v28  ;;  %v8168_v58 = vrot.slane %v14615_v28, 4  ;;  %v6097_v40 = vrot.slane %v6096_v3, 4  ;;  %v6841_v36 = vadd.f32 %v6705_v14, %v5551_v21  ;;  %v5417_v29 = vpop.f32.mrf.mxu2 }
 0x3d3   :  { %v7990_v0 = vpack.c.bf16 %v7818_v52, %v7818_v52  ;;  %v7135_v1 = vsel %vm11351_vm5, %v7133_v2, %v7134_v59  ;;  %v4997_v17 = vadd.f32 %v4862_v34, %v12356_v13  ;;  %v9637_v45 = vrot.slane %v9605_v33, 9  ;;  %v6707_v62 = vpop.f32.mrf.mxu3  ;;  %v10485_v59 = vld [vmem:[%s15968_s0 + $0xfc] sm:$0xff]  ;;  %v9993_v33 = vld [vmem:[%s15968_s0 + $0x104] sm:$0x1] }
 0x3d4   :  { %v8738_v26 = vsel %vm13735_vm8, %v8167_v20, %v10231_v60  ;;  %v6102_v10 = vsel %vm10739_vm2, %v6097_v40, %v6101_v23  ;;  %v7291_v24 = vunpack.c.l.b16 %v7135_v1  ;;  %v7619_v46 = vadd.f32 %v7483_v54, %v6841_v36  ;;  %v10234_v54 = vld [vmem:[%s15971_s4 + $0x68] sm:$0x1]  ;;  %v9992_v52 = vld [vmem:[%s15968_s0 + $0x100] sm:$0xf]  ;;  %v10101_v40 = vld [vmem:[%s15968_s0 + $0xfc] sm:$0xe] }
 0x3d5   :  { %10232 = vst [vmem:[%s15971_s4 + $0x60] sm:$0xf] %v8738_v26  ;;  %v8170_v8 = vshrl.u32 %v7990_v0, 16  ;;  %v8173_v27 = vshll.u32 %v7990_v0, 16  ;;  %v6513_v13 = vunpack.c.l.b16 %v6102_v10  ;;  %v4515_v48 = vrot.slane %v10645_v50, 5  ;;  %v4865_v30 = vpop.f32.mrf.mxu1 }
 0x3d6   :  { %v7338_v4 = vpack.c.b16 %v7291_v24, %v7290_v42  ;;  %v4518_v32 = vrot.slane %v10646_v49, 5  ;;  %v6104_v35 = vshrl.u32 %v9991_v43, 16  ;;  %v7687_v39 = vmul.f32 %v14447_v9, %v7619_v46 }
 0x3d7   :  { %v8172_v53 = vrot.slane %v8170_v8, 7  ;;  %v6560_v6 = vpack.c.b16 %v6513_v13, %v6512_v37  ;;  %v5552_v14 = vadd.f32 %v5417_v29, %v4997_v17  ;;  %v4516_v23 = vsel %vm11351_vm5, %v9637_v45, %v4515_v48  ;;  %5459 = vmatmul.bf16.gmra.mxu2 %v10485_v59  ;;  %v7488_v8 = vpop.f32.mrf.mxu0  ;;  %v10236_v59 = vld [vmem:[%s15971_s4 + $0x6c] sm:$0xf] }
 0x3d8   :  { %7522 = vmatmul.bf16.gmra.mxu0 %v7338_v4  ;;  %v4517_v57 = vrot.slane %v4515_v48, 4  ;;  %v6106_v28 = vrot.slane %v6104_v35, 4  ;;  %v6107_v5 = vshll.u32 %v9991_v43, 16  ;;  %v7755_v34 = vadd.f32 %v14458_v56, %v7687_v39 }
 0x3d9   :  { %v8175_v3 = vor.u32 %v8173_v27, %v8172_v53  ;;  %v8177_v21 = vrot.slane %v8172_v53, 4  ;;  %6744 = vmatmul.bf16.gmra.mxu3 %v6560_v6  ;;  %v6842_v60 = vadd.f32 %v6707_v62, %v5552_v14  ;;  %v4998_v37 = vadd.f32 %v4865_v30, %v12378_v41 }
 0x3da   :  { %v4519_v51 = vsel %vm11351_vm5, %v4517_v57, %v4518_v32  ;;  %v4669_v2 = vunpack.c.l.b16 %v4516_v23  ;;  %v6109_v20 = vrot.slane %v6107_v5, 5  ;;  %v7819_v41 = vmax.f32 %v7755_v34, 0.0  ;;  %v5420_v4 = vpop.f32.mrf.mxu2  ;;  %v9606_v57 = vld [vmem:[%s15968_s0 + $0xfc] sm:$0xe] }
 0x3db   :  { %v8176_v42 = vsel %vm13786_vm11, %v8168_v58, %v8175_v3  ;;  %v8742_v0 = vsel %vm14037_vm13, %v8177_v21, %v10234_v54  ;;  %v7620_v1 = vadd.f32 %v7485_v55, %v6842_v60  ;;  %v4670_v36 = vunpack.c.l.b16 %v4519_v51  ;;  %v6710_v49 = vpop.f32.mrf.mxu3 }
 0x3dc   :  { %10233 = vst [vmem:[%s15971_s4 + $0x64] sm:$0xf] %v8176_v42  ;;  %v6110_v17 = vor.u32 %v6109_v20, %v6106_v28  ;;  %v6113_v43 = vshll.u32 %v9992_v52, 16  ;;  %v6117_v26 = vshrl.u32 %v9992_v52, 16  ;;  %v7991_v10 = vpack.c.bf16 %v7819_v41, %v7819_v41 }
 0x3dd   :  { %10235 = vst [vmem:[%s15971_s4 + $0x68] sm:$0x1] %v8742_v0  ;;  %v7688_v58 = vmul.f32 %v14447_v9, %v7620_v1  ;;  %v6123_v24 = vshll.u32 %v9993_v33, 16  ;;  %v10133_v45 = vrot.slane %v10101_v40, 9  ;;  %v4716_v55 = vpack.c.b16 %v4670_v36, %v4669_v2  ;;  %v4867_v39 = vpop.f32.mrf.mxu1  ;;  %v9994_v40 = vld [vmem:[%s15968_s0 + $0x108] sm:$0xf] }
 0x3de   :  { %v6111_v27 = vrot.slane %v6110_v17, 4  ;;  %v6115_v13 = vrot.slane %v6113_v43, 5  ;;  %v6119_v46 = vrot.slane %v6117_v26, 4  ;;  %v8179_v29 = vshrl.u32 %v7991_v10, 16  ;;  %v10647_v26 = vld [vmem:[%s15968_s0 + $0x100] sm:$0xf] }
 0x3df   :  { %v8182_v62 = vshll.u32 %v7991_v10, 16  ;;  %v7756_v50 = vadd.f32 %v14458_v56, %v7688_v58  ;;  %v6125_v48 = vrot.slane %v6123_v24, 5  ;;  %4904 = vmatmul.bf16.gmra.mxu1 %v4716_v55  ;;  %v7138_v53 = vrot.slane %v9992_v52, 5  ;;  %v7490_v17 = vpop.f32.mrf.mxu0  ;;  %v10648_v58 = vld [vmem:[%s15968_s0 + $0x104] sm:$0x1] }
 0x3e0   :  { %v6116_v32 = vsel %vm10739_vm2, %v6111_v27, %v6115_v13  ;;  %v6120_v35 = vor.u32 %v6119_v46, %v6115_v13  ;;  %v7141_v6 = vrot.slane %v9993_v33, 5  ;;  %v8181_v14 = vrot.slane %v8179_v29, 7 }
 0x3e1   :  { %v7820_v54 = vmax.f32 %v7756_v50, 0.0  ;;  %v6514_v30 = vunpack.c.l.b16 %v6116_v32  ;;  %v5553_v23 = vadd.f32 %v5420_v4, %v4998_v37  ;;  %v7139_v5 = vsel %vm11351_vm5, %v10133_v45, %v7138_v53 }
 0x3e2   :  { %v6121_v28 = vrot.slane %v6120_v35, 4  ;;  %v7140_v3 = vrot.slane %v7138_v53, 4  ;;  %v4999_v21 = vadd.f32 %v4867_v39, %v12403_v15  ;;  %v8184_v34 = vor.u32 %v8182_v62, %v8181_v14  ;;  %v5422_v43 = vpop.f32.mrf.mxu2  ;;  %v9995_v39 = vld [vmem:[%s15968_s0 + $0x10c] sm:$0xf] }
 0x3e3   :  { %v8185_v60 = vrot.slane %v8181_v14, 4  ;;  %v7992_v52 = vpack.c.bf16 %v7820_v54, %v7820_v54  ;;  %v7292_v51 = vunpack.c.l.b16 %v7139_v5  ;;  %v6843_v33 = vadd.f32 %v6710_v49, %v5553_v23  ;;  %v6712_v13 = vpop.f32.mrf.mxu3  ;;  %v10486_v49 = vld [vmem:[%s15968_s0 + $0x108] sm:$0xff]  ;;  %v9996_v23 = vld [vmem:[%s15968_s0 + $0x110] sm:$0x1] }
 0x3e4   :  { %v6126_v37 = vsel %vm10739_vm2, %v6121_v28, %v6125_v48  ;;  %v7142_v2 = vsel %vm11351_vm5, %v7140_v3, %v7141_v6  ;;  %v9638_v20 = vrot.slane %v9606_v57, 9  ;;  %v8745_v42 = vsel %vm13735_vm8, %v8184_v34, %v10236_v59 }
 0x3e5   :  { %v8187_v15 = vshrl.u32 %v7992_v52, 16  ;;  %v8190_v0 = vshll.u32 %v7992_v52, 16  ;;  %v6515_v41 = vunpack.c.l.b16 %v6126_v37  ;;  %10237 = vst [vmem:[%s15971_s4 + $0x6c] sm:$0xf] %v8745_v42  ;;  %v7293_v1 = vunpack.c.l.b16 %v7142_v2  ;;  %v4870_v62 = vpop.f32.mrf.mxu1 }
 0x3e6   :  { %v7621_v36 = vadd.f32 %v7488_v8, %v6843_v33  ;;  %v4522_v10 = vrot.slane %v10647_v26, 5  ;;  %v4525_v24 = vrot.slane %v10648_v58, 5  ;;  %v5554_v27 = vadd.f32 %v5422_v43, %v4999_v21  ;;  %v10239_v8 = vld [vmem:[%s15971_s4 + $0x74] sm:$0x1] }
 0x3e7   :  { %v8189_v45 = vrot.slane %v8187_v15, 7  ;;  %v6561_v55 = vpack.c.b16 %v6515_v41, %v6514_v30  ;;  %v6128_v46 = vshrl.u32 %v9994_v40, 16  ;;  %v7339_v4 = vpack.c.b16 %v7293_v1, %v7292_v51  ;;  %5464 = vmatmul.bf16.gmra.mxu2 %v10486_v49 }
 0x3e8   :  { %v7689_v29 = vmul.f32 %v14447_v9, %v7621_v36  ;;  %v4523_v50 = vsel %vm11351_vm5, %v9638_v20, %v4522_v10  ;;  %v4524_v48 = vrot.slane %v4522_v10, 4  ;;  %v6844_v53 = vadd.f32 %v6712_v13, %v5554_v27  ;;  %v7493_v36 = vpop.f32.mrf.mxu0 }
 0x3e9   :  { %v8192_v32 = vor.u32 %v8190_v0, %v8189_v45  ;;  %v8194_v35 = vrot.slane %v8189_v45, 4  ;;  %6749 = vmatmul.bf16.gmra.mxu3 %v6561_v55  ;;  %v5000_v6 = vadd.f32 %v4870_v62, %v12434_v18  ;;  %7527 = vmatmul.bf16.gmra.mxu0 %v7339_v4  ;;  %v4671_v30 = vunpack.c.l.b16 %v4523_v50  ;;  %v10102_v18 = vld [vmem:[%s15968_s0 + $0x108] sm:$0xe] }
 0x3ea   :  { %v7757_v14 = vadd.f32 %v14458_v56, %v7689_v29  ;;  %v4526_v54 = vsel %vm11351_vm5, %v4524_v48, %v4525_v24  ;;  %v6130_v57 = vrot.slane %v6128_v46, 4  ;;  %v7622_v5 = vadd.f32 %v7490_v17, %v6844_v53  ;;  %v5425_v41 = vpop.f32.mrf.mxu2  ;;  %v10241_v48 = vld [vmem:[%s15971_s4 + $0x78] sm:$0xf] }
 0x3eb   :  { %v8193_v59 = vsel %vm13786_vm11, %v8185_v60, %v8192_v32  ;;  %v8749_v28 = vsel %vm14037_vm13, %v8194_v35, %v10239_v8  ;;  %v4672_v3 = vunpack.c.l.b16 %v4526_v54  ;;  %v6131_v34 = vshll.u32 %v9994_v40, 16  ;;  %v6715_v8 = vpop.f32.mrf.mxu3 }
 0x3ec   :  { %10238 = vst [vmem:[%s15971_s4 + $0x70] sm:$0xf] %v8193_v59  ;;  %v7821_v21 = vmax.f32 %v7757_v14, 0.0  ;;  %v6137_v52 = vshll.u32 %v9995_v39, 16  ;;  %v6141_v51 = vshrl.u32 %v9995_v39, 16  ;;  %v7690_v60 = vmul.f32 %v14447_v9, %v7622_v5 }
 0x3ed   :  { %10240 = vst [vmem:[%s15971_s4 + $0x74] sm:$0x1] %v8749_v28  ;;  %v4717_v37 = vpack.c.b16 %v4672_v3, %v4671_v30  ;;  %v6147_v2 = vshll.u32 %v9996_v23, 16  ;;  %v10134_v33 = vrot.slane %v10102_v18, 9  ;;  %v6133_v42 = vrot.slane %v6131_v34, 5  ;;  %v4872_v45 = vpop.f32.mrf.mxu1 }
 0x3ee   :  { %v7993_v20 = vpack.c.bf16 %v7821_v21, %v7821_v21  ;;  %v6139_v15 = vrot.slane %v6137_v52, 5  ;;  %v6143_v0 = vrot.slane %v6141_v51, 4  ;;  %v7758_v1 = vadd.f32 %v14458_v56, %v7690_v60 }
 0x3ef   :  { %v6149_v40 = vrot.slane %v6147_v2, 5  ;;  %v7145_v17 = vrot.slane %v9995_v39, 5  ;;  %v7148_v43 = vrot.slane %v9996_v23, 5  ;;  %4909 = vmatmul.bf16.gmra.mxu1 %v4717_v37  ;;  %v6134_v58 = vor.u32 %v6133_v42, %v6130_v57  ;;  %v10649_v37 = vld [vmem:[%s15968_s0 + $0x10c] sm:$0xf] }
 0x3f0   :  { %v8196_v26 = vshrl.u32 %v7993_v20, 16  ;;  %v8199_v10 = vshll.u32 %v7993_v20, 16  ;;  %v6144_v24 = vor.u32 %v6143_v0, %v6139_v15  ;;  %v7822_v55 = vmax.f32 %v7758_v1, 0.0  ;;  %v10650_v0 = vld [vmem:[%s15968_s0 + $0x110] sm:$0x1]  ;;  %v10487_v1 = vld [vmem:[%s15968_s0 + $0x114] sm:$0xff] }
 0x3f1   :  { %v7146_v27 = vsel %vm11351_vm5, %v10134_v33, %v7145_v17  ;;  %v7147_v13 = vrot.slane %v7145_v17, 4  ;;  %v5555_v46 = vadd.f32 %v5425_v41, %v5000_v6  ;;  %v6135_v29 = vrot.slane %v6134_v58, 4  ;;  %v9607_v6 = vld [vmem:[%s15968_s0 + $0x108] sm:$0xe]  ;;  %v10244_v33 = vld [vmem:[%s15971_s4 + $0x80] sm:$0x1] }
 0x3f2   :  { %v8198_v4 = vrot.slane %v8196_v26, 7  ;;  %v6145_v62 = vrot.slane %v6144_v24, 4  ;;  %v7294_v50 = vunpack.c.l.b16 %v7146_v27  ;;  %v7994_v49 = vpack.c.bf16 %v7822_v55, %v7822_v55  ;;  %v5427_v21 = vpop.f32.mrf.mxu2 }
 0x3f3   :  { %v7149_v32 = vsel %vm11351_vm5, %v7147_v13, %v7148_v43  ;;  %v6845_v35 = vadd.f32 %v6715_v8, %v5555_v46  ;;  %v5001_v53 = vadd.f32 %v4872_v45, %v12456_v12  ;;  %v6140_v54 = vsel %vm10739_vm2, %v6135_v29, %v6139_v15  ;;  %v9997_v12 = vld [vmem:[%s15968_s0 + $0x114] sm:$0xf]  ;;  %v7495_v15 = vpop.f32.mrf.mxu0  ;;  %v6717_v43 = vpop.f32.mrf.mxu3  ;;  %v9998_v13 = vld [vmem:[%s15968_s0 + $0x118] sm:$0xf]  ;;  %v9999_v46 = vld [vmem:[%s15968_s0 + $0x11c] sm:$0x1] }
 0x3f4   :  { %v8201_v39 = vor.u32 %v8199_v10, %v8198_v4  ;;  %v8202_v14 = vrot.slane %v8198_v4, 4  ;;  %v6150_v30 = vsel %vm10739_vm2, %v6145_v62, %v6149_v40  ;;  %v8204_v23 = vshrl.u32 %v7994_v49, 16  ;;  %v10103_v8 = vld [vmem:[%s15968_s0 + $0x114] sm:$0xe] }
 0x3f5   :  { %v8207_v57 = vshll.u32 %v7994_v49, 16  ;;  %v6516_v18 = vunpack.c.l.b16 %v6140_v54  ;;  %v6517_v59 = vunpack.c.l.b16 %v6150_v30  ;;  %v7295_v5 = vunpack.c.l.b16 %v7149_v32  ;;  %v4875_v26 = vpop.f32.mrf.mxu1 }
 0x3f6   :  { %v8752_v28 = vsel %vm13735_vm8, %v8201_v39, %v10241_v48  ;;  %v7623_v3 = vadd.f32 %v7493_v36, %v6845_v35  ;;  %v9639_v34 = vrot.slane %v9607_v6, 9  ;;  %v8206_v52 = vrot.slane %v8204_v23, 7 }
 0x3f7   :  { %10242 = vst [vmem:[%s15971_s4 + $0x78] sm:$0xf] %v8752_v28  ;;  %v6562_v51 = vpack.c.b16 %v6517_v59, %v6516_v18  ;;  %v5556_v60 = vadd.f32 %v5427_v21, %v5001_v53  ;;  %v4529_v2 = vrot.slane %v10649_v37, 5  ;;  %v7340_v20 = vpack.c.b16 %v7295_v5, %v7294_v50  ;;  %5469 = vmatmul.bf16.gmra.mxu2 %v10487_v1 }
 0x3f8   :  { %v7691_v42 = vmul.f32 %v14447_v9, %v7623_v3  ;;  %v4532_v41 = vrot.slane %v10650_v0, 5  ;;  %v6152_v36 = vshrl.u32 %v9997_v12, 16  ;;  %v8209_v40 = vor.u32 %v8207_v57, %v8206_v52 }
 0x3f9   :  { %v8211_v17 = vrot.slane %v8206_v52, 4  ;;  %6754 = vmatmul.bf16.gmra.mxu3 %v6562_v51  ;;  %v4530_v10 = vsel %vm11351_vm5, %v9639_v34, %v4529_v2  ;;  %v4531_v58 = vrot.slane %v4529_v2, 4  ;;  %7532 = vmatmul.bf16.gmra.mxu0 %v7340_v20  ;;  %v6846_v45 = vadd.f32 %v6717_v43, %v5556_v60 }
 0x3fa   :  { %v7759_v24 = vadd.f32 %v14458_v56, %v7691_v42  ;;  %v5002_v55 = vadd.f32 %v4875_v26, %v12478_v61  ;;  %v4673_v27 = vunpack.c.l.b16 %v4530_v10  ;;  %v8210_v4 = vsel %vm13786_vm11, %v8202_v14, %v8209_v40  ;;  %v5430_v5 = vpop.f32.mrf.mxu2 }
 0x3fb   :  { %v8756_v29 = vsel %vm14037_vm13, %v8211_v17, %v10244_v33  ;;  %v4533_v61 = vsel %vm11351_vm5, %v4531_v58, %v4532_v41  ;;  %v6154_v62 = vrot.slane %v6152_v36, 4  ;;  %10243 = vst [vmem:[%s15971_s4 + $0x7c] sm:$0xf] %v8210_v4  ;;  %v7624_v48 = vadd.f32 %v7495_v15, %v6846_v45  ;;  %v10246_v15 = vld [vmem:[%s15971_s4 + $0x84] sm:$0xf]  ;;  %v7498_v0 = vpop.f32.mrf.mxu0  ;;  %v16093_v36 = vld [vmem:[#allocation35_spill] sm:$0xff] }
 0x3fc   :  { %v7823_v50 = vmax.f32 %v7759_v24, 0.0  ;;  %v4674_v49 = vunpack.c.l.b16 %v4533_v61  ;;  %v6155_v32 = vshll.u32 %v9997_v12, 16  ;;  %10245 = vst [vmem:[%s15971_s4 + $0x80] sm:$0x1] %v8756_v29  ;;  %v6161_v35 = vshll.u32 %v9998_v13, 16  ;;  %v6720_v61 = vpop.f32.mrf.mxu3 }
 0x3fd   :  { %v6165_v53 = vshrl.u32 %v9998_v13, 16  ;;  %v6171_v6 = vshll.u32 %v9999_v46, 16  ;;  %v10135_v39 = vrot.slane %v10103_v8, 9  ;;  %v7692_v54 = vmul.f32 %v14447_v9, %v7624_v48  ;;  %v4877_v9 = vpop.f32.mrf.mxu1  ;;  %v9608_v17 = vld [vmem:[%s15968_s0 + $0x114] sm:$0xe] }
 0x3fe   :  { %v7995_v14 = vpack.c.bf16 %v7823_v50, %v7823_v50  ;;  %v4718_v30 = vpack.c.b16 %v4674_v49, %v4673_v27  ;;  %v6157_v23 = vrot.slane %v6155_v32, 5  ;;  %v6163_v57 = vrot.slane %v6161_v35, 5  ;;  %v10651_v49 = vld [vmem:[%s15968_s0 + $0x118] sm:$0xf]  ;;  %v10652_v35 = vld [vmem:[%s15968_s0 + $0x11c] sm:$0x1] }
 0x3ff   :  { %v6167_v18 = vrot.slane %v6165_v53, 4  ;;  %v6173_v59 = vrot.slane %v6171_v6, 5  ;;  %v7152_v28 = vrot.slane %v9998_v13, 5  ;;  %v7760_v21 = vadd.f32 %v14458_v56, %v7692_v54  ;;  %v10488_v54 = vld [vmem:[%s15968_s0 + $0x120] sm:$0xff] }
 0x400   :  { %v8213_v3 = vshrl.u32 %v7995_v14, 16  ;;  %v8216_v12 = vshll.u32 %v7995_v14, 16  ;;  %4914 = vmatmul.bf16.gmra.mxu1 %v4718_v30  ;;  %v6158_v34 = vor.u32 %v6157_v23, %v6154_v62  ;;  %v7155_v37 = vrot.slane %v9999_v46, 5  ;;  %v10249_v23 = vld [vmem:[%s15971_s4 + $0x8c] sm:$0x1] }
 0x401   :  { %v6168_v52 = vor.u32 %v6167_v18, %v6163_v57  ;;  %v7153_v51 = vsel %vm11351_vm5, %v10135_v39, %v7152_v28  ;;  %v7154_v60 = vrot.slane %v7152_v28, 4  ;;  %v7824_v33 = vmax.f32 %v7760_v21, 0.0 }
 0x402   :  { %v8215_v2 = vrot.slane %v8213_v3, 7  ;;  %v6159_v20 = vrot.slane %v6158_v34, 4  ;;  %v7296_v42 = vunpack.c.l.b16 %v7153_v51  ;;  %v5557_v1 = vadd.f32 %v5430_v5, %v5002_v55  ;;  %v10000_v55 = vld [vmem:[%s15968_s0 + $0x120] sm:$0xf]  ;;  %v5432_v48 = vpop.f32.mrf.mxu2  ;;  %v10001_v5 = vld [vmem:[%s15968_s0 + $0x124] sm:$0xf] }
 0x403   :  { %v6169_v41 = vrot.slane %v6168_v52, 4  ;;  %v7156_v56 = vsel %vm11351_vm5, %v7154_v60, %v7155_v37  ;;  %v5003_v40 = vadd.f32 %v4877_v9, %v16093_v36  ;;  %v7996_v10 = vpack.c.bf16 %v7824_v33, %v7824_v33  ;;  %v16094_v34 = vld [vmem:[#allocation36_spill] sm:$0xff]  ;;  %v10002_v60 = vld [vmem:[%s15968_s0 + $0x128] sm:$0x1]  ;;  %v14855_v37 = vld [vmem:[%s15969_s2] ss:$0 sm:$0xff] }
 0x404   :  { %v8218_v43 = vor.u32 %v8216_v12, %v8215_v2  ;;  %v8219_v26 = vrot.slane %v8215_v2, 4  ;;  %v6164_v58 = vsel %vm10739_vm2, %v6159_v20, %v6163_v57  ;;  %v7297_v27 = vunpack.c.l.b16 %v7156_v56  ;;  %v7500_v2 = vpop.f32.mrf.mxu0  ;;  %v14873_v36 = vld [vmem:[%s15970_s3] ss:$0 sm:$0xff] }
 0x405   :  { %v6174_v24 = vsel %vm10739_vm2, %v6169_v41, %v6173_v59  ;;  %v6518_v45 = vunpack.c.l.b16 %v6164_v58  ;;  %v9640_v13 = vrot.slane %v9608_v17, 9  ;;  %v8221_v8 = vshrl.u32 %v7996_v10, 16  ;;  %v4880_v18 = vpop.f32.mrf.mxu1 }
 0x406   :  { %v8759_v46 = vsel %vm13735_vm8, %v8218_v43, %v10246_v15  ;;  %v8224_v4 = vshll.u32 %v7996_v10, 16  ;;  %v6519_v29 = vunpack.c.l.b16 %v6174_v24  ;;  %v7341_v62 = vpack.c.b16 %v7297_v27, %v7296_v42  ;;  %v10104_v15 = vld [vmem:[%s15968_s0 + $0x120] sm:$0xe]  ;;  %v6722_v10 = vpop.f32.mrf.mxu3 }
 0x407   :  { %10247 = vst [vmem:[%s15971_s4 + $0x84] sm:$0xf] %v8759_v46  ;;  %v6847_v50 = vadd.f32 %v6720_v61, %v5557_v1  ;;  %v4536_v32 = vrot.slane %v10651_v49, 5  ;;  %v4539_v53 = vrot.slane %v10652_v35, 5  ;;  %v8223_v6 = vrot.slane %v8221_v8, 7  ;;  %5474 = vmatmul.bf16.gmra.mxu2 %v10488_v54 }
 0x408   :  { %v6563_v39 = vpack.c.b16 %v6519_v29, %v6518_v45  ;;  %v5558_v14 = vadd.f32 %v5432_v48, %v5003_v40  ;;  %v6176_v30 = vshrl.u32 %v10000_v55, 16  ;;  %v6179_v3 = vshll.u32 %v10000_v55, 16 }
 0x409   :  { %v7625_v57 = vadd.f32 %v7498_v0, %v6847_v50  ;;  %v4537_v59 = vsel %vm11351_vm5, %v9640_v13, %v4536_v32  ;;  %v4538_v28 = vrot.slane %v4536_v32, 4  ;;  %v8226_v12 = vor.u32 %v8224_v4, %v8223_v6  ;;  %7537 = vmatmul.bf16.gmra.mxu0 %v7341_v62 }
 0x40a   :  { %v8228_v21 = vrot.slane %v8223_v6, 4  ;;  %6759 = vmatmul.bf16.gmra.mxu3 %v6563_v39  ;;  %v5004_v52 = vadd.f32 %v4880_v18, %v16094_v34  ;;  %v4675_v51 = vunpack.c.l.b16 %v4537_v59  ;;  %v6178_v20 = vrot.slane %v6176_v30, 4  ;;  %v5435_v4 = vpop.f32.mrf.mxu2  ;;  %v10655_v34 = vld [vmem:[%s15968_s0 + $0x124] sm:$0xf] }
 0x40b   :  { %v7693_v9 = vmul.f32 %v14855_v37, %v7625_v57  ;;  %v4540_v33 = vsel %vm11351_vm5, %v4538_v28, %v4539_v53  ;;  %v6181_v42 = vrot.slane %v6179_v3, 5  ;;  %v8227_v0 = vsel %vm13786_vm11, %v8219_v26, %v8226_v12  ;;  %v9609_v28 = vld [vmem:[%s15968_s0 + $0x120] sm:$0xe]  ;;  %v16095_v3 = vld [vmem:[#allocation37_spill] sm:$0xff] }
 0x40c   :  { %v8763_v41 = vsel %vm14037_vm13, %v8228_v21, %v10249_v23  ;;  %v4676_v56 = vunpack.c.l.b16 %v4540_v33  ;;  %v6185_v1 = vshll.u32 %v10001_v5, 16  ;;  %10248 = vst [vmem:[%s15971_s4 + $0x88] sm:$0xf] %v8227_v0  ;;  %v6189_v43 = vshrl.u32 %v10001_v5, 16 }
 0x40d   :  { %v7761_v40 = vadd.f32 %v14873_v36, %v7693_v9  ;;  %v6182_v17 = vor.u32 %v6181_v42, %v6178_v20  ;;  %v6195_v26 = vshll.u32 %v10002_v60, 16  ;;  %10250 = vst [vmem:[%s15971_s4 + $0x8c] sm:$0x1] %v8763_v41  ;;  %v10136_v45 = vrot.slane %v10104_v15, 9  ;;  %v4882_v53 = vpop.f32.mrf.mxu1  ;;  %v10003_v20 = vld [vmem:[%s15968_s0 + $0x12c] sm:$0xf] }
 0x40e   :  { %v4719_v58 = vpack.c.b16 %v4676_v56, %v4675_v51  ;;  %v6187_v24 = vrot.slane %v6185_v1, 5  ;;  %v7159_v27 = vrot.slane %v10001_v5, 5  ;;  %v6848_v55 = vadd.f32 %v6722_v10, %v5558_v14  ;;  %v10251_v42 = vld [vmem:[%s15971_s4 + $0x90] sm:$0xf] }
 0x40f   :  { %v7825_v13 = vmax.f32 %v7761_v40, 0.0  ;;  %v6183_v46 = vrot.slane %v6182_v17, 4  ;;  %v6191_v8 = vrot.slane %v6189_v43, 4  ;;  %v6197_v29 = vrot.slane %v6195_v26, 5  ;;  %v10004_v10 = vld [vmem:[%s15968_s0 + $0x130] sm:$0xf] }
 0x410   :  { %4919 = vmatmul.bf16.gmra.mxu1 %v4719_v58  ;;  %v7160_v61 = vsel %vm11351_vm5, %v10136_v45, %v7159_v27  ;;  %v7161_v62 = vrot.slane %v7159_v27, 4  ;;  %v7162_v50 = vrot.slane %v10002_v60, 5  ;;  %v7626_v49 = vadd.f32 %v7500_v2, %v6848_v55  ;;  %v10656_v2 = vld [vmem:[%s15968_s0 + $0x128] sm:$0x1] }
 0x411   :  { %v7997_v48 = vpack.c.bf16 %v7825_v13, %v7825_v13  ;;  %v6188_v32 = vsel %vm10739_vm2, %v6183_v46, %v6187_v24  ;;  %v6192_v35 = vor.u32 %v6191_v8, %v6187_v24  ;;  %v7298_v14 = vunpack.c.l.b16 %v7160_v61  ;;  %v10489_v13 = vld [vmem:[%s15968_s0 + $0x12c] sm:$0xff] }
 0x412   :  { %v6520_v6 = vunpack.c.l.b16 %v6188_v32  ;;  %v7163_v39 = vsel %vm11351_vm5, %v7161_v62, %v7162_v50  ;;  %v5559_v54 = vadd.f32 %v5435_v4, %v5004_v52  ;;  %v7694_v57 = vmul.f32 %v14855_v37, %v7626_v49  ;;  %v5437_v43 = vpop.f32.mrf.mxu2  ;;  %v10005_v62 = vld [vmem:[%s15968_s0 + $0x134] sm:$0x1]  ;;  %v10105_v50 = vld [vmem:[%s15968_s0 + $0x12c] sm:$0xe] }
 0x413   :  { %v8230_v30 = vshrl.u32 %v7997_v48, 16  ;;  %v8233_v23 = vshll.u32 %v7997_v48, 16  ;;  %v6193_v59 = vrot.slane %v6192_v35, 4  ;;  %v7299_v5 = vunpack.c.l.b16 %v7163_v39  ;;  %v16096_v48 = vld [vmem:[#allocation38_spill] sm:$0xff] }
 0x414   :  { %v5005_v12 = vadd.f32 %v4882_v53, %v16095_v3  ;;  %v9641_v21 = vrot.slane %v9609_v28, 9  ;;  %v4543_v51 = vrot.slane %v10655_v34, 5  ;;  %v7762_v60 = vadd.f32 %v14873_v36, %v7694_v57  ;;  %v10254_v34 = vld [vmem:[%s15971_s4 + $0x98] sm:$0x1] }
 0x415   :  { %v7503_v18 = vpop.f32.mrf.mxu0  ;;  %v14893_v52 = vrot.slane %v8230_v30, 7  ;;  %v6198_v9 = vsel %vm10739_vm2, %v6193_v59, %v6197_v29  ;;  %v4546_v33 = vrot.slane %v10656_v2, 5  ;;  %v7342_v0 = vpack.c.b16 %v7299_v5, %v7298_v14 }
 0x416   :  { %v6521_v15 = vunpack.c.l.b16 %v6198_v9  ;;  %v4544_v41 = vsel %vm11351_vm5, %v9641_v21, %v4543_v51  ;;  %v4545_v56 = vrot.slane %v4543_v51, 4  ;;  %v7826_v17 = vmax.f32 %v7762_v60, 0.0 }
 0x417   :  { %v8235_v1 = vor.u32 %v8233_v23, %v14893_v52  ;;  %v8236_v40 = vrot.slane %v14893_v52, 4  ;;  %v4677_v26 = vunpack.c.l.b16 %v4544_v41  ;;  %v5560_v45 = vadd.f32 %v5437_v43, %v5005_v12  ;;  %5479 = vmatmul.bf16.gmra.mxu2 %v10489_v13 }
 0x418   :  { %v6564_v58 = vpack.c.b16 %v6521_v15, %v6520_v6  ;;  %v4547_v27 = vsel %vm11351_vm5, %v4545_v56, %v4546_v33  ;;  %v6200_v55 = vshrl.u32 %v10003_v20, 16  ;;  %v7998_v8 = vpack.c.bf16 %v7826_v17, %v7826_v17 }
 0x419   :  { %v8766_v46 = vsel %vm13735_vm8, %v8235_v1, %v10251_v42  ;;  %v4885_v29 = vpop.f32.mrf.mxu1  ;;  %v4678_v61 = vunpack.c.l.b16 %v4547_v27  ;;  %7542 = vmatmul.bf16.gmra.mxu0 %v7342_v0  ;;  %v6203_v35 = vshll.u32 %v10003_v20, 16  ;;  %v6209_v53 = vshll.u32 %v10004_v10, 16 }
 0x41a   :  { %v6725_v24 = vpop.f32.mrf.mxu3  ;;  %10252 = vst [vmem:[%s15971_s4 + $0x90] sm:$0xf] %v8766_v46  ;;  %6764 = vmatmul.bf16.gmra.mxu3 %v6564_v58  ;;  %v5006_v49 = vadd.f32 %v4885_v29, %v16096_v48  ;;  %v6202_v32 = vrot.slane %v6200_v55, 4  ;;  %v8238_v6 = vshrl.u32 %v7998_v8, 16  ;;  %v8241_v39 = vshll.u32 %v7998_v8, 16  ;;  %v5440_v42 = vpop.f32.mrf.mxu2 }
 0x41b   :  { %v6849_v4 = vadd.f32 %v6725_v24, %v5559_v54  ;;  %v4720_v30 = vpack.c.b16 %v4678_v61, %v4677_v26  ;;  %v6205_v23 = vrot.slane %v6203_v35, 5  ;;  %v6211_v57 = vrot.slane %v6209_v53, 5 }
 0x41c   :  { %v6213_v59 = vshrl.u32 %v10004_v10, 16  ;;  %v6219_v28 = vshll.u32 %v10005_v62, 16  ;;  %v8240_v5 = vrot.slane %v8238_v6, 7  ;;  %v10137_v12 = vrot.slane %v10105_v50, 9 }
 0x41d   :  { %v7627_v14 = vadd.f32 %v7503_v18, %v6849_v4  ;;  %v7505_v54 = vpop.f32.mrf.mxu0  ;;  %v7166_v21 = vrot.slane %v10004_v10, 5  ;;  %v6206_v51 = vor.u32 %v6205_v23, %v6202_v32  ;;  %v7169_v18 = vrot.slane %v10005_v62, 5  ;;  %v9610_v4 = vld [vmem:[%s15968_s0 + $0x12c] sm:$0xe] }
 0x41e   :  { %v6215_v52 = vrot.slane %v6213_v59, 4  ;;  %v6221_v60 = vrot.slane %v6219_v28, 5  ;;  %v8243_v9 = vor.u32 %v8241_v39, %v8240_v5  ;;  %v8245_v2 = vrot.slane %v8240_v5, 4  ;;  %v16097_v62 = vld [vmem:[#allocation39_spill] sm:$0xff] }
 0x41f   :  { %v7695_v3 = vmul.f32 %v14855_v37, %v7627_v14  ;;  %v7167_v20 = vsel %vm11351_vm5, %v10137_v12, %v7166_v21  ;;  %v6207_v0 = vrot.slane %v6206_v51, 4  ;;  %v7168_v56 = vrot.slane %v7166_v21, 4  ;;  %v10006_v14 = vld [vmem:[%s15968_s0 + $0x138] sm:$0xf]  ;;  %v10256_v51 = vld [vmem:[%s15971_s4 + $0x9c] sm:$0xf] }
 0x420   :  { %4924 = vmatmul.bf16.gmra.mxu1 %v4720_v30  ;;  %v6216_v41 = vor.u32 %v6215_v52, %v6211_v57  ;;  %v7300_v1 = vunpack.c.l.b16 %v7167_v20  ;;  %v8244_v17 = vsel %vm13786_vm11, %v8236_v40, %v8243_v9  ;;  %v8770_v43 = vsel %vm14037_vm13, %v8245_v2, %v10254_v34  ;;  %v10007_v34 = vld [vmem:[%s15968_s0 + $0x13c] sm:$0xf] }
 0x421   :  { %v7763_v33 = vadd.f32 %v14873_v36, %v7695_v3  ;;  %v4887_v58 = vpop.f32.mrf.mxu1  ;;  %10253 = vst [vmem:[%s15971_s4 + $0x94] sm:$0xf] %v8244_v17  ;;  %v6212_v24 = vsel %vm10739_vm2, %v6207_v0, %v6211_v57  ;;  %v7170_v13 = vsel %vm11351_vm5, %v7168_v56, %v7169_v18  ;;  %v5561_v55 = vadd.f32 %v5440_v42, %v5006_v49  ;;  %v10657_v49 = vld [vmem:[%s15968_s0 + $0x130] sm:$0xf]  ;;  %v10658_v57 = vld [vmem:[%s15968_s0 + $0x134] sm:$0x1] }
 0x422   :  { %v6727_v15 = vpop.f32.mrf.mxu3  ;;  %v6217_v27 = vrot.slane %v6216_v41, 4  ;;  %10255 = vst [vmem:[%s15971_s4 + $0x98] sm:$0x1] %v8770_v43  ;;  %v7301_v8 = vunpack.c.l.b16 %v7170_v13  ;;  %v5007_v50 = vadd.f32 %v4887_v58, %v16097_v62  ;;  %v9642_v48 = vrot.slane %v9610_v4, 9  ;;  %v5442_v12 = vpop.f32.mrf.mxu2  ;;  %v10490_v9 = vld [vmem:[%s15968_s0 + $0x138] sm:$0xff] }
 0x423   :  { %v7827_v26 = vmax.f32 %v7763_v33, 0.0  ;;  %v6850_v10 = vadd.f32 %v6727_v15, %v5560_v45  ;;  %v6522_v45 = vunpack.c.l.b16 %v6212_v24  ;;  %v4550_v32 = vrot.slane %v10657_v49, 5  ;;  %v10008_v24 = vld [vmem:[%s15968_s0 + $0x140] sm:$0x1]  ;;  %v10106_v13 = vld [vmem:[%s15968_s0 + $0x138] sm:$0xe] }
 0x424   :  { %v6222_v61 = vsel %vm10739_vm2, %v6217_v27, %v6221_v60  ;;  %v4553_v59 = vrot.slane %v10658_v57, 5  ;;  %v5562_v60 = vadd.f32 %v5442_v12, %v5007_v50  ;;  %v6224_v2 = vshrl.u32 %v10006_v14, 16 }
 0x425   :  { %v7999_v40 = vpack.c.bf16 %v7827_v26, %v7827_v26  ;;  %v7628_v46 = vadd.f32 %v7505_v54, %v6850_v10  ;;  %v7508_v29 = vpop.f32.mrf.mxu0  ;;  %v6523_v39 = vunpack.c.l.b16 %v6222_v61  ;;  %v7343_v54 = vpack.c.b16 %v7301_v8, %v7300_v1 }
 0x426   :  { %v4551_v30 = vsel %vm11351_vm5, %v9642_v48, %v4550_v32  ;;  %v4552_v23 = vrot.slane %v4550_v32, 4  ;;  %v6227_v33 = vshll.u32 %v10006_v14, 16  ;;  %v6226_v56 = vrot.slane %v6224_v2, 4 }
 0x427   :  { %v8247_v35 = vshrl.u32 %v7999_v40, 16  ;;  %v8250_v53 = vshll.u32 %v7999_v40, 16  ;;  %v7696_v6 = vmul.f32 %v14855_v37, %v7628_v46  ;;  %v6565_v3 = vpack.c.b16 %v6523_v39, %v6522_v45  ;;  %v16098_v40 = vld [vmem:[#allocation40_spill] sm:$0xff]  ;;  %5484 = vmatmul.bf16.gmra.mxu2 %v10490_v9 }
 0x428   :  { %v4679_v21 = vunpack.c.l.b16 %v4551_v30  ;;  %v4554_v18 = vsel %vm11351_vm5, %v4552_v23, %v4553_v59  ;;  %v6229_v1 = vrot.slane %v6227_v33, 5  ;;  %v6233_v17 = vshll.u32 %v10007_v34, 16  ;;  %v10259_v30 = vld [vmem:[%s15971_s4 + $0xa4] sm:$0x1] }
 0x429   :  { %v14970_v28 = vrot.slane %v8247_v35, 7  ;;  %v7764_v5 = vadd.f32 %v14873_v36, %v7696_v6  ;;  %7547 = vmatmul.bf16.gmra.mxu0 %v7343_v54  ;;  %v4680_v41 = vunpack.c.l.b16 %v4554_v18  ;;  %v6237_v27 = vshrl.u32 %v10007_v34, 16 }
 0x42a   :  { %v6730_v52 = vpop.f32.mrf.mxu3  ;;  %6769 = vmatmul.bf16.gmra.mxu3 %v6565_v3  ;;  %v4890_v58 = vpop.f32.mrf.mxu1  ;;  %v6230_v8 = vor.u32 %v6229_v1, %v6226_v56  ;;  %v6235_v4 = vrot.slane %v6233_v17, 5  ;;  %v6243_v49 = vshll.u32 %v10008_v24, 16  ;;  %v10138_v32 = vrot.slane %v10106_v13, 9  ;;  %v16099_v17 = vld [vmem:[#allocation3_spill] sm:$0xff] }
 0x42b   :  { %v8252_v20 = vor.u32 %v8250_v53, %v14970_v28  ;;  %v8253_v42 = vrot.slane %v14970_v28, 4  ;;  %v7828_v15 = vmax.f32 %v7764_v5, 0.0  ;;  %v6851_v0 = vadd.f32 %v6730_v52, %v5561_v55  ;;  %v5445_v54 = vpop.f32.mrf.mxu2 }
 0x42c   :  { %v5008_v46 = vadd.f32 %v4890_v58, %v16098_v40  ;;  %v4721_v45 = vpack.c.b16 %v4680_v41, %v4679_v21  ;;  %v6239_v50 = vrot.slane %v6237_v27, 4  ;;  %v6231_v48 = vrot.slane %v6230_v8, 4  ;;  %v9611_v41 = vld [vmem:[%s15968_s0 + $0x138] sm:$0xe]  ;;  %v10659_v40 = vld [vmem:[%s15968_s0 + $0x13c] sm:$0xf] }
 0x42d   :  { %v8773_v43 = vsel %vm13735_vm8, %v8252_v20, %v10256_v51  ;;  %v8000_v26 = vpack.c.bf16 %v7828_v15, %v7828_v15  ;;  %v7629_v10 = vadd.f32 %v7508_v29, %v6851_v0  ;;  %v7510_v55 = vpop.f32.mrf.mxu0  ;;  %v7173_v35 = vrot.slane %v10007_v34, 5 }
 0x42e   :  { %10257 = vst [vmem:[%s15971_s4 + $0x9c] sm:$0xf] %v8773_v43  ;;  %v6240_v39 = vor.u32 %v6239_v50, %v6235_v4  ;;  %v7176_v14 = vrot.slane %v10008_v24, 5  ;;  %v6236_v57 = vsel %vm10739_vm2, %v6231_v48, %v6235_v4  ;;  %v6245_v59 = vrot.slane %v6243_v49, 5 }
 0x42f   :  { %v8255_v29 = vshrl.u32 %v8000_v26, 16  ;;  %v8258_v61 = vshll.u32 %v8000_v26, 16  ;;  %v7697_v62 = vmul.f32 %v14855_v37, %v7629_v10  ;;  %v7174_v28 = vsel %vm11351_vm5, %v10138_v32, %v7173_v35  ;;  %v10009_v26 = vld [vmem:[%s15968_s0 + $0x144] sm:$0xf] }
 0x430   :  { %4929 = vmatmul.bf16.gmra.mxu1 %v4721_v45  ;;  %v7175_v5 = vrot.slane %v7173_v35, 4  ;;  %v6241_v51 = vrot.slane %v6240_v39, 4  ;;  %v6524_v52 = vunpack.c.l.b16 %v6236_v57  ;;  %v7302_v9 = vunpack.c.l.b16 %v7174_v28  ;;  %v10660_v45 = vld [vmem:[%s15968_s0 + $0x140] sm:$0x1]  ;;  %v10491_v35 = vld [vmem:[%s15968_s0 + $0x144] sm:$0xff] }
 0x431   :  { %v8257_v53 = vrot.slane %v8255_v29, 7  ;;  %v7765_v6 = vadd.f32 %v14873_v36, %v7697_v62  ;;  %v4560_v8 = vrot.slane %v10660_v45, 5  ;;  %v10261_v29 = vld [vmem:[%s15971_s4 + $0xa8] sm:$0xf]  ;;  %v6248_v48 = vshrl.u32 %v10009_v26, 16 }
 0x432   :  { %v6732_v23 = vpop.f32.mrf.mxu3  ;;  %v7177_v18 = vsel %vm11351_vm5, %v7175_v5, %v7176_v14  ;;  %v4892_v0 = vpop.f32.mrf.mxu1  ;;  %v6246_v56 = vsel %vm10739_vm2, %v6241_v51, %v6245_v59  ;;  %v10011_v51 = vld [vmem:[%s15968_s0 + $0x14c] sm:$0x1] }
 0x433   :  { %v8260_v3 = vor.u32 %v8258_v61, %v8257_v53  ;;  %v8262_v12 = vrot.slane %v8257_v53, 4  ;;  %v7829_v21 = vmax.f32 %v7765_v6, 0.0  ;;  %v6852_v34 = vadd.f32 %v6732_v23, %v5562_v60  ;;  %v5447_v50 = vpop.f32.mrf.mxu2  ;;  %v10010_v53 = vld [vmem:[%s15968_s0 + $0x148] sm:$0xf] }
 0x434   :  { %v7303_v1 = vunpack.c.l.b16 %v7177_v18  ;;  %v5009_v43 = vadd.f32 %v4892_v0, %v16099_v17  ;;  %v6525_v27 = vunpack.c.l.b16 %v6246_v56  ;;  %v6251_v6 = vshll.u32 %v10009_v26, 16 }
 0x435   :  { %v8261_v2 = vsel %vm13786_vm11, %v8253_v42, %v8260_v3  ;;  %v8777_v33 = vsel %vm14037_vm13, %v8262_v12, %v10259_v30  ;;  %v8001_v20 = vpack.c.bf16 %v7829_v21, %v7829_v21  ;;  %v7630_v15 = vadd.f32 %v7510_v55, %v6852_v34  ;;  %v7513_v60 = vpop.f32.mrf.mxu0 }
 0x436   :  { %10258 = vst [vmem:[%s15971_s4 + $0xa0] sm:$0xf] %v8261_v2  ;;  %v5563_v42 = vadd.f32 %v5445_v54, %v5008_v46  ;;  %v7344_v13 = vpack.c.b16 %v7303_v1, %v7302_v9  ;;  %v9643_v55 = vrot.slane %v9611_v41, 9  ;;  %v4557_v46 = vrot.slane %v10659_v40, 5 }
 0x437   :  { %10260 = vst [vmem:[%s15971_s4 + $0xa4] sm:$0x1] %v8777_v33  ;;  %v8264_v10 = vshrl.u32 %v8001_v20, 16  ;;  %v8267_v58 = vshll.u32 %v8001_v20, 16  ;;  %v7698_v24 = vmul.f32 %v14855_v37, %v7630_v15  ;;  %v6566_v62 = vpack.c.b16 %v6525_v27, %v6524_v52  ;;  %5489 = vmatmul.bf16.gmra.mxu2 %v10491_v35  ;;  %v10107_v15 = vld [vmem:[%s15968_s0 + $0x144] sm:$0xe] }
 0x438   :  { %v4558_v49 = vsel %vm11351_vm5, %v9643_v55, %v4557_v46  ;;  %v4559_v32 = vrot.slane %v4557_v46, 4  ;;  %v5564_v30 = vadd.f32 %v5447_v50, %v5009_v43  ;;  %v6250_v28 = vrot.slane %v6248_v48, 4 }
 0x439   :  { %v15035_v4 = vrot.slane %v8264_v10, 7  ;;  %v7766_v61 = vadd.f32 %v14873_v36, %v7698_v24  ;;  %v4681_v23 = vunpack.c.l.b16 %v4558_v49  ;;  %7552 = vmatmul.bf16.gmra.mxu0 %v7344_v13  ;;  %v6253_v5 = vrot.slane %v6251_v6, 5  ;;  %v10264_v13 = vld [vmem:[%s15971_s4 + $0xb0] sm:$0x1] }
 0x43a   :  { %v6735_v54 = vpop.f32.mrf.mxu3  ;;  %6774 = vmatmul.bf16.gmra.mxu3 %v6566_v62  ;;  %v4561_v59 = vsel %vm11351_vm5, %v4559_v32, %v4560_v8  ;;  %v6257_v52 = vshll.u32 %v10010_v53, 16  ;;  %v6261_v20 = vshrl.u32 %v10010_v53, 16  ;;  %v6267_v26 = vshll.u32 %v10011_v51, 16 }
 0x43b   :  { %v8269_v39 = vor.u32 %v8267_v58, %v15035_v4  ;;  %v7830_v14 = vmax.f32 %v7766_v61, 0.0  ;;  %v6853_v57 = vadd.f32 %v6735_v54, %v5563_v42  ;;  %v4895_v21 = vpop.f32.mrf.mxu1  ;;  %v4682_v34 = vunpack.c.l.b16 %v4561_v59  ;;  %v5450_v27 = vpop.f32.mrf.mxu2  ;;  %v16100_v61 = vld [vmem:[#allocation5_spill] sm:$0xff] }
 0x43c   :  { %v8270_v18 = vrot.slane %v15035_v4, 4  ;;  %v6254_v33 = vor.u32 %v6253_v5, %v6250_v28  ;;  %v6259_v1 = vrot.slane %v6257_v52, 5  ;;  %v6263_v43 = vrot.slane %v6261_v20, 4  ;;  %v10012_v5 = vld [vmem:[%s15968_s0 + $0x150] sm:$0xf] }
 0x43d   :  { %v8780_v3 = vsel %vm13735_vm8, %v8269_v39, %v10261_v29  ;;  %v8002_v12 = vpack.c.bf16 %v7830_v14, %v7830_v14  ;;  %v7631_v9 = vadd.f32 %v7513_v60, %v6853_v57  ;;  %v7515_v2 = vpop.f32.mrf.mxu0  ;;  %v4722_v56 = vpack.c.b16 %v4682_v34, %v4681_v23  ;;  %v9612_v23 = vld [vmem:[%s15968_s0 + $0x144] sm:$0xe] }
 0x43e   :  { %10262 = vst [vmem:[%s15971_s4 + $0xa8] sm:$0xf] %v8780_v3  ;;  %v6255_v17 = vrot.slane %v6254_v33, 4  ;;  %v10139_v58 = vrot.slane %v10107_v15, 9  ;;  %v7180_v60 = vrot.slane %v10010_v53, 5  ;;  %v7183_v24 = vrot.slane %v10011_v51, 5 }
 0x43f   :  { %v8272_v0 = vshrl.u32 %v8002_v12, 16  ;;  %v8275_v41 = vshll.u32 %v8002_v12, 16  ;;  %v7699_v42 = vmul.f32 %v14855_v37, %v7631_v9  ;;  %v6264_v46 = vor.u32 %v6263_v43, %v6259_v1  ;;  %v16101_v9 = vld [vmem:[#allocation7_spill] sm:$0xff] }
 0x440   :  { %4934 = vmatmul.bf16.gmra.mxu1 %v4722_v56  ;;  %v6260_v40 = vsel %vm10739_vm2, %v6255_v17, %v6259_v1  ;;  %v6269_v45 = vrot.slane %v6267_v26, 5  ;;  %v5010_v62 = vadd.f32 %v4895_v21, %v16100_v61  ;;  %v7181_v50 = vsel %vm11351_vm5, %v10139_v58, %v7180_v60  ;;  %v10661_v33 = vld [vmem:[%s15968_s0 + $0x148] sm:$0xf]  ;;  %v10662_v56 = vld [vmem:[%s15968_s0 + $0x14c] sm:$0x1] }
 0x441   :  { %v8274_v10 = vrot.slane %v8272_v0, 7  ;;  %v7767_v55 = vadd.f32 %v14873_v36, %v7699_v42  ;;  %v6265_v32 = vrot.slane %v6264_v46, 4  ;;  %v7182_v35 = vrot.slane %v7180_v60, 4  ;;  %v15105_v42 = vld [vmem:[%s15968_s0 + $0x154] sm:$0xf] }
 0x442   :  { %v6737_v29 = vpop.f32.mrf.mxu3  ;;  %v6526_v39 = vunpack.c.l.b16 %v6260_v40  ;;  %v7304_v14 = vunpack.c.l.b16 %v7181_v50  ;;  %v5565_v34 = vadd.f32 %v5450_v27, %v5010_v62  ;;  %v9644_v51 = vrot.slane %v9612_v23, 9  ;;  %v15115_v60 = vld [vmem:[%s15968_s0 + $0x158] sm:$0x1] }
 0x443   :  { %v8277_v8 = vor.u32 %v8275_v41, %v8274_v10  ;;  %v8279_v4 = vrot.slane %v8274_v10, 4  ;;  %v7831_v48 = vmax.f32 %v7767_v55, 0.0  ;;  %v6854_v49 = vadd.f32 %v6737_v29, %v5564_v30  ;;  %v4897_v54 = vpop.f32.mrf.mxu1  ;;  %v5452_v41 = vpop.f32.mrf.mxu2  ;;  %v10492_v55 = vld [vmem:[%s15968_s0 + $0x150] sm:$0xff] }
 0x444   :  { %v6270_v59 = vsel %vm10739_vm2, %v6265_v32, %v6269_v45  ;;  %v7184_v28 = vsel %vm11351_vm5, %v7182_v35, %v7183_v24  ;;  %v4564_v20 = vrot.slane %v10661_v33, 5  ;;  %v4567_v1 = vrot.slane %v10662_v56, 5  ;;  %v10266_v24 = vld [vmem:[%s15971_s4 + $0xb4] sm:$0xf]  ;;  %v10269_v56 = vld [vmem:[%s15971_s4 + $0xbc] sm:$0x1] }
 0x445   :  { %v8278_v53 = vsel %vm13786_vm11, %v8270_v18, %v8277_v8  ;;  %v8784_v6 = vsel %vm14037_vm13, %v8279_v4, %v10264_v13  ;;  %v8003_v30 = vpack.c.bf16 %v7831_v48, %v7831_v48  ;;  %v7632_v57 = vadd.f32 %v7515_v2, %v6854_v49  ;;  %v7518_v3 = vpop.f32.mrf.mxu0 }
 0x446   :  { %10263 = vst [vmem:[%s15971_s4 + $0xac] sm:$0xf] %v8278_v53  ;;  %v6527_v12 = vunpack.c.l.b16 %v6270_v59  ;;  %v7305_v21 = vunpack.c.l.b16 %v7184_v28  ;;  %v5011_v2 = vadd.f32 %v4897_v54, %v16101_v9  ;;  %v6272_v17 = vshrl.u32 %v10012_v5, 16 }
 0x447   :  { %10265 = vst [vmem:[%s15971_s4 + $0xb0] sm:$0x1] %v8784_v6  ;;  %v8281_v52 = vshrl.u32 %v8003_v30, 16  ;;  %v7700_v18 = vmul.f32 %v14855_v37, %v7632_v57  ;;  %v8284_v26 = vshll.u32 %v8003_v30, 16  ;;  %v4565_v58 = vsel %vm11351_vm5, %v9644_v51, %v4564_v20  ;;  %5494 = vmatmul.bf16.gmra.mxu2 %v10492_v55 }
 0x448   :  { %v6567_v15 = vpack.c.b16 %v6527_v12, %v6526_v39  ;;  %v7345_v0 = vpack.c.b16 %v7305_v21, %v7304_v14  ;;  %v15120_v27 = vadd.f32 %v5452_v41, %v5011_v2  ;;  %v4566_v13 = vrot.slane %v4564_v20, 4  ;;  %v10108_v14 = vld [vmem:[%s15968_s0 + $0x150] sm:$0xe]  ;;  %v10015_v41 = vld [vmem:[%s15968_s0 + $0x15c] sm:$0xf] }
 0x449   :  { %v15107_v43 = vrot.slane %v8281_v52, 7  ;;  %v7768_v10 = vadd.f32 %v14873_v36, %v7700_v18  ;;  %v6274_v40 = vrot.slane %v6272_v17, 4  ;;  %v6275_v46 = vshll.u32 %v10012_v5, 16  ;;  %v16102_v5 = vld [vmem:[#allocation9_spill] sm:$0xff] }
 0x44a   :  { %6779 = vmatmul.bf16.gmra.mxu3 %v6567_v15  ;;  %7557 = vmatmul.bf16.gmra.mxu0 %v7345_v0  ;;  %v4683_v4 = vunpack.c.l.b16 %v4565_v58  ;;  %v6281_v29 = vshll.u32 %v15105_v42, 16  ;;  %v4568_v62 = vsel %vm11351_vm5, %v4566_v13, %v4567_v1  ;;  %v6285_v48 = vshrl.u32 %v15105_v42, 16 }
 0x44b   :  { %v8286_v45 = vor.u32 %v8284_v26, %v15107_v43  ;;  %v7832_v8 = vmax.f32 %v7768_v10, 0.0  ;;  %v4900_v61 = vpop.f32.mrf.mxu1  ;;  %v6277_v50 = vrot.slane %v6275_v46, 5  ;;  %v6291_v49 = vshll.u32 %v15115_v60, 16  ;;  %v5455_v33 = vpop.f32.mrf.mxu2 }
 0x44c   :  { %v8287_v32 = vrot.slane %v15107_v43, 4  ;;  %v6740_v6 = vpop.f32.mrf.mxu3  ;;  %v4684_v39 = vunpack.c.l.b16 %v4568_v62  ;;  %v6283_v57 = vrot.slane %v6281_v29, 5  ;;  %v6287_v59 = vrot.slane %v6285_v48, 4 }
 0x44d   :  { %v8787_v35 = vsel %vm13735_vm8, %v8286_v45, %v10266_v24  ;;  %v8004_v53 = vpack.c.bf16 %v7832_v8, %v7832_v8  ;;  %v6855_v54 = vadd.f32 %v6740_v6, %v5565_v34  ;;  %v7520_v23 = vpop.f32.mrf.mxu0  ;;  %v6278_v30 = vor.u32 %v6277_v50, %v6274_v40  ;;  %v9613_v40 = vld [vmem:[%s15968_s0 + $0x150] sm:$0xe]  ;;  %v10663_v6 = vld [vmem:[%s15968_s0 + $0x154] sm:$0xf] }
 0x44e   :  { %10267 = vst [vmem:[%s15971_s4 + $0xb4] sm:$0xf] %v8787_v35  ;;  %v5012_v12 = vadd.f32 %v4900_v61, %v16102_v5  ;;  %v4723_v21 = vpack.c.b16 %v4684_v39, %v4683_v4  ;;  %v6293_v51 = vrot.slane %v6291_v49, 5  ;;  %v6288_v9 = vor.u32 %v6287_v59, %v6283_v57  ;;  %v10016_v5 = vld [vmem:[%s15968_s0 + $0x160] sm:$0xf] }
 0x44f   :  { %v8289_v28 = vshrl.u32 %v8004_v53, 16  ;;  %v7633_v52 = vadd.f32 %v7518_v3, %v6855_v54  ;;  %v6279_v18 = vrot.slane %v6278_v30, 4  ;;  %v10140_v2 = vrot.slane %v10108_v14, 9 }
 0x450   :  { %v8292_v15 = vshll.u32 %v8004_v53, 16  ;;  %4939 = vmatmul.bf16.gmra.mxu1 %v4723_v21  ;;  %v7187_v0 = vrot.slane %v15105_v42, 5  ;;  %v7190_v34 = vrot.slane %v15115_v60, 5  ;;  %v6289_v17 = vrot.slane %v6288_v9, 4 }
 0x451   :  { %v8291_v20 = vrot.slane %v8289_v28, 7  ;;  %v7701_v3 = vmul.f32 %v14855_v37, %v7633_v52  ;;  %v6284_v1 = vsel %vm10739_vm2, %v6279_v18, %v6283_v57  ;;  %v15152_v43 = vadd.f32 %v5455_v33, %v5012_v12  ;;  %v16103_v57 = vld [vmem:[#allocation11_spill] sm:$0xff]  ;;  %v15190_v18 = vld [vmem:[%s15968_s0 + $0x164] sm:$0x1] }
 0x452   :  { %v6528_v10 = vunpack.c.l.b16 %v6284_v1  ;;  %v7188_v58 = vsel %vm11351_vm5, %v10140_v2, %v7187_v0  ;;  %v6294_v24 = vsel %vm10739_vm2, %v6289_v17, %v6293_v51  ;;  %v7189_v13 = vrot.slane %v7187_v0, 4 }
 0x453   :  { %v8294_v26 = vor.u32 %v8292_v15, %v8291_v20  ;;  %v8296_v42 = vrot.slane %v8291_v20, 4  ;;  %v7769_v60 = vadd.f32 %v14873_v36, %v7701_v3  ;;  %v4902_v55 = vpop.f32.mrf.mxu1  ;;  %v6296_v46 = vshrl.u32 %v10015_v41, 16  ;;  %v5457_v28 = vpop.f32.mrf.mxu2  ;;  %v10493_v15 = vld [vmem:[%s15968_s0 + $0x15c] sm:$0xff] }
 0x454   :  { %v6742_v4 = vpop.f32.mrf.mxu3  ;;  %v6529_v29 = vunpack.c.l.b16 %v6294_v24  ;;  %v7306_v61 = vunpack.c.l.b16 %v7188_v58  ;;  %v7191_v49 = vsel %vm11351_vm5, %v7189_v13, %v7190_v34  ;;  %v9645_v35 = vrot.slane %v9613_v40, 9  ;;  %v10109_v3 = vld [vmem:[%s15968_s0 + $0x15c] sm:$0xe] }
 0x455   :  { %v8295_v45 = vsel %vm13786_vm11, %v8287_v32, %v8294_v26  ;;  %v8791_v8 = vsel %vm14037_vm13, %v8296_v42, %v10269_v56  ;;  %v7833_v62 = vmax.f32 %v7769_v60, 0.0  ;;  %v6856_v50 = vadd.f32 %v6742_v4, %v15120_v27  ;;  %v7523_v48 = vpop.f32.mrf.mxu0  ;;  %v10664_v27 = vld [vmem:[%s15968_s0 + $0x158] sm:$0x1] }
 0x456   :  { %10268 = vst [vmem:[%s15971_s4 + $0xb8] sm:$0xf] %v8295_v45  ;;  %v6568_v32 = vpack.c.b16 %v6529_v29, %v6528_v10  ;;  %v7307_v53 = vunpack.c.l.b16 %v7191_v49  ;;  %v4571_v39 = vrot.slane %v10663_v6, 5  ;;  %v4574_v14 = vrot.slane %v10664_v27, 5  ;;  %v10271_v10 = vld [vmem:[%s15971_s4 + $0xc0] sm:$0xf] }
 0x457   :  { %10270 = vst [vmem:[%s15971_s4 + $0xbc] sm:$0x1] %v8791_v8  ;;  %v8005_v54 = vpack.c.bf16 %v7833_v62, %v7833_v62  ;;  %v7634_v30 = vadd.f32 %v7520_v23, %v6856_v50  ;;  %v5013_v59 = vadd.f32 %v4902_v55, %v16103_v57  ;;  %v6299_v12 = vshll.u32 %v10015_v41, 16  ;;  %5499 = vmatmul.bf16.gmra.mxu2 %v10493_v15 }
 0x458   :  { %v7346_v21 = vpack.c.b16 %v7307_v53, %v7306_v61  ;;  %v4572_v51 = vsel %vm11351_vm5, %v9645_v35, %v4571_v39  ;;  %v4573_v52 = vrot.slane %v4571_v39, 4  ;;  %v6298_v9 = vrot.slane %v6296_v46, 4 }
 0x459   :  { %v8298_v23 = vshrl.u32 %v8005_v54, 16  ;;  %v8301_v2 = vshll.u32 %v8005_v54, 16  ;;  %v7702_v33 = vmul.f32 %v14855_v37, %v7634_v30  ;;  %v4685_v20 = vunpack.c.l.b16 %v4572_v51 }
 0x45a   :  { %6784 = vmatmul.bf16.gmra.mxu3 %v6568_v32  ;;  %7562 = vmatmul.bf16.gmra.mxu0 %v7346_v21  ;;  %v4575_v0 = vsel %vm11351_vm5, %v4573_v52, %v4574_v14  ;;  %v6301_v34 = vrot.slane %v6299_v12, 5  ;;  %v6305_v41 = vshll.u32 %v10016_v5, 16  ;;  %v6309_v56 = vshrl.u32 %v10016_v5, 16 }
 0x45b   :  { %v15201_v1 = vrot.slane %v8298_v23, 7  ;;  %v7770_v17 = vadd.f32 %v14873_v36, %v7702_v33  ;;  %v4686_v26 = vunpack.c.l.b16 %v4575_v0  ;;  %v6315_v42 = vshll.u32 %v15190_v18, 16  ;;  %v5460_v39 = vpop.f32.mrf.mxu2  ;;  %v10274_v33 = vld [vmem:[%s15971_s4 + $0xc8] sm:$0x1] }
 0x45c   :  { %v6745_v58 = vpop.f32.mrf.mxu3  ;;  %v5568_v60 = vadd.f32 %v5457_v28, %v5013_v59  ;;  %v6302_v24 = vor.u32 %v6301_v34, %v6298_v9  ;;  %v6307_v13 = vrot.slane %v6305_v41, 5  ;;  %v6311_v55 = vrot.slane %v6309_v56, 4  ;;  %v4905_v4 = vpop.f32.mrf.mxu1  ;;  %v16104_v28 = vld [vmem:[#allocation13_spill] sm:$0xff]  ;;  %v10665_v41 = vld [vmem:[%s15968_s0 + $0x160] sm:$0xf] }
 0x45d   :  { %v8303_v40 = vor.u32 %v8301_v2, %v15201_v1  ;;  %v7834_v46 = vmax.f32 %v7770_v17, 0.0  ;;  %v6857_v45 = vadd.f32 %v6745_v58, %v15152_v43  ;;  %v7525_v8 = vpop.f32.mrf.mxu0  ;;  %v10141_v29 = vrot.slane %v10109_v3, 9 }
 0x45e   :  { %v8304_v61 = vrot.slane %v15201_v1, 4  ;;  %v4724_v62 = vpack.c.b16 %v4686_v26, %v4685_v20  ;;  %v6303_v50 = vrot.slane %v6302_v24, 4  ;;  %v6312_v49 = vor.u32 %v6311_v55, %v6307_v13 }
 0x45f   :  { %v8794_v35 = vsel %vm13735_vm8, %v8303_v40, %v10271_v10  ;;  %v8006_v32 = vpack.c.bf16 %v7834_v46, %v7834_v46  ;;  %v7635_v53 = vadd.f32 %v7523_v48, %v6857_v45  ;;  %v6317_v6 = vrot.slane %v6315_v42, 5  ;;  %v10018_v40 = vld [vmem:[%s15968_s0 + $0x168] sm:$0xf] }
 0x460   :  { %10272 = vst [vmem:[%s15971_s4 + $0xc0] sm:$0xf] %v8794_v35  ;;  %4944 = vmatmul.bf16.gmra.mxu1 %v4724_v62  ;;  %v6308_v43 = vsel %vm10739_vm2, %v6303_v50, %v6307_v13  ;;  %v6313_v27 = vrot.slane %v6312_v49, 4  ;;  %v7194_v14 = vrot.slane %v10016_v5, 5  ;;  %v7197_v54 = vrot.slane %v15190_v18, 5  ;;  %v16105_v35 = vld [vmem:[#allocation15_spill] sm:$0xff] }
 0x461   :  { %v8306_v30 = vshrl.u32 %v8006_v32, 16  ;;  %v8309_v57 = vshll.u32 %v8006_v32, 16  ;;  %v7703_v59 = vmul.f32 %v14855_v37, %v7635_v53  ;;  %v5014_v48 = vadd.f32 %v4905_v4, %v16104_v28  ;;  %v9614_v18 = vld [vmem:[%s15968_s0 + $0x15c] sm:$0xe]  ;;  %v10666_v13 = vld [vmem:[%s15968_s0 + $0x164] sm:$0x1] }
 0x462   :  { %v6318_v12 = vsel %vm10739_vm2, %v6313_v27, %v6317_v6  ;;  %v6530_v21 = vunpack.c.l.b16 %v6308_v43  ;;  %v7195_v51 = vsel %vm11351_vm5, %v10141_v29, %v7194_v14  ;;  %v7196_v52 = vrot.slane %v7194_v14, 4  ;;  %v10019_v50 = vld [vmem:[%s15968_s0 + $0x16c] sm:$0xf]  ;;  %v15259_v6 = vld [vmem:[%s15968_s0 + $0x170] sm:$0x1] }
 0x463   :  { %v8308_v9 = vrot.slane %v8306_v30, 7  ;;  %v7771_v23 = vadd.f32 %v14873_v36, %v7703_v59  ;;  %v6531_v5 = vunpack.c.l.b16 %v6318_v12  ;;  %v5569_v2 = vadd.f32 %v5460_v39, %v5014_v48  ;;  %v5462_v62 = vpop.f32.mrf.mxu2  ;;  %v10494_v27 = vld [vmem:[%s15968_s0 + $0x168] sm:$0xff] }
 0x464   :  { %v6747_v20 = vpop.f32.mrf.mxu3  ;;  %v7198_v15 = vsel %vm11351_vm5, %v7196_v52, %v7197_v54  ;;  %v7308_v0 = vunpack.c.l.b16 %v7195_v51  ;;  %v9646_v34 = vrot.slane %v9614_v18, 9  ;;  %v4578_v56 = vrot.slane %v10665_v41, 5  ;;  %v4907_v42 = vpop.f32.mrf.mxu1 }
 0x465   :  { %v8311_v3 = vor.u32 %v8309_v57, %v8308_v9  ;;  %v8313_v1 = vrot.slane %v8308_v9, 4  ;;  %v7835_v17 = vmax.f32 %v7771_v23, 0.0  ;;  %v6858_v26 = vadd.f32 %v6747_v20, %v5568_v60 }
 0x466   :  { %v6569_v10 = vpack.c.b16 %v6531_v5, %v6530_v21  ;;  %v7309_v58 = vunpack.c.l.b16 %v7198_v15  ;;  %v4579_v24 = vsel %vm11351_vm5, %v9646_v34, %v4578_v56  ;;  %v4581_v55 = vrot.slane %v10666_v13, 5  ;;  %v7528_v29 = vpop.f32.mrf.mxu0 }
 0x467   :  { %v8312_v46 = vsel %vm13786_vm11, %v8304_v61, %v8311_v3  ;;  %v8798_v60 = vsel %vm14037_vm13, %v8313_v1, %v10274_v33  ;;  %v8007_v45 = vpack.c.bf16 %v7835_v17, %v7835_v17  ;;  %v7636_v4 = vadd.f32 %v7525_v8, %v6858_v26  ;;  %5504 = vmatmul.bf16.gmra.mxu2 %v10494_v27  ;;  %v16106_v27 = vld [vmem:[#allocation17_spill] sm:$0xff] }
 0x468   :  { %10273 = vst [vmem:[%s15971_s4 + $0xc4] sm:$0xf] %v8312_v46  ;;  %v7347_v49 = vpack.c.b16 %v7309_v58, %v7308_v0  ;;  %v5015_v32 = vadd.f32 %v4907_v42, %v16105_v35  ;;  %v4580_v53 = vrot.slane %v4578_v56, 4  ;;  %v4687_v61 = vunpack.c.l.b16 %v4579_v24 }
 0x469   :  { %10275 = vst [vmem:[%s15971_s4 + $0xc8] sm:$0x1] %v8798_v60  ;;  %v8315_v8 = vshrl.u32 %v8007_v45, 16  ;;  %v8318_v39 = vshll.u32 %v8007_v45, 16  ;;  %v7704_v43 = vmul.f32 %v14855_v37, %v7636_v4  ;;  %v6320_v14 = vshrl.u32 %v10018_v40, 16 }
 0x46a   :  { %6789 = vmatmul.bf16.gmra.mxu3 %v6569_v10  ;;  %7567 = vmatmul.bf16.gmra.mxu0 %v7347_v49  ;;  %v4582_v54 = vsel %vm11351_vm5, %v4580_v53, %v4581_v55  ;;  %v6323_v30 = vshll.u32 %v10018_v40, 16  ;;  %v6329_v57 = vshll.u32 %v10019_v50, 16  ;;  %v6333_v59 = vshrl.u32 %v10019_v50, 16  ;;  %v10276_v37 = vld [vmem:[%s15971_s4 + $0xe4] sm:$0xf] }
 0x46b   :  { %v15270_v28 = vrot.slane %v8315_v8, 7  ;;  %v7772_v48 = vadd.f32 %v14873_v36, %v7704_v43  ;;  %v4688_v12 = vunpack.c.l.b16 %v4582_v54  ;;  %v6322_v21 = vrot.slane %v6320_v14, 4  ;;  %v10110_v36 = vld [vmem:[%s15968_s0 + $0x168] sm:$0xe]  ;;  %v5465_v58 = vpop.f32.mrf.mxu2  ;;  %v15290_v60 = vld [vmem:[%s15969_s2] ss:$0 sm:$0xff] }
 0x46c   :  { %v6750_v51 = vpop.f32.mrf.mxu3  ;;  %v6325_v52 = vrot.slane %v6323_v30, 5  ;;  %v6331_v9 = vrot.slane %v6329_v57, 5  ;;  %v6335_v23 = vrot.slane %v6333_v59, 4  ;;  %v6339_v5 = vshll.u32 %v15259_v6, 16  ;;  %v4910_v0 = vpop.f32.mrf.mxu1  ;;  %v9615_v8 = vld [vmem:[%s15968_s0 + $0x168] sm:$0xe] }
 0x46d   :  { %v8320_v18 = vor.u32 %v8318_v39, %v15270_v28  ;;  %v7836_v33 = vmax.f32 %v7772_v48, 0.0  ;;  %v6859_v20 = vadd.f32 %v6750_v51, %v5569_v2  ;;  %v5570_v15 = vadd.f32 %v5462_v62, %v5015_v32  ;;  %v15303_v32 = vld [vmem:[%s15970_s3] ss:$0 sm:$0xff]  ;;  %v10279_v39 = vld [vmem:[%s15971_s4 + $0xec] sm:$0x1] }
 0x46e   :  { %v8321_v34 = vrot.slane %v15270_v28, 4  ;;  %v4725_v41 = vpack.c.b16 %v4688_v12, %v4687_v61  ;;  %v6326_v56 = vor.u32 %v6325_v52, %v6322_v21  ;;  %v6336_v3 = vor.u32 %v6335_v23, %v6331_v9  ;;  %v7530_v42 = vpop.f32.mrf.mxu0 }
 0x46f   :  { %v8801_v1 = vsel %vm13735_vm8, %v8320_v18, %v10276_v37  ;;  %v8008_v17 = vpack.c.bf16 %v7836_v33, %v7836_v33  ;;  %v7637_v26 = vadd.f32 %v7528_v29, %v6859_v20  ;;  %v6341_v10 = vrot.slane %v6339_v5, 5 }
 0x470   :  { %10277 = vst [vmem:[%s15971_s4 + $0xe4] sm:$0xf] %v8801_v1  ;;  %4949 = vmatmul.bf16.gmra.mxu1 %v4725_v41  ;;  %v6327_v2 = vrot.slane %v6326_v56, 4  ;;  %v6337_v24 = vrot.slane %v6336_v3, 4  ;;  %v10142_v13 = vrot.slane %v10110_v36, 9  ;;  %v7201_v55 = vrot.slane %v10019_v50, 5 }
 0x471   :  { %v8323_v40 = vshrl.u32 %v8008_v17, 16  ;;  %v8326_v46 = vshll.u32 %v8008_v17, 16  ;;  %v7705_v45 = vmul.f32 %v15290_v60, %v7637_v26  ;;  %v7204_v4 = vrot.slane %v15259_v6, 5  ;;  %v10022_v41 = vld [vmem:[%s15968_s0 + $0x178] sm:$0xf]  ;;  %v16107_v56 = vld [vmem:[#allocation19_spill] sm:$0xff] }
 0x472   :  { %v6332_v29 = vsel %vm10739_vm2, %v6327_v2, %v6331_v9  ;;  %v6342_v62 = vsel %vm10739_vm2, %v6337_v24, %v6341_v10  ;;  %v7202_v50 = vsel %vm11351_vm5, %v10142_v13, %v7201_v55  ;;  %v7203_v49 = vrot.slane %v7201_v55, 4  ;;  %v10669_v9 = vld [vmem:[%s15968_s0 + $0x16c] sm:$0xf]  ;;  %v10495_v24 = vld [vmem:[%s15968_s0 + $0x174] sm:$0xff] }
 0x473   :  { %v8325_v35 = vrot.slane %v8323_v40, 7  ;;  %v7773_v53 = vadd.f32 %v15303_v32, %v7705_v45  ;;  %v6532_v61 = vunpack.c.l.b16 %v6332_v29  ;;  %v6533_v6 = vunpack.c.l.b16 %v6342_v62  ;;  %v5467_v36 = vpop.f32.mrf.mxu2 }
 0x474   :  { %v6752_v43 = vpop.f32.mrf.mxu3  ;;  %v5016_v14 = vadd.f32 %v4910_v0, %v16106_v27  ;;  %v7205_v54 = vsel %vm11351_vm5, %v7203_v49, %v7204_v4  ;;  %v7310_v30 = vunpack.c.l.b16 %v7202_v50  ;;  %v9647_v57 = vrot.slane %v9615_v8, 9  ;;  %v4912_v21 = vpop.f32.mrf.mxu1  ;;  %v10281_v4 = vld [vmem:[%s15971_s4 + $0xf0] sm:$0xf] }
 0x475   :  { %v8328_v59 = vor.u32 %v8326_v46, %v8325_v35  ;;  %v8330_v28 = vrot.slane %v8325_v35, 4  ;;  %v7837_v48 = vmax.f32 %v7773_v53, 0.0  ;;  %v6860_v12 = vadd.f32 %v6752_v43, %v5570_v15  ;;  %v10021_v15 = vld [vmem:[%s15968_s0 + $0x174] sm:$0xf]  ;;  %v10023_v53 = vld [vmem:[%s15968_s0 + $0x17c] sm:$0x1] }
 0x476   :  { %v6570_v37 = vpack.c.b16 %v6533_v6, %v6532_v61  ;;  %v7311_v51 = vunpack.c.l.b16 %v7205_v54  ;;  %v5571_v52 = vadd.f32 %v5465_v58, %v5016_v14  ;;  %v4585_v23 = vrot.slane %v10669_v9, 5  ;;  %v7533_v0 = vpop.f32.mrf.mxu0  ;;  %v10670_v58 = vld [vmem:[%s15968_s0 + $0x170] sm:$0x1] }
 0x477   :  { %v8329_v5 = vsel %vm13786_vm11, %v8321_v34, %v8328_v59  ;;  %v8805_v18 = vsel %vm14037_vm13, %v8330_v28, %v10279_v39  ;;  %v8009_v33 = vpack.c.bf16 %v7837_v48, %v7837_v48  ;;  %v7638_v20 = vadd.f32 %v7530_v42, %v6860_v12  ;;  %5509 = vmatmul.bf16.gmra.mxu2 %v10495_v24 }
 0x478   :  { %10278 = vst [vmem:[%s15971_s4 + $0xe8] sm:$0xf] %v8329_v5  ;;  %v7348_v34 = vpack.c.b16 %v7311_v51, %v7310_v30  ;;  %v5017_v3 = vadd.f32 %v4912_v21, %v16107_v56  ;;  %v4586_v1 = vsel %vm11351_vm5, %v9647_v57, %v4585_v23  ;;  %v4587_v17 = vrot.slane %v4585_v23, 4  ;;  %v10111_v30 = vld [vmem:[%s15968_s0 + $0x174] sm:$0xe] }
 0x479   :  { %10280 = vst [vmem:[%s15971_s4 + $0xec] sm:$0x1] %v8805_v18  ;;  %v8332_v26 = vshrl.u32 %v8009_v33, 16  ;;  %v8335_v42 = vshll.u32 %v8009_v33, 16  ;;  %v7706_v10 = vmul.f32 %v15290_v60, %v7638_v20  ;;  %v4588_v2 = vrot.slane %v10670_v58, 5 }
 0x47a   :  { %6794 = vmatmul.bf16.gmra.mxu3 %v6570_v37  ;;  %7572 = vmatmul.bf16.gmra.mxu0 %v7348_v34  ;;  %v4689_v13 = vunpack.c.l.b16 %v4586_v1  ;;  %v6344_v55 = vshrl.u32 %v10021_v15, 16  ;;  %v6347_v40 = vshll.u32 %v10021_v15, 16  ;;  %v6353_v46 = vshll.u32 %v10022_v41, 16  ;;  %v16108_v15 = vld [vmem:[#allocation21_spill] sm:$0xff] }
 0x47b   :  { %v15344_v45 = vrot.slane %v8332_v26, 7  ;;  %v7774_v29 = vadd.f32 %v15303_v32, %v7706_v10  ;;  %v4589_v62 = vsel %vm11351_vm5, %v4587_v17, %v4588_v2  ;;  %v6357_v50 = vshrl.u32 %v10022_v41, 16  ;;  %v5470_v23 = vpop.f32.mrf.mxu2  ;;  %v10284_v2 = vld [vmem:[%s15971_s4 + $0xf8] sm:$0x1] }
 0x47c   :  { %v6755_v49 = vpop.f32.mrf.mxu3  ;;  %v4690_v35 = vunpack.c.l.b16 %v4589_v62  ;;  %v6346_v61 = vrot.slane %v6344_v55, 4  ;;  %v6349_v6 = vrot.slane %v6347_v40, 5  ;;  %v6355_v8 = vrot.slane %v6353_v46, 5 }
 0x47d   :  { %v8337_v39 = vor.u32 %v8335_v42, %v15344_v45  ;;  %v7838_v43 = vmax.f32 %v7774_v29, 0.0  ;;  %v6861_v27 = vadd.f32 %v6755_v49, %v5571_v52  ;;  %v5572_v14 = vadd.f32 %v5467_v36, %v5017_v3  ;;  %v4915_v54 = vpop.f32.mrf.mxu1 }
 0x47e   :  { %v8338_v57 = vrot.slane %v15344_v45, 4  ;;  %v4726_v59 = vpack.c.b16 %v4690_v35, %v4689_v13  ;;  %v6350_v28 = vor.u32 %v6349_v6, %v6346_v61  ;;  %v6359_v48 = vrot.slane %v6357_v50, 4  ;;  %v7535_v51 = vpop.f32.mrf.mxu0  ;;  %v10671_v61 = vld [vmem:[%s15968_s0 + $0x178] sm:$0xf] }
 0x47f   :  { %v8808_v12 = vsel %vm13735_vm8, %v8337_v39, %v10281_v4  ;;  %v8010_v21 = vpack.c.bf16 %v7838_v43, %v7838_v43  ;;  %v7639_v37 = vadd.f32 %v7533_v0, %v6861_v27  ;;  %v6363_v9 = vshll.u32 %v10023_v53, 16 }
 0x480   :  { %10282 = vst [vmem:[%s15971_s4 + $0xf0] sm:$0xf] %v8808_v12  ;;  %4954 = vmatmul.bf16.gmra.mxu1 %v4726_v59  ;;  %v6351_v52 = vrot.slane %v6350_v28, 4  ;;  %v6360_v5 = vor.u32 %v6359_v48, %v6355_v8  ;;  %v10143_v18 = vrot.slane %v10111_v30, 9  ;;  %v7208_v33 = vrot.slane %v10022_v41, 5  ;;  %v16109_v48 = vld [vmem:[#allocation23_spill] sm:$0xff] }
 0x481   :  { %v8340_v20 = vshrl.u32 %v8010_v21, 16  ;;  %v7707_v36 = vmul.f32 %v15290_v60, %v7639_v37  ;;  %v5018_v34 = vadd.f32 %v4915_v54, %v16108_v15  ;;  %v6365_v56 = vrot.slane %v6363_v9, 5  ;;  %v9616_v41 = vld [vmem:[%s15968_s0 + $0x174] sm:$0xe]  ;;  %v10024_v30 = vld [vmem:[%s15968_s0 + $0x180] sm:$0xf] }
 0x482   :  { %v6356_v0 = vsel %vm10739_vm2, %v6351_v52, %v6355_v8  ;;  %v6361_v3 = vrot.slane %v6360_v5, 4  ;;  %v7209_v1 = vsel %vm11351_vm5, %v10143_v18, %v7208_v33  ;;  %v7210_v17 = vrot.slane %v7208_v33, 4  ;;  %v10672_v18 = vld [vmem:[%s15968_s0 + $0x17c] sm:$0x1] }
 0x483   :  { %v8342_v26 = vrot.slane %v8340_v20, 7  ;;  %v8343_v42 = vshll.u32 %v8010_v21, 16  ;;  %v7775_v10 = vadd.f32 %v15303_v32, %v7707_v36  ;;  %v7211_v58 = vrot.slane %v10023_v53, 5  ;;  %v5472_v54 = vpop.f32.mrf.mxu2  ;;  %v10025_v21 = vld [vmem:[%s15968_s0 + $0x184] sm:$0xf] }
 0x484   :  { %v6757_v24 = vpop.f32.mrf.mxu3  ;;  %v6366_v13 = vsel %vm10739_vm2, %v6361_v3, %v6365_v56  ;;  %v6534_v55 = vunpack.c.l.b16 %v6356_v0  ;;  %v7312_v40 = vunpack.c.l.b16 %v7209_v1  ;;  %v9648_v46 = vrot.slane %v9616_v41, 9  ;;  %v10496_v20 = vld [vmem:[%s15968_s0 + $0x180] sm:$0xff]  ;;  %v15414_v36 = vld [vmem:[%s15968_s0 + $0x188] sm:$0x1]  ;;  %v10286_v1 = vld [vmem:[%s15971_s4 + $0xfc] sm:$0xf] }
 0x485   :  { %v8345_v45 = vor.u32 %v8343_v42, %v8342_v26  ;;  %v8347_v4 = vrot.slane %v8342_v26, 4  ;;  %v7839_v29 = vmax.f32 %v7775_v10, 0.0  ;;  %v6862_v62 = vadd.f32 %v6757_v24, %v5572_v14  ;;  %v4917_v50 = vpop.f32.mrf.mxu1 }
 0x486   :  { %v6535_v49 = vunpack.c.l.b16 %v6366_v13  ;;  %v7212_v35 = vsel %vm11351_vm5, %v7210_v17, %v7211_v58  ;;  %v5573_v53 = vadd.f32 %v5470_v23, %v5018_v34  ;;  %v4592_v6 = vrot.slane %v10671_v61, 5  ;;  %v7538_v14 = vpop.f32.mrf.mxu0 }
 0x487   :  { %v8346_v8 = vsel %vm13786_vm11, %v8338_v57, %v8345_v45  ;;  %v8812_v39 = vsel %vm14037_vm13, %v8347_v4, %v10284_v2  ;;  %v8011_v43 = vpack.c.bf16 %v7839_v29, %v7839_v29  ;;  %v7640_v27 = vadd.f32 %v7535_v51, %v6862_v62  ;;  %5514 = vmatmul.bf16.gmra.mxu2 %v10496_v20 }
 0x488   :  { %10283 = vst [vmem:[%s15971_s4 + $0xf4] sm:$0xf] %v8346_v8  ;;  %v6571_v59 = vpack.c.b16 %v6535_v49, %v6534_v55  ;;  %v7313_v28 = vunpack.c.l.b16 %v7212_v35  ;;  %v5019_v12 = vadd.f32 %v4917_v50, %v16109_v48  ;;  %v4593_v57 = vsel %vm11351_vm5, %v9648_v46, %v4592_v6 }
 0x489   :  { %10285 = vst [vmem:[%s15971_s4 + $0xf8] sm:$0x1] %v8812_v39  ;;  %v8349_v37 = vshrl.u32 %v8011_v43, 16  ;;  %v8352_v51 = vshll.u32 %v8011_v43, 16  ;;  %v7708_v9 = vmul.f32 %v15290_v60, %v7640_v27  ;;  %v4691_v23 = vunpack.c.l.b16 %v4593_v57  ;;  %v16110_v39 = vld [vmem:[#allocation25_spill] sm:$0xff] }
 0x48a   :  { %6799 = vmatmul.bf16.gmra.mxu3 %v6571_v59  ;;  %v7349_v52 = vpack.c.b16 %v7313_v28, %v7312_v40  ;;  %v4594_v5 = vrot.slane %v4592_v6, 4  ;;  %v4595_v33 = vrot.slane %v10672_v18, 5  ;;  %v6368_v15 = vshrl.u32 %v10024_v30, 16  ;;  %v10112_v40 = vld [vmem:[%s15968_s0 + $0x180] sm:$0xe] }
 0x48b   :  { %v15416_v34 = vrot.slane %v8349_v37, 7  ;;  %v7776_v56 = vadd.f32 %v15303_v32, %v7708_v9  ;;  %v6371_v0 = vshll.u32 %v10024_v30, 16  ;;  %v6377_v3 = vshll.u32 %v10025_v21, 16  ;;  %v5475_v6 = vpop.f32.mrf.mxu2 }
 0x48c   :  { %7577 = vmatmul.bf16.gmra.mxu0 %v7349_v52  ;;  %v5574_v17 = vadd.f32 %v5472_v54, %v5019_v12  ;;  %v4596_v26 = vsel %vm11351_vm5, %v4594_v5, %v4595_v33  ;;  %v6370_v42 = vrot.slane %v6368_v15, 4  ;;  %v6381_v10 = vshrl.u32 %v10025_v21, 16  ;;  %v9617_v52 = vld [vmem:[%s15968_s0 + $0x180] sm:$0xe] }
 0x48d   :  { %v8354_v58 = vor.u32 %v8352_v51, %v15416_v34  ;;  %v7840_v41 = vmax.f32 %v7776_v56, 0.0  ;;  %v6760_v2 = vpop.f32.mrf.mxu3  ;;  %v4920_v24 = vpop.f32.mrf.mxu1  ;;  %v4692_v13 = vunpack.c.l.b16 %v4596_v26  ;;  %v6387_v55 = vshll.u32 %v15414_v36, 16 }
 0x48e   :  { %v8355_v46 = vrot.slane %v15416_v34, 4  ;;  %v6863_v45 = vadd.f32 %v6760_v2, %v5573_v53  ;;  %v6373_v4 = vrot.slane %v6371_v0, 5  ;;  %v6379_v29 = vrot.slane %v6377_v3, 5  ;;  %v7540_v49 = vpop.f32.mrf.mxu0 }
 0x48f   :  { %v8815_v62 = vsel %vm13735_vm8, %v8354_v58, %v10286_v1  ;;  %v8012_v50 = vpack.c.bf16 %v7840_v41, %v7840_v41  ;;  %v4727_v35 = vpack.c.b16 %v4692_v13, %v4691_v23  ;;  %v6383_v61 = vrot.slane %v6381_v10, 4  ;;  %v16111_v13 = vld [vmem:[#allocation27_spill] sm:$0xff] }
 0x490   :  { %10287 = vst [vmem:[%s15971_s4 + $0xfc] sm:$0xf] %v8815_v62  ;;  %v7641_v8 = vadd.f32 %v7538_v14, %v6863_v45  ;;  %v5020_v43 = vadd.f32 %v4920_v24, %v16110_v39  ;;  %v6374_v27 = vor.u32 %v6373_v4, %v6370_v42  ;;  %v10144_v54 = vrot.slane %v10112_v40, 9  ;;  %v10027_v62 = vld [vmem:[%s15968_s0 + $0x18c] sm:$0xf] }
 0x491   :  { %v8357_v53 = vshrl.u32 %v8012_v50, 16  ;;  %4959 = vmatmul.bf16.gmra.mxu1 %v4727_v35  ;;  %v6384_v30 = vor.u32 %v6383_v61, %v6379_v29  ;;  %v6389_v59 = vrot.slane %v6387_v55, 5  ;;  %v7215_v28 = vrot.slane %v10025_v21, 5  ;;  %v10289_v21 = vld [vmem:[%s15971_s4 + $0x104] sm:$0x1] }
 0x492   :  { %v8360_v48 = vshll.u32 %v8012_v50, 16  ;;  %v7709_v12 = vmul.f32 %v15290_v60, %v7641_v8  ;;  %v6375_v57 = vrot.slane %v6374_v27, 4  ;;  %v7218_v37 = vrot.slane %v15414_v36, 5  ;;  %v10497_v8 = vld [vmem:[%s15968_s0 + $0x18c] sm:$0xff] }
 0x493   :  { %v8359_v51 = vrot.slane %v8357_v53, 7  ;;  %v6385_v9 = vrot.slane %v6384_v30, 4  ;;  %v7216_v14 = vsel %vm11351_vm5, %v10144_v54, %v7215_v28  ;;  %v7217_v23 = vrot.slane %v7215_v28, 4  ;;  %v5477_v40 = vpop.f32.mrf.mxu2  ;;  %v10028_v39 = vld [vmem:[%s15968_s0 + $0x190] sm:$0xf] }
 0x494   :  { %v7777_v5 = vadd.f32 %v15303_v32, %v7709_v12  ;;  %v6380_v18 = vsel %vm10739_vm2, %v6375_v57, %v6379_v29  ;;  %v7314_v33 = vunpack.c.l.b16 %v7216_v14  ;;  %v9649_v20 = vrot.slane %v9617_v52, 9  ;;  %v10673_v29 = vld [vmem:[%s15968_s0 + $0x184] sm:$0xf] }
 0x495   :  { %v8362_v36 = vor.u32 %v8360_v48, %v8359_v51  ;;  %v8364_v15 = vrot.slane %v8359_v51, 4  ;;  %v6762_v34 = vpop.f32.mrf.mxu3  ;;  %v6390_v56 = vsel %vm10739_vm2, %v6385_v9, %v6389_v59  ;;  %v6536_v0 = vunpack.c.l.b16 %v6380_v18  ;;  %v4922_v3 = vpop.f32.mrf.mxu1  ;;  %v15487_v59 = vld [vmem:[%s15968_s0 + $0x194] sm:$0x1]  ;;  %v10291_v9 = vld [vmem:[%s15971_s4 + $0x108] sm:$0xf] }
 0x496   :  { %v7841_v1 = vmax.f32 %v7777_v5, 0.0  ;;  %v6864_v26 = vadd.f32 %v6762_v34, %v5574_v17  ;;  %v6537_v42 = vunpack.c.l.b16 %v6390_v56  ;;  %v7219_v10 = vsel %vm11351_vm5, %v7217_v23, %v7218_v37  ;;  %v7543_v2 = vpop.f32.mrf.mxu0  ;;  %v10113_v34 = vld [vmem:[%s15968_s0 + $0x18c] sm:$0xe] }
 0x497   :  { %v8363_v58 = vsel %vm13786_vm11, %v8355_v46, %v8362_v36  ;;  %v8819_v41 = vsel %vm14037_vm13, %v8364_v15, %v10289_v21  ;;  %v7315_v24 = vunpack.c.l.b16 %v7219_v10  ;;  %v5021_v55 = vadd.f32 %v4922_v3, %v16111_v13  ;;  %5519 = vmatmul.bf16.gmra.mxu2 %v10497_v8  ;;  %v16112_v13 = vld [vmem:[#allocation29_spill] sm:$0xff] }
 0x498   :  { %10288 = vst [vmem:[%s15971_s4 + $0x100] sm:$0xf] %v8363_v58  ;;  %v8013_v17 = vpack.c.bf16 %v7841_v1, %v7841_v1  ;;  %v7642_v45 = vadd.f32 %v7540_v49, %v6864_v26  ;;  %v6572_v4 = vpack.c.b16 %v6537_v42, %v6536_v0  ;;  %v4599_v46 = vrot.slane %v10673_v29, 5  ;;  %v10674_v49 = vld [vmem:[%s15968_s0 + $0x188] sm:$0x1] }
 0x499   :  { %10290 = vst [vmem:[%s15971_s4 + $0x104] sm:$0x1] %v8819_v41  ;;  %v7350_v50 = vpack.c.b16 %v7315_v24, %v7314_v33  ;;  %v5575_v35 = vadd.f32 %v5475_v6, %v5020_v43  ;;  %v4602_v61 = vrot.slane %v10674_v49, 5  ;;  %v15480_v53 = vadd.f32 %v5477_v40, %v5021_v55 }
 0x49a   :  { %v8366_v27 = vshrl.u32 %v8013_v17, 16  ;;  %v7710_v54 = vmul.f32 %v15290_v60, %v7642_v45  ;;  %6804 = vmatmul.bf16.gmra.mxu3 %v6572_v4  ;;  %v4600_v6 = vsel %vm11351_vm5, %v9649_v20, %v4599_v46  ;;  %v8369_v43 = vshll.u32 %v8013_v17, 16 }
 0x49b   :  { %v4601_v30 = vrot.slane %v4599_v46, 4  ;;  %v6392_v28 = vshrl.u32 %v10027_v62, 16  ;;  %v6395_v48 = vshll.u32 %v10027_v62, 16  ;;  %v6401_v37 = vshll.u32 %v10028_v39, 16  ;;  %v5480_v42 = vpop.f32.mrf.mxu2 }
 0x49c   :  { %v15489_v12 = vrot.slane %v8366_v27, 7  ;;  %v7778_v57 = vadd.f32 %v15303_v32, %v7710_v54  ;;  %7582 = vmatmul.bf16.gmra.mxu0 %v7350_v50  ;;  %v6405_v51 = vshrl.u32 %v10028_v39, 16  ;;  %v4693_v21 = vunpack.c.l.b16 %v4600_v6 }
 0x49d   :  { %v6765_v14 = vpop.f32.mrf.mxu3  ;;  %v4925_v23 = vpop.f32.mrf.mxu1  ;;  %v4603_v52 = vsel %vm11351_vm5, %v4601_v30, %v4602_v61  ;;  %v6394_v5 = vrot.slane %v6392_v28, 4  ;;  %v6397_v18 = vrot.slane %v6395_v48, 5  ;;  %v6411_v15 = vshll.u32 %v15487_v59, 16  ;;  %v9618_v61 = vld [vmem:[%s15968_s0 + $0x18c] sm:$0xe] }
 0x49e   :  { %v8371_v33 = vor.u32 %v8369_v43, %v15489_v12  ;;  %v7842_v20 = vmax.f32 %v7778_v57, 0.0  ;;  %v6865_v36 = vadd.f32 %v6765_v14, %v5575_v35  ;;  %v8372_v56 = vrot.slane %v15489_v12, 4  ;;  %v7545_v0 = vpop.f32.mrf.mxu0  ;;  %v10294_v43 = vld [vmem:[%s15971_s4 + $0x110] sm:$0x1] }
 0x49f   :  { %v4694_v3 = vunpack.c.l.b16 %v4603_v52  ;;  %v6398_v1 = vor.u32 %v6397_v18, %v6394_v5  ;;  %v6403_v26 = vrot.slane %v6401_v37, 5  ;;  %v6407_v24 = vrot.slane %v6405_v51, 4  ;;  %v10675_v12 = vld [vmem:[%s15968_s0 + $0x190] sm:$0xf]  ;;  %v16113_v18 = vld [vmem:[#allocation31_spill] sm:$0xff] }
 0x4a0   :  { %v8822_v10 = vsel %vm13735_vm8, %v8371_v33, %v10291_v9  ;;  %v8014_v58 = vpack.c.bf16 %v7842_v20, %v7842_v20  ;;  %v7643_v41 = vadd.f32 %v7543_v2, %v6865_v36  ;;  %v5022_v55 = vadd.f32 %v4925_v23, %v16112_v13  ;;  %v10031_v13 = vld [vmem:[%s15968_s0 + $0x19c] sm:$0xf] }
 0x4a1   :  { %10292 = vst [vmem:[%s15971_s4 + $0x108] sm:$0xf] %v8822_v10  ;;  %v4728_v40 = vpack.c.b16 %v4694_v3, %v4693_v21  ;;  %v6399_v17 = vrot.slane %v6398_v1, 4  ;;  %v10145_v45 = vrot.slane %v10113_v34, 9  ;;  %v6408_v46 = vor.u32 %v6407_v24, %v6403_v26 }
 0x4a2   :  { %v8374_v4 = vshrl.u32 %v8014_v58, 16  ;;  %v7711_v29 = vmul.f32 %v15290_v60, %v7643_v41  ;;  %v6413_v62 = vrot.slane %v6411_v15, 5  ;;  %v8377_v50 = vshll.u32 %v8014_v58, 16  ;;  %v10498_v58 = vld [vmem:[%s15968_s0 + $0x198] sm:$0xff] }
 0x4a3   :  { %4964 = vmatmul.bf16.gmra.mxu1 %v4728_v40  ;;  %v6404_v2 = vsel %vm10739_vm2, %v6399_v17, %v6403_v26  ;;  %v7222_v35 = vrot.slane %v10028_v39, 5  ;;  %v7225_v49 = vrot.slane %v15487_v59, 5  ;;  %v6409_v54 = vrot.slane %v6408_v46, 4  ;;  %v5482_v20 = vpop.f32.mrf.mxu2 }
 0x4a4   :  { %v8376_v8 = vrot.slane %v8374_v4, 7  ;;  %v7779_v27 = vadd.f32 %v15303_v32, %v7711_v29  ;;  %v6538_v6 = vunpack.c.l.b16 %v6404_v2  ;;  %v9650_v59 = vrot.slane %v9618_v61, 9  ;;  %v15561_v29 = vld [vmem:[%s15968_s0 + $0x1a0] sm:$0x1] }
 0x4a5   :  { %v6767_v30 = vpop.f32.mrf.mxu3  ;;  %v7223_v28 = vsel %vm11351_vm5, %v10145_v45, %v7222_v35  ;;  %v7224_v39 = vrot.slane %v7222_v35, 4  ;;  %v4927_v48 = vpop.f32.mrf.mxu1  ;;  %v4606_v57 = vrot.slane %v10675_v12, 5  ;;  %v6414_v52 = vsel %vm10739_vm2, %v6409_v54, %v6413_v62  ;;  %v10676_v45 = vld [vmem:[%s15968_s0 + $0x194] sm:$0x1] }
 0x4a6   :  { %v8379_v37 = vor.u32 %v8377_v50, %v8376_v8  ;;  %v8381_v51 = vrot.slane %v8376_v8, 4  ;;  %v7843_v9 = vmax.f32 %v7779_v27, 0.0  ;;  %v6866_v14 = vadd.f32 %v6767_v30, %v15480_v53  ;;  %v7548_v23 = vpop.f32.mrf.mxu0  ;;  %v10296_v35 = vld [vmem:[%s15971_s4 + $0x114] sm:$0xf] }
 0x4a7   :  { %v7226_v21 = vsel %vm11351_vm5, %v7224_v39, %v7225_v49  ;;  %v7316_v5 = vunpack.c.l.b16 %v7223_v28  ;;  %v5023_v33 = vadd.f32 %v4927_v48, %v16113_v18  ;;  %v6539_v53 = vunpack.c.l.b16 %v6414_v52  ;;  %5524 = vmatmul.bf16.gmra.mxu2 %v10498_v58  ;;  %v16114_v18 = vld [vmem:[#allocation2_spill] sm:$0xff] }
 0x4a8   :  { %v8380_v36 = vsel %vm13786_vm11, %v8372_v56, %v8379_v37  ;;  %v8826_v15 = vsel %vm14037_vm13, %v8381_v51, %v10294_v43  ;;  %v8015_v34 = vpack.c.bf16 %v7843_v9, %v7843_v9  ;;  %v7644_v3 = vadd.f32 %v7545_v0, %v6866_v14  ;;  %v10030_v56 = vld [vmem:[%s15968_s0 + $0x198] sm:$0xf] }
 0x4a9   :  { %10293 = vst [vmem:[%s15971_s4 + $0x10c] sm:$0xf] %v8380_v36  ;;  %v7317_v1 = vunpack.c.l.b16 %v7226_v21  ;;  %v5577_v26 = vadd.f32 %v5480_v42, %v5022_v55  ;;  %v15538_v10 = vadd.f32 %v5482_v20, %v5023_v33  ;;  %v4607_v42 = vsel %vm11351_vm5, %v9650_v59, %v4606_v57  ;;  %v10114_v51 = vld [vmem:[%s15968_s0 + $0x198] sm:$0xe] }
 0x4aa   :  { %10295 = vst [vmem:[%s15971_s4 + $0x110] sm:$0x1] %v8826_v15  ;;  %v8383_v0 = vshrl.u32 %v8015_v34, 16  ;;  %v7712_v41 = vmul.f32 %v15290_v60, %v7644_v3  ;;  %v4608_v24 = vrot.slane %v4606_v57, 4  ;;  %v8386_v55 = vshll.u32 %v8015_v34, 16 }
 0x4ab   :  { %v6573_v40 = vpack.c.b16 %v6539_v53, %v6538_v6  ;;  %v7351_v17 = vpack.c.b16 %v7317_v1, %v7316_v5  ;;  %v4609_v4 = vrot.slane %v10676_v45, 5  ;;  %v6416_v50 = vshrl.u32 %v10030_v56, 16  ;;  %v5485_v9 = vpop.f32.mrf.mxu2 }
 0x4ac   :  { %v15563_v46 = vrot.slane %v8383_v0, 7  ;;  %v7780_v62 = vadd.f32 %v15303_v32, %v7712_v41  ;;  %v6419_v2 = vshll.u32 %v10030_v56, 16  ;;  %v4695_v27 = vunpack.c.l.b16 %v4607_v42  ;;  %v9619_v0 = vld [vmem:[%s15968_s0 + $0x198] sm:$0xe] }
 0x4ad   :  { %6809 = vmatmul.bf16.gmra.mxu3 %v6573_v40  ;;  %7587 = vmatmul.bf16.gmra.mxu0 %v7351_v17  ;;  %v6770_v49 = vpop.f32.mrf.mxu3  ;;  %v4930_v61 = vpop.f32.mrf.mxu1  ;;  %v4610_v8 = vsel %vm11351_vm5, %v4608_v24, %v4609_v4  ;;  %v6425_v54 = vshll.u32 %v10031_v13, 16  ;;  %v6429_v6 = vshrl.u32 %v10031_v13, 16  ;;  %v6435_v39 = vshll.u32 %v15561_v29, 16  ;;  %v10299_v40 = vld [vmem:[%s15971_s4 + $0x11c] sm:$0x1] }
 0x4ae   :  { %v8388_v43 = vor.u32 %v8386_v55, %v15563_v46  ;;  %v7844_v30 = vmax.f32 %v7780_v62, 0.0  ;;  %v6867_v28 = vadd.f32 %v6770_v49, %v5577_v26  ;;  %v8389_v48 = vrot.slane %v15563_v46, 4  ;;  %v7550_v59 = vpop.f32.mrf.mxu0 }
 0x4af   :  { %v4696_v12 = vunpack.c.l.b16 %v4610_v8  ;;  %v6418_v57 = vrot.slane %v6416_v50, 4  ;;  %v6421_v37 = vrot.slane %v6419_v2, 5  ;;  %v6427_v5 = vrot.slane %v6425_v54, 5 }
 0x4b0   :  { %v8829_v14 = vsel %vm13735_vm8, %v8388_v43, %v10296_v35  ;;  %v8016_v52 = vpack.c.bf16 %v7844_v30, %v7844_v30  ;;  %v7645_v21 = vadd.f32 %v7548_v23, %v6867_v28  ;;  %v5024_v33 = vadd.f32 %v4930_v61, %v16114_v18  ;;  %v15625_v18 = vld [vmem:[%s15968_s0 + $0x1a8] sm:$0xf] }
 0x4b1   :  { %10297 = vst [vmem:[%s15971_s4 + $0x114] sm:$0xf] %v8829_v14  ;;  %v4729_v20 = vpack.c.b16 %v4696_v12, %v4695_v27  ;;  %v6422_v36 = vor.u32 %v6421_v37, %v6418_v57  ;;  %v6431_v15 = vrot.slane %v6429_v6, 4  ;;  %v6437_v53 = vrot.slane %v6435_v39, 5  ;;  %v10677_v57 = vld [vmem:[%s15968_s0 + $0x19c] sm:$0xf] }
 0x4b2   :  { %v8391_v34 = vshrl.u32 %v8016_v52, 16  ;;  %v7713_v3 = vmul.f32 %v15290_v60, %v7645_v21  ;;  %v10146_v1 = vrot.slane %v10114_v51, 9  ;;  %v7229_v56 = vrot.slane %v10031_v13, 5  ;;  %v10033_v51 = vld [vmem:[%s15968_s0 + $0x1a4] sm:$0xf]  ;;  %v16115_v21 = vld [vmem:[#allocation4_spill] sm:$0xff] }
 0x4b3   :  { %4969 = vmatmul.bf16.gmra.mxu1 %v4729_v20  ;;  %v6423_v26 = vrot.slane %v6422_v36, 4  ;;  %v6432_v58 = vor.u32 %v6431_v15, %v6427_v5  ;;  %v7232_v23 = vrot.slane %v15561_v29, 5  ;;  %v8394_v42 = vshll.u32 %v8016_v52, 16  ;;  %v5487_v6 = vpop.f32.mrf.mxu2 }
 0x4b4   :  { %v8393_v41 = vrot.slane %v8391_v34, 7  ;;  %v7781_v24 = vadd.f32 %v15303_v32, %v7713_v3  ;;  %v9651_v55 = vrot.slane %v9619_v0, 9  ;;  %v7230_v4 = vsel %vm11351_vm5, %v10146_v1, %v7229_v56  ;;  %v10678_v34 = vld [vmem:[%s15968_s0 + $0x1a0] sm:$0x1] }
 0x4b5   :  { %v6772_v17 = vpop.f32.mrf.mxu3  ;;  %v6428_v45 = vsel %vm10739_vm2, %v6423_v26, %v6427_v5  ;;  %v6433_v13 = vrot.slane %v6432_v58, 4  ;;  %v7231_v29 = vrot.slane %v7229_v56, 4  ;;  %v4932_v46 = vpop.f32.mrf.mxu1  ;;  %v7318_v54 = vunpack.c.l.b16 %v7230_v4  ;;  %v10301_v26 = vld [vmem:[%s15971_s4 + $0x120] sm:$0xf] }
 0x4b6   :  { %v8396_v62 = vor.u32 %v8394_v42, %v8393_v41  ;;  %v8398_v50 = vrot.slane %v8393_v41, 4  ;;  %v7845_v2 = vmax.f32 %v7781_v24, 0.0  ;;  %v6868_v35 = vadd.f32 %v6772_v17, %v15538_v10  ;;  %v7553_v49 = vpop.f32.mrf.mxu0 }
 0x4b7   :  { %v6438_v61 = vsel %vm10739_vm2, %v6433_v13, %v6437_v53  ;;  %v6540_v8 = vunpack.c.l.b16 %v6428_v45  ;;  %v7233_v27 = vsel %vm11351_vm5, %v7231_v29, %v7232_v23  ;;  %v4613_v37 = vrot.slane %v10677_v57, 5  ;;  %v10035_v45 = vld [vmem:[%s15968_s0 + $0x1ac] sm:$0x1] }
 0x4b8   :  { %v8397_v43 = vsel %vm13786_vm11, %v8389_v48, %v8396_v62  ;;  %v8833_v30 = vsel %vm14037_vm13, %v8398_v50, %v10299_v40  ;;  %v8017_v28 = vpack.c.bf16 %v7845_v2, %v7845_v2  ;;  %v7646_v39 = vadd.f32 %v7550_v59, %v6868_v35  ;;  %v10499_v48 = vld [vmem:[%s15968_s0 + $0x1a4] sm:$0xff] }
 0x4b9   :  { %10298 = vst [vmem:[%s15971_s4 + $0x118] sm:$0xf] %v8397_v43  ;;  %v6541_v10 = vunpack.c.l.b16 %v6438_v61  ;;  %v7319_v12 = vunpack.c.l.b16 %v7233_v27  ;;  %v5579_v52 = vadd.f32 %v5485_v9, %v5024_v33  ;;  %v5025_v5 = vadd.f32 %v4932_v46, %v16115_v21  ;;  %5529 = vmatmul.bf16.gmra.mxu2 %v10499_v48  ;;  %v10115_v27 = vld [vmem:[%s15968_s0 + $0x1a4] sm:$0xe]  ;;  %v10304_v21 = vld [vmem:[%s15971_s4 + $0x128] sm:$0x1] }
 0x4ba   :  { %10300 = vst [vmem:[%s15971_s4 + $0x11c] sm:$0x1] %v8833_v30  ;;  %v8400_v59 = vshrl.u32 %v8017_v28, 16  ;;  %v7714_v14 = vmul.f32 %v15290_v60, %v7646_v39  ;;  %v4614_v15 = vsel %vm11351_vm5, %v9651_v55, %v4613_v37  ;;  %v4616_v3 = vrot.slane %v10678_v34, 5 }
 0x4bb   :  { %v6574_v20 = vpack.c.b16 %v6541_v10, %v6540_v8  ;;  %v7352_v36 = vpack.c.b16 %v7319_v12, %v7318_v54  ;;  %v8403_v9 = vshll.u32 %v8017_v28, 16  ;;  %v4615_v1 = vrot.slane %v4613_v37, 4  ;;  %v5490_v50 = vpop.f32.mrf.mxu2 }
 0x4bc   :  { %v15632_v53 = vrot.slane %v8400_v59, 7  ;;  %v7782_v33 = vadd.f32 %v15303_v32, %v7714_v14  ;;  %v6440_v23 = vshrl.u32 %v10033_v51, 16  ;;  %v6443_v0 = vshll.u32 %v10033_v51, 16 }
 0x4bd   :  { %6814 = vmatmul.bf16.gmra.mxu3 %v6574_v20  ;;  %7592 = vmatmul.bf16.gmra.mxu0 %v7352_v36  ;;  %v6775_v58 = vpop.f32.mrf.mxu3  ;;  %v4935_v56 = vpop.f32.mrf.mxu1  ;;  %v6449_v41 = vshll.u32 %v15625_v18, 16  ;;  %v6453_v42 = vshrl.u32 %v15625_v18, 16  ;;  %v4697_v17 = vunpack.c.l.b16 %v4614_v15  ;;  %v5580_v4 = vadd.f32 %v5487_v6, %v5025_v5  ;;  %v16116_v20 = vld [vmem:[#allocation6_spill] sm:$0xff] }
 0x4be   :  { %v8405_v24 = vor.u32 %v8403_v9, %v15632_v53  ;;  %v7846_v55 = vmax.f32 %v7782_v33, 0.0  ;;  %v6869_v40 = vadd.f32 %v6775_v58, %v5579_v52  ;;  %v7555_v13 = vpop.f32.mrf.mxu0  ;;  %v4617_v29 = vsel %vm11351_vm5, %v4615_v1, %v4616_v3 }
 0x4bf   :  { %v6442_v46 = vrot.slane %v6440_v23, 4  ;;  %v6445_v62 = vrot.slane %v6443_v0, 5  ;;  %v4698_v8 = vunpack.c.l.b16 %v4617_v29  ;;  %v6451_v6 = vrot.slane %v6449_v41, 5 }
 0x4c0   :  { %v8836_v2 = vsel %vm13735_vm8, %v8405_v24, %v10301_v26  ;;  %v8018_v35 = vpack.c.bf16 %v7846_v55, %v7846_v55  ;;  %v7647_v61 = vadd.f32 %v7553_v49, %v6869_v40  ;;  %v6455_v43 = vrot.slane %v6453_v42, 4 }
 0x4c1   :  { %10302 = vst [vmem:[%s15971_s4 + $0x120] sm:$0xf] %v8836_v2  ;;  %v6446_v54 = vor.u32 %v6445_v62, %v6442_v46  ;;  %v6459_v30 = vshll.u32 %v10035_v45, 16  ;;  %v8406_v28 = vrot.slane %v15632_v53, 4  ;;  %v4730_v12 = vpack.c.b16 %v4698_v8, %v4697_v17 }
 0x4c2   :  { %v8408_v39 = vshrl.u32 %v8018_v35, 16  ;;  %v7715_v10 = vmul.f32 %v15290_v60, %v7647_v61  ;;  %v6456_v57 = vor.u32 %v6455_v43, %v6451_v6  ;;  %v10147_v48 = vrot.slane %v10115_v27, 9 }
 0x4c3   :  { %v6447_v49 = vrot.slane %v6446_v54, 4  ;;  %v6461_v37 = vrot.slane %v6459_v30, 5  ;;  %v8411_v59 = vshll.u32 %v8018_v35, 16  ;;  %4974 = vmatmul.bf16.gmra.mxu1 %v4730_v12  ;;  %v7236_v52 = vrot.slane %v15625_v18, 5 }
 0x4c4   :  { %v8410_v51 = vrot.slane %v8408_v39, 7  ;;  %v7783_v14 = vadd.f32 %v15303_v32, %v7715_v10  ;;  %v5026_v36 = vadd.f32 %v4935_v56, %v16116_v20  ;;  %v6457_v34 = vrot.slane %v6456_v57, 4  ;;  %v5492_v56 = vpop.f32.mrf.mxu2 }
 0x4c5   :  { %v6777_v5 = vpop.f32.mrf.mxu3  ;;  %v6452_v15 = vsel %vm10739_vm2, %v6447_v49, %v6451_v6  ;;  %v7239_v3 = vrot.slane %v10035_v45, 5  ;;  %v4937_v53 = vpop.f32.mrf.mxu1  ;;  %v7237_v0 = vsel %vm11351_vm5, %v10147_v48, %v7236_v52  ;;  %v7238_v41 = vrot.slane %v7236_v52, 4 }
 0x4c6   :  { %v8413_v9 = vor.u32 %v8411_v59, %v8410_v51  ;;  %v8415_v33 = vrot.slane %v8410_v51, 4  ;;  %v7847_v1 = vmax.f32 %v7783_v14, 0.0  ;;  %v6870_v26 = vadd.f32 %v6777_v5, %v5580_v4 }
 0x4c7   :  { %v7558_v58 = vpop.f32.mrf.mxu0  ;;  %v6462_v18 = vsel %vm10739_vm2, %v6457_v34, %v6461_v37  ;;  %v6542_v23 = vunpack.c.l.b16 %v6452_v15  ;;  %v7240_v17 = vsel %vm11351_vm5, %v7238_v41, %v7239_v3  ;;  %v7320_v45 = vunpack.c.l.b16 %v7237_v0  ;;  %v15716_v41 = vld [vmem:[%s15970_s3] ss:$0 sm:$0xff] }
 0x4c8   :  { %v8414_v42 = vsel %vm13786_vm11, %v8406_v28, %v8413_v9  ;;  %v8840_v24 = vsel %vm14037_vm13, %v8415_v33, %v10304_v21  ;;  %v8019_v55 = vpack.c.bf16 %v7847_v1, %v7847_v1  ;;  %v7648_v40 = vadd.f32 %v7555_v13, %v6870_v26  ;;  %v10309_v21 = vld [vmem:[%s15971_s4 + $0x134] sm:$0x1] }
 0x4c9   :  { %10303 = vst [vmem:[%s15971_s4 + $0x124] sm:$0xf] %v8414_v42  ;;  %v6543_v25 = vunpack.c.l.b16 %v6462_v18  ;;  %v7321_v46 = vunpack.c.l.b16 %v7240_v17  ;;  %v5581_v62 = vadd.f32 %v5490_v50, %v5026_v36  ;;  %v5027_v49 = vadd.f32 %v4937_v53, %v13213_v22  ;;  %v10311_v42 = vld [vmem:[%s15971_s4 + $0x138] sm:$0xf] }
 0x4ca   :  { %10305 = vst [vmem:[%s15971_s4 + $0x128] sm:$0x1] %v8840_v24  ;;  %v8417_v4 = vshrl.u32 %v8019_v55, 16  ;;  %v7716_v29 = vmul.f32 %v15290_v60, %v7648_v40  ;;  %v8420_v35 = vshll.u32 %v8019_v55, 16 }
 0x4cb   :  { %v6575_v2 = vpack.c.b16 %v6543_v25, %v6542_v23  ;;  %v7353_v8 = vpack.c.b16 %v7321_v46, %v7320_v45  ;;  %v5582_v48 = vadd.f32 %v5492_v56, %v5027_v49  ;;  %v16118_v49 = vld [vmem:[#allocation10_spill] sm:$0xff] }
 0x4cc   :  { %v8419_v13 = vrot.slane %v8417_v4, 7  ;;  %v7784_v61 = vadd.f32 %v15303_v32, %v7716_v29  ;;  %v5495_v39 = vpop.f32.mrf.mxu2 }
 0x4cd   :  { %6819 = vmatmul.bf16.gmra.mxu3 %v6575_v2  ;;  %v6780_v27 = vpop.f32.mrf.mxu3  ;;  %v4940_v54 = vpop.f32.mrf.mxu1  ;;  %7597 = vmatmul.bf16.gmra.mxu0 %v7353_v8  ;;  %v16117_v2 = vld [vmem:[#allocation8_spill] sm:$0xff] }
 0x4ce   :  { %v8422_v6 = vor.u32 %v8420_v35, %v8419_v13  ;;  %v7848_v43 = vmax.f32 %v7784_v61, 0.0  ;;  %v6871_v30 = vadd.f32 %v6780_v27, %v5581_v62  ;;  %v8423_v52 = vrot.slane %v8419_v13, 4 }
 0x4cf   :  { %v7560_v28 = vpop.f32.mrf.mxu0  ;;  %v5028_v3 = vadd.f32 %v4940_v54, %v13240_v47  ;;  %v15710_v47 = vld [vmem:[%s15969_s2] ss:$0 sm:$0xff] }
 0x4d0   :  { %v8843_v50 = vsel %vm13735_vm8, %v8422_v6, %v10306_v7  ;;  %v8020_v10 = vpack.c.bf16 %v7848_v43, %v7848_v43  ;;  %v7649_v12 = vadd.f32 %v7558_v58, %v6871_v30  ;;  %v10314_v43 = vld [vmem:[%s15971_s4 + $0x140] sm:$0x1] }
 0x4d1   :  { %10307 = vst [vmem:[%s15971_s4 + $0x12c] sm:$0xf] %v8843_v50  ;;  %v5583_v18 = vadd.f32 %v5495_v39, %v5028_v3 }
 0x4d2   :  { %v8425_v57 = vshrl.u32 %v8020_v10, 16  ;;  %v7717_v37 = vmul.f32 %v15290_v60, %v7649_v12  ;;  %v8428_v59 = vshll.u32 %v8020_v10, 16 }
 0x4d4   :  { %v8427_v51 = vrot.slane %v8425_v57, 7  ;;  %v7785_v14 = vadd.f32 %v15303_v32, %v7717_v37  ;;  %v5497_v60 = vpop.f32.mrf.mxu2 }
 0x4d5   :  { %v6782_v5 = vpop.f32.mrf.mxu3  ;;  %v4942_v20 = vpop.f32.mrf.mxu1 }
 0x4d6   :  { %v8430_v22 = vor.u32 %v8428_v59, %v8427_v51  ;;  %v8432_v36 = vrot.slane %v8427_v51, 4  ;;  %v7849_v15 = vmax.f32 %v7785_v14, 0.0  ;;  %v6872_v34 = vadd.f32 %v6782_v5, %v5582_v48 }
 0x4d7   :  { %v7563_v53 = vpop.f32.mrf.mxu0  ;;  %v5029_v13 = vadd.f32 %v4942_v20, %v16117_v2 }
 0x4d8   :  { %v8431_v9 = vsel %vm13786_vm11, %v8423_v52, %v8430_v22  ;;  %v8847_v32 = vsel %vm14037_vm13, %v8432_v36, %v10309_v21  ;;  %v8021_v33 = vpack.c.bf16 %v7849_v15, %v7849_v15  ;;  %v7650_v1 = vadd.f32 %v7560_v28, %v6872_v34  ;;  %v10316_v34 = vld [vmem:[%s15971_s4 + $0x144] sm:$0xf] }
 0x4d9   :  { %10308 = vst [vmem:[%s15971_s4 + $0x130] sm:$0xf] %v8431_v9  ;;  %v5584_v8 = vadd.f32 %v5497_v60, %v5029_v13 }
 0x4da   :  { %10310 = vst [vmem:[%s15971_s4 + $0x134] sm:$0x1] %v8847_v32  ;;  %v8434_v26 = vshrl.u32 %v8021_v33, 16  ;;  %v7718_v58 = vmul.f32 %v15710_v47, %v7650_v1  ;;  %v8437_v0 = vshll.u32 %v8021_v33, 16 }
 0x4dc   :  { %v8436_v23 = vrot.slane %v8434_v26, 7  ;;  %v7786_v56 = vadd.f32 %v15716_v41, %v7718_v58  ;;  %v5500_v4 = vpop.f32.mrf.mxu2 }
 0x4dd   :  { %v6785_v24 = vpop.f32.mrf.mxu3  ;;  %v4945_v55 = vpop.f32.mrf.mxu1 }
 0x4de   :  { %v8439_v40 = vor.u32 %v8437_v0, %v8436_v23  ;;  %v7850_v25 = vmax.f32 %v7786_v56, 0.0  ;;  %v6873_v17 = vadd.f32 %v6785_v24, %v5583_v18  ;;  %v8440_v6 = vrot.slane %v8436_v23, 4  ;;  %v16119_v23 = vld [vmem:[#allocation12_spill] sm:$0xff] }
 0x4df   :  { %v7565_v45 = vpop.f32.mrf.mxu0  ;;  %v5030_v57 = vadd.f32 %v4945_v55, %v16118_v49  ;;  %v10321_v49 = vld [vmem:[%s15971_s4 + $0x150] sm:$0xf] }
 0x4e0   :  { %v8850_v29 = vsel %vm13735_vm8, %v8439_v40, %v10311_v42  ;;  %v8022_v46 = vpack.c.bf16 %v7850_v25, %v7850_v25  ;;  %v7651_v62 = vadd.f32 %v7563_v53, %v6873_v17 }
 0x4e1   :  { %10312 = vst [vmem:[%s15971_s4 + $0x138] sm:$0xf] %v8850_v29  ;;  %v5585_v20 = vadd.f32 %v5500_v4, %v5030_v57 }
 0x4e2   :  { %v8442_v35 = vshrl.u32 %v8022_v46, 16  ;;  %v7719_v61 = vmul.f32 %v15710_v47, %v7651_v62  ;;  %v8445_v27 = vshll.u32 %v8022_v46, 16 }
 0x4e4   :  { %v8444_v7 = vrot.slane %v8442_v35, 7  ;;  %v7787_v54 = vadd.f32 %v15716_v41, %v7719_v61  ;;  %v5502_v48 = vpop.f32.mrf.mxu2  ;;  %v16120_v35 = vld [vmem:[#allocation14_spill] sm:$0xff] }
 0x4e5   :  { %v6787_v30 = vpop.f32.mrf.mxu3  ;;  %v4947_v28 = vpop.f32.mrf.mxu1 }
 0x4e6   :  { %v8447_v39 = vor.u32 %v8445_v27, %v8444_v7  ;;  %v8449_v50 = vrot.slane %v8444_v7, 4  ;;  %v7851_v10 = vmax.f32 %v7787_v54, 0.0  ;;  %v6874_v12 = vadd.f32 %v6787_v30, %v5584_v8 }
 0x4e7   :  { %v7568_v37 = vpop.f32.mrf.mxu0  ;;  %v5031_v0 = vadd.f32 %v4947_v28, %v16119_v23 }
 0x4e8   :  { %v8448_v51 = vsel %vm13786_vm11, %v8440_v6, %v8447_v39  ;;  %v8854_v59 = vsel %vm14037_vm13, %v8449_v50, %v10314_v43  ;;  %v8023_v14 = vpack.c.bf16 %v7851_v10, %v7851_v10  ;;  %v7652_v52 = vadd.f32 %v7565_v45, %v6874_v12  ;;  %v10319_v45 = vld [vmem:[%s15971_s4 + $0x14c] sm:$0x1] }
 0x4e9   :  { %10313 = vst [vmem:[%s15971_s4 + $0x13c] sm:$0xf] %v8448_v51  ;;  %v5586_v24 = vadd.f32 %v5502_v48, %v5031_v0 }
 0x4ea   :  { %10315 = vst [vmem:[%s15971_s4 + $0x140] sm:$0x1] %v8854_v59  ;;  %v8451_v21 = vshrl.u32 %v8023_v14, 16  ;;  %v7720_v5 = vmul.f32 %v15710_v47, %v7652_v52  ;;  %v8454_v36 = vshll.u32 %v8023_v14, 16 }
 0x4ec   :  { %v8453_v22 = vrot.slane %v8451_v21, 7  ;;  %v7788_v15 = vadd.f32 %v15716_v41, %v7720_v5  ;;  %v5505_v1 = vpop.f32.mrf.mxu2 }
 0x4ed   :  { %v6790_v3 = vpop.f32.mrf.mxu3  ;;  %v4950_v53 = vpop.f32.mrf.mxu1 }
 0x4ee   :  { %v8456_v60 = vor.u32 %v8454_v36, %v8453_v22  ;;  %v7852_v9 = vmax.f32 %v7788_v15, 0.0  ;;  %v6875_v32 = vadd.f32 %v6790_v3, %v5585_v20  ;;  %v8457_v17 = vrot.slane %v8453_v22, 4 }
 0x4ef   :  { %v7570_v33 = vpop.f32.mrf.mxu0  ;;  %v5032_v61 = vadd.f32 %v4950_v53, %v16120_v35 }
 0x4f0   :  { %v8857_v26 = vsel %vm13735_vm8, %v8456_v60, %v10316_v34  ;;  %v8024_v58 = vpack.c.bf16 %v7852_v9, %v7852_v9  ;;  %v7653_v18 = vadd.f32 %v7568_v37, %v6875_v32  ;;  %v10324_v32 = vld [vmem:[%s15971_s4 + $0x158] sm:$0x1] }
 0x4f1   :  { %10317 = vst [vmem:[%s15971_s4 + $0x144] sm:$0xf] %v8857_v26  ;;  %v5587_v39 = vadd.f32 %v5505_v1, %v5032_v61 }
 0x4f2   :  { %v8459_v56 = vshrl.u32 %v8024_v58, 16  ;;  %v7721_v42 = vmul.f32 %v15710_v47, %v7653_v18  ;;  %v8462_v40 = vshll.u32 %v8024_v58, 16 }
 0x4f4   :  { %v8461_v55 = vrot.slane %v8459_v56, 7  ;;  %v7789_v25 = vadd.f32 %v15716_v41, %v7721_v42  ;;  %v5507_v7 = vpop.f32.mrf.mxu2 }
 0x4f5   :  { %v6792_v4 = vpop.f32.mrf.mxu3  ;;  %v4952_v29 = vpop.f32.mrf.mxu1 }
 0x4f6   :  { %v8464_v46 = vor.u32 %v8462_v40, %v8461_v55  ;;  %v8466_v62 = vrot.slane %v8461_v55, 4  ;;  %v7853_v2 = vmax.f32 %v7789_v25, 0.0  ;;  %v6876_v13 = vadd.f32 %v6792_v4, %v5586_v24 }
 0x4f7   :  { %v7573_v8 = vpop.f32.mrf.mxu0  ;;  %v5033_v22 = vadd.f32 %v4952_v29, %v13401_v16 }
 0x4f8   :  { %v8465_v27 = vsel %vm13786_vm11, %v8457_v17, %v8464_v46  ;;  %v8861_v54 = vsel %vm14037_vm13, %v8466_v62, %v10319_v45  ;;  %v8025_v6 = vpack.c.bf16 %v7853_v2, %v7853_v2  ;;  %v7654_v43 = vadd.f32 %v7570_v33, %v6876_v13  ;;  %v10326_v46 = vld [vmem:[%s15971_s4 + $0x15c] sm:$0xf] }
 0x4f9   :  { %10318 = vst [vmem:[%s15971_s4 + $0x148] sm:$0xf] %v8465_v27  ;;  %v5588_v34 = vadd.f32 %v5507_v7, %v5033_v22 }
 0x4fa   :  { %10320 = vst [vmem:[%s15971_s4 + $0x14c] sm:$0x1] %v8861_v54  ;;  %v8468_v30 = vshrl.u32 %v8025_v6, 16  ;;  %v7722_v28 = vmul.f32 %v15710_v47, %v7654_v43  ;;  %v8471_v10 = vshll.u32 %v8025_v6, 16 }
 0x4fc   :  { %v8470_v50 = vrot.slane %v8468_v30, 7  ;;  %v7790_v12 = vadd.f32 %v15716_v41, %v7722_v28  ;;  %v5510_v52 = vpop.f32.mrf.mxu2 }
 0x4fd   :  { %v6795_v57 = vpop.f32.mrf.mxu3  ;;  %v4955_v37 = vpop.f32.mrf.mxu1 }
 0x4fe   :  { %v8473_v48 = vor.u32 %v8471_v10, %v8470_v50  ;;  %v7854_v51 = vmax.f32 %v7790_v12, 0.0  ;;  %v6877_v59 = vadd.f32 %v6795_v57, %v5587_v39  ;;  %v8474_v9 = vrot.slane %v8470_v50, 4  ;;  %v10329_v57 = vld [vmem:[%s15971_s4 + $0x164] sm:$0x1] }
 0x4ff   :  { %v7575_v14 = vpop.f32.mrf.mxu0  ;;  %v5034_v23 = vadd.f32 %v4955_v37, %v13428_v19 }
 0x500   :  { %v8864_v21 = vsel %vm13735_vm8, %v8473_v48, %v10321_v49  ;;  %v8026_v5 = vpack.c.bf16 %v7854_v51, %v7854_v51  ;;  %v7655_v20 = vadd.f32 %v7573_v8, %v6877_v59 }
 0x501   :  { %10322 = vst [vmem:[%s15971_s4 + $0x150] sm:$0xf] %v8864_v21  ;;  %v5589_v17 = vadd.f32 %v5510_v52, %v5034_v23 }
 0x502   :  { %v8476_v36 = vshrl.u32 %v8026_v5, 16  ;;  %v7723_v15 = vmul.f32 %v15710_v47, %v7655_v20  ;;  %v8479_v53 = vshll.u32 %v8026_v5, 16 }
 0x504   :  { %v8478_v3 = vrot.slane %v8476_v36, 7  ;;  %v7791_v60 = vadd.f32 %v15716_v41, %v7723_v15  ;;  %v5512_v0 = vpop.f32.mrf.mxu2 }
 0x505   :  { %v6797_v33 = vpop.f32.mrf.mxu3  ;;  %v4957_v1 = vpop.f32.mrf.mxu1 }
 0x506   :  { %v8481_v16 = vor.u32 %v8479_v53, %v8478_v3  ;;  %v8483_v26 = vrot.slane %v8478_v3, 4  ;;  %v7855_v58 = vmax.f32 %v7791_v60, 0.0  ;;  %v6878_v18 = vadd.f32 %v6797_v33, %v5588_v34 }
 0x507   :  { %v5035_v6 = vadd.f32 %v4957_v1, %v13465_v38 }
 0x508   :  { %v8482_v56 = vsel %vm13786_vm11, %v8474_v9, %v8481_v16  ;;  %v8868_v42 = vsel %vm14037_vm13, %v8483_v26, %v10324_v32  ;;  %v8027_v24 = vpack.c.bf16 %v7855_v58, %v7855_v58  ;;  %v7656_v55 = vadd.f32 %v7575_v14, %v6878_v18  ;;  %v10331_v32 = vld [vmem:[%s15971_s4 + $0x168] sm:$0xf] }
 0x509   :  { %10323 = vst [vmem:[%s15971_s4 + $0x154] sm:$0xf] %v8482_v56  ;;  %v7578_v40 = vpop.f32.mrf.mxu0  ;;  %v5590_v39 = vadd.f32 %v5512_v0, %v5035_v6  ;;  %v16121_v0 = vld [vmem:[#allocation44_spill] sm:$0xff] }
 0x50a   :  { %10325 = vst [vmem:[%s15971_s4 + $0x158] sm:$0x1] %v8868_v42  ;;  %v8485_v25 = vshrl.u32 %v8027_v24, 16  ;;  %v7724_v19 = vmul.f32 %v15710_v47, %v7656_v55  ;;  %v8488_v4 = vshll.u32 %v8027_v24, 16 }
 0x50c   :  { %v8487_v45 = vrot.slane %v8485_v25, 7  ;;  %v7792_v29 = vadd.f32 %v15716_v41, %v7724_v19  ;;  %v5515_v8 = vpop.f32.mrf.mxu2 }
 0x50d   :  { %v6800_v62 = vpop.f32.mrf.mxu3 }
 0x50e   :  { %v8490_v2 = vor.u32 %v8488_v4, %v8487_v45  ;;  %v7856_v13 = vmax.f32 %v7792_v29, 0.0  ;;  %v6879_v35 = vadd.f32 %v6800_v62, %v5589_v17  ;;  %v4960_v61 = vpop.f32.mrf.mxu1  ;;  %v8491_v49 = vrot.slane %v8487_v45, 4 }
 0x50f   :  { %v5036_v52 = vadd.f32 %v4960_v61, %v13491_v44 }
 0x510   :  { %v8871_v7 = vsel %vm13735_vm8, %v8490_v2, %v10326_v46  ;;  %v8028_v27 = vpack.c.bf16 %v7856_v13, %v7856_v13  ;;  %v7657_v54 = vadd.f32 %v7578_v40, %v6879_v35  ;;  %v10334_v46 = vld [vmem:[%s15971_s4 + $0x170] sm:$0x1] }
 0x511   :  { %10327 = vst [vmem:[%s15971_s4 + $0x15c] sm:$0xf] %v8871_v7  ;;  %v7580_v43 = vpop.f32.mrf.mxu0  ;;  %v5591_v3 = vadd.f32 %v5515_v8, %v5036_v52  ;;  %v16122_v8 = vld [vmem:[#allocation24_spill] sm:$0xff] }
 0x512   :  { %v8493_v30 = vshrl.u32 %v8028_v27, 16  ;;  %v7725_v28 = vmul.f32 %v15710_v47, %v7657_v54  ;;  %v8496_v10 = vshll.u32 %v8028_v27, 16  ;;  %v16123_v7 = vld [vmem:[#allocation16_spill] sm:$0xff] }
 0x513   :  { %v1660_v27 = vadd.f32 %v16123_v7, %v16122_v8 }
 0x514   :  { %v8495_v50 = vrot.slane %v8493_v30, 7  ;;  %v7793_v12 = vadd.f32 %v15716_v41, %v7725_v28  ;;  %v5517_v21 = vpop.f32.mrf.mxu2 }
 0x515   :  { %v6802_v37 = vpop.f32.mrf.mxu3 }
 0x516   :  { %v8498_v38 = vor.u32 %v8496_v10, %v8495_v50  ;;  %v8500_v48 = vrot.slane %v8495_v50, 4  ;;  %v7857_v51 = vmax.f32 %v7793_v12, 0.0  ;;  %v6880_v59 = vadd.f32 %v6802_v37, %v5590_v39  ;;  %v4962_v14 = vpop.f32.mrf.mxu1  ;;  %v16124_v39 = vld [vmem:[#allocation18_spill] sm:$0xff]  ;;  %v16125_v37 = vld [vmem:[#allocation45_spill] sm:$0xff] }
 0x517   :  { %v5037_v56 = vadd.f32 %v4962_v14, %v16121_v0  ;;  %v2416_v50 = vadd.f32 %v16124_v39, %v1660_v27  ;;  %v16126_v14 = vld [vmem:[#allocation22_spill] sm:$0xff] }
 0x518   :  { %v8499_v5 = vsel %vm13786_vm11, %v8491_v49, %v8498_v38  ;;  %v8875_v20 = vsel %vm14037_vm13, %v8500_v48, %v10329_v57  ;;  %v8029_v22 = vpack.c.bf16 %v7857_v51, %v7857_v51  ;;  %v7658_v36 = vadd.f32 %v7580_v43, %v6880_v59 }
 0x519   :  { %10328 = vst [vmem:[%s15971_s4 + $0x160] sm:$0xf] %v8499_v5  ;;  %v7583_v15 = vpop.f32.mrf.mxu0  ;;  %v5592_v19 = vadd.f32 %v5517_v21, %v5037_v56  ;;  %v2971_v52 = vadd.f32 %v16126_v14, %v2416_v50  ;;  %v10336_v21 = vld [vmem:[%s15971_s4 + $0x174] sm:$0xf] }
 0x51a   :  { %10330 = vst [vmem:[%s15971_s4 + $0x164] sm:$0x1] %v8875_v20  ;;  %v8502_v34 = vshrl.u32 %v8029_v22, 16  ;;  %v7726_v44 = vmul.f32 %v15710_v47, %v7658_v36  ;;  %v8505_v60 = vshll.u32 %v8029_v22, 16 }
 0x51c   :  { %v8504_v53 = vrot.slane %v8502_v34, 7  ;;  %v7794_v9 = vadd.f32 %v15716_v41, %v7726_v44  ;;  %v5520_v24 = vpop.f32.mrf.mxu2 }
 0x51d   :  { %v6805_v33 = vpop.f32.mrf.mxu3 }
 0x51e   :  { %v8507_v1 = vor.u32 %v8505_v60, %v8504_v53  ;;  %v7858_v16 = vmax.f32 %v7794_v9, 0.0  ;;  %v6881_v26 = vadd.f32 %v6805_v33, %v5591_v3  ;;  %v8508_v29 = vrot.slane %v8504_v53, 4  ;;  %v16127_v3 = vld [vmem:[#allocation20_spill] sm:$0xff] }
 0x51f   :  { %v4261_v53 = vadd.f32 %v16127_v3, %v2971_v52 }
 0x520   :  { %v8878_v58 = vsel %vm13735_vm8, %v8507_v1, %v10331_v32  ;;  %v8030_v18 = vpack.c.bf16 %v7858_v16, %v7858_v16  ;;  %v7659_v23 = vadd.f32 %v7583_v15, %v6881_v26  ;;  %v4965_v42 = vpop.f32.mrf.mxu1 }
 0x521   :  { %10332 = vst [vmem:[%s15971_s4 + $0x168] sm:$0xf] %v8878_v58  ;;  %v7585_v55 = vpop.f32.mrf.mxu0  ;;  %v5038_v38 = vadd.f32 %v4965_v42, %v16125_v37 }
 0x522   :  { %v8510_v40 = vshrl.u32 %v8030_v18, 16  ;;  %v7727_v25 = vmul.f32 %v15710_v47, %v7659_v23  ;;  %v8513_v45 = vshll.u32 %v8030_v18, 16  ;;  %v10339_v18 = vld [vmem:[%s15971_s4 + $0x17c] sm:$0x1] }
 0x523   :  { %v5593_v5 = vadd.f32 %v5520_v24, %v5038_v38 }
 0x524   :  { %v8512_v17 = vrot.slane %v8510_v40, 7  ;;  %v7795_v4 = vadd.f32 %v15716_v41, %v7727_v25  ;;  %v5522_v57 = vpop.f32.mrf.mxu2  ;;  %v16129_v40 = vld [vmem:[#allocation41_spill] sm:$0xff] }
 0x525   :  { %v6807_v62 = vpop.f32.mrf.mxu3 }
 0x526   :  { %v8515_v2 = vor.u32 %v8513_v45, %v8512_v17  ;;  %v8517_v13 = vrot.slane %v8512_v17, 4  ;;  %v7859_v35 = vmax.f32 %v7795_v4, 0.0  ;;  %v6882_v61 = vadd.f32 %v6807_v62, %v5592_v19 }
 0x528   :  { %v8516_v54 = vsel %vm13786_vm11, %v8508_v29, %v8515_v2  ;;  %v8882_v6 = vsel %vm14037_vm13, %v8517_v13, %v10334_v46  ;;  %v8031_v43 = vpack.c.bf16 %v7859_v35, %v7859_v35  ;;  %v7660_v30 = vadd.f32 %v7585_v55, %v6882_v61  ;;  %v4967_v28 = vpop.f32.mrf.mxu1  ;;  %v16128_v55 = vld [vmem:[#allocation28_spill] sm:$0xff]  ;;  %v16130_v29 = vld [vmem:[#allocation26_spill] sm:$0xff]  ;;  %v16131_v61 = vld [vmem:[#allocation33_spill] sm:$0xff] }
 0x529   :  { %10333 = vst [vmem:[%s15971_s4 + $0x16c] sm:$0xf] %v8516_v54  ;;  %v5039_v1 = vadd.f32 %v4967_v28, %v4261_v53  ;;  %v1665_v25 = vadd.f32 %v16129_v40, %v16128_v55  ;;  %v16132_v54 = vld [vmem:[#allocation43_spill] sm:$0xff] }
 0x52a   :  { %10335 = vst [vmem:[%s15971_s4 + $0x170] sm:$0x1] %v8882_v6  ;;  %v8519_v10 = vshrl.u32 %v8031_v43, 16  ;;  %v7728_v12 = vmul.f32 %v15710_v47, %v7660_v30  ;;  %v7588_v49 = vpop.f32.mrf.mxu0  ;;  %v8522_v51 = vshll.u32 %v8031_v43, 16 }
 0x52b   :  { %v5594_v0 = vadd.f32 %v5522_v57, %v5039_v1  ;;  %v2418_v46 = vadd.f32 %v16130_v29, %v1665_v25 }
 0x52c   :  { %v8521_v48 = vrot.slane %v8519_v10, 7  ;;  %v7796_v59 = vadd.f32 %v15716_v41, %v7728_v12  ;;  %v5525_v58 = vpop.f32.mrf.mxu2 }
 0x52d   :  { %v2973_v6 = vadd.f32 %v16132_v54, %v2418_v46 }
 0x52e   :  { %v8524_v20 = vor.u32 %v8522_v51, %v8521_v48  ;;  %v7860_v22 = vmax.f32 %v7796_v59, 0.0  ;;  %v8525_v56 = vrot.slane %v8521_v48, 4  ;;  %v16133_v51 = vld [vmem:[#allocation42_spill] sm:$0xff] }
 0x52f   :  { %v4263_v59 = vadd.f32 %v16133_v51, %v2973_v6 }
 0x530   :  { %v8885_v36 = vsel %vm13735_vm8, %v8524_v20, %v10336_v21  ;;  %v8032_v15 = vpack.c.bf16 %v7860_v22, %v7860_v22  ;;  %v6810_v34 = vpop.f32.mrf.mxu3  ;;  %v4970_v60 = vpop.f32.mrf.mxu1 }
 0x531   :  { %10337 = vst [vmem:[%s15971_s4 + $0x174] sm:$0xf] %v8885_v36  ;;  %v6883_v44 = vadd.f32 %v6810_v34, %v5593_v5  ;;  %v5040_v8 = vadd.f32 %v4970_v60, %v16131_v61  ;;  %v16134_v34 = vld [vmem:[#allocation32_spill] sm:$0xff] }
 0x532   :  { %v8527_v9 = vshrl.u32 %v8032_v15, 16  ;;  %v7590_v32 = vpop.f32.mrf.mxu0  ;;  %v8530_v26 = vshll.u32 %v8032_v15, 16 }
 0x533   :  { %v7661_v33 = vadd.f32 %v7588_v49, %v6883_v44  ;;  %v5595_v28 = vadd.f32 %v5525_v58, %v5040_v8  ;;  %v10341_v49 = vld [vmem:[%s15971_s4 + $0x180] sm:$0xf]  ;;  %v10346_v8 = vld [vmem:[%s15971_s4 + $0x18c] sm:$0xf] }
 0x534   :  { %v8529_v16 = vrot.slane %v8527_v9, 7  ;;  %v5527_v39 = vpop.f32.mrf.mxu2  ;;  %v16135_v44 = vld [vmem:[#allocation30_spill] sm:$0xff] }
 0x535   :  { %v7729_v23 = vmul.f32 %v15710_v47, %v7661_v33  ;;  %v1670_v3 = vadd.f32 %v16135_v44, %v16134_v34  ;;  %v16136_v33 = vld [vmem:[#allocation46_spill] sm:$0xff] }
 0x536   :  { %v8532_v42 = vor.u32 %v8530_v26, %v8529_v16  ;;  %v8534_v24 = vrot.slane %v8529_v16, 4  ;;  %v10344_v26 = vld [vmem:[%s15971_s4 + $0x188] sm:$0x1] }
 0x537   :  { %v7797_v19 = vadd.f32 %v15716_v41, %v7729_v23  ;;  %v2420_v1 = vadd.f32 %v16136_v33, %v1670_v3 }
 0x538   :  { %v8533_v17 = vsel %vm13786_vm11, %v8525_v56, %v8532_v42  ;;  %v8889_v45 = vsel %vm14037_vm13, %v8534_v24, %v10339_v18  ;;  %v6812_v4 = vpop.f32.mrf.mxu3  ;;  %v4972_v7 = vpop.f32.mrf.mxu1  ;;  %v16137_v24 = vld [vmem:[#allocation34_spill] sm:$0xff] }
 0x539   :  { %10338 = vst [vmem:[%s15971_s4 + $0x178] sm:$0xf] %v8533_v17  ;;  %v7861_v62 = vmax.f32 %v7797_v19, 0.0  ;;  %v6884_v2 = vadd.f32 %v6812_v4, %v5594_v0  ;;  %v5041_v5 = vadd.f32 %v4972_v7, %v4263_v59 }
 0x53a   :  { %10340 = vst [vmem:[%s15971_s4 + $0x17c] sm:$0x1] %v8889_v45  ;;  %v7593_v27 = vpop.f32.mrf.mxu0  ;;  %v16138_v45 = vld [vmem:[#allocation48_spill] sm:$0xff] }
 0x53b   :  { %v8033_v13 = vpack.c.bf16 %v7861_v62, %v7861_v62  ;;  %v7662_v35 = vadd.f32 %v7590_v32, %v6884_v2  ;;  %v5596_v36 = vadd.f32 %v5527_v39, %v5041_v5  ;;  %v2975_v4 = vadd.f32 %v16138_v45, %v2420_v1 }
 0x53c   :  { %v5530_v18 = vpop.f32.mrf.mxu2 }
 0x53d   :  { %v8536_v43 = vshrl.u32 %v8033_v13, 16  ;;  %v7730_v30 = vmul.f32 %v15710_v47, %v7662_v35  ;;  %v8539_v10 = vshll.u32 %v8033_v13, 16 }
 0x53f   :  { %v8538_v50 = vrot.slane %v8536_v43, 7  ;;  %v7798_v12 = vadd.f32 %v15716_v41, %v7730_v30  ;;  %v16139_v30 = vld [vmem:[#allocation47_spill] sm:$0xff] }
 0x540   :  { %v6815_v57 = vpop.f32.mrf.mxu3  ;;  %v4975_v15 = vpop.f32.mrf.mxu1 }
 0x541   :  { %v8541_v37 = vor.u32 %v8539_v10, %v8538_v50  ;;  %v7862_v38 = vmax.f32 %v7798_v12, 0.0  ;;  %v6885_v48 = vadd.f32 %v6815_v57, %v5595_v28  ;;  %v8542_v16 = vrot.slane %v8538_v50, 4 }
 0x542   :  { %v7595_v53 = vpop.f32.mrf.mxu0  ;;  %v5042_v55 = vadd.f32 %v4975_v15, %v16137_v24  ;;  %v4265_v28 = vadd.f32 %v16139_v30, %v2975_v4 }
 0x543   :  { %v8892_v14 = vsel %vm13735_vm8, %v8541_v37, %v10341_v49  ;;  %v8034_v52 = vpack.c.bf16 %v7862_v38, %v7862_v38  ;;  %v7663_v21 = vadd.f32 %v7593_v27, %v6885_v48 }
 0x544   :  { %10342 = vst [vmem:[%s15971_s4 + $0x180] sm:$0xf] %v8892_v14  ;;  %v5597_v62 = vadd.f32 %v5530_v18, %v5042_v55  ;;  %v5532_v39 = vpop.f32.mrf.mxu2 }
 0x545   :  { %v8544_v20 = vshrl.u32 %v8034_v52, 16  ;;  %v7731_v22 = vmul.f32 %v15710_v47, %v7663_v21  ;;  %v8547_v9 = vshll.u32 %v8034_v52, 16  ;;  %v10349_v52 = vld [vmem:[%s15971_s4 + $0x194] sm:$0x1] }
 0x547   :  { %v8546_v60 = vrot.slane %v8544_v20, 7  ;;  %v7799_v32 = vadd.f32 %v15716_v41, %v7731_v22 }
 0x548   :  { %v6817_v58 = vpop.f32.mrf.mxu3  ;;  %v4977_v61 = vpop.f32.mrf.mxu1 }
 0x549   :  { %v8549_v23 = vor.u32 %v8547_v9, %v8546_v60  ;;  %v8551_v0 = vrot.slane %v8546_v60, 4  ;;  %v7863_v56 = vmax.f32 %v7799_v32, 0.0  ;;  %v6886_v42 = vadd.f32 %v6817_v58, %v5596_v36 }
 0x54a   :  { %v7598_v7 = vpop.f32.mrf.mxu0  ;;  %v5043_v49 = vadd.f32 %v4977_v61, %v4265_v28 }
 0x54b   :  { %v8550_v40 = vsel %vm13786_vm11, %v8542_v16, %v8549_v23  ;;  %v8896_v25 = vsel %vm14037_vm13, %v8551_v0, %v10344_v26  ;;  %v8035_v19 = vpack.c.bf16 %v7863_v56, %v7863_v56  ;;  %v7664_v17 = vadd.f32 %v7595_v53, %v6886_v42  ;;  %v10351_v16 = vld [vmem:[%s15971_s4 + $0x198] sm:$0xf] }
 0x54c   :  { %10343 = vst [vmem:[%s15971_s4 + $0x184] sm:$0xf] %v8550_v40  ;;  %v5598_v38 = vadd.f32 %v5532_v39, %v5043_v49 }
 0x54d   :  { %10345 = vst [vmem:[%s15971_s4 + $0x188] sm:$0x1] %v8896_v25  ;;  %v8553_v29 = vshrl.u32 %v8035_v19, 16  ;;  %v7732_v46 = vmul.f32 %v15710_v47, %v7664_v17  ;;  %v8556_v13 = vshll.u32 %v8035_v19, 16 }
 0x54f   :  { %v8555_v2 = vrot.slane %v8553_v29, 7  ;;  %v7800_v35 = vadd.f32 %v15716_v41, %v7732_v46 }
 0x550   :  { %v6820_v27 = vpop.f32.mrf.mxu3 }
 0x551   :  { %v8558_v54 = vor.u32 %v8556_v13, %v8555_v2  ;;  %v7864_v6 = vmax.f32 %v7800_v35, 0.0  ;;  %v6887_v43 = vadd.f32 %v6820_v27, %v5597_v62  ;;  %v8559_v14 = vrot.slane %v8555_v2, 4 }
 0x552   :  { %v7600_v15 = vpop.f32.mrf.mxu0 }
 0x553   :  { %v8899_v50 = vsel %vm13735_vm8, %v8558_v54, %v10346_v8  ;;  %v8036_v10 = vpack.c.bf16 %v7864_v6, %v7864_v6  ;;  %v7665_v12 = vadd.f32 %v7598_v7, %v6887_v43 }
 0x554   :  { %10347 = vst [vmem:[%s15971_s4 + $0x18c] sm:$0xf] %v8899_v50 }
 0x555   :  { %v8561_v57 = vshrl.u32 %v8036_v10, 16  ;;  %v7733_v37 = vmul.f32 %v15710_v47, %v7665_v12  ;;  %v8564_v51 = vshll.u32 %v8036_v10, 16 }
 0x557   :  { %v8563_v48 = vrot.slane %v8561_v57, 7  ;;  %v7801_v59 = vadd.f32 %v15716_v41, %v7733_v37 }
 0x558   :  { %v6822_v21 = vpop.f32.mrf.mxu3 }
 0x559   :  { %v8566_v5 = vor.u32 %v8564_v51, %v8563_v48  ;;  %v8568_v20 = vrot.slane %v8563_v48, 4  ;;  %v7865_v22 = vmax.f32 %v7801_v59, 0.0  ;;  %v6888_v36 = vadd.f32 %v6822_v21, %v5598_v38 }
 0x55b   :  { %v8567_v34 = vsel %vm13786_vm11, %v8559_v14, %v8566_v5  ;;  %v8903_v44 = vsel %vm14037_vm13, %v8568_v20, %v10349_v52  ;;  %v8037_v3 = vpack.c.bf16 %v7865_v22, %v7865_v22  ;;  %v7666_v53 = vadd.f32 %v7600_v15, %v6888_v36 }
 0x55c   :  { %10348 = vst [vmem:[%s15971_s4 + $0x190] sm:$0xf] %v8567_v34 }
 0x55d   :  { %10350 = vst [vmem:[%s15971_s4 + $0x194] sm:$0x1] %v8903_v44  ;;  %v8570_v60 = vshrl.u32 %v8037_v3, 16  ;;  %v7734_v9 = vmul.f32 %v15710_v47, %v7666_v53  ;;  %v8573_v33 = vshll.u32 %v8037_v3, 16 }
 0x55f   :  { %v8572_v32 = vrot.slane %v8570_v60, 7  ;;  %v7802_v1 = vadd.f32 %v15716_v41, %v7734_v9  ;;  %v10354_v41 = vld [vmem:[%s15971_s4 + $0x1a0] sm:$0x1] }
 0x561   :  { %v8575_v26 = vor.u32 %v8573_v33, %v8572_v32  ;;  %v7866_v58 = vmax.f32 %v7802_v1, 0.0  ;;  %v8576_v42 = vrot.slane %v8572_v32, 4 }
 0x563   :  { %v8906_v18 = vsel %vm13735_vm8, %v8575_v26, %v10351_v16  ;;  %v8038_v23 = vpack.c.bf16 %v7866_v58, %v7866_v58 }
 0x564   :  { %10352 = vst [vmem:[%s15971_s4 + $0x198] sm:$0xf] %v8906_v18 }
 0x565   :  { %v8578_v0 = vshrl.u32 %v8038_v23, 16  ;;  %v8581_v56 = vshll.u32 %v8038_v23, 16 }
 0x567   :  { %v8580_v47 = vrot.slane %v8578_v0, 7 }
 0x569   :  { %v8583_v24 = vor.u32 %v8581_v56, %v8580_v47  ;;  %v8585_v55 = vrot.slane %v8580_v47, 4 }
 0x56b   :  { %v8584_v40 = vsel %vm13786_vm11, %v8576_v42, %v8583_v24  ;;  %v8910_v11 = vsel %vm14037_vm13, %v8585_v55, %v10354_v41 }
 0x56c   :  { %10353 = vst [vmem:[%s15971_s4 + $0x19c] sm:$0xf] %v8584_v40 }
 0x56d   :  { %10355 = vst [vmem:[%s15971_s4 + $0x1a0] sm:$0x1] %v8910_v11 }

</bundles_post_ra>
